<compile_context>
chip_gen: v6e
topology: v6e:2x2x1
jax: 0.10.0
libtpu: 0.0.40
codegen_flags: <defaults>
</compile_context>

<pallas_src>
import functools

import jax
import jax.numpy as jnp
from jax.experimental import pallas as pl
from jax.experimental.pallas import tpu as pltpu

IMAGENET_MEAN = (0.485, 0.456, 0.406)
IMAGENET_STD = (0.229, 0.224, 0.225)
INT32_MAX = 2**31 - 1
NLANE = 128  # lane-dense output width: classes in lanes [0, ncls), match flag in lane ncls


# ---------------------------------------------------------------------------
# Fused kernel: crop + mean-pad + (folded normalize) conv3x3 + ReLU + GAP
#               + linear head + argmax + per-sample match
# ---------------------------------------------------------------------------
def _fused_kernel(x_ref, w1t_ref, b1t_ref, wh_ref, b2p_ref, y_ref, out_ref, pad_ref,
                  *, crop, top, left, c_mid, ncls, mean):
    # x_ref  : (N, C, H, W)        f32 VMEM  -- raw image, crop done in-kernel
    # w1t_ref: (C*9, c_mid*crop)   f32 VMEM  -- normalize-folded conv weights, lane-tiled
    # b1t_ref: (1, c_mid*crop)     f32 VMEM  -- normalize-folded conv bias, lane-tiled
    # wh_ref : (c_mid*crop, 128)   f32 VMEM  -- GAP (sum_w / HW) + 8->10 head, class-padded
    # b2p_ref: (1, 128)            f32 VMEM  -- head bias, class-padded with zeros
    # y_ref  : (N, 1)              i32 VMEM  -- labels
    # out_ref: (N, 128)            f32 VMEM  -- lanes [0,ncls)=logits, lane ncls=match flag
    # pad_ref: (N, C, crop+2, crop+2) f32 VMEM scratch -- mean-padded center crop
    n, c_in, _, _ = x_ref.shape
    hp = crop + 2
    lanes = c_mid * crop

    # ---- fused CenterCrop + per-channel ImageNet-mean padding (static offsets).
    # Mean padding == zero padding in the normalized domain after folding Normalize
    # into the conv weights/bias.
    for c in range(c_in):
        pad_ref[:, c, :, :] = jnp.full((n, hp, hp), float(mean[c]), jnp.float32)
    pad_ref[:, :, 1:1 + crop, 1:1 + crop] = x_ref[:, :, top:top + crop, left:left + crop]

    # ---- 3x3 SAME conv as 27 lane-dense FMAs.
    # acc layout: (N, H, c_mid*W), lane j = m*W + w.  Weight rows are pre-tiled host-side,
    # so each tap is one dense vmul+vadd; tap replication across channel groups is a
    # lane-axis concat (XLU slot, which has slack).
    acc = jnp.zeros((n, crop, lanes), jnp.float32)
    for c in range(c_in):
        for kh in range(3):
            for kw in range(3):
                t = c * 9 + kh * 3 + kw
                tap = pad_ref[:, c, kh:kh + crop, kw:kw + crop]      # (N, H, W)
                tap_t = jnp.concatenate([tap] * c_mid, axis=-1)      # (N, H, c_mid*W)
                acc = acc + tap_t * w1t_ref[t:t + 1, :]              # dense vmul + vadd

    # ---- ReLU + GAP(H) ; GAP(W), 1/(H*W) and the 8->10 head folded into one matmul.
    z = jnp.maximum(acc + b1t_ref[...], 0.0)                         # (N, H, lanes)
    zs = jnp.sum(z, axis=1)                                          # (N, lanes) sublane reduce
    logits = jnp.dot(zs, wh_ref[...],
                     preferred_element_type=jnp.float32) + b2p_ref[...]   # (N, 128)

    # ---- argmax over the real classes (first-max index, matches torch.argmax)
    lane_idx = jax.lax.broadcasted_iota(jnp.int32, (n, NLANE), 1)
    valid = lane_idx < ncls
    lm = jnp.where(valid, logits, -3.0e38)
    mx = jnp.max(lm, axis=-1, keepdims=True)                         # (N, 1)
    cand = jnp.where(lm == mx, lane_idx, INT32_MAX)
    preds = jnp.min(cand, axis=-1, keepdims=True)                    # (N, 1) i32
    match = (preds == y_ref[...]).astype(jnp.float32)                # (N, 1)

    # ---- single lane-dense output tile
    out = jnp.where(valid, logits, 0.0)
    out = jnp.where(lane_idx == ncls, jnp.broadcast_to(match, (n, NLANE)), out)
    out_ref[...] = out


# ---------------------------------------------------------------------------
# Host-side, one-time parameter preparation (weights are frozen in the module)
# ---------------------------------------------------------------------------
def fold_params(w1_oihw, b1, w2, b2, crop):
    """Fold Normalize into the conv, pre-tile weights lane-dense, fold GAP into the head."""
    c_mid, c_in, kh, kw = w1_oihw.shape
    ncls = w2.shape[1]
    assert kh == 3 and kw == 3 and ncls + 1 <= NLANE
    lanes = c_mid * crop

    mean = jnp.asarray(IMAGENET_MEAN, jnp.float32).reshape(1, c_in, 1, 1)
    stdv = jnp.asarray(IMAGENET_STD, jnp.float32).reshape(1, c_in, 1, 1)
    w1s = w1_oihw / stdv                                             # (c_mid, C, 3, 3)
    # tap index t = c*9 + kh*3 + kw  ->  w1f[t, m]
    w1f = jnp.transpose(w1s, (1, 2, 3, 0)).reshape(c_in * 9, c_mid)  # (27, c_mid)
    b1f = b1 - jnp.sum(w1s * mean, axis=(1, 2, 3))                   # (c_mid,)

    # lane-dense tiling: lane j = m*crop + w
    w1t = jnp.repeat(w1f, crop, axis=1)                              # (27, lanes)
    b1t = jnp.repeat(b1f, crop).reshape(1, lanes)                    # (1, lanes)

    # fold GAP (sum over w, * 1/(crop*crop)) + 8->10 head into one (lanes, 128) matrix
    w_head = jnp.zeros((lanes, NLANE), jnp.float32)
    w_head = w_head.at[:, :ncls].set(jnp.repeat(w2, crop, axis=0) / float(crop * crop))
    b2p = jnp.zeros((1, NLANE), jnp.float32).at[0, :ncls].set(b2)

    return dict(w1t=w1t, b1t=b1t, w_head=w_head, b2p=b2p, c_mid=c_mid, ncls=ncls)


def vision_net_forward(x, y, params, crop=16):
    """Eval-path VisionNet.forward: everything from CenterCrop to argmax in one kernel;
    only the batch-mean of the per-sample match flags is reduced outside."""
    N, C, H, W = x.shape
    top, left = (H - crop) // 2, (W - crop) // 2
    c_mid, ncls = params["c_mid"], params["ncls"]
    lanes = c_mid * crop
    Hp = crop + 2
    y2 = y.reshape(N, 1).astype(jnp.int32)

    kernel = functools.partial(_fused_kernel, crop=crop, top=top, left=left,
                               c_mid=c_mid, ncls=ncls, mean=IMAGENET_MEAN)

    out = pl.pallas_call(
        kernel,
        out_shape=jax.ShapeDtypeStruct((N, NLANE), jnp.float32),
        grid=(1,),
        in_specs=[
            pl.BlockSpec((N, C, H, W), lambda i: (0, 0, 0, 0)),      # raw image (crop in-kernel)
            pl.BlockSpec((C * 9, lanes), lambda i: (0, 0)),          # tiled folded conv weights
            pl.BlockSpec((1, lanes), lambda i: (0, 0)),              # tiled folded conv bias
            pl.BlockSpec((lanes, NLANE), lambda i: (0, 0)),          # GAP+head matrix
            pl.BlockSpec((1, NLANE), lambda i: (0, 0)),              # padded head bias
            pl.BlockSpec((N, 1), lambda i: (0, 0)),                  # labels
        ],
        out_specs=pl.BlockSpec((N, NLANE), lambda i: (0, 0)),
        scratch_shapes=[pltpu.VMEM((N, C, Hp, Hp), jnp.float32)],    # mean-padded crop
        compiler_params=pltpu.CompilerParams(dimension_semantics=("arbitrary",)),
    )(x, params["w1t"], params["b1t"], params["w_head"], params["b2p"], y2)

    logits = out[:, :ncls]
    accuracy = jnp.mean(out[:, ncls])   # per-sample matches reduced outside (grid-safe)
    return logits, accuracy


# ---------------------------------------------------------------------------
# Pure-JAX reference (for correctness check)
# ---------------------------------------------------------------------------
def reference_forward(x, y, w1_oihw, b1, w2, b2, crop):
    N, C, H, W = x.shape
    top, left = (H - crop) // 2, (W - crop) // 2
    xc = x[:, :, top:top + crop, left:left + crop]
    mean = jnp.asarray(IMAGENET_MEAN, jnp.float32).reshape(1, 3, 1, 1)
    std = jnp.asarray(IMAGENET_STD, jnp.float32).reshape(1, 3, 1, 1)
    xn = (xc - mean) / std
    conv = jax.lax.conv_general_dilated(
        xn, w1_oihw, (1, 1), "SAME", dimension_numbers=("NCHW", "OIHW", "NCHW"))
    conv = jnp.maximum(conv + b1.reshape(1, -1, 1, 1), 0.0)
    pooled = conv.mean(axis=(2, 3))
    logits = pooled @ w2 + b2
    preds = jnp.argmax(logits, axis=1)
    acc = (preds == y).astype(jnp.float32).mean()
    return logits, acc


# ---------------------------------------------------------------------------
if __name__ == "__main__":
    key = jax.random.PRNGKey(0)
    kx, kw1, kw2, ky = jax.random.split(key, 4)

    N, C, H, W = 2, 3, 20, 20
    CROP, CMID, NCLS = 16, 8, 10

    x = jax.random.uniform(kx, (N, C, H, W), jnp.float32)
    y = jax.random.randint(ky, (N,), 0, NCLS)

    # deterministic synthetic "backbone" parameters
    w1_oihw = jax.random.normal(kw1, (CMID, C, 3, 3), jnp.float32) * 0.1
    b1 = jnp.linspace(-0.1, 0.1, CMID).astype(jnp.float32)
    w2 = jax.random.normal(kw2, (CMID, NCLS), jnp.float32) * 0.1
    b2 = jnp.linspace(-0.05, 0.05, NCLS).astype(jnp.float32)

    params = fold_params(w1_oihw, b1, w2, b2, crop=CROP)

    logits, acc = vision_net_forward(x, y, params, crop=CROP)
    jax.block_until_ready((logits, acc))

    ref_logits, ref_acc = reference_forward(x, y, w1_oihw, b1, w2, b2, CROP)
    assert jnp.allclose(logits, ref_logits, atol=1e-3, rtol=1e-3), "logits mismatch"
    assert jnp.allclose(acc, ref_acc), "accuracy mismatch"

    print("KERNEL_OK")
</pallas_src>

<mosaic_0001>
module attributes {stable_mosaic.version = 11 : i64} {
  func.func @_fused_kernel(%arg0: i32, %arg1: memref<2x3x20x20xf32, #tpu.memory_space<vmem>>, %arg2: memref<27x128xf32, #tpu.memory_space<vmem>>, %arg3: memref<1x128xf32, #tpu.memory_space<vmem>>, %arg4: memref<128x128xf32, #tpu.memory_space<vmem>>, %arg5: memref<1x128xf32, #tpu.memory_space<vmem>>, %arg6: memref<2x1xi32, #tpu.memory_space<vmem>>, %arg7: memref<2x128xf32, #tpu.memory_space<vmem>>, %arg8: memref<2x3x18x18xf32, #tpu.memory_space<vmem>>) attributes {dimension_semantics = [#tpu.dimension_semantics<arbitrary>], iteration_bounds = array<i64: 1>, scalar_prefetch = 0 : i64, scratch_operands = 1 : i64, tpu.core_type = #tpu.core_type<tc>, window_params = [{pipeline_mode = #tpu.pipeline_mode<synchronous>, transform_indices = @transform_0, window_bounds = array<i64: 2, 3, 20, 20>}, {pipeline_mode = #tpu.pipeline_mode<synchronous>, transform_indices = @transform_1, window_bounds = array<i64: 27, 128>}, {pipeline_mode = #tpu.pipeline_mode<synchronous>, transform_indices = @transform_2, window_bounds = array<i64: 1, 128>}, {pipeline_mode = #tpu.pipeline_mode<synchronous>, transform_indices = @transform_3, window_bounds = array<i64: 128, 128>}, {pipeline_mode = #tpu.pipeline_mode<synchronous>, transform_indices = @transform_4, window_bounds = array<i64: 1, 128>}, {pipeline_mode = #tpu.pipeline_mode<synchronous>, transform_indices = @transform_5, window_bounds = array<i64: 2, 1>}, {pipeline_mode = #tpu.pipeline_mode<synchronous>, transform_indices = @transform_6, window_bounds = array<i64: 2, 128>}]} {
    %cst = arith.constant 4.850000e-01 : f32
    %0 = vector.broadcast %cst : f32 to vector<2x18x18xf32>
    %c0 = arith.constant 0 : index
    %c0_0 = arith.constant 0 : index
    %c0_1 = arith.constant 0 : index
    %c0_2 = arith.constant 0 : index
    %1 = vector.load %arg8[%c0, %c0_0, %c0_1, %c0_2] : memref<2x3x18x18xf32, #tpu.memory_space<vmem>>, vector<2x1x18x18xf32>
    %2 = vector.shape_cast %1 : vector<2x1x18x18xf32> to vector<2x18x18xf32>
    %3 = vector.shape_cast %0 : vector<2x18x18xf32> to vector<2x1x18x18xf32>
    tpu.vector_store %arg8[%c0, %c0_0, %c0_1, %c0_2], %3 {strides = array<i32>} : memref<2x3x18x18xf32, #tpu.memory_space<vmem>>, vector<2x1x18x18xf32>,
    %cst_3 = arith.constant 4.560000e-01 : f32
    %4 = vector.broadcast %cst_3 : f32 to vector<2x18x18xf32>
    %c0_4 = arith.constant 0 : index
    %c1 = arith.constant 1 : index
    %c0_5 = arith.constant 0 : index
    %c0_6 = arith.constant 0 : index
    %5 = vector.load %arg8[%c0_4, %c1, %c0_5, %c0_6] : memref<2x3x18x18xf32, #tpu.memory_space<vmem>>, vector<2x1x18x18xf32>
    %6 = vector.shape_cast %5 : vector<2x1x18x18xf32> to vector<2x18x18xf32>
    %7 = vector.shape_cast %4 : vector<2x18x18xf32> to vector<2x1x18x18xf32>
    tpu.vector_store %arg8[%c0_4, %c1, %c0_5, %c0_6], %7 {strides = array<i32>} : memref<2x3x18x18xf32, #tpu.memory_space<vmem>>, vector<2x1x18x18xf32>,
    %cst_7 = arith.constant 4.060000e-01 : f32
    %8 = vector.broadcast %cst_7 : f32 to vector<2x18x18xf32>
    %c0_8 = arith.constant 0 : index
    %c2 = arith.constant 2 : index
    %c0_9 = arith.constant 0 : index
    %c0_10 = arith.constant 0 : index
    %9 = vector.load %arg8[%c0_8, %c2, %c0_9, %c0_10] : memref<2x3x18x18xf32, #tpu.memory_space<vmem>>, vector<2x1x18x18xf32>
    %10 = vector.shape_cast %9 : vector<2x1x18x18xf32> to vector<2x18x18xf32>
    %11 = vector.shape_cast %8 : vector<2x18x18xf32> to vector<2x1x18x18xf32>
    tpu.vector_store %arg8[%c0_8, %c2, %c0_9, %c0_10], %11 {strides = array<i32>} : memref<2x3x18x18xf32, #tpu.memory_space<vmem>>, vector<2x1x18x18xf32>,
    %c0_11 = arith.constant 0 : index
    %c0_12 = arith.constant 0 : index
    %c2_13 = arith.constant 2 : index
    %c2_14 = arith.constant 2 : index
    %12 = vector.load %arg1[%c0_11, %c0_12, %c2_13, %c2_14] : memref<2x3x20x20xf32, #tpu.memory_space<vmem>>, vector<2x3x16x16xf32>
    %c0_15 = arith.constant 0 : index
    %c0_16 = arith.constant 0 : index
    %c1_17 = arith.constant 1 : index
    %c1_18 = arith.constant 1 : index
    %13 = vector.load %arg8[%c0_15, %c0_16, %c1_17, %c1_18] : memref<2x3x18x18xf32, #tpu.memory_space<vmem>>, vector<2x3x16x16xf32>
    tpu.vector_store %arg8[%c0_15, %c0_16, %c1_17, %c1_18], %12 {strides = array<i32>} : memref<2x3x18x18xf32, #tpu.memory_space<vmem>>, vector<2x3x16x16xf32>,
    %cst_19 = arith.constant 0.000000e+00 : f32
    %14 = vector.broadcast %cst_19 : f32 to vector<2x16x128xf32>
    %c0_20 = arith.constant 0 : index
    %c0_21 = arith.constant 0 : index
    %c0_22 = arith.constant 0 : index
    %c0_23 = arith.constant 0 : index
    %15 = vector.load %arg8[%c0_20, %c0_21, %c0_22, %c0_23] : memref<2x3x18x18xf32, #tpu.memory_space<vmem>>, vector<2x1x16x16xf32>
    %16 = vector.shape_cast %15 : vector<2x1x16x16xf32> to vector<2x16x16xf32>
    %17 = tpu.concatenate %16, %16, %16, %16, %16, %16, %16, %16 in 2 : vector<2x16x16xf32>, vector<2x16x16xf32>, vector<2x16x16xf32>, vector<2x16x16xf32>, vector<2x16x16xf32>, vector<2x16x16xf32>, vector<2x16x16xf32>, vector<2x16x16xf32> -> vector<2x16x128xf32>
    %c0_24 = arith.constant 0 : index
    %c0_25 = arith.constant 0 : index
    %18 = vector.load %arg2[%c0_24, %c0_25] : memref<27x128xf32, #tpu.memory_space<vmem>>, vector<1x128xf32>
    %19 = vector.shape_cast %18 : vector<1x128xf32> to vector<1x1x128xf32>
    %20 = vector.broadcast %19 : vector<1x1x128xf32> to vector<2x16x128xf32>
    %21 = arith.mulf %17, %20 : vector<2x16x128xf32>
    %22 = arith.addf %14, %21 : vector<2x16x128xf32>
    %c0_26 = arith.constant 0 : index
    %c0_27 = arith.constant 0 : index
    %c0_28 = arith.constant 0 : index
    %c1_29 = arith.constant 1 : index
    %23 = vector.load %arg8[%c0_26, %c0_27, %c0_28, %c1_29] : memref<2x3x18x18xf32, #tpu.memory_space<vmem>>, vector<2x1x16x16xf32>
    %24 = vector.shape_cast %23 : vector<2x1x16x16xf32> to vector<2x16x16xf32>
    %25 = tpu.concatenate %24, %24, %24, %24, %24, %24, %24, %24 in 2 : vector<2x16x16xf32>, vector<2x16x16xf32>, vector<2x16x16xf32>, vector<2x16x16xf32>, vector<2x16x16xf32>, vector<2x16x16xf32>, vector<2x16x16xf32>, vector<2x16x16xf32> -> vector<2x16x128xf32>
    %c1_30 = arith.constant 1 : index
    %c0_31 = arith.constant 0 : index
    %26 = vector.load %arg2[%c1_30, %c0_31] : memref<27x128xf32, #tpu.memory_space<vmem>>, vector<1x128xf32>
    %27 = vector.shape_cast %26 : vector<1x128xf32> to vector<1x1x128xf32>
    %28 = vector.broadcast %27 : vector<1x1x128xf32> to vector<2x16x128xf32>
    %29 = arith.mulf %25, %28 : vector<2x16x128xf32>
    %30 = arith.addf %22, %29 : vector<2x16x128xf32>
    %c0_32 = arith.constant 0 : index
    %c0_33 = arith.constant 0 : index
    %c0_34 = arith.constant 0 : index
    %c2_35 = arith.constant 2 : index
    %31 = vector.load %arg8[%c0_32, %c0_33, %c0_34, %c2_35] : memref<2x3x18x18xf32, #tpu.memory_space<vmem>>, vector<2x1x16x16xf32>
    %32 = vector.shape_cast %31 : vector<2x1x16x16xf32> to vector<2x16x16xf32>
    %33 = tpu.concatenate %32, %32, %32, %32, %32, %32, %32, %32 in 2 : vector<2x16x16xf32>, vector<2x16x16xf32>, vector<2x16x16xf32>, vector<2x16x16xf32>, vector<2x16x16xf32>, vector<2x16x16xf32>, vector<2x16x16xf32>, vector<2x16x16xf32> -> vector<2x16x128xf32>
    %c2_36 = arith.constant 2 : index
    %c0_37 = arith.constant 0 : index
    %34 = vector.load %arg2[%c2_36, %c0_37] : memref<27x128xf32, #tpu.memory_space<vmem>>, vector<1x128xf32>
    %35 = vector.shape_cast %34 : vector<1x128xf32> to vector<1x1x128xf32>
    %36 = vector.broadcast %35 : vector<1x1x128xf32> to vector<2x16x128xf32>
    %37 = arith.mulf %33, %36 : vector<2x16x128xf32>
    %38 = arith.addf %30, %37 : vector<2x16x128xf32>
    %c0_38 = arith.constant 0 : index
    %c0_39 = arith.constant 0 : index
    %c1_40 = arith.constant 1 : index
    %c0_41 = arith.constant 0 : index
    %39 = vector.load %arg8[%c0_38, %c0_39, %c1_40, %c0_41] : memref<2x3x18x18xf32, #tpu.memory_space<vmem>>, vector<2x1x16x16xf32>
    %40 = vector.shape_cast %39 : vector<2x1x16x16xf32> to vector<2x16x16xf32>
    %41 = tpu.concatenate %40, %40, %40, %40, %40, %40, %40, %40 in 2 : vector<2x16x16xf32>, vector<2x16x16xf32>, vector<2x16x16xf32>, vector<2x16x16xf32>, vector<2x16x16xf32>, vector<2x16x16xf32>, vector<2x16x16xf32>, vector<2x16x16xf32> -> vector<2x16x128xf32>
    %c3 = arith.constant 3 : index
    %c0_42 = arith.constant 0 : index
    %42 = vector.load %arg2[%c3, %c0_42] : memref<27x128xf32, #tpu.memory_space<vmem>>, vector<1x128xf32>
    %43 = vector.shape_cast %42 : vector<1x128xf32> to vector<1x1x128xf32>
    %44 = vector.broadcast %43 : vector<1x1x128xf32> to vector<2x16x128xf32>
    %45 = arith.mulf %41, %44 : vector<2x16x128xf32>
    %46 = arith.addf %38, %45 : vector<2x16x128xf32>
    %c0_43 = arith.constant 0 : index
    %c0_44 = arith.constant 0 : index
    %c1_45 = arith.constant 1 : index
    %c1_46 = arith.constant 1 : index
    %47 = vector.load %arg8[%c0_43, %c0_44, %c1_45, %c1_46] : memref<2x3x18x18xf32, #tpu.memory_space<vmem>>, vector<2x1x16x16xf32>
    %48 = vector.shape_cast %47 : vector<2x1x16x16xf32> to vector<2x16x16xf32>
    %49 = tpu.concatenate %48, %48, %48, %48, %48, %48, %48, %48 in 2 : vector<2x16x16xf32>, vector<2x16x16xf32>, vector<2x16x16xf32>, vector<2x16x16xf32>, vector<2x16x16xf32>, vector<2x16x16xf32>, vector<2x16x16xf32>, vector<2x16x16xf32> -> vector<2x16x128xf32>
    %c4 = arith.constant 4 : index
    %c0_47 = arith.constant 0 : index
    %50 = vector.load %arg2[%c4, %c0_47] : memref<27x128xf32, #tpu.memory_space<vmem>>, vector<1x128xf32>
    %51 = vector.shape_cast %50 : vector<1x128xf32> to vector<1x1x128xf32>
    %52 = vector.broadcast %51 : vector<1x1x128xf32> to vector<2x16x128xf32>
    %53 = arith.mulf %49, %52 : vector<2x16x128xf32>
    %54 = arith.addf %46, %53 : vector<2x16x128xf32>
    %c0_48 = arith.constant 0 : index
    %c0_49 = arith.constant 0 : index
    %c1_50 = arith.constant 1 : index
    %c2_51 = arith.constant 2 : index
    %55 = vector.load %arg8[%c0_48, %c0_49, %c1_50, %c2_51] : memref<2x3x18x18xf32, #tpu.memory_space<vmem>>, vector<2x1x16x16xf32>
    %56 = vector.shape_cast %55 : vector<2x1x16x16xf32> to vector<2x16x16xf32>
    %57 = tpu.concatenate %56, %56, %56, %56, %56, %56, %56, %56 in 2 : vector<2x16x16xf32>, vector<2x16x16xf32>, vector<2x16x16xf32>, vector<2x16x16xf32>, vector<2x16x16xf32>, vector<2x16x16xf32>, vector<2x16x16xf32>, vector<2x16x16xf32> -> vector<2x16x128xf32>
    %c5 = arith.constant 5 : index
    %c0_52 = arith.constant 0 : index
    %58 = vector.load %arg2[%c5, %c0_52] : memref<27x128xf32, #tpu.memory_space<vmem>>, vector<1x128xf32>
    %59 = vector.shape_cast %58 : vector<1x128xf32> to vector<1x1x128xf32>
    %60 = vector.broadcast %59 : vector<1x1x128xf32> to vector<2x16x128xf32>
    %61 = arith.mulf %57, %60 : vector<2x16x128xf32>
    %62 = arith.addf %54, %61 : vector<2x16x128xf32>
    %c0_53 = arith.constant 0 : index
    %c0_54 = arith.constant 0 : index
    %c2_55 = arith.constant 2 : index
    %c0_56 = arith.constant 0 : index
    %63 = vector.load %arg8[%c0_53, %c0_54, %c2_55, %c0_56] : memref<2x3x18x18xf32, #tpu.memory_space<vmem>>, vector<2x1x16x16xf32>
    %64 = vector.shape_cast %63 : vector<2x1x16x16xf32> to vector<2x16x16xf32>
    %65 = tpu.concatenate %64, %64, %64, %64, %64, %64, %64, %64 in 2 : vector<2x16x16xf32>, vector<2x16x16xf32>, vector<2x16x16xf32>, vector<2x16x16xf32>, vector<2x16x16xf32>, vector<2x16x16xf32>, vector<2x16x16xf32>, vector<2x16x16xf32> -> vector<2x16x128xf32>
    %c6 = arith.constant 6 : index
    %c0_57 = arith.constant 0 : index
    %66 = vector.load %arg2[%c6, %c0_57] : memref<27x128xf32, #tpu.memory_space<vmem>>, vector<1x128xf32>
    %67 = vector.shape_cast %66 : vector<1x128xf32> to vector<1x1x128xf32>
    %68 = vector.broadcast %67 : vector<1x1x128xf32> to vector<2x16x128xf32>
    %69 = arith.mulf %65, %68 : vector<2x16x128xf32>
    %70 = arith.addf %62, %69 : vector<2x16x128xf32>
    %c0_58 = arith.constant 0 : index
    %c0_59 = arith.constant 0 : index
    %c2_60 = arith.constant 2 : index
    %c1_61 = arith.constant 1 : index
    %71 = vector.load %arg8[%c0_58, %c0_59, %c2_60, %c1_61] : memref<2x3x18x18xf32, #tpu.memory_space<vmem>>, vector<2x1x16x16xf32>
    %72 = vector.shape_cast %71 : vector<2x1x16x16xf32> to vector<2x16x16xf32>
    %73 = tpu.concatenate %72, %72, %72, %72, %72, %72, %72, %72 in 2 : vector<2x16x16xf32>, vector<2x16x16xf32>, vector<2x16x16xf32>, vector<2x16x16xf32>, vector<2x16x16xf32>, vector<2x16x16xf32>, vector<2x16x16xf32>, vector<2x16x16xf32> -> vector<2x16x128xf32>
    %c7 = arith.constant 7 : index
    %c0_62 = arith.constant 0 : index
    %74 = vector.load %arg2[%c7, %c0_62] : memref<27x128xf32, #tpu.memory_space<vmem>>, vector<1x128xf32>
    %75 = vector.shape_cast %74 : vector<1x128xf32> to vector<1x1x128xf32>
    %76 = vector.broadcast %75 : vector<1x1x128xf32> to vector<2x16x128xf32>
    %77 = arith.mulf %73, %76 : vector<2x16x128xf32>
    %78 = arith.addf %70, %77 : vector<2x16x128xf32>
    %c0_63 = arith.constant 0 : index
    %c0_64 = arith.constant 0 : index
    %c2_65 = arith.constant 2 : index
    %c2_66 = arith.constant 2 : index
    %79 = vector.load %arg8[%c0_63, %c0_64, %c2_65, %c2_66] : memref<2x3x18x18xf32, #tpu.memory_space<vmem>>, vector<2x1x16x16xf32>
    %80 = vector.shape_cast %79 : vector<2x1x16x16xf32> to vector<2x16x16xf32>
    %81 = tpu.concatenate %80, %80, %80, %80, %80, %80, %80, %80 in 2 : vector<2x16x16xf32>, vector<2x16x16xf32>, vector<2x16x16xf32>, vector<2x16x16xf32>, vector<2x16x16xf32>, vector<2x16x16xf32>, vector<2x16x16xf32>, vector<2x16x16xf32> -> vector<2x16x128xf32>
    %c8 = arith.constant 8 : index
    %c0_67 = arith.constant 0 : index
    %82 = vector.load %arg2[%c8, %c0_67] : memref<27x128xf32, #tpu.memory_space<vmem>>, vector<1x128xf32>
    %83 = vector.shape_cast %82 : vector<1x128xf32> to vector<1x1x128xf32>
    %84 = vector.broadcast %83 : vector<1x1x128xf32> to vector<2x16x128xf32>
    %85 = arith.mulf %81, %84 : vector<2x16x128xf32>
    %86 = arith.addf %78, %85 : vector<2x16x128xf32>
    %c0_68 = arith.constant 0 : index
    %c1_69 = arith.constant 1 : index
    %c0_70 = arith.constant 0 : index
    %c0_71 = arith.constant 0 : index
    %87 = vector.load %arg8[%c0_68, %c1_69, %c0_70, %c0_71] : memref<2x3x18x18xf32, #tpu.memory_space<vmem>>, vector<2x1x16x16xf32>
    %88 = vector.shape_cast %87 : vector<2x1x16x16xf32> to vector<2x16x16xf32>
    %89 = tpu.concatenate %88, %88, %88, %88, %88, %88, %88, %88 in 2 : vector<2x16x16xf32>, vector<2x16x16xf32>, vector<2x16x16xf32>, vector<2x16x16xf32>, vector<2x16x16xf32>, vector<2x16x16xf32>, vector<2x16x16xf32>, vector<2x16x16xf32> -> vector<2x16x128xf32>
    %c9 = arith.constant 9 : index
    %c0_72 = arith.constant 0 : index
    %90 = vector.load %arg2[%c9, %c0_72] : memref<27x128xf32, #tpu.memory_space<vmem>>, vector<1x128xf32>
    %91 = vector.shape_cast %90 : vector<1x128xf32> to vector<1x1x128xf32>
    %92 = vector.broadcast %91 : vector<1x1x128xf32> to vector<2x16x128xf32>
    %93 = arith.mulf %89, %92 : vector<2x16x128xf32>
    %94 = arith.addf %86, %93 : vector<2x16x128xf32>
    %c0_73 = arith.constant 0 : index
    %c1_74 = arith.constant 1 : index
    %c0_75 = arith.constant 0 : index
    %c1_76 = arith.constant 1 : index
    %95 = vector.load %arg8[%c0_73, %c1_74, %c0_75, %c1_76] : memref<2x3x18x18xf32, #tpu.memory_space<vmem>>, vector<2x1x16x16xf32>
    %96 = vector.shape_cast %95 : vector<2x1x16x16xf32> to vector<2x16x16xf32>
    %97 = tpu.concatenate %96, %96, %96, %96, %96, %96, %96, %96 in 2 : vector<2x16x16xf32>, vector<2x16x16xf32>, vector<2x16x16xf32>, vector<2x16x16xf32>, vector<2x16x16xf32>, vector<2x16x16xf32>, vector<2x16x16xf32>, vector<2x16x16xf32> -> vector<2x16x128xf32>
    %c10 = arith.constant 10 : index
    %c0_77 = arith.constant 0 : index
    %98 = vector.load %arg2[%c10, %c0_77] : memref<27x128xf32, #tpu.memory_space<vmem>>, vector<1x128xf32>
    %99 = vector.shape_cast %98 : vector<1x128xf32> to vector<1x1x128xf32>
    %100 = vector.broadcast %99 : vector<1x1x128xf32> to vector<2x16x128xf32>
    %101 = arith.mulf %97, %100 : vector<2x16x128xf32>
    %102 = arith.addf %94, %101 : vector<2x16x128xf32>
    %c0_78 = arith.constant 0 : index
    %c1_79 = arith.constant 1 : index
    %c0_80 = arith.constant 0 : index
    %c2_81 = arith.constant 2 : index
    %103 = vector.load %arg8[%c0_78, %c1_79, %c0_80, %c2_81] : memref<2x3x18x18xf32, #tpu.memory_space<vmem>>, vector<2x1x16x16xf32>
    %104 = vector.shape_cast %103 : vector<2x1x16x16xf32> to vector<2x16x16xf32>
    %105 = tpu.concatenate %104, %104, %104, %104, %104, %104, %104, %104 in 2 : vector<2x16x16xf32>, vector<2x16x16xf32>, vector<2x16x16xf32>, vector<2x16x16xf32>, vector<2x16x16xf32>, vector<2x16x16xf32>, vector<2x16x16xf32>, vector<2x16x16xf32> -> vector<2x16x128xf32>
    %c11 = arith.constant 11 : index
    %c0_82 = arith.constant 0 : index
    %106 = vector.load %arg2[%c11, %c0_82] : memref<27x128xf32, #tpu.memory_space<vmem>>, vector<1x128xf32>
    %107 = vector.shape_cast %106 : vector<1x128xf32> to vector<1x1x128xf32>
    %108 = vector.broadcast %107 : vector<1x1x128xf32> to vector<2x16x128xf32>
    %109 = arith.mulf %105, %108 : vector<2x16x128xf32>
    %110 = arith.addf %102, %109 : vector<2x16x128xf32>
    %c0_83 = arith.constant 0 : index
    %c1_84 = arith.constant 1 : index
    %c1_85 = arith.constant 1 : index
    %c0_86 = arith.constant 0 : index
    %111 = vector.load %arg8[%c0_83, %c1_84, %c1_85, %c0_86] : memref<2x3x18x18xf32, #tpu.memory_space<vmem>>, vector<2x1x16x16xf32>
    %112 = vector.shape_cast %111 : vector<2x1x16x16xf32> to vector<2x16x16xf32>
    %113 = tpu.concatenate %112, %112, %112, %112, %112, %112, %112, %112 in 2 : vector<2x16x16xf32>, vector<2x16x16xf32>, vector<2x16x16xf32>, vector<2x16x16xf32>, vector<2x16x16xf32>, vector<2x16x16xf32>, vector<2x16x16xf32>, vector<2x16x16xf32> -> vector<2x16x128xf32>
    %c12 = arith.constant 12 : index
    %c0_87 = arith.constant 0 : index
    %114 = vector.load %arg2[%c12, %c0_87] : memref<27x128xf32, #tpu.memory_space<vmem>>, vector<1x128xf32>
    %115 = vector.shape_cast %114 : vector<1x128xf32> to vector<1x1x128xf32>
    %116 = vector.broadcast %115 : vector<1x1x128xf32> to vector<2x16x128xf32>
    %117 = arith.mulf %113, %116 : vector<2x16x128xf32>
    %118 = arith.addf %110, %117 : vector<2x16x128xf32>
    %c0_88 = arith.constant 0 : index
    %c1_89 = arith.constant 1 : index
    %c1_90 = arith.constant 1 : index
    %c1_91 = arith.constant 1 : index
    %119 = vector.load %arg8[%c0_88, %c1_89, %c1_90, %c1_91] : memref<2x3x18x18xf32, #tpu.memory_space<vmem>>, vector<2x1x16x16xf32>
    %120 = vector.shape_cast %119 : vector<2x1x16x16xf32> to vector<2x16x16xf32>
    %121 = tpu.concatenate %120, %120, %120, %120, %120, %120, %120, %120 in 2 : vector<2x16x16xf32>, vector<2x16x16xf32>, vector<2x16x16xf32>, vector<2x16x16xf32>, vector<2x16x16xf32>, vector<2x16x16xf32>, vector<2x16x16xf32>, vector<2x16x16xf32> -> vector<2x16x128xf32>
    %c13 = arith.constant 13 : index
    %c0_92 = arith.constant 0 : index
    %122 = vector.load %arg2[%c13, %c0_92] : memref<27x128xf32, #tpu.memory_space<vmem>>, vector<1x128xf32>
    %123 = vector.shape_cast %122 : vector<1x128xf32> to vector<1x1x128xf32>
    %124 = vector.broadcast %123 : vector<1x1x128xf32> to vector<2x16x128xf32>
    %125 = arith.mulf %121, %124 : vector<2x16x128xf32>
    %126 = arith.addf %118, %125 : vector<2x16x128xf32>
    %c0_93 = arith.constant 0 : index
    %c1_94 = arith.constant 1 : index
    %c1_95 = arith.constant 1 : index
    %c2_96 = arith.constant 2 : index
    %127 = vector.load %arg8[%c0_93, %c1_94, %c1_95, %c2_96] : memref<2x3x18x18xf32, #tpu.memory_space<vmem>>, vector<2x1x16x16xf32>
    %128 = vector.shape_cast %127 : vector<2x1x16x16xf32> to vector<2x16x16xf32>
    %129 = tpu.concatenate %128, %128, %128, %128, %128, %128, %128, %128 in 2 : vector<2x16x16xf32>, vector<2x16x16xf32>, vector<2x16x16xf32>, vector<2x16x16xf32>, vector<2x16x16xf32>, vector<2x16x16xf32>, vector<2x16x16xf32>, vector<2x16x16xf32> -> vector<2x16x128xf32>
    %c14 = arith.constant 14 : index
    %c0_97 = arith.constant 0 : index
    %130 = vector.load %arg2[%c14, %c0_97] : memref<27x128xf32, #tpu.memory_space<vmem>>, vector<1x128xf32>
    %131 = vector.shape_cast %130 : vector<1x128xf32> to vector<1x1x128xf32>
    %132 = vector.broadcast %131 : vector<1x1x128xf32> to vector<2x16x128xf32>
    %133 = arith.mulf %129, %132 : vector<2x16x128xf32>
    %134 = arith.addf %126, %133 : vector<2x16x128xf32>
    %c0_98 = arith.constant 0 : index
    %c1_99 = arith.constant 1 : index
    %c2_100 = arith.constant 2 : index
    %c0_101 = arith.constant 0 : index
    %135 = vector.load %arg8[%c0_98, %c1_99, %c2_100, %c0_101] : memref<2x3x18x18xf32, #tpu.memory_space<vmem>>, vector<2x1x16x16xf32>
    %136 = vector.shape_cast %135 : vector<2x1x16x16xf32> to vector<2x16x16xf32>
    %137 = tpu.concatenate %136, %136, %136, %136, %136, %136, %136, %136 in 2 : vector<2x16x16xf32>, vector<2x16x16xf32>, vector<2x16x16xf32>, vector<2x16x16xf32>, vector<2x16x16xf32>, vector<2x16x16xf32>, vector<2x16x16xf32>, vector<2x16x16xf32> -> vector<2x16x128xf32>
    %c15 = arith.constant 15 : index
    %c0_102 = arith.constant 0 : index
    %138 = vector.load %arg2[%c15, %c0_102] : memref<27x128xf32, #tpu.memory_space<vmem>>, vector<1x128xf32>
    %139 = vector.shape_cast %138 : vector<1x128xf32> to vector<1x1x128xf32>
    %140 = vector.broadcast %139 : vector<1x1x128xf32> to vector<2x16x128xf32>
    %141 = arith.mulf %137, %140 : vector<2x16x128xf32>
    %142 = arith.addf %134, %141 : vector<2x16x128xf32>
    %c0_103 = arith.constant 0 : index
    %c1_104 = arith.constant 1 : index
    %c2_105 = arith.constant 2 : index
    %c1_106 = arith.constant 1 : index
    %143 = vector.load %arg8[%c0_103, %c1_104, %c2_105, %c1_106] : memref<2x3x18x18xf32, #tpu.memory_space<vmem>>, vector<2x1x16x16xf32>
    %144 = vector.shape_cast %143 : vector<2x1x16x16xf32> to vector<2x16x16xf32>
    %145 = tpu.concatenate %144, %144, %144, %144, %144, %144, %144, %144 in 2 : vector<2x16x16xf32>, vector<2x16x16xf32>, vector<2x16x16xf32>, vector<2x16x16xf32>, vector<2x16x16xf32>, vector<2x16x16xf32>, vector<2x16x16xf32>, vector<2x16x16xf32> -> vector<2x16x128xf32>
    %c16 = arith.constant 16 : index
    %c0_107 = arith.constant 0 : index
    %146 = vector.load %arg2[%c16, %c0_107] : memref<27x128xf32, #tpu.memory_space<vmem>>, vector<1x128xf32>
    %147 = vector.shape_cast %146 : vector<1x128xf32> to vector<1x1x128xf32>
    %148 = vector.broadcast %147 : vector<1x1x128xf32> to vector<2x16x128xf32>
    %149 = arith.mulf %145, %148 : vector<2x16x128xf32>
    %150 = arith.addf %142, %149 : vector<2x16x128xf32>
    %c0_108 = arith.constant 0 : index
    %c1_109 = arith.constant 1 : index
    %c2_110 = arith.constant 2 : index
    %c2_111 = arith.constant 2 : index
    %151 = vector.load %arg8[%c0_108, %c1_109, %c2_110, %c2_111] : memref<2x3x18x18xf32, #tpu.memory_space<vmem>>, vector<2x1x16x16xf32>
    %152 = vector.shape_cast %151 : vector<2x1x16x16xf32> to vector<2x16x16xf32>
    %153 = tpu.concatenate %152, %152, %152, %152, %152, %152, %152, %152 in 2 : vector<2x16x16xf32>, vector<2x16x16xf32>, vector<2x16x16xf32>, vector<2x16x16xf32>, vector<2x16x16xf32>, vector<2x16x16xf32>, vector<2x16x16xf32>, vector<2x16x16xf32> -> vector<2x16x128xf32>
    %c17 = arith.constant 17 : index
    %c0_112 = arith.constant 0 : index
    %154 = vector.load %arg2[%c17, %c0_112] : memref<27x128xf32, #tpu.memory_space<vmem>>, vector<1x128xf32>
    %155 = vector.shape_cast %154 : vector<1x128xf32> to vector<1x1x128xf32>
    %156 = vector.broadcast %155 : vector<1x1x128xf32> to vector<2x16x128xf32>
    %157 = arith.mulf %153, %156 : vector<2x16x128xf32>
    %158 = arith.addf %150, %157 : vector<2x16x128xf32>
    %c0_113 = arith.constant 0 : index
    %c2_114 = arith.constant 2 : index
    %c0_115 = arith.constant 0 : index
    %c0_116 = arith.constant 0 : index
    %159 = vector.load %arg8[%c0_113, %c2_114, %c0_115, %c0_116] : memref<2x3x18x18xf32, #tpu.memory_space<vmem>>, vector<2x1x16x16xf32>
    %160 = vector.shape_cast %159 : vector<2x1x16x16xf32> to vector<2x16x16xf32>
    %161 = tpu.concatenate %160, %160, %160, %160, %160, %160, %160, %160 in 2 : vector<2x16x16xf32>, vector<2x16x16xf32>, vector<2x16x16xf32>, vector<2x16x16xf32>, vector<2x16x16xf32>, vector<2x16x16xf32>, vector<2x16x16xf32>, vector<2x16x16xf32> -> vector<2x16x128xf32>
    %c18 = arith.constant 18 : index
    %c0_117 = arith.constant 0 : index
    %162 = vector.load %arg2[%c18, %c0_117] : memref<27x128xf32, #tpu.memory_space<vmem>>, vector<1x128xf32>
    %163 = vector.shape_cast %162 : vector<1x128xf32> to vector<1x1x128xf32>
    %164 = vector.broadcast %163 : vector<1x1x128xf32> to vector<2x16x128xf32>
    %165 = arith.mulf %161, %164 : vector<2x16x128xf32>
    %166 = arith.addf %158, %165 : vector<2x16x128xf32>
    %c0_118 = arith.constant 0 : index
    %c2_119 = arith.constant 2 : index
    %c0_120 = arith.constant 0 : index
    %c1_121 = arith.constant 1 : index
    %167 = vector.load %arg8[%c0_118, %c2_119, %c0_120, %c1_121] : memref<2x3x18x18xf32, #tpu.memory_space<vmem>>, vector<2x1x16x16xf32>
    %168 = vector.shape_cast %167 : vector<2x1x16x16xf32> to vector<2x16x16xf32>
    %169 = tpu.concatenate %168, %168, %168, %168, %168, %168, %168, %168 in 2 : vector<2x16x16xf32>, vector<2x16x16xf32>, vector<2x16x16xf32>, vector<2x16x16xf32>, vector<2x16x16xf32>, vector<2x16x16xf32>, vector<2x16x16xf32>, vector<2x16x16xf32> -> vector<2x16x128xf32>
    %c19 = arith.constant 19 : index
    %c0_122 = arith.constant 0 : index
    %170 = vector.load %arg2[%c19, %c0_122] : memref<27x128xf32, #tpu.memory_space<vmem>>, vector<1x128xf32>
    %171 = vector.shape_cast %170 : vector<1x128xf32> to vector<1x1x128xf32>
    %172 = vector.broadcast %171 : vector<1x1x128xf32> to vector<2x16x128xf32>
    %173 = arith.mulf %169, %172 : vector<2x16x128xf32>
    %174 = arith.addf %166, %173 : vector<2x16x128xf32>
    %c0_123 = arith.constant 0 : index
    %c2_124 = arith.constant 2 : index
    %c0_125 = arith.constant 0 : index
    %c2_126 = arith.constant 2 : index
    %175 = vector.load %arg8[%c0_123, %c2_124, %c0_125, %c2_126] : memref<2x3x18x18xf32, #tpu.memory_space<vmem>>, vector<2x1x16x16xf32>
    %176 = vector.shape_cast %175 : vector<2x1x16x16xf32> to vector<2x16x16xf32>
    %177 = tpu.concatenate %176, %176, %176, %176, %176, %176, %176, %176 in 2 : vector<2x16x16xf32>, vector<2x16x16xf32>, vector<2x16x16xf32>, vector<2x16x16xf32>, vector<2x16x16xf32>, vector<2x16x16xf32>, vector<2x16x16xf32>, vector<2x16x16xf32> -> vector<2x16x128xf32>
    %c20 = arith.constant 20 : index
    %c0_127 = arith.constant 0 : index
    %178 = vector.load %arg2[%c20, %c0_127] : memref<27x128xf32, #tpu.memory_space<vmem>>, vector<1x128xf32>
    %179 = vector.shape_cast %178 : vector<1x128xf32> to vector<1x1x128xf32>
    %180 = vector.broadcast %179 : vector<1x1x128xf32> to vector<2x16x128xf32>
    %181 = arith.mulf %177, %180 : vector<2x16x128xf32>
    %182 = arith.addf %174, %181 : vector<2x16x128xf32>
    %c0_128 = arith.constant 0 : index
    %c2_129 = arith.constant 2 : index
    %c1_130 = arith.constant 1 : index
    %c0_131 = arith.constant 0 : index
    %183 = vector.load %arg8[%c0_128, %c2_129, %c1_130, %c0_131] : memref<2x3x18x18xf32, #tpu.memory_space<vmem>>, vector<2x1x16x16xf32>
    %184 = vector.shape_cast %183 : vector<2x1x16x16xf32> to vector<2x16x16xf32>
    %185 = tpu.concatenate %184, %184, %184, %184, %184, %184, %184, %184 in 2 : vector<2x16x16xf32>, vector<2x16x16xf32>, vector<2x16x16xf32>, vector<2x16x16xf32>, vector<2x16x16xf32>, vector<2x16x16xf32>, vector<2x16x16xf32>, vector<2x16x16xf32> -> vector<2x16x128xf32>
    %c21 = arith.constant 21 : index
    %c0_132 = arith.constant 0 : index
    %186 = vector.load %arg2[%c21, %c0_132] : memref<27x128xf32, #tpu.memory_space<vmem>>, vector<1x128xf32>
    %187 = vector.shape_cast %186 : vector<1x128xf32> to vector<1x1x128xf32>
    %188 = vector.broadcast %187 : vector<1x1x128xf32> to vector<2x16x128xf32>
    %189 = arith.mulf %185, %188 : vector<2x16x128xf32>
    %190 = arith.addf %182, %189 : vector<2x16x128xf32>
    %c0_133 = arith.constant 0 : index
    %c2_134 = arith.constant 2 : index
    %c1_135 = arith.constant 1 : index
    %c1_136 = arith.constant 1 : index
    %191 = vector.load %arg8[%c0_133, %c2_134, %c1_135, %c1_136] : memref<2x3x18x18xf32, #tpu.memory_space<vmem>>, vector<2x1x16x16xf32>
    %192 = vector.shape_cast %191 : vector<2x1x16x16xf32> to vector<2x16x16xf32>
    %193 = tpu.concatenate %192, %192, %192, %192, %192, %192, %192, %192 in 2 : vector<2x16x16xf32>, vector<2x16x16xf32>, vector<2x16x16xf32>, vector<2x16x16xf32>, vector<2x16x16xf32>, vector<2x16x16xf32>, vector<2x16x16xf32>, vector<2x16x16xf32> -> vector<2x16x128xf32>
    %c22 = arith.constant 22 : index
    %c0_137 = arith.constant 0 : index
    %194 = vector.load %arg2[%c22, %c0_137] : memref<27x128xf32, #tpu.memory_space<vmem>>, vector<1x128xf32>
    %195 = vector.shape_cast %194 : vector<1x128xf32> to vector<1x1x128xf32>
    %196 = vector.broadcast %195 : vector<1x1x128xf32> to vector<2x16x128xf32>
    %197 = arith.mulf %193, %196 : vector<2x16x128xf32>
    %198 = arith.addf %190, %197 : vector<2x16x128xf32>
    %c0_138 = arith.constant 0 : index
    %c2_139 = arith.constant 2 : index
    %c1_140 = arith.constant 1 : index
    %c2_141 = arith.constant 2 : index
    %199 = vector.load %arg8[%c0_138, %c2_139, %c1_140, %c2_141] : memref<2x3x18x18xf32, #tpu.memory_space<vmem>>, vector<2x1x16x16xf32>
    %200 = vector.shape_cast %199 : vector<2x1x16x16xf32> to vector<2x16x16xf32>
    %201 = tpu.concatenate %200, %200, %200, %200, %200, %200, %200, %200 in 2 : vector<2x16x16xf32>, vector<2x16x16xf32>, vector<2x16x16xf32>, vector<2x16x16xf32>, vector<2x16x16xf32>, vector<2x16x16xf32>, vector<2x16x16xf32>, vector<2x16x16xf32> -> vector<2x16x128xf32>
    %c23 = arith.constant 23 : index
    %c0_142 = arith.constant 0 : index
    %202 = vector.load %arg2[%c23, %c0_142] : memref<27x128xf32, #tpu.memory_space<vmem>>, vector<1x128xf32>
    %203 = vector.shape_cast %202 : vector<1x128xf32> to vector<1x1x128xf32>
    %204 = vector.broadcast %203 : vector<1x1x128xf32> to vector<2x16x128xf32>
    %205 = arith.mulf %201, %204 : vector<2x16x128xf32>
    %206 = arith.addf %198, %205 : vector<2x16x128xf32>
    %c0_143 = arith.constant 0 : index
    %c2_144 = arith.constant 2 : index
    %c2_145 = arith.constant 2 : index
    %c0_146 = arith.constant 0 : index
    %207 = vector.load %arg8[%c0_143, %c2_144, %c2_145, %c0_146] : memref<2x3x18x18xf32, #tpu.memory_space<vmem>>, vector<2x1x16x16xf32>
    %208 = vector.shape_cast %207 : vector<2x1x16x16xf32> to vector<2x16x16xf32>
    %209 = tpu.concatenate %208, %208, %208, %208, %208, %208, %208, %208 in 2 : vector<2x16x16xf32>, vector<2x16x16xf32>, vector<2x16x16xf32>, vector<2x16x16xf32>, vector<2x16x16xf32>, vector<2x16x16xf32>, vector<2x16x16xf32>, vector<2x16x16xf32> -> vector<2x16x128xf32>
    %c24 = arith.constant 24 : index
    %c0_147 = arith.constant 0 : index
    %210 = vector.load %arg2[%c24, %c0_147] : memref<27x128xf32, #tpu.memory_space<vmem>>, vector<1x128xf32>
    %211 = vector.shape_cast %210 : vector<1x128xf32> to vector<1x1x128xf32>
    %212 = vector.broadcast %211 : vector<1x1x128xf32> to vector<2x16x128xf32>
    %213 = arith.mulf %209, %212 : vector<2x16x128xf32>
    %214 = arith.addf %206, %213 : vector<2x16x128xf32>
    %c0_148 = arith.constant 0 : index
    %c2_149 = arith.constant 2 : index
    %c2_150 = arith.constant 2 : index
    %c1_151 = arith.constant 1 : index
    %215 = vector.load %arg8[%c0_148, %c2_149, %c2_150, %c1_151] : memref<2x3x18x18xf32, #tpu.memory_space<vmem>>, vector<2x1x16x16xf32>
    %216 = vector.shape_cast %215 : vector<2x1x16x16xf32> to vector<2x16x16xf32>
    %217 = tpu.concatenate %216, %216, %216, %216, %216, %216, %216, %216 in 2 : vector<2x16x16xf32>, vector<2x16x16xf32>, vector<2x16x16xf32>, vector<2x16x16xf32>, vector<2x16x16xf32>, vector<2x16x16xf32>, vector<2x16x16xf32>, vector<2x16x16xf32> -> vector<2x16x128xf32>
    %c25 = arith.constant 25 : index
    %c0_152 = arith.constant 0 : index
    %218 = vector.load %arg2[%c25, %c0_152] : memref<27x128xf32, #tpu.memory_space<vmem>>, vector<1x128xf32>
    %219 = vector.shape_cast %218 : vector<1x128xf32> to vector<1x1x128xf32>
    %220 = vector.broadcast %219 : vector<1x1x128xf32> to vector<2x16x128xf32>
    %221 = arith.mulf %217, %220 : vector<2x16x128xf32>
    %222 = arith.addf %214, %221 : vector<2x16x128xf32>
    %c0_153 = arith.constant 0 : index
    %c2_154 = arith.constant 2 : index
    %c2_155 = arith.constant 2 : index
    %c2_156 = arith.constant 2 : index
    %223 = vector.load %arg8[%c0_153, %c2_154, %c2_155, %c2_156] : memref<2x3x18x18xf32, #tpu.memory_space<vmem>>, vector<2x1x16x16xf32>
    %224 = vector.shape_cast %223 : vector<2x1x16x16xf32> to vector<2x16x16xf32>
    %225 = tpu.concatenate %224, %224, %224, %224, %224, %224, %224, %224 in 2 : vector<2x16x16xf32>, vector<2x16x16xf32>, vector<2x16x16xf32>, vector<2x16x16xf32>, vector<2x16x16xf32>, vector<2x16x16xf32>, vector<2x16x16xf32>, vector<2x16x16xf32> -> vector<2x16x128xf32>
    %c26 = arith.constant 26 : index
    %c0_157 = arith.constant 0 : index
    %226 = vector.load %arg2[%c26, %c0_157] : memref<27x128xf32, #tpu.memory_space<vmem>>, vector<1x128xf32>
    %227 = vector.shape_cast %226 : vector<1x128xf32> to vector<1x1x128xf32>
    %228 = vector.broadcast %227 : vector<1x1x128xf32> to vector<2x16x128xf32>
    %229 = arith.mulf %225, %228 : vector<2x16x128xf32>
    %230 = arith.addf %222, %229 : vector<2x16x128xf32>
    %c0_158 = arith.constant 0 : index
    %c0_159 = arith.constant 0 : index
    %231 = vector.load %arg3[%c0_158, %c0_159] : memref<1x128xf32, #tpu.memory_space<vmem>>, vector<1x128xf32>
    %232 = vector.shape_cast %231 : vector<1x128xf32> to vector<1x1x128xf32>
    %233 = vector.broadcast %232 : vector<1x1x128xf32> to vector<2x16x128xf32>
    %234 = arith.addf %230, %233 : vector<2x16x128xf32>
    %cst_160 = arith.constant 0.000000e+00 : f32
    %235 = vector.broadcast %cst_160 : f32 to vector<2x16x128xf32>
    %236 = arith.maximumf %234, %235 : vector<2x16x128xf32>
    %cst_161 = arith.constant dense<0.000000e+00> : vector<2x128xf32>
    %237 = vector.multi_reduction <add>, %236, %cst_161 [1] : vector<2x16x128xf32> to vector<2x128xf32>
    %c0_162 = arith.constant 0 : index
    %c0_163 = arith.constant 0 : index
    %238 = vector.load %arg4[%c0_162, %c0_163] : memref<128x128xf32, #tpu.memory_space<vmem>>, vector<128x128xf32>
    %cst_164 = arith.constant dense<0.000000e+00> : vector<2x128xf32>
    %239 = tpu.matmul %237, %238, %cst_164 {dimension_numbers = #tpu.dot_dimension_numbers<[1], [0], [0], [1], [0, 0, 1, 1], [], []>} : vector<2x128xf32>, vector<128x128xf32>, vector<2x128xf32> -> vector<2x128xf32>
    %c0_165 = arith.constant 0 : index
    %c0_166 = arith.constant 0 : index
    %240 = vector.load %arg5[%c0_165, %c0_166] : memref<1x128xf32, #tpu.memory_space<vmem>>, vector<1x128xf32>
    %241 = vector.broadcast %240 : vector<1x128xf32> to vector<2x128xf32>
    %242 = arith.addf %239, %241 : vector<2x128xf32>
    %243 = tpu.iota {dimensions = array<i32: 1>} : vector<2x128xi32>
    %c10_i32 = arith.constant 10 : i32
    %244 = vector.broadcast %c10_i32 : i32 to vector<2x128xi32>
    %245 = arith.cmpi slt, %243, %244 : vector<2x128xi32>
    %cst_167 = arith.constant -3.000000e+38 : f32
    %246 = vector.broadcast %cst_167 : f32 to vector<2x128xf32>
    %247 = arith.select %245, %242, %246 : vector<2x128xi1>, vector<2x128xf32>
    %cst_168 = arith.constant dense<0xFF800000> : vector<2xf32>
    %248 = vector.multi_reduction <maximumf>, %247, %cst_168 [1] : vector<2x128xf32> to vector<2xf32>
    %249 = vector.shape_cast %248 : vector<2xf32> to vector<2x1xf32>
    %250 = vector.broadcast %249 : vector<2x1xf32> to vector<2x128xf32>
    %251 = arith.cmpf oeq, %247, %250 : vector<2x128xf32>
    %c2147483647_i32 = arith.constant 2147483647 : i32
    %252 = vector.broadcast %c2147483647_i32 : i32 to vector<2x128xi32>
    %253 = arith.select %251, %243, %252 : vector<2x128xi1>, vector<2x128xi32>
    %cst_169 = arith.constant dense<2147483647> : vector<2xi32>
    %254 = vector.multi_reduction <minsi>, %253, %cst_169 [1] : vector<2x128xi32> to vector<2xi32>
    %255 = vector.shape_cast %254 : vector<2xi32> to vector<2x1xi32>
    %c0_170 = arith.constant 0 : index
    %c0_171 = arith.constant 0 : index
    %256 = vector.load %arg6[%c0_170, %c0_171] : memref<2x1xi32, #tpu.memory_space<vmem>>, vector<2x1xi32>
    %257 = arith.cmpi eq, %255, %256 : vector<2x1xi32>
    %258 = arith.extui %257 : vector<2x1xi1> to vector<2x1xi32>
    %259 = arith.sitofp %258 : vector<2x1xi32> to vector<2x1xf32>
    %cst_172 = arith.constant 0.000000e+00 : f32
    %260 = vector.broadcast %cst_172 : f32 to vector<2x128xf32>
    %261 = arith.select %245, %242, %260 : vector<2x128xi1>, vector<2x128xf32>
    %c10_i32_173 = arith.constant 10 : i32
    %262 = vector.broadcast %c10_i32_173 : i32 to vector<2x128xi32>
    %263 = arith.cmpi eq, %243, %262 : vector<2x128xi32>
    %264 = vector.shape_cast %259 : vector<2x1xf32> to vector<2x1xf32>
    %265 = vector.broadcast %264 : vector<2x1xf32> to vector<2x128xf32>
    %266 = arith.select %263, %265, %261 : vector<2x128xi1>, vector<2x128xf32>
    %c0_174 = arith.constant 0 : index
    %c0_175 = arith.constant 0 : index
    %267 = vector.load %arg7[%c0_174, %c0_175] : memref<2x128xf32, #tpu.memory_space<vmem>>, vector<2x128xf32>
    tpu.vector_store %arg7[%c0_174, %c0_175], %266 {strides = array<i32>} : memref<2x128xf32, #tpu.memory_space<vmem>>, vector<2x128xf32>,
    return
  }
  func.func @transform_0(%arg0: i32) -> (i32, i32, i32, i32) {
    %c0_i32 = arith.constant 0 : i32
    %c0_i32_0 = arith.constant 0 : i32
    %c0_i32_1 = arith.constant 0 : i32
    %c0_i32_2 = arith.constant 0 : i32
    %c0_i32_3 = arith.constant 0 : i32
    return %c0_i32, %c0_i32_0, %c0_i32_1, %c0_i32_2 : i32, i32, i32, i32
  }
  func.func @transform_1(%arg0: i32) -> (i32, i32) {
    %c0_i32 = arith.constant 0 : i32
    %c0_i32_0 = arith.constant 0 : i32
    %c0_i32_1 = arith.constant 0 : i32
    return %c0_i32, %c0_i32_0 : i32, i32
  }
  func.func @transform_2(%arg0: i32) -> (i32, i32) {
    %c0_i32 = arith.constant 0 : i32
    %c0_i32_0 = arith.constant 0 : i32
    %c0_i32_1 = arith.constant 0 : i32
    return %c0_i32, %c0_i32_0 : i32, i32
  }
  func.func @transform_3(%arg0: i32) -> (i32, i32) {
    %c0_i32 = arith.constant 0 : i32
    %c0_i32_0 = arith.constant 0 : i32
    %c0_i32_1 = arith.constant 0 : i32
    return %c0_i32, %c0_i32_0 : i32, i32
  }
  func.func @transform_4(%arg0: i32) -> (i32, i32) {
    %c0_i32 = arith.constant 0 : i32
    %c0_i32_0 = arith.constant 0 : i32
    %c0_i32_1 = arith.constant 0 : i32
    return %c0_i32, %c0_i32_0 : i32, i32
  }
  func.func @transform_5(%arg0: i32) -> (i32, i32) {
    %c0_i32 = arith.constant 0 : i32
    %c0_i32_0 = arith.constant 0 : i32
    %c0_i32_1 = arith.constant 0 : i32
    return %c0_i32, %c0_i32_0 : i32, i32
  }
  func.func @transform_6(%arg0: i32) -> (i32, i32) {
    %c0_i32 = arith.constant 0 : i32
    %c0_i32_0 = arith.constant 0 : i32
    %c0_i32_1 = arith.constant 0 : i32
    return %c0_i32, %c0_i32_0 : i32, i32
  }
}

</mosaic_0001>

<bundles_post_ra>
// kernel: tpu_custom_call.1
= control target key start
LH: loop header
LB: loop body
LE: loop exit
PB: predicated region body
PF: predicated region fallthrough
CT: control target
= control target key end

     0   :  { %vm24_vm0 = vcmask 146432   ;;  %s4143_s25 = smov 127   ;;  %v4144_v4 = vmov 0.456   ;;  %v4145_v5 = vmov 0.485   ;;  %s9463_s0 = inlined_call_operand.vmem [shape: f32[2,3,20,20], index: 0, kind: input, shape index: {}]   ;;  %s9464_s1 = inlined_call_operand.vmem [shape: f32[27,128], index: 1, kind: input, shape index: {}]   ;;  %s9465_s2 = inlined_call_operand.vmem [shape: f32[1,128], index: 2, kind: input, shape index: {}]   ;;  %s9466_s3 = inlined_call_operand.vmem [shape: f32[128,128], index: 3, kind: input, shape index: {}]   ;;  %s9467_s4 = inlined_call_operand.vmem [shape: f32[1,128], index: 4, kind: input, shape index: {}]   ;;  %s9468_s5 = inlined_call_operand.vmem [shape: s32[2,1], index: 5, kind: input, shape index: {}]   ;;  %s9469_s6 = inlined_call_operand.hbm [shape: f32[2,128], index: 6, kind: output, shape index: {}]  }
   0x1   :  { %v48_v0 = vld [vmem:[%s9463_s0 + $0x1a] sm:$0xff]  ;;  %v46_v1 = vld [vmem:[%s9463_s0 + $0x2] sm:$0xff]  ;;  %v47_v3 = vld [vmem:[%s9463_s0 + $0xa] sm:$0xff]  ;;  %33 = vst.msk [vmem:[#allocation2 + $0x18] sm:$0xff] %vm24_vm0, %v4144_v4  ;;  %vm27_vm1 = vcmask 140288  }
   0x2   :  { %74 = vrot.lane.b32.xlu1 %v48_v0, %s4143_s25  ;;  %70 = vrot.lane.b32.xlu0 %v46_v1, %s4143_s25  ;;  %v49_v2 = vld [vmem:[%s9463_s0 + $0x22] sm:$0xff]  ;;  %34 = vst.msk [vmem:[#allocation2 + $0x20] sm:$0xff] %vm24_vm0, %v4144_v4  ;;  %36 = vst.msk [vmem:[#allocation2 + $0x60] sm:$0xff] %vm24_vm0, %v4144_v4  ;;  %v4146_v6 = vmov 0.406  }
   0x3   :  { %37 = vst.msk [vmem:[#allocation2 + $0x68] sm:$0xff] %vm24_vm0, %v4144_v4  ;;  %25 = vst.msk [vmem:[#allocation2] sm:$0xff] %vm24_vm0, %v4145_v5 }
   0x4   :  { %26 = vst.msk [vmem:[#allocation2 + $0x8] sm:$0xff] %vm24_vm0, %v4145_v5  ;;  %29 = vst.msk [vmem:[#allocation2 + $0x48] sm:$0xff] %vm24_vm0, %v4145_v5 }
   0x5   :  { %30 = vst.msk [vmem:[#allocation2 + $0x50] sm:$0xff] %vm24_vm0, %v4145_v5  ;;  %41 = vst.msk [vmem:[#allocation2 + $0x38] sm:$0xff] %vm24_vm0, %v4146_v6 }
   0x6   :  { %35 = vst.msk [vmem:[#allocation2 + $0x28] sm:$0x3] %vm27_vm1, %v4144_v4  ;;  %28 = vst.msk [vmem:[#allocation2 + $0x10] sm:$0x3] %vm27_vm1, %v4145_v5 }
   0x7   :  { %31 = vst.msk [vmem:[#allocation2 + $0x58] sm:$0x3] %vm27_vm1, %v4145_v5  ;;  %38 = vst.msk [vmem:[#allocation2 + $0x70] sm:$0x3] %vm27_vm1, %v4144_v4 }
   0x8   :  { %42 = vst.msk [vmem:[#allocation2 + $0x40] sm:$0x3] %vm27_vm1, %v4146_v6  ;;  %45 = vst.msk [vmem:[#allocation2 + $0x88] sm:$0x3] %vm27_vm1, %v4146_v6 }
   0x9   :  { %40 = vst.msk [vmem:[#allocation2 + $0x30] sm:$0xff] %vm24_vm0, %v4146_v6  ;;  %43 = vst.msk [vmem:[#allocation2 + $0x78] sm:$0xff] %vm24_vm0, %v4146_v6 }
   0xa   :  { %44 = vst.msk [vmem:[#allocation2 + $0x80] sm:$0xff] %vm24_vm0, %v4146_v6 }
   0xb   :  { %11 = vsyncpa [#allocation4], 0  ;;  %76 = vrot.lane.b32.xlu1 %v49_v2, %s4143_s25  ;;  %72 = vrot.lane.b32.xlu0 %v47_v3, %s4143_s25  ;;  %v51_v7 = vld [vmem:[%s9463_s0 + $0x3a] sm:$0xff]  ;;  %v50_v8 = vld [vmem:[%s9463_s0 + $0x32] sm:$0xff]  ;;  %vm106_vm2 = vcmask 138248   ;;  %s4148_s22 = smov 32  }
   0xc   :  { %v53_v9 = vld [vmem:[%s9463_s0 + $0x52] sm:$0xff]  ;;  %v52_v10 = vld [vmem:[%s9463_s0 + $0x4a] sm:$0xff]  ;;  %v54_v11 = vld [vmem:[%s9463_s0 + $0x62] sm:$0xff]  ;;  %s4149_s23 = smov 48   ;;  %s4150_s24 = smov 64   ;;  %vm211_vm3 = vcmask 130048  }
   0xd   :  { %v55_v12 = vld [vmem:[%s9463_s0 + $0x6a] sm:$0xff]  ;;  %v56_v13 = vld [vmem:[%s9463_s0 + $0x7a] sm:$0xff]  ;;  %v57_v14 = vld [vmem:[%s9463_s0 + $0x82] sm:$0xff]  ;;  %s4147_s0 = smov 16   ;;  %s4151_s26 = smov 80   ;;  %vm216_vm4 = vcmask 261120  }
   0xe   :  { %s4152_s27 = smov 96   ;;  %s4153_s28 = smov 112   ;;  %vm221_vm5 = vcmask 392192   ;;  %vm226_vm6 = vcmask 523264   ;;  %vm231_vm7 = vcmask 654336   ;;  %vm236_vm8 = vcmask 785408  }
   0xf   :  { %80 = vrot.lane.b32.xlu1 %v51_v7, %s4143_s25  ;;  %78 = vrot.lane.b32.xlu0 %v50_v8, %s4143_s25  ;;  %s4154_s29 = smov 15   ;;  %s4155_s30 = smov 31   ;;  %vm241_vm9 = vcmask 916480   ;;  %vm4170_vm10 = vmmov 0   ;;  %vm3843_vm11 = vcmask 1041409   ;;  %vm3920_vm13 = vcmask 1041408  }
  0x10   :  { %s4156_s7 = smov 47   ;;  %s4157_s8 = smov 63  }
  0x11   :  { %s4158_s9 = smov 79   ;;  %s4159_s10 = smov 95  }
  0x12   :  { %s4160_s11 = smov 111   ;;  %s4161_s12 = smov 126  }
  0x13   :  { %84 = vrot.lane.b32.xlu1 %v53_v9, %s4143_s25  ;;  %82 = vrot.lane.b32.xlu0 %v52_v10, %s4143_s25  ;;  %s4162_s13 = smov 14   ;;  %s4163_s14 = smov 30  }
  0x14   :  { %s4164_s15 = smov 46   ;;  %s4165_s16 = smov 62  }
  0x15   :  { %s4166_s17 = smov 78   ;;  %s4167_s18 = smov 94  }
  0x16   :  { %s4168_s19 = smov 110  }
  0x17   :  { %86 = vrot.lane.b32.xlu0 %v54_v11, %s4143_s25  ;;  %88 = vrot.lane.b32.xlu1 %v55_v12, %s4143_s25 }
  0x1b   :  { %90 = vrot.lane.b32.xlu0 %v56_v13, %s4143_s25  ;;  %92 = vrot.lane.b32.xlu1 %v57_v14, %s4143_s25 }
  0x74   :  { %v75_v15 = vpop.permute.xlu1 %74  ;;  %v71_v16 = vpop.permute.xlu0 %70 }
  0x75   :  { %109 = vst.msk [vmem:[#allocation2 + $0x19] sm:$0xff] %vm106_vm2, %v75_v15  ;;  %107 = vst.msk [vmem:[#allocation2 + $0x1] sm:$0xff] %vm106_vm2, %v71_v16 }
  0x7c   :  { %v4272_v19 = vld [vmem:[#allocation2] sm:$0xff] }
  0x7d   :  { %v77_v17 = vpop.permute.xlu1 %76  ;;  %v73_v18 = vpop.permute.xlu0 %72  ;;  %127 = vrot.lane.b32.xlu0 %v4272_v19, %s4147_s0  ;;  %v4542_v2 = vld [vmem:[#allocation2 + $0x1] sm:$0xff] }
  0x7e   :  { %110 = vst.msk [vmem:[#allocation2 + $0x21] sm:$0xff] %vm106_vm2, %v77_v17  ;;  %108 = vst.msk [vmem:[#allocation2 + $0x9] sm:$0xff] %vm106_vm2, %v73_v18 }
  0x81   :  { %v81_v20 = vpop.permute.xlu1 %80  ;;  %v79_v21 = vpop.permute.xlu0 %78 }
  0x82   :  { %112 = vst.msk [vmem:[#allocation2 + $0x39] sm:$0xff] %vm106_vm2, %v81_v20  ;;  %111 = vst.msk [vmem:[#allocation2 + $0x31] sm:$0xff] %vm106_vm2, %v79_v21 }
  0x85   :  { %v85_v22 = vpop.permute.xlu1 %84  ;;  %v83_v23 = vpop.permute.xlu0 %82  ;;  %v4278_v24 = vld [vmem:[#allocation2 + $0x8] sm:$0xff] }
  0x86   :  { %114 = vst.msk [vmem:[#allocation2 + $0x51] sm:$0xff] %vm106_vm2, %v85_v22  ;;  %113 = vst.msk [vmem:[#allocation2 + $0x49] sm:$0xff] %vm106_vm2, %v83_v23  ;;  %129 = vrot.lane.b32.xlu1 %v4278_v24, %s4147_s0  ;;  %v4546_v4 = vld [vmem:[#allocation2 + $0x9] sm:$0xff] }
  0x89   :  { %v87_v25 = vpop.permute.xlu0 %86  ;;  %v89_v26 = vpop.permute.xlu1 %88 }
  0x8a   :  { %115 = vst.msk [vmem:[#allocation2 + $0x61] sm:$0xff] %vm106_vm2, %v87_v25  ;;  %116 = vst.msk [vmem:[#allocation2 + $0x69] sm:$0xff] %vm106_vm2, %v89_v26 }
  0x8d   :  { %v4286_v27 = vld [vmem:[#allocation2 + $0x48] sm:$0xff]  ;;  %v91_v28 = vpop.permute.xlu0 %90  ;;  %v93_v29 = vpop.permute.xlu1 %92  ;;  %v4288_v30 = vld [vmem:[#allocation2 + $0x50] sm:$0xff] }
  0x8e   :  { %131 = vrot.lane.b32.xlu0 %v4286_v27, %s4147_s0  ;;  %117 = vst.msk [vmem:[#allocation2 + $0x79] sm:$0xff] %vm106_vm2, %v91_v28  ;;  %118 = vst.msk [vmem:[#allocation2 + $0x81] sm:$0xff] %vm106_vm2, %v93_v29  ;;  %133 = vrot.lane.b32.xlu1 %v4288_v30, %s4147_s0  ;;  %v4554_v6 = vld [vmem:[#allocation2 + $0x49] sm:$0xff]  ;;  %v4558_v8 = vld [vmem:[#allocation2 + $0x51] sm:$0xff] }
  0x92   :  { %139 = vrot.lane.b32.xlu0 %v4272_v19, %s4148_s22  ;;  %141 = vrot.lane.b32.xlu1 %v4278_v24, %s4148_s22 }
  0x96   :  { %143 = vrot.lane.b32.xlu0 %v4286_v27, %s4148_s22  ;;  %145 = vrot.lane.b32.xlu1 %v4288_v30, %s4148_s22 }
  0x9a   :  { %151 = vrot.lane.b32.xlu0 %v4272_v19, %s4149_s23  ;;  %153 = vrot.lane.b32.xlu1 %v4278_v24, %s4149_s23 }
  0x9e   :  { %155 = vrot.lane.b32.xlu0 %v4286_v27, %s4149_s23  ;;  %157 = vrot.lane.b32.xlu1 %v4288_v30, %s4149_s23 }
  0xa2   :  { %163 = vrot.lane.b32.xlu0 %v4272_v19, %s4150_s24  ;;  %165 = vrot.lane.b32.xlu1 %v4278_v24, %s4150_s24 }
  0xa6   :  { %167 = vrot.lane.b32.xlu0 %v4286_v27, %s4150_s24  ;;  %169 = vrot.lane.b32.xlu1 %v4288_v30, %s4150_s24 }
  0xaa   :  { %175 = vrot.lane.b32.xlu0 %v4272_v19, %s4151_s26  ;;  %177 = vrot.lane.b32.xlu1 %v4278_v24, %s4151_s26 }
  0xae   :  { %179 = vrot.lane.b32.xlu0 %v4286_v27, %s4151_s26  ;;  %181 = vrot.lane.b32.xlu1 %v4288_v30, %s4151_s26 }
  0xb2   :  { %187 = vrot.lane.b32.xlu0 %v4272_v19, %s4152_s27  ;;  %189 = vrot.lane.b32.xlu1 %v4278_v24, %s4152_s27 }
  0xb6   :  { %191 = vrot.lane.b32.xlu0 %v4286_v27, %s4152_s27  ;;  %193 = vrot.lane.b32.xlu1 %v4288_v30, %s4152_s27 }
  0xba   :  { %199 = vrot.lane.b32.xlu0 %v4272_v19, %s4153_s28  ;;  %201 = vrot.lane.b32.xlu1 %v4278_v24, %s4153_s28 }
  0xbe   :  { %203 = vrot.lane.b32.xlu0 %v4286_v27, %s4153_s28  ;;  %205 = vrot.lane.b32.xlu1 %v4288_v30, %s4153_s28 }
  0xc2   :  { %259 = vrot.lane.b32.xlu0 %v4272_v19, %s4143_s25  ;;  %261 = vrot.lane.b32.xlu1 %v4278_v24, %s4143_s25 }
  0xc6   :  { %263 = vrot.lane.b32.xlu0 %v4286_v27, %s4143_s25  ;;  %265 = vrot.lane.b32.xlu1 %v4288_v30, %s4143_s25 }
  0xca   :  { %271 = vrot.lane.b32.xlu0 %v4272_v19, %s4154_s29  ;;  %273 = vrot.lane.b32.xlu1 %v4278_v24, %s4154_s29 }
  0xce   :  { %275 = vrot.lane.b32.xlu0 %v4286_v27, %s4154_s29  ;;  %277 = vrot.lane.b32.xlu1 %v4288_v30, %s4154_s29 }
  0xd2   :  { %283 = vrot.lane.b32.xlu0 %v4272_v19, %s4155_s30  ;;  %285 = vrot.lane.b32.xlu1 %v4278_v24, %s4155_s30 }
  0xd6   :  { %287 = vrot.lane.b32.xlu0 %v4286_v27, %s4155_s30  ;;  %289 = vrot.lane.b32.xlu1 %v4288_v30, %s4155_s30 }
  0xda   :  { %295 = vrot.lane.b32.xlu0 %v4272_v19, %s4156_s7  ;;  %297 = vrot.lane.b32.xlu1 %v4278_v24, %s4156_s7 }
  0xde   :  { %299 = vrot.lane.b32.xlu0 %v4286_v27, %s4156_s7  ;;  %301 = vrot.lane.b32.xlu1 %v4288_v30, %s4156_s7 }
  0xe2   :  { %307 = vrot.lane.b32.xlu0 %v4272_v19, %s4157_s8  ;;  %309 = vrot.lane.b32.xlu1 %v4278_v24, %s4157_s8 }
  0xe6   :  { %311 = vrot.lane.b32.xlu0 %v4286_v27, %s4157_s8  ;;  %313 = vrot.lane.b32.xlu1 %v4288_v30, %s4157_s8 }
  0xea   :  { %319 = vrot.lane.b32.xlu0 %v4272_v19, %s4158_s9  ;;  %321 = vrot.lane.b32.xlu1 %v4278_v24, %s4158_s9 }
  0xee   :  { %323 = vrot.lane.b32.xlu0 %v4286_v27, %s4158_s9  ;;  %325 = vrot.lane.b32.xlu1 %v4288_v30, %s4158_s9 }
  0xef   :  { %v4404_v31 = vpop.permute.xlu0 %127 }
  0xf2   :  { %331 = vrot.lane.b32.xlu0 %v4272_v19, %s4159_s10  ;;  %333 = vrot.lane.b32.xlu1 %v4278_v24, %s4159_s10 }
  0xf6   :  { %335 = vrot.lane.b32.xlu0 %v4286_v27, %s4159_s10  ;;  %337 = vrot.lane.b32.xlu1 %v4288_v30, %s4159_s10 }
  0xf8   :  { %v4406_v32 = vpop.permute.xlu1 %129 }
  0xfa   :  { %343 = vrot.lane.b32.xlu0 %v4272_v19, %s4160_s11  ;;  %345 = vrot.lane.b32.xlu1 %v4278_v24, %s4160_s11 }
  0xfe   :  { %347 = vrot.lane.b32.xlu0 %v4286_v27, %s4160_s11  ;;  %349 = vrot.lane.b32.xlu1 %v4288_v30, %s4160_s11 }
 0x100   :  { %v4412_v33 = vpop.permute.xlu0 %131  ;;  %v4414_v34 = vpop.permute.xlu1 %133 }
 0x102   :  { %396 = vrot.lane.b32.xlu0 %v4272_v19, %s4161_s12  ;;  %398 = vrot.lane.b32.xlu1 %v4278_v24, %s4161_s12 }
 0x104   :  { %v4420_v35 = vpop.permute.xlu0 %139  ;;  %v4422_v36 = vpop.permute.xlu1 %141 }
 0x106   :  { %400 = vrot.lane.b32.xlu0 %v4286_v27, %s4161_s12  ;;  %402 = vrot.lane.b32.xlu1 %v4288_v30, %s4161_s12 }
 0x108   :  { %v4428_v37 = vpop.permute.xlu0 %143  ;;  %v4430_v38 = vpop.permute.xlu1 %145 }
 0x10a   :  { %408 = vrot.lane.b32.xlu0 %v4272_v19, %s4162_s13  ;;  %410 = vrot.lane.b32.xlu1 %v4278_v24, %s4162_s13 }
 0x10c   :  { %v4436_v39 = vpop.permute.xlu0 %151  ;;  %v4438_v40 = vpop.permute.xlu1 %153 }
 0x10e   :  { %412 = vrot.lane.b32.xlu0 %v4286_v27, %s4162_s13  ;;  %414 = vrot.lane.b32.xlu1 %v4288_v30, %s4162_s13 }
 0x110   :  { %v4444_v41 = vpop.permute.xlu0 %155  ;;  %v4446_v42 = vpop.permute.xlu1 %157 }
 0x112   :  { %420 = vrot.lane.b32.xlu0 %v4272_v19, %s4163_s14  ;;  %422 = vrot.lane.b32.xlu1 %v4278_v24, %s4163_s14 }
 0x114   :  { %v4452_v43 = vpop.permute.xlu0 %163  ;;  %v4454_v44 = vpop.permute.xlu1 %165 }
 0x116   :  { %424 = vrot.lane.b32.xlu0 %v4286_v27, %s4163_s14  ;;  %426 = vrot.lane.b32.xlu1 %v4288_v30, %s4163_s14 }
 0x118   :  { %v4460_v45 = vpop.permute.xlu0 %167  ;;  %v4462_v46 = vpop.permute.xlu1 %169 }
 0x11a   :  { %432 = vrot.lane.b32.xlu0 %v4272_v19, %s4164_s15  ;;  %434 = vrot.lane.b32.xlu1 %v4278_v24, %s4164_s15 }
 0x11c   :  { %v4468_v47 = vpop.permute.xlu0 %175  ;;  %v4470_v48 = vpop.permute.xlu1 %177 }
 0x11e   :  { %436 = vrot.lane.b32.xlu0 %v4286_v27, %s4164_s15  ;;  %438 = vrot.lane.b32.xlu1 %v4288_v30, %s4164_s15 }
 0x120   :  { %v4476_v49 = vpop.permute.xlu0 %179  ;;  %v4478_v50 = vpop.permute.xlu1 %181 }
 0x122   :  { %444 = vrot.lane.b32.xlu0 %v4272_v19, %s4165_s16  ;;  %446 = vrot.lane.b32.xlu1 %v4278_v24, %s4165_s16 }
 0x124   :  { %v4484_v51 = vpop.permute.xlu0 %187  ;;  %v4486_v52 = vpop.permute.xlu1 %189 }
 0x126   :  { %448 = vrot.lane.b32.xlu0 %v4286_v27, %s4165_s16  ;;  %450 = vrot.lane.b32.xlu1 %v4288_v30, %s4165_s16 }
 0x128   :  { %v4492_v53 = vpop.permute.xlu0 %191  ;;  %v4494_v54 = vpop.permute.xlu1 %193 }
 0x12a   :  { %456 = vrot.lane.b32.xlu0 %v4272_v19, %s4166_s17  ;;  %458 = vrot.lane.b32.xlu1 %v4278_v24, %s4166_s17 }
 0x12c   :  { %v4500_v55 = vpop.permute.xlu0 %199  ;;  %v4502_v56 = vpop.permute.xlu1 %201 }
 0x12e   :  { %460 = vrot.lane.b32.xlu0 %v4286_v27, %s4166_s17  ;;  %462 = vrot.lane.b32.xlu1 %v4288_v30, %s4166_s17 }
 0x130   :  { %v4508_v57 = vpop.permute.xlu0 %203  ;;  %v4510_v58 = vpop.permute.xlu1 %205 }
 0x131   :  { %9472 = vst [vmem:[#allocation6_spill] sm:$0xff] %v4508_v57  ;;  %9473 = vst [vmem:[#allocation7_spill] sm:$0xff] %v4510_v58  ;;  %v6718_v58 = vld [vmem:[#allocation2 + $0x81] sm:$0xff] }
 0x132   :  { %468 = vrot.lane.b32.xlu0 %v4272_v19, %s4167_s18  ;;  %470 = vrot.lane.b32.xlu1 %v4278_v24, %s4167_s18 }
 0x134   :  { %v4516_v59 = vpop.permute.xlu0 %259  ;;  %v4518_v60 = vpop.permute.xlu1 %261 }
 0x136   :  { %472 = vrot.lane.b32.xlu0 %v4286_v27, %s4167_s18  ;;  %474 = vrot.lane.b32.xlu1 %v4288_v30, %s4167_s18 }
 0x138   :  { %v4524_v61 = vpop.permute.xlu0 %263  ;;  %v4526_v62 = vpop.permute.xlu1 %265 }
 0x13a   :  { %480 = vrot.lane.b32.xlu0 %v4272_v19, %s4168_s19  ;;  %482 = vrot.lane.b32.xlu1 %v4278_v24, %s4168_s19 }
 0x13c   :  { %v4532_v63 = vpop.permute.xlu0 %271  ;;  %v4534_v0 = vpop.permute.xlu1 %273 }
 0x13e   :  { %484 = vrot.lane.b32.xlu0 %v4286_v27, %s4168_s19  ;;  %486 = vrot.lane.b32.xlu1 %v4288_v30, %s4168_s19 }
 0x140   :  { %v4540_v1 = vpop.permute.xlu0 %275  ;;  %v4544_v3 = vpop.permute.xlu1 %277 }
 0x142   :  { %541 = vrot.lane.b32.xlu0 %v4542_v2, %s4147_s0  ;;  %543 = vrot.lane.b32.xlu1 %v4546_v4, %s4147_s0 }
 0x144   :  { %v4552_v5 = vpop.permute.xlu0 %283  ;;  %v4556_v7 = vpop.permute.xlu1 %285 }
 0x146   :  { %545 = vrot.lane.b32.xlu0 %v4554_v6, %s4147_s0  ;;  %547 = vrot.lane.b32.xlu1 %v4558_v8, %s4147_s0 }
 0x148   :  { %v4564_v9 = vpop.permute.xlu0 %287  ;;  %v4566_v10 = vpop.permute.xlu1 %289 }
 0x14a   :  { %553 = vrot.lane.b32.xlu0 %v4542_v2, %s4148_s22  ;;  %555 = vrot.lane.b32.xlu1 %v4546_v4, %s4148_s22 }
 0x14c   :  { %v4572_v11 = vpop.permute.xlu0 %295  ;;  %v4574_v12 = vpop.permute.xlu1 %297 }
 0x14e   :  { %557 = vrot.lane.b32.xlu0 %v4554_v6, %s4148_s22  ;;  %559 = vrot.lane.b32.xlu1 %v4558_v8, %s4148_s22 }
 0x150   :  { %v4580_v13 = vpop.permute.xlu0 %299  ;;  %v4582_v14 = vpop.permute.xlu1 %301 }
 0x152   :  { %565 = vrot.lane.b32.xlu0 %v4542_v2, %s4149_s23  ;;  %567 = vrot.lane.b32.xlu1 %v4546_v4, %s4149_s23 }
 0x154   :  { %v4588_v15 = vpop.permute.xlu0 %307  ;;  %v4590_v16 = vpop.permute.xlu1 %309 }
 0x156   :  { %569 = vrot.lane.b32.xlu0 %v4554_v6, %s4149_s23  ;;  %571 = vrot.lane.b32.xlu1 %v4558_v8, %s4149_s23 }
 0x158   :  { %v4596_v17 = vpop.permute.xlu0 %311  ;;  %v4598_v18 = vpop.permute.xlu1 %313 }
 0x159   :  { %9474 = vst [vmem:[#allocation8_spill] sm:$0xff] %v4596_v17  ;;  %9475 = vst [vmem:[#allocation9_spill] sm:$0xff] %v4598_v18  ;;  %v4083_v18 = vld [vmem:[#allocation2 + $0x50] sm:$0xff] }
 0x15a   :  { %577 = vrot.lane.b32.xlu0 %v4542_v2, %s4150_s24  ;;  %579 = vrot.lane.b32.xlu1 %v4546_v4, %s4150_s24 }
 0x15c   :  { %v4604_v19 = vpop.permute.xlu0 %319  ;;  %v4606_v20 = vpop.permute.xlu1 %321 }
 0x15e   :  { %581 = vrot.lane.b32.xlu0 %v4554_v6, %s4150_s24  ;;  %583 = vrot.lane.b32.xlu1 %v4558_v8, %s4150_s24 }
 0x160   :  { %v4612_v21 = vpop.permute.xlu0 %323  ;;  %v4614_v22 = vpop.permute.xlu1 %325 }
 0x161   :  { %9476 = vst [vmem:[#allocation10_spill] sm:$0xff] %v4612_v21  ;;  %9477 = vst [vmem:[#allocation11_spill] sm:$0xff] %v4614_v22  ;;  %v6706_v22 = vld [vmem:[#allocation2 + $0x39] sm:$0xff] }
 0x162   :  { %589 = vrot.lane.b32.xlu0 %v4542_v2, %s4151_s26  ;;  %591 = vrot.lane.b32.xlu1 %v4546_v4, %s4151_s26  ;;  %9989 = vst [vmem:[#allocation523_spill] sm:$0xff] %v6706_v22 }
 0x164   :  { %v4620_v23 = vpop.permute.xlu0 %331  ;;  %v4622_v24 = vpop.permute.xlu1 %333 }
 0x166   :  { %593 = vrot.lane.b32.xlu0 %v4554_v6, %s4151_s26  ;;  %595 = vrot.lane.b32.xlu1 %v4558_v8, %s4151_s26 }
 0x168   :  { %v4628_v25 = vpop.permute.xlu0 %335  ;;  %v4630_v26 = vpop.permute.xlu1 %337 }
 0x169   :  { %9478 = vst [vmem:[#allocation12_spill] sm:$0xff] %v4628_v25  ;;  %9479 = vst [vmem:[#allocation13_spill] sm:$0xff] %v4630_v26 }
 0x16a   :  { %601 = vrot.lane.b32.xlu0 %v4542_v2, %s4152_s27  ;;  %603 = vrot.lane.b32.xlu1 %v4546_v4, %s4152_s27 }
 0x16c   :  { %v4636_v27 = vpop.permute.xlu0 %343  ;;  %v4638_v28 = vpop.permute.xlu1 %345 }
 0x16d   :  { %9480 = vst [vmem:[#allocation14_spill] sm:$0xff] %v4636_v27  ;;  %9481 = vst [vmem:[#allocation15_spill] sm:$0xff] %v4638_v28  ;;  %v4084_v27 = vld [vmem:[#allocation2 + $0x48] sm:$0xff] }
 0x16e   :  { %605 = vrot.lane.b32.xlu0 %v4554_v6, %s4152_s27  ;;  %607 = vrot.lane.b32.xlu1 %v4558_v8, %s4152_s27 }
 0x170   :  { %v4644_v29 = vpop.permute.xlu0 %347  ;;  %v4646_v30 = vpop.permute.xlu1 %349 }
 0x171   :  { %9482 = vst [vmem:[#allocation16_spill] sm:$0xff] %v4644_v29  ;;  %9483 = vst [vmem:[#allocation17_spill] sm:$0xff] %v4646_v30 }
 0x172   :  { %613 = vrot.lane.b32.xlu0 %v4542_v2, %s4153_s28  ;;  %615 = vrot.lane.b32.xlu1 %v4546_v4, %s4153_s28 }
 0x174   :  { %v4652_v25 = vpop.permute.xlu0 %396  ;;  %v4654_v26 = vpop.permute.xlu1 %398 }
 0x175   :  { %9484 = vst [vmem:[#allocation18_spill] sm:$0xff] %v4652_v25  ;;  %9485 = vst [vmem:[#allocation19_spill] sm:$0xff] %v4654_v26 }
 0x176   :  { %617 = vrot.lane.b32.xlu0 %v4554_v6, %s4153_s28  ;;  %619 = vrot.lane.b32.xlu1 %v4558_v8, %s4153_s28 }
 0x178   :  { %v4660_v21 = vpop.permute.xlu0 %400  ;;  %v4662_v29 = vpop.permute.xlu1 %402 }
 0x179   :  { %9486 = vst [vmem:[#allocation20_spill] sm:$0xff] %v4660_v21  ;;  %9487 = vst [vmem:[#allocation21_spill] sm:$0xff] %v4662_v29 }
 0x17a   :  { %666 = vrot.lane.b32.xlu0 %v4542_v2, %s4143_s25  ;;  %668 = vrot.lane.b32.xlu1 %v4546_v4, %s4143_s25 }
 0x17c   :  { %v4668_v30 = vpop.permute.xlu0 %408  ;;  %v4670_v25 = vpop.permute.xlu1 %410 }
 0x17d   :  { %9488 = vst [vmem:[#allocation22_spill] sm:$0xff] %v4668_v30  ;;  %9489 = vst [vmem:[#allocation23_spill] sm:$0xff] %v4670_v25 }
 0x17e   :  { %670 = vrot.lane.b32.xlu0 %v4554_v6, %s4143_s25  ;;  %672 = vrot.lane.b32.xlu1 %v4558_v8, %s4143_s25 }
 0x180   :  { %v4676_v26 = vpop.permute.xlu0 %412  ;;  %v4678_v21 = vpop.permute.xlu1 %414 }
 0x181   :  { %9490 = vst [vmem:[#allocation24_spill] sm:$0xff] %v4676_v26  ;;  %9491 = vst [vmem:[#allocation25_spill] sm:$0xff] %v4678_v21 }
 0x182   :  { %678 = vrot.lane.b32.xlu0 %v4542_v2, %s4154_s29  ;;  %680 = vrot.lane.b32.xlu1 %v4546_v4, %s4154_s29 }
 0x184   :  { %v4684_v29 = vpop.permute.xlu0 %420  ;;  %v4686_v30 = vpop.permute.xlu1 %422 }
 0x185   :  { %9492 = vst [vmem:[#allocation26_spill] sm:$0xff] %v4684_v29  ;;  %9493 = vst [vmem:[#allocation27_spill] sm:$0xff] %v4686_v30 }
 0x186   :  { %682 = vrot.lane.b32.xlu0 %v4554_v6, %s4154_s29  ;;  %684 = vrot.lane.b32.xlu1 %v4558_v8, %s4154_s29 }
 0x188   :  { %v4692_v25 = vpop.permute.xlu0 %424  ;;  %v4694_v26 = vpop.permute.xlu1 %426 }
 0x189   :  { %9494 = vst [vmem:[#allocation28_spill] sm:$0xff] %v4692_v25  ;;  %9495 = vst [vmem:[#allocation29_spill] sm:$0xff] %v4694_v26 }
 0x18a   :  { %690 = vrot.lane.b32.xlu0 %v4542_v2, %s4155_s30  ;;  %692 = vrot.lane.b32.xlu1 %v4546_v4, %s4155_s30 }
 0x18c   :  { %v4700_v21 = vpop.permute.xlu0 %432  ;;  %v4702_v29 = vpop.permute.xlu1 %434 }
 0x18d   :  { %9496 = vst [vmem:[#allocation30_spill] sm:$0xff] %v4700_v21  ;;  %9497 = vst [vmem:[#allocation31_spill] sm:$0xff] %v4702_v29 }
 0x18e   :  { %694 = vrot.lane.b32.xlu0 %v4554_v6, %s4155_s30  ;;  %696 = vrot.lane.b32.xlu1 %v4558_v8, %s4155_s30 }
 0x190   :  { %v4708_v30 = vpop.permute.xlu0 %436  ;;  %v4710_v25 = vpop.permute.xlu1 %438 }
 0x191   :  { %9498 = vst [vmem:[#allocation32_spill] sm:$0xff] %v4708_v30  ;;  %9499 = vst [vmem:[#allocation33_spill] sm:$0xff] %v4710_v25 }
 0x192   :  { %702 = vrot.lane.b32.xlu0 %v4542_v2, %s4156_s7  ;;  %704 = vrot.lane.b32.xlu1 %v4546_v4, %s4156_s7 }
 0x194   :  { %v4716_v26 = vpop.permute.xlu0 %444  ;;  %v4718_v21 = vpop.permute.xlu1 %446 }
 0x195   :  { %9500 = vst [vmem:[#allocation34_spill] sm:$0xff] %v4716_v26  ;;  %9501 = vst [vmem:[#allocation35_spill] sm:$0xff] %v4718_v21 }
 0x196   :  { %706 = vrot.lane.b32.xlu0 %v4554_v6, %s4156_s7  ;;  %708 = vrot.lane.b32.xlu1 %v4558_v8, %s4156_s7 }
 0x198   :  { %v4724_v29 = vpop.permute.xlu0 %448  ;;  %v4726_v30 = vpop.permute.xlu1 %450 }
 0x199   :  { %9502 = vst [vmem:[#allocation36_spill] sm:$0xff] %v4724_v29  ;;  %9503 = vst [vmem:[#allocation37_spill] sm:$0xff] %v4726_v30 }
 0x19a   :  { %714 = vrot.lane.b32.xlu0 %v4542_v2, %s4157_s8  ;;  %716 = vrot.lane.b32.xlu1 %v4546_v4, %s4157_s8 }
 0x19c   :  { %v4732_v25 = vpop.permute.xlu0 %456  ;;  %v4734_v26 = vpop.permute.xlu1 %458 }
 0x19d   :  { %9504 = vst [vmem:[#allocation38_spill] sm:$0xff] %v4732_v25  ;;  %9505 = vst [vmem:[#allocation39_spill] sm:$0xff] %v4734_v26 }
 0x19e   :  { %718 = vrot.lane.b32.xlu0 %v4554_v6, %s4157_s8  ;;  %720 = vrot.lane.b32.xlu1 %v4558_v8, %s4157_s8 }
 0x1a0   :  { %v4740_v21 = vpop.permute.xlu0 %460  ;;  %v4742_v29 = vpop.permute.xlu1 %462 }
 0x1a1   :  { %9506 = vst [vmem:[#allocation40_spill] sm:$0xff] %v4740_v21  ;;  %9507 = vst [vmem:[#allocation41_spill] sm:$0xff] %v4742_v29 }
 0x1a2   :  { %726 = vrot.lane.b32.xlu0 %v4542_v2, %s4158_s9  ;;  %728 = vrot.lane.b32.xlu1 %v4546_v4, %s4158_s9 }
 0x1a4   :  { %v4748_v30 = vpop.permute.xlu0 %468  ;;  %v4750_v25 = vpop.permute.xlu1 %470 }
 0x1a5   :  { %9508 = vst [vmem:[#allocation42_spill] sm:$0xff] %v4748_v30  ;;  %9509 = vst [vmem:[#allocation43_spill] sm:$0xff] %v4750_v25 }
 0x1a6   :  { %730 = vrot.lane.b32.xlu0 %v4554_v6, %s4158_s9  ;;  %732 = vrot.lane.b32.xlu1 %v4558_v8, %s4158_s9 }
 0x1a8   :  { %v4756_v26 = vpop.permute.xlu0 %472  ;;  %v4758_v21 = vpop.permute.xlu1 %474 }
 0x1a9   :  { %9510 = vst [vmem:[#allocation44_spill] sm:$0xff] %v4756_v26  ;;  %9511 = vst [vmem:[#allocation45_spill] sm:$0xff] %v4758_v21 }
 0x1aa   :  { %738 = vrot.lane.b32.xlu0 %v4542_v2, %s4159_s10  ;;  %740 = vrot.lane.b32.xlu1 %v4546_v4, %s4159_s10 }
 0x1ac   :  { %v4764_v29 = vpop.permute.xlu0 %480  ;;  %v4766_v30 = vpop.permute.xlu1 %482 }
 0x1ad   :  { %9512 = vst [vmem:[#allocation46_spill] sm:$0xff] %v4764_v29  ;;  %9513 = vst [vmem:[#allocation47_spill] sm:$0xff] %v4766_v30 }
 0x1ae   :  { %742 = vrot.lane.b32.xlu0 %v4554_v6, %s4159_s10  ;;  %744 = vrot.lane.b32.xlu1 %v4558_v8, %s4159_s10 }
 0x1b0   :  { %v4772_v25 = vpop.permute.xlu0 %484  ;;  %v4774_v26 = vpop.permute.xlu1 %486 }
 0x1b1   :  { %9514 = vst [vmem:[#allocation48_spill] sm:$0xff] %v4772_v25  ;;  %9515 = vst [vmem:[#allocation49_spill] sm:$0xff] %v4774_v26 }
 0x1b2   :  { %750 = vrot.lane.b32.xlu0 %v4542_v2, %s4160_s11  ;;  %752 = vrot.lane.b32.xlu1 %v4546_v4, %s4160_s11 }
 0x1b4   :  { %v4780_v21 = vpop.permute.xlu0 %541  ;;  %v4782_v29 = vpop.permute.xlu1 %543 }
 0x1b5   :  { %9516 = vst [vmem:[#allocation50_spill] sm:$0xff] %v4780_v21  ;;  %9517 = vst [vmem:[#allocation51_spill] sm:$0xff] %v4782_v29 }
 0x1b6   :  { %754 = vrot.lane.b32.xlu0 %v4554_v6, %s4160_s11  ;;  %756 = vrot.lane.b32.xlu1 %v4558_v8, %s4160_s11 }
 0x1b8   :  { %v4788_v30 = vpop.permute.xlu0 %545  ;;  %v4790_v25 = vpop.permute.xlu1 %547 }
 0x1b9   :  { %9518 = vst [vmem:[#allocation52_spill] sm:$0xff] %v4788_v30  ;;  %9519 = vst [vmem:[#allocation53_spill] sm:$0xff] %v4790_v25 }
 0x1ba   :  { %803 = vrot.lane.b32.xlu0 %v4542_v2, %s4161_s12  ;;  %805 = vrot.lane.b32.xlu1 %v4546_v4, %s4161_s12 }
 0x1bc   :  { %v4796_v26 = vpop.permute.xlu0 %553  ;;  %v4798_v21 = vpop.permute.xlu1 %555 }
 0x1bd   :  { %9520 = vst [vmem:[#allocation54_spill] sm:$0xff] %v4796_v26  ;;  %9521 = vst [vmem:[#allocation55_spill] sm:$0xff] %v4798_v21 }
 0x1be   :  { %807 = vrot.lane.b32.xlu0 %v4554_v6, %s4161_s12  ;;  %809 = vrot.lane.b32.xlu1 %v4558_v8, %s4161_s12 }
 0x1c0   :  { %v4804_v29 = vpop.permute.xlu0 %557  ;;  %v4806_v30 = vpop.permute.xlu1 %559 }
 0x1c1   :  { %9522 = vst [vmem:[#allocation56_spill] sm:$0xff] %v4804_v29  ;;  %9523 = vst [vmem:[#allocation57_spill] sm:$0xff] %v4806_v30 }
 0x1c2   :  { %815 = vrot.lane.b32.xlu0 %v4542_v2, %s4162_s13  ;;  %817 = vrot.lane.b32.xlu1 %v4546_v4, %s4162_s13 }
 0x1c4   :  { %v4812_v25 = vpop.permute.xlu0 %565  ;;  %v4814_v26 = vpop.permute.xlu1 %567 }
 0x1c5   :  { %9524 = vst [vmem:[#allocation58_spill] sm:$0xff] %v4812_v25  ;;  %9525 = vst [vmem:[#allocation59_spill] sm:$0xff] %v4814_v26 }
 0x1c6   :  { %819 = vrot.lane.b32.xlu0 %v4554_v6, %s4162_s13  ;;  %821 = vrot.lane.b32.xlu1 %v4558_v8, %s4162_s13 }
 0x1c8   :  { %v4820_v21 = vpop.permute.xlu0 %569  ;;  %v4822_v29 = vpop.permute.xlu1 %571 }
 0x1c9   :  { %9526 = vst [vmem:[#allocation60_spill] sm:$0xff] %v4820_v21  ;;  %9527 = vst [vmem:[#allocation61_spill] sm:$0xff] %v4822_v29 }
 0x1ca   :  { %827 = vrot.lane.b32.xlu0 %v4542_v2, %s4163_s14  ;;  %829 = vrot.lane.b32.xlu1 %v4546_v4, %s4163_s14 }
 0x1cc   :  { %v4828_v30 = vpop.permute.xlu0 %577  ;;  %v4830_v25 = vpop.permute.xlu1 %579 }
 0x1cd   :  { %9528 = vst [vmem:[#allocation62_spill] sm:$0xff] %v4828_v30  ;;  %9529 = vst [vmem:[#allocation63_spill] sm:$0xff] %v4830_v25 }
 0x1ce   :  { %831 = vrot.lane.b32.xlu0 %v4554_v6, %s4163_s14  ;;  %833 = vrot.lane.b32.xlu1 %v4558_v8, %s4163_s14 }
 0x1d0   :  { %v4836_v26 = vpop.permute.xlu0 %581  ;;  %v4838_v21 = vpop.permute.xlu1 %583 }
 0x1d1   :  { %9530 = vst [vmem:[#allocation64_spill] sm:$0xff] %v4836_v26  ;;  %9531 = vst [vmem:[#allocation65_spill] sm:$0xff] %v4838_v21 }
 0x1d2   :  { %839 = vrot.lane.b32.xlu0 %v4542_v2, %s4164_s15  ;;  %841 = vrot.lane.b32.xlu1 %v4546_v4, %s4164_s15 }
 0x1d4   :  { %v4844_v29 = vpop.permute.xlu0 %589  ;;  %v4846_v30 = vpop.permute.xlu1 %591 }
 0x1d5   :  { %9532 = vst [vmem:[#allocation66_spill] sm:$0xff] %v4844_v29  ;;  %9533 = vst [vmem:[#allocation67_spill] sm:$0xff] %v4846_v30 }
 0x1d6   :  { %843 = vrot.lane.b32.xlu0 %v4554_v6, %s4164_s15  ;;  %845 = vrot.lane.b32.xlu1 %v4558_v8, %s4164_s15 }
 0x1d8   :  { %v4852_v25 = vpop.permute.xlu0 %593  ;;  %v4854_v26 = vpop.permute.xlu1 %595 }
 0x1d9   :  { %9534 = vst [vmem:[#allocation68_spill] sm:$0xff] %v4852_v25  ;;  %9535 = vst [vmem:[#allocation69_spill] sm:$0xff] %v4854_v26 }
 0x1da   :  { %851 = vrot.lane.b32.xlu0 %v4542_v2, %s4165_s16  ;;  %853 = vrot.lane.b32.xlu1 %v4546_v4, %s4165_s16 }
 0x1dc   :  { %v4860_v21 = vpop.permute.xlu0 %601  ;;  %v4862_v29 = vpop.permute.xlu1 %603 }
 0x1dd   :  { %9536 = vst [vmem:[#allocation70_spill] sm:$0xff] %v4860_v21  ;;  %9537 = vst [vmem:[#allocation71_spill] sm:$0xff] %v4862_v29 }
 0x1de   :  { %855 = vrot.lane.b32.xlu0 %v4554_v6, %s4165_s16  ;;  %857 = vrot.lane.b32.xlu1 %v4558_v8, %s4165_s16 }
 0x1e0   :  { %v4868_v30 = vpop.permute.xlu0 %605  ;;  %v4870_v25 = vpop.permute.xlu1 %607 }
 0x1e1   :  { %9538 = vst [vmem:[#allocation72_spill] sm:$0xff] %v4868_v30  ;;  %9539 = vst [vmem:[#allocation73_spill] sm:$0xff] %v4870_v25 }
 0x1e2   :  { %863 = vrot.lane.b32.xlu0 %v4542_v2, %s4166_s17  ;;  %865 = vrot.lane.b32.xlu1 %v4546_v4, %s4166_s17 }
 0x1e4   :  { %v4876_v26 = vpop.permute.xlu0 %613  ;;  %v4878_v21 = vpop.permute.xlu1 %615 }
 0x1e5   :  { %9540 = vst [vmem:[#allocation74_spill] sm:$0xff] %v4876_v26  ;;  %9541 = vst [vmem:[#allocation75_spill] sm:$0xff] %v4878_v21 }
 0x1e6   :  { %867 = vrot.lane.b32.xlu0 %v4554_v6, %s4166_s17  ;;  %869 = vrot.lane.b32.xlu1 %v4558_v8, %s4166_s17 }
 0x1e8   :  { %v4884_v29 = vpop.permute.xlu0 %617  ;;  %v4886_v30 = vpop.permute.xlu1 %619 }
 0x1e9   :  { %9542 = vst [vmem:[#allocation76_spill] sm:$0xff] %v4884_v29  ;;  %9543 = vst [vmem:[#allocation77_spill] sm:$0xff] %v4886_v30 }
 0x1ea   :  { %875 = vrot.lane.b32.xlu0 %v4542_v2, %s4167_s18  ;;  %877 = vrot.lane.b32.xlu1 %v4546_v4, %s4167_s18 }
 0x1ec   :  { %v4892_v25 = vpop.permute.xlu0 %666  ;;  %v4894_v26 = vpop.permute.xlu1 %668 }
 0x1ed   :  { %9544 = vst [vmem:[#allocation78_spill] sm:$0xff] %v4892_v25  ;;  %9545 = vst [vmem:[#allocation79_spill] sm:$0xff] %v4894_v26 }
 0x1ee   :  { %879 = vrot.lane.b32.xlu0 %v4554_v6, %s4167_s18  ;;  %881 = vrot.lane.b32.xlu1 %v4558_v8, %s4167_s18 }
 0x1f0   :  { %v4900_v21 = vpop.permute.xlu0 %670  ;;  %v4902_v29 = vpop.permute.xlu1 %672 }
 0x1f1   :  { %9546 = vst [vmem:[#allocation80_spill] sm:$0xff] %v4900_v21  ;;  %9547 = vst [vmem:[#allocation81_spill] sm:$0xff] %v4902_v29  ;;  %v4918_v21 = vld [vmem:[#allocation2 + $0x2] sm:$0xff] }
 0x1f2   :  { %887 = vrot.lane.b32.xlu0 %v4542_v2, %s4168_s19  ;;  %889 = vrot.lane.b32.xlu1 %v4546_v4, %s4168_s19  ;;  %v4922_v2 = vld [vmem:[#allocation2 + $0xa] sm:$0xff] }
 0x1f4   :  { %v4908_v30 = vpop.permute.xlu0 %678  ;;  %v4910_v25 = vpop.permute.xlu1 %680 }
 0x1f5   :  { %9548 = vst [vmem:[#allocation82_spill] sm:$0xff] %v4908_v30  ;;  %9549 = vst [vmem:[#allocation83_spill] sm:$0xff] %v4910_v25 }
 0x1f6   :  { %891 = vrot.lane.b32.xlu0 %v4554_v6, %s4168_s19  ;;  %893 = vrot.lane.b32.xlu1 %v4558_v8, %s4168_s19  ;;  %v4930_v6 = vld [vmem:[#allocation2 + $0x4a] sm:$0xff]  ;;  %v4934_v8 = vld [vmem:[#allocation2 + $0x52] sm:$0xff] }
 0x1f8   :  { %v4916_v26 = vpop.permute.xlu0 %682  ;;  %v4920_v29 = vpop.permute.xlu1 %684 }
 0x1f9   :  { %9550 = vst [vmem:[#allocation84_spill] sm:$0xff] %v4916_v26  ;;  %9551 = vst [vmem:[#allocation85_spill] sm:$0xff] %v4920_v29 }
 0x1fa   :  { %948 = vrot.lane.b32.xlu0 %v4918_v21, %s4147_s0  ;;  %950 = vrot.lane.b32.xlu1 %v4922_v2, %s4147_s0 }
 0x1fc   :  { %v4928_v4 = vpop.permute.xlu0 %690  ;;  %v4932_v30 = vpop.permute.xlu1 %692 }
 0x1fd   :  { %9552 = vst [vmem:[#allocation86_spill] sm:$0xff] %v4928_v4  ;;  %9553 = vst [vmem:[#allocation87_spill] sm:$0xff] %v4932_v30 }
 0x1fe   :  { %952 = vrot.lane.b32.xlu0 %v4930_v6, %s4147_s0  ;;  %954 = vrot.lane.b32.xlu1 %v4934_v8, %s4147_s0 }
 0x200   :  { %v4940_v26 = vpop.permute.xlu0 %694  ;;  %v4942_v29 = vpop.permute.xlu1 %696 }
 0x201   :  { %9554 = vst [vmem:[#allocation88_spill] sm:$0xff] %v4940_v26  ;;  %9555 = vst [vmem:[#allocation89_spill] sm:$0xff] %v4942_v29 }
 0x202   :  { %960 = vrot.lane.b32.xlu0 %v4918_v21, %s4148_s22  ;;  %962 = vrot.lane.b32.xlu1 %v4922_v2, %s4148_s22 }
 0x204   :  { %v4948_v4 = vpop.permute.xlu0 %702  ;;  %v4950_v30 = vpop.permute.xlu1 %704 }
 0x205   :  { %9556 = vst [vmem:[#allocation90_spill] sm:$0xff] %v4948_v4  ;;  %9557 = vst [vmem:[#allocation91_spill] sm:$0xff] %v4950_v30 }
 0x206   :  { %964 = vrot.lane.b32.xlu0 %v4930_v6, %s4148_s22  ;;  %966 = vrot.lane.b32.xlu1 %v4934_v8, %s4148_s22 }
 0x208   :  { %v4956_v25 = vpop.permute.xlu0 %706  ;;  %v4958_v26 = vpop.permute.xlu1 %708 }
 0x209   :  { %9558 = vst [vmem:[#allocation92_spill] sm:$0xff] %v4956_v25  ;;  %9559 = vst [vmem:[#allocation93_spill] sm:$0xff] %v4958_v26 }
 0x20a   :  { %972 = vrot.lane.b32.xlu0 %v4918_v21, %s4149_s23  ;;  %974 = vrot.lane.b32.xlu1 %v4922_v2, %s4149_s23 }
 0x20c   :  { %v4964_v29 = vpop.permute.xlu0 %714  ;;  %v4966_v4 = vpop.permute.xlu1 %716 }
 0x20d   :  { %9560 = vst [vmem:[#allocation94_spill] sm:$0xff] %v4964_v29  ;;  %9561 = vst [vmem:[#allocation95_spill] sm:$0xff] %v4966_v4 }
 0x20e   :  { %976 = vrot.lane.b32.xlu0 %v4930_v6, %s4149_s23  ;;  %978 = vrot.lane.b32.xlu1 %v4934_v8, %s4149_s23 }
 0x210   :  { %v4972_v30 = vpop.permute.xlu0 %718  ;;  %v4974_v25 = vpop.permute.xlu1 %720 }
 0x211   :  { %9562 = vst [vmem:[#allocation96_spill] sm:$0xff] %v4972_v30  ;;  %9563 = vst [vmem:[#allocation97_spill] sm:$0xff] %v4974_v25 }
 0x212   :  { %984 = vrot.lane.b32.xlu0 %v4918_v21, %s4150_s24  ;;  %986 = vrot.lane.b32.xlu1 %v4922_v2, %s4150_s24 }
 0x214   :  { %v4980_v26 = vpop.permute.xlu0 %726  ;;  %v4982_v29 = vpop.permute.xlu1 %728 }
 0x215   :  { %9564 = vst [vmem:[#allocation98_spill] sm:$0xff] %v4980_v26  ;;  %9565 = vst [vmem:[#allocation99_spill] sm:$0xff] %v4982_v29 }
 0x216   :  { %988 = vrot.lane.b32.xlu0 %v4930_v6, %s4150_s24  ;;  %990 = vrot.lane.b32.xlu1 %v4934_v8, %s4150_s24 }
 0x218   :  { %v4988_v4 = vpop.permute.xlu0 %730  ;;  %v4990_v30 = vpop.permute.xlu1 %732 }
 0x219   :  { %9566 = vst [vmem:[#allocation100_spill] sm:$0xff] %v4988_v4  ;;  %9567 = vst [vmem:[#allocation101_spill] sm:$0xff] %v4990_v30 }
 0x21a   :  { %996 = vrot.lane.b32.xlu0 %v4918_v21, %s4151_s26  ;;  %998 = vrot.lane.b32.xlu1 %v4922_v2, %s4151_s26 }
 0x21c   :  { %v4996_v25 = vpop.permute.xlu0 %738  ;;  %v4998_v26 = vpop.permute.xlu1 %740 }
 0x21d   :  { %9568 = vst [vmem:[#allocation102_spill] sm:$0xff] %v4996_v25  ;;  %9569 = vst [vmem:[#allocation103_spill] sm:$0xff] %v4998_v26 }
 0x21e   :  { %1000 = vrot.lane.b32.xlu0 %v4930_v6, %s4151_s26  ;;  %1002 = vrot.lane.b32.xlu1 %v4934_v8, %s4151_s26 }
 0x220   :  { %v5004_v29 = vpop.permute.xlu0 %742  ;;  %v5006_v4 = vpop.permute.xlu1 %744 }
 0x221   :  { %9570 = vst [vmem:[#allocation104_spill] sm:$0xff] %v5004_v29  ;;  %9571 = vst [vmem:[#allocation105_spill] sm:$0xff] %v5006_v4 }
 0x222   :  { %1008 = vrot.lane.b32.xlu0 %v4918_v21, %s4152_s27  ;;  %1010 = vrot.lane.b32.xlu1 %v4922_v2, %s4152_s27 }
 0x224   :  { %v5012_v30 = vpop.permute.xlu0 %750  ;;  %v5014_v25 = vpop.permute.xlu1 %752 }
 0x225   :  { %9572 = vst [vmem:[#allocation106_spill] sm:$0xff] %v5012_v30  ;;  %9573 = vst [vmem:[#allocation107_spill] sm:$0xff] %v5014_v25 }
 0x226   :  { %1012 = vrot.lane.b32.xlu0 %v4930_v6, %s4152_s27  ;;  %1014 = vrot.lane.b32.xlu1 %v4934_v8, %s4152_s27 }
 0x228   :  { %v5020_v26 = vpop.permute.xlu0 %754  ;;  %v5022_v29 = vpop.permute.xlu1 %756 }
 0x229   :  { %9574 = vst [vmem:[#allocation108_spill] sm:$0xff] %v5020_v26  ;;  %9575 = vst [vmem:[#allocation109_spill] sm:$0xff] %v5022_v29 }
 0x22a   :  { %1020 = vrot.lane.b32.xlu0 %v4918_v21, %s4153_s28  ;;  %1022 = vrot.lane.b32.xlu1 %v4922_v2, %s4153_s28 }
 0x22c   :  { %v5028_v4 = vpop.permute.xlu0 %803  ;;  %v5030_v30 = vpop.permute.xlu1 %805 }
 0x22d   :  { %9576 = vst [vmem:[#allocation110_spill] sm:$0xff] %v5028_v4  ;;  %9577 = vst [vmem:[#allocation111_spill] sm:$0xff] %v5030_v30 }
 0x22e   :  { %1024 = vrot.lane.b32.xlu0 %v4930_v6, %s4153_s28  ;;  %1026 = vrot.lane.b32.xlu1 %v4934_v8, %s4153_s28 }
 0x230   :  { %v5036_v25 = vpop.permute.xlu0 %807  ;;  %v5038_v26 = vpop.permute.xlu1 %809 }
 0x231   :  { %9578 = vst [vmem:[#allocation112_spill] sm:$0xff] %v5036_v25  ;;  %9579 = vst [vmem:[#allocation113_spill] sm:$0xff] %v5038_v26 }
 0x232   :  { %1073 = vrot.lane.b32.xlu0 %v4918_v21, %s4143_s25  ;;  %1075 = vrot.lane.b32.xlu1 %v4922_v2, %s4143_s25 }
 0x234   :  { %v5044_v29 = vpop.permute.xlu0 %815  ;;  %v5046_v4 = vpop.permute.xlu1 %817 }
 0x235   :  { %9580 = vst [vmem:[#allocation114_spill] sm:$0xff] %v5044_v29  ;;  %9581 = vst [vmem:[#allocation115_spill] sm:$0xff] %v5046_v4 }
 0x236   :  { %1077 = vrot.lane.b32.xlu0 %v4930_v6, %s4143_s25  ;;  %1079 = vrot.lane.b32.xlu1 %v4934_v8, %s4143_s25 }
 0x238   :  { %v5052_v30 = vpop.permute.xlu0 %819  ;;  %v5054_v25 = vpop.permute.xlu1 %821 }
 0x239   :  { %9582 = vst [vmem:[#allocation116_spill] sm:$0xff] %v5052_v30  ;;  %9583 = vst [vmem:[#allocation117_spill] sm:$0xff] %v5054_v25 }
 0x23a   :  { %1085 = vrot.lane.b32.xlu0 %v4918_v21, %s4154_s29  ;;  %1087 = vrot.lane.b32.xlu1 %v4922_v2, %s4154_s29 }
 0x23c   :  { %v5060_v26 = vpop.permute.xlu0 %827  ;;  %v5062_v29 = vpop.permute.xlu1 %829 }
 0x23d   :  { %9584 = vst [vmem:[#allocation118_spill] sm:$0xff] %v5060_v26  ;;  %9585 = vst [vmem:[#allocation119_spill] sm:$0xff] %v5062_v29 }
 0x23e   :  { %1089 = vrot.lane.b32.xlu0 %v4930_v6, %s4154_s29  ;;  %1091 = vrot.lane.b32.xlu1 %v4934_v8, %s4154_s29 }
 0x240   :  { %v5068_v4 = vpop.permute.xlu0 %831  ;;  %v5070_v30 = vpop.permute.xlu1 %833 }
 0x241   :  { %9586 = vst [vmem:[#allocation120_spill] sm:$0xff] %v5068_v4  ;;  %9587 = vst [vmem:[#allocation121_spill] sm:$0xff] %v5070_v30 }
 0x242   :  { %1097 = vrot.lane.b32.xlu0 %v4918_v21, %s4155_s30  ;;  %1099 = vrot.lane.b32.xlu1 %v4922_v2, %s4155_s30 }
 0x244   :  { %v5076_v25 = vpop.permute.xlu0 %839  ;;  %v5078_v26 = vpop.permute.xlu1 %841 }
 0x245   :  { %9588 = vst [vmem:[#allocation122_spill] sm:$0xff] %v5076_v25  ;;  %9589 = vst [vmem:[#allocation123_spill] sm:$0xff] %v5078_v26 }
 0x246   :  { %1101 = vrot.lane.b32.xlu0 %v4930_v6, %s4155_s30  ;;  %1103 = vrot.lane.b32.xlu1 %v4934_v8, %s4155_s30 }
 0x248   :  { %v5084_v29 = vpop.permute.xlu0 %843  ;;  %v5086_v4 = vpop.permute.xlu1 %845 }
 0x249   :  { %9590 = vst [vmem:[#allocation124_spill] sm:$0xff] %v5084_v29  ;;  %9591 = vst [vmem:[#allocation125_spill] sm:$0xff] %v5086_v4 }
 0x24a   :  { %1109 = vrot.lane.b32.xlu0 %v4918_v21, %s4156_s7  ;;  %1111 = vrot.lane.b32.xlu1 %v4922_v2, %s4156_s7 }
 0x24c   :  { %v5092_v30 = vpop.permute.xlu0 %851  ;;  %v5094_v25 = vpop.permute.xlu1 %853 }
 0x24d   :  { %9592 = vst [vmem:[#allocation126_spill] sm:$0xff] %v5092_v30  ;;  %9593 = vst [vmem:[#allocation127_spill] sm:$0xff] %v5094_v25 }
 0x24e   :  { %1113 = vrot.lane.b32.xlu0 %v4930_v6, %s4156_s7  ;;  %1115 = vrot.lane.b32.xlu1 %v4934_v8, %s4156_s7 }
 0x250   :  { %v5100_v26 = vpop.permute.xlu0 %855  ;;  %v5102_v29 = vpop.permute.xlu1 %857 }
 0x251   :  { %9594 = vst [vmem:[#allocation128_spill] sm:$0xff] %v5100_v26  ;;  %9595 = vst [vmem:[#allocation129_spill] sm:$0xff] %v5102_v29 }
 0x252   :  { %1121 = vrot.lane.b32.xlu0 %v4918_v21, %s4157_s8  ;;  %1123 = vrot.lane.b32.xlu1 %v4922_v2, %s4157_s8 }
 0x254   :  { %v5108_v4 = vpop.permute.xlu0 %863  ;;  %v5110_v30 = vpop.permute.xlu1 %865 }
 0x255   :  { %9596 = vst [vmem:[#allocation130_spill] sm:$0xff] %v5108_v4  ;;  %9597 = vst [vmem:[#allocation131_spill] sm:$0xff] %v5110_v30 }
 0x256   :  { %1125 = vrot.lane.b32.xlu0 %v4930_v6, %s4157_s8  ;;  %1127 = vrot.lane.b32.xlu1 %v4934_v8, %s4157_s8 }
 0x258   :  { %v5116_v25 = vpop.permute.xlu0 %867  ;;  %v5118_v26 = vpop.permute.xlu1 %869 }
 0x259   :  { %9598 = vst [vmem:[#allocation132_spill] sm:$0xff] %v5116_v25  ;;  %9599 = vst [vmem:[#allocation133_spill] sm:$0xff] %v5118_v26 }
 0x25a   :  { %1133 = vrot.lane.b32.xlu0 %v4918_v21, %s4158_s9  ;;  %1135 = vrot.lane.b32.xlu1 %v4922_v2, %s4158_s9 }
 0x25c   :  { %v5124_v29 = vpop.permute.xlu0 %875  ;;  %v5126_v4 = vpop.permute.xlu1 %877 }
 0x25d   :  { %9600 = vst [vmem:[#allocation134_spill] sm:$0xff] %v5124_v29  ;;  %9601 = vst [vmem:[#allocation135_spill] sm:$0xff] %v5126_v4 }
 0x25e   :  { %1137 = vrot.lane.b32.xlu0 %v4930_v6, %s4158_s9  ;;  %1139 = vrot.lane.b32.xlu1 %v4934_v8, %s4158_s9 }
 0x260   :  { %v5132_v30 = vpop.permute.xlu0 %879  ;;  %v5134_v25 = vpop.permute.xlu1 %881 }
 0x261   :  { %9602 = vst [vmem:[#allocation136_spill] sm:$0xff] %v5132_v30  ;;  %9603 = vst [vmem:[#allocation137_spill] sm:$0xff] %v5134_v25 }
 0x262   :  { %1145 = vrot.lane.b32.xlu0 %v4918_v21, %s4159_s10  ;;  %1147 = vrot.lane.b32.xlu1 %v4922_v2, %s4159_s10 }
 0x264   :  { %v5140_v26 = vpop.permute.xlu0 %887  ;;  %v5142_v29 = vpop.permute.xlu1 %889 }
 0x265   :  { %9604 = vst [vmem:[#allocation138_spill] sm:$0xff] %v5140_v26  ;;  %9605 = vst [vmem:[#allocation139_spill] sm:$0xff] %v5142_v29 }
 0x266   :  { %1149 = vrot.lane.b32.xlu0 %v4930_v6, %s4159_s10  ;;  %1151 = vrot.lane.b32.xlu1 %v4934_v8, %s4159_s10 }
 0x268   :  { %v5148_v4 = vpop.permute.xlu0 %891  ;;  %v5150_v30 = vpop.permute.xlu1 %893 }
 0x269   :  { %9606 = vst [vmem:[#allocation140_spill] sm:$0xff] %v5148_v4  ;;  %9607 = vst [vmem:[#allocation141_spill] sm:$0xff] %v5150_v30 }
 0x26a   :  { %1157 = vrot.lane.b32.xlu0 %v4918_v21, %s4160_s11  ;;  %1159 = vrot.lane.b32.xlu1 %v4922_v2, %s4160_s11 }
 0x26c   :  { %v5156_v25 = vpop.permute.xlu0 %948  ;;  %v5158_v26 = vpop.permute.xlu1 %950 }
 0x26d   :  { %9608 = vst [vmem:[#allocation142_spill] sm:$0xff] %v5156_v25  ;;  %9609 = vst [vmem:[#allocation143_spill] sm:$0xff] %v5158_v26 }
 0x26e   :  { %1161 = vrot.lane.b32.xlu0 %v4930_v6, %s4160_s11  ;;  %1163 = vrot.lane.b32.xlu1 %v4934_v8, %s4160_s11 }
 0x270   :  { %v5164_v29 = vpop.permute.xlu0 %952  ;;  %v5166_v4 = vpop.permute.xlu1 %954 }
 0x271   :  { %9610 = vst [vmem:[#allocation144_spill] sm:$0xff] %v5164_v29  ;;  %9611 = vst [vmem:[#allocation145_spill] sm:$0xff] %v5166_v4 }
 0x272   :  { %1210 = vrot.lane.b32.xlu0 %v4918_v21, %s4161_s12  ;;  %1212 = vrot.lane.b32.xlu1 %v4922_v2, %s4161_s12 }
 0x274   :  { %v5172_v30 = vpop.permute.xlu0 %960  ;;  %v5174_v25 = vpop.permute.xlu1 %962 }
 0x275   :  { %9612 = vst [vmem:[#allocation146_spill] sm:$0xff] %v5172_v30  ;;  %9613 = vst [vmem:[#allocation147_spill] sm:$0xff] %v5174_v25 }
 0x276   :  { %1214 = vrot.lane.b32.xlu0 %v4930_v6, %s4161_s12  ;;  %1216 = vrot.lane.b32.xlu1 %v4934_v8, %s4161_s12 }
 0x278   :  { %v5180_v26 = vpop.permute.xlu0 %964  ;;  %v5182_v29 = vpop.permute.xlu1 %966 }
 0x279   :  { %9614 = vst [vmem:[#allocation148_spill] sm:$0xff] %v5180_v26  ;;  %9615 = vst [vmem:[#allocation149_spill] sm:$0xff] %v5182_v29 }
 0x27a   :  { %1222 = vrot.lane.b32.xlu0 %v4918_v21, %s4162_s13  ;;  %1224 = vrot.lane.b32.xlu1 %v4922_v2, %s4162_s13 }
 0x27c   :  { %v5188_v4 = vpop.permute.xlu0 %972  ;;  %v5190_v30 = vpop.permute.xlu1 %974 }
 0x27d   :  { %9616 = vst [vmem:[#allocation150_spill] sm:$0xff] %v5188_v4  ;;  %9617 = vst [vmem:[#allocation151_spill] sm:$0xff] %v5190_v30 }
 0x27e   :  { %1226 = vrot.lane.b32.xlu0 %v4930_v6, %s4162_s13  ;;  %1228 = vrot.lane.b32.xlu1 %v4934_v8, %s4162_s13 }
 0x280   :  { %v5196_v25 = vpop.permute.xlu0 %976  ;;  %v5198_v26 = vpop.permute.xlu1 %978 }
 0x281   :  { %9618 = vst [vmem:[#allocation152_spill] sm:$0xff] %v5196_v25  ;;  %9619 = vst [vmem:[#allocation153_spill] sm:$0xff] %v5198_v26 }
 0x282   :  { %1234 = vrot.lane.b32.xlu0 %v4918_v21, %s4163_s14  ;;  %1236 = vrot.lane.b32.xlu1 %v4922_v2, %s4163_s14 }
 0x284   :  { %v5204_v29 = vpop.permute.xlu0 %984  ;;  %v5206_v4 = vpop.permute.xlu1 %986 }
 0x285   :  { %9620 = vst [vmem:[#allocation154_spill] sm:$0xff] %v5204_v29  ;;  %9621 = vst [vmem:[#allocation155_spill] sm:$0xff] %v5206_v4 }
 0x286   :  { %1238 = vrot.lane.b32.xlu0 %v4930_v6, %s4163_s14  ;;  %1240 = vrot.lane.b32.xlu1 %v4934_v8, %s4163_s14 }
 0x288   :  { %v5212_v30 = vpop.permute.xlu0 %988  ;;  %v5214_v25 = vpop.permute.xlu1 %990 }
 0x289   :  { %9622 = vst [vmem:[#allocation156_spill] sm:$0xff] %v5212_v30  ;;  %9623 = vst [vmem:[#allocation157_spill] sm:$0xff] %v5214_v25 }
 0x28a   :  { %1246 = vrot.lane.b32.xlu0 %v4918_v21, %s4164_s15  ;;  %1248 = vrot.lane.b32.xlu1 %v4922_v2, %s4164_s15 }
 0x28c   :  { %v5220_v26 = vpop.permute.xlu0 %996  ;;  %v5222_v29 = vpop.permute.xlu1 %998 }
 0x28d   :  { %9624 = vst [vmem:[#allocation158_spill] sm:$0xff] %v5220_v26  ;;  %9625 = vst [vmem:[#allocation159_spill] sm:$0xff] %v5222_v29 }
 0x28e   :  { %1250 = vrot.lane.b32.xlu0 %v4930_v6, %s4164_s15  ;;  %1252 = vrot.lane.b32.xlu1 %v4934_v8, %s4164_s15 }
 0x290   :  { %v5228_v4 = vpop.permute.xlu0 %1000  ;;  %v5230_v30 = vpop.permute.xlu1 %1002 }
 0x291   :  { %9626 = vst [vmem:[#allocation160_spill] sm:$0xff] %v5228_v4  ;;  %9627 = vst [vmem:[#allocation161_spill] sm:$0xff] %v5230_v30 }
 0x292   :  { %1258 = vrot.lane.b32.xlu0 %v4918_v21, %s4165_s16  ;;  %1260 = vrot.lane.b32.xlu1 %v4922_v2, %s4165_s16 }
 0x294   :  { %v5236_v25 = vpop.permute.xlu0 %1008  ;;  %v5238_v26 = vpop.permute.xlu1 %1010 }
 0x295   :  { %9628 = vst [vmem:[#allocation162_spill] sm:$0xff] %v5236_v25  ;;  %9629 = vst [vmem:[#allocation163_spill] sm:$0xff] %v5238_v26 }
 0x296   :  { %1262 = vrot.lane.b32.xlu0 %v4930_v6, %s4165_s16  ;;  %1264 = vrot.lane.b32.xlu1 %v4934_v8, %s4165_s16 }
 0x298   :  { %v5244_v29 = vpop.permute.xlu0 %1012  ;;  %v5246_v4 = vpop.permute.xlu1 %1014 }
 0x299   :  { %9630 = vst [vmem:[#allocation164_spill] sm:$0xff] %v5244_v29  ;;  %9631 = vst [vmem:[#allocation165_spill] sm:$0xff] %v5246_v4 }
 0x29a   :  { %1270 = vrot.lane.b32.xlu0 %v4918_v21, %s4166_s17  ;;  %1272 = vrot.lane.b32.xlu1 %v4922_v2, %s4166_s17 }
 0x29c   :  { %v5252_v30 = vpop.permute.xlu0 %1020  ;;  %v5254_v25 = vpop.permute.xlu1 %1022 }
 0x29d   :  { %9632 = vst [vmem:[#allocation166_spill] sm:$0xff] %v5252_v30  ;;  %9633 = vst [vmem:[#allocation167_spill] sm:$0xff] %v5254_v25 }
 0x29e   :  { %1274 = vrot.lane.b32.xlu0 %v4930_v6, %s4166_s17  ;;  %1276 = vrot.lane.b32.xlu1 %v4934_v8, %s4166_s17 }
 0x2a0   :  { %v5260_v26 = vpop.permute.xlu0 %1024  ;;  %v5262_v29 = vpop.permute.xlu1 %1026 }
 0x2a1   :  { %9634 = vst [vmem:[#allocation168_spill] sm:$0xff] %v5260_v26  ;;  %9635 = vst [vmem:[#allocation169_spill] sm:$0xff] %v5262_v29 }
 0x2a2   :  { %1282 = vrot.lane.b32.xlu0 %v4918_v21, %s4167_s18  ;;  %1284 = vrot.lane.b32.xlu1 %v4922_v2, %s4167_s18 }
 0x2a4   :  { %v5268_v4 = vpop.permute.xlu0 %1073  ;;  %v5270_v30 = vpop.permute.xlu1 %1075 }
 0x2a5   :  { %9636 = vst [vmem:[#allocation170_spill] sm:$0xff] %v5268_v4  ;;  %9637 = vst [vmem:[#allocation171_spill] sm:$0xff] %v5270_v30 }
 0x2a6   :  { %1286 = vrot.lane.b32.xlu0 %v4930_v6, %s4167_s18  ;;  %1288 = vrot.lane.b32.xlu1 %v4934_v8, %s4167_s18 }
 0x2a8   :  { %v5276_v25 = vpop.permute.xlu0 %1077  ;;  %v5278_v26 = vpop.permute.xlu1 %1079 }
 0x2a9   :  { %9638 = vst [vmem:[#allocation172_spill] sm:$0xff] %v5276_v25  ;;  %9639 = vst [vmem:[#allocation173_spill] sm:$0xff] %v5278_v26  ;;  %v5294_v25 = vld [vmem:[#allocation2 + $0x18] sm:$0xff] }
 0x2aa   :  { %1294 = vrot.lane.b32.xlu0 %v4918_v21, %s4168_s19  ;;  %1296 = vrot.lane.b32.xlu1 %v4922_v2, %s4168_s19  ;;  %v5298_v21 = vld [vmem:[#allocation2 + $0x20] sm:$0xff] }
 0x2ac   :  { %v5284_v29 = vpop.permute.xlu0 %1085  ;;  %v5286_v4 = vpop.permute.xlu1 %1087 }
 0x2ad   :  { %9640 = vst [vmem:[#allocation174_spill] sm:$0xff] %v5284_v29  ;;  %9641 = vst [vmem:[#allocation175_spill] sm:$0xff] %v5286_v4 }
 0x2ae   :  { %1298 = vrot.lane.b32.xlu0 %v4930_v6, %s4168_s19  ;;  %1300 = vrot.lane.b32.xlu1 %v4934_v8, %s4168_s19  ;;  %v5306_v6 = vld [vmem:[#allocation2 + $0x60] sm:$0xff]  ;;  %v5310_v8 = vld [vmem:[#allocation2 + $0x68] sm:$0xff] }
 0x2b0   :  { %v5292_v30 = vpop.permute.xlu0 %1089  ;;  %v5296_v26 = vpop.permute.xlu1 %1091 }
 0x2b1   :  { %9642 = vst [vmem:[#allocation176_spill] sm:$0xff] %v5292_v30  ;;  %9643 = vst [vmem:[#allocation177_spill] sm:$0xff] %v5296_v26 }
 0x2b2   :  { %1355 = vrot.lane.b32.xlu0 %v5294_v25, %s4147_s0  ;;  %1357 = vrot.lane.b32.xlu1 %v5298_v21, %s4147_s0 }
 0x2b4   :  { %v5304_v2 = vpop.permute.xlu0 %1097  ;;  %v5308_v29 = vpop.permute.xlu1 %1099 }
 0x2b5   :  { %9644 = vst [vmem:[#allocation178_spill] sm:$0xff] %v5304_v2  ;;  %9645 = vst [vmem:[#allocation179_spill] sm:$0xff] %v5308_v29 }
 0x2b6   :  { %1359 = vrot.lane.b32.xlu0 %v5306_v6, %s4147_s0  ;;  %1361 = vrot.lane.b32.xlu1 %v5310_v8, %s4147_s0 }
 0x2b8   :  { %v5316_v30 = vpop.permute.xlu0 %1101  ;;  %v5318_v26 = vpop.permute.xlu1 %1103 }
 0x2b9   :  { %9646 = vst [vmem:[#allocation180_spill] sm:$0xff] %v5316_v30  ;;  %9647 = vst [vmem:[#allocation181_spill] sm:$0xff] %v5318_v26 }
 0x2ba   :  { %1367 = vrot.lane.b32.xlu0 %v5294_v25, %s4148_s22  ;;  %1369 = vrot.lane.b32.xlu1 %v5298_v21, %s4148_s22 }
 0x2bc   :  { %v5324_v2 = vpop.permute.xlu0 %1109  ;;  %v5326_v29 = vpop.permute.xlu1 %1111 }
 0x2bd   :  { %9648 = vst [vmem:[#allocation182_spill] sm:$0xff] %v5324_v2  ;;  %9649 = vst [vmem:[#allocation183_spill] sm:$0xff] %v5326_v29 }
 0x2be   :  { %1371 = vrot.lane.b32.xlu0 %v5306_v6, %s4148_s22  ;;  %1373 = vrot.lane.b32.xlu1 %v5310_v8, %s4148_s22 }
 0x2c0   :  { %v5332_v4 = vpop.permute.xlu0 %1113  ;;  %v5334_v30 = vpop.permute.xlu1 %1115 }
 0x2c1   :  { %9650 = vst [vmem:[#allocation184_spill] sm:$0xff] %v5332_v4  ;;  %9651 = vst [vmem:[#allocation185_spill] sm:$0xff] %v5334_v30 }
 0x2c2   :  { %1379 = vrot.lane.b32.xlu0 %v5294_v25, %s4149_s23  ;;  %1381 = vrot.lane.b32.xlu1 %v5298_v21, %s4149_s23 }
 0x2c4   :  { %v5340_v26 = vpop.permute.xlu0 %1121  ;;  %v5342_v2 = vpop.permute.xlu1 %1123 }
 0x2c5   :  { %9652 = vst [vmem:[#allocation186_spill] sm:$0xff] %v5340_v26  ;;  %9653 = vst [vmem:[#allocation187_spill] sm:$0xff] %v5342_v2 }
 0x2c6   :  { %1383 = vrot.lane.b32.xlu0 %v5306_v6, %s4149_s23  ;;  %1385 = vrot.lane.b32.xlu1 %v5310_v8, %s4149_s23 }
 0x2c8   :  { %v5348_v29 = vpop.permute.xlu0 %1125  ;;  %v5350_v4 = vpop.permute.xlu1 %1127 }
 0x2c9   :  { %9654 = vst [vmem:[#allocation188_spill] sm:$0xff] %v5348_v29  ;;  %9655 = vst [vmem:[#allocation189_spill] sm:$0xff] %v5350_v4 }
 0x2ca   :  { %1391 = vrot.lane.b32.xlu0 %v5294_v25, %s4150_s24  ;;  %1393 = vrot.lane.b32.xlu1 %v5298_v21, %s4150_s24 }
 0x2cc   :  { %v5356_v30 = vpop.permute.xlu0 %1133  ;;  %v5358_v26 = vpop.permute.xlu1 %1135 }
 0x2cd   :  { %9656 = vst [vmem:[#allocation190_spill] sm:$0xff] %v5356_v30  ;;  %9657 = vst [vmem:[#allocation191_spill] sm:$0xff] %v5358_v26 }
 0x2ce   :  { %1395 = vrot.lane.b32.xlu0 %v5306_v6, %s4150_s24  ;;  %1397 = vrot.lane.b32.xlu1 %v5310_v8, %s4150_s24 }
 0x2d0   :  { %v5364_v2 = vpop.permute.xlu0 %1137  ;;  %v5366_v29 = vpop.permute.xlu1 %1139 }
 0x2d1   :  { %9658 = vst [vmem:[#allocation192_spill] sm:$0xff] %v5364_v2  ;;  %9659 = vst [vmem:[#allocation193_spill] sm:$0xff] %v5366_v29 }
 0x2d2   :  { %1403 = vrot.lane.b32.xlu0 %v5294_v25, %s4151_s26  ;;  %1405 = vrot.lane.b32.xlu1 %v5298_v21, %s4151_s26 }
 0x2d4   :  { %v5372_v4 = vpop.permute.xlu0 %1145  ;;  %v5374_v30 = vpop.permute.xlu1 %1147 }
 0x2d5   :  { %9660 = vst [vmem:[#allocation194_spill] sm:$0xff] %v5372_v4  ;;  %9661 = vst [vmem:[#allocation195_spill] sm:$0xff] %v5374_v30 }
 0x2d6   :  { %1407 = vrot.lane.b32.xlu0 %v5306_v6, %s4151_s26  ;;  %1409 = vrot.lane.b32.xlu1 %v5310_v8, %s4151_s26 }
 0x2d8   :  { %v5380_v26 = vpop.permute.xlu0 %1149  ;;  %v5382_v2 = vpop.permute.xlu1 %1151 }
 0x2d9   :  { %9662 = vst [vmem:[#allocation196_spill] sm:$0xff] %v5380_v26  ;;  %9663 = vst [vmem:[#allocation197_spill] sm:$0xff] %v5382_v2 }
 0x2da   :  { %1415 = vrot.lane.b32.xlu0 %v5294_v25, %s4152_s27  ;;  %1417 = vrot.lane.b32.xlu1 %v5298_v21, %s4152_s27 }
 0x2dc   :  { %v5388_v29 = vpop.permute.xlu0 %1157  ;;  %v5390_v4 = vpop.permute.xlu1 %1159 }
 0x2dd   :  { %9664 = vst [vmem:[#allocation198_spill] sm:$0xff] %v5388_v29  ;;  %9665 = vst [vmem:[#allocation199_spill] sm:$0xff] %v5390_v4 }
 0x2de   :  { %1419 = vrot.lane.b32.xlu0 %v5306_v6, %s4152_s27  ;;  %1421 = vrot.lane.b32.xlu1 %v5310_v8, %s4152_s27 }
 0x2e0   :  { %v5396_v30 = vpop.permute.xlu0 %1161  ;;  %v5398_v26 = vpop.permute.xlu1 %1163 }
 0x2e1   :  { %9666 = vst [vmem:[#allocation200_spill] sm:$0xff] %v5396_v30  ;;  %9667 = vst [vmem:[#allocation201_spill] sm:$0xff] %v5398_v26 }
 0x2e2   :  { %1427 = vrot.lane.b32.xlu0 %v5294_v25, %s4153_s28  ;;  %1429 = vrot.lane.b32.xlu1 %v5298_v21, %s4153_s28 }
 0x2e4   :  { %v5404_v2 = vpop.permute.xlu0 %1210  ;;  %v5406_v29 = vpop.permute.xlu1 %1212 }
 0x2e5   :  { %9668 = vst [vmem:[#allocation202_spill] sm:$0xff] %v5404_v2  ;;  %9669 = vst [vmem:[#allocation203_spill] sm:$0xff] %v5406_v29 }
 0x2e6   :  { %1431 = vrot.lane.b32.xlu0 %v5306_v6, %s4153_s28  ;;  %1433 = vrot.lane.b32.xlu1 %v5310_v8, %s4153_s28 }
 0x2e8   :  { %v5412_v4 = vpop.permute.xlu0 %1214  ;;  %v5414_v30 = vpop.permute.xlu1 %1216 }
 0x2e9   :  { %9670 = vst [vmem:[#allocation204_spill] sm:$0xff] %v5412_v4  ;;  %9671 = vst [vmem:[#allocation205_spill] sm:$0xff] %v5414_v30 }
 0x2ea   :  { %1480 = vrot.lane.b32.xlu0 %v5294_v25, %s4143_s25  ;;  %1482 = vrot.lane.b32.xlu1 %v5298_v21, %s4143_s25 }
 0x2ec   :  { %v5420_v26 = vpop.permute.xlu0 %1222  ;;  %v5422_v2 = vpop.permute.xlu1 %1224 }
 0x2ed   :  { %9672 = vst [vmem:[#allocation206_spill] sm:$0xff] %v5420_v26  ;;  %9673 = vst [vmem:[#allocation207_spill] sm:$0xff] %v5422_v2 }
 0x2ee   :  { %1484 = vrot.lane.b32.xlu0 %v5306_v6, %s4143_s25  ;;  %1486 = vrot.lane.b32.xlu1 %v5310_v8, %s4143_s25 }
 0x2f0   :  { %v5428_v29 = vpop.permute.xlu0 %1226  ;;  %v5430_v4 = vpop.permute.xlu1 %1228 }
 0x2f1   :  { %9674 = vst [vmem:[#allocation208_spill] sm:$0xff] %v5428_v29  ;;  %9675 = vst [vmem:[#allocation209_spill] sm:$0xff] %v5430_v4 }
 0x2f2   :  { %1492 = vrot.lane.b32.xlu0 %v5294_v25, %s4154_s29  ;;  %1494 = vrot.lane.b32.xlu1 %v5298_v21, %s4154_s29 }
 0x2f4   :  { %v5436_v30 = vpop.permute.xlu0 %1234  ;;  %v5438_v26 = vpop.permute.xlu1 %1236 }
 0x2f5   :  { %9676 = vst [vmem:[#allocation210_spill] sm:$0xff] %v5436_v30  ;;  %9677 = vst [vmem:[#allocation211_spill] sm:$0xff] %v5438_v26 }
 0x2f6   :  { %1496 = vrot.lane.b32.xlu0 %v5306_v6, %s4154_s29  ;;  %1498 = vrot.lane.b32.xlu1 %v5310_v8, %s4154_s29 }
 0x2f8   :  { %v5444_v2 = vpop.permute.xlu0 %1238  ;;  %v5446_v29 = vpop.permute.xlu1 %1240 }
 0x2f9   :  { %9678 = vst [vmem:[#allocation212_spill] sm:$0xff] %v5444_v2  ;;  %9679 = vst [vmem:[#allocation213_spill] sm:$0xff] %v5446_v29 }
 0x2fa   :  { %1504 = vrot.lane.b32.xlu0 %v5294_v25, %s4155_s30  ;;  %1506 = vrot.lane.b32.xlu1 %v5298_v21, %s4155_s30 }
 0x2fc   :  { %v5452_v4 = vpop.permute.xlu0 %1246  ;;  %v5454_v30 = vpop.permute.xlu1 %1248 }
 0x2fd   :  { %9680 = vst [vmem:[#allocation214_spill] sm:$0xff] %v5452_v4  ;;  %9681 = vst [vmem:[#allocation215_spill] sm:$0xff] %v5454_v30 }
 0x2fe   :  { %1508 = vrot.lane.b32.xlu0 %v5306_v6, %s4155_s30  ;;  %1510 = vrot.lane.b32.xlu1 %v5310_v8, %s4155_s30 }
 0x300   :  { %v5460_v26 = vpop.permute.xlu0 %1250  ;;  %v5462_v2 = vpop.permute.xlu1 %1252 }
 0x301   :  { %9682 = vst [vmem:[#allocation216_spill] sm:$0xff] %v5460_v26  ;;  %9683 = vst [vmem:[#allocation217_spill] sm:$0xff] %v5462_v2 }
 0x302   :  { %1516 = vrot.lane.b32.xlu0 %v5294_v25, %s4156_s7  ;;  %1518 = vrot.lane.b32.xlu1 %v5298_v21, %s4156_s7 }
 0x304   :  { %v5468_v29 = vpop.permute.xlu0 %1258  ;;  %v5470_v4 = vpop.permute.xlu1 %1260 }
 0x305   :  { %9684 = vst [vmem:[#allocation218_spill] sm:$0xff] %v5468_v29  ;;  %9685 = vst [vmem:[#allocation219_spill] sm:$0xff] %v5470_v4 }
 0x306   :  { %1520 = vrot.lane.b32.xlu0 %v5306_v6, %s4156_s7  ;;  %1522 = vrot.lane.b32.xlu1 %v5310_v8, %s4156_s7 }
 0x308   :  { %v5476_v30 = vpop.permute.xlu0 %1262  ;;  %v5478_v26 = vpop.permute.xlu1 %1264 }
 0x309   :  { %9686 = vst [vmem:[#allocation220_spill] sm:$0xff] %v5476_v30  ;;  %9687 = vst [vmem:[#allocation221_spill] sm:$0xff] %v5478_v26 }
 0x30a   :  { %1528 = vrot.lane.b32.xlu0 %v5294_v25, %s4157_s8  ;;  %1530 = vrot.lane.b32.xlu1 %v5298_v21, %s4157_s8 }
 0x30c   :  { %v5484_v2 = vpop.permute.xlu0 %1270  ;;  %v5486_v29 = vpop.permute.xlu1 %1272 }
 0x30d   :  { %9688 = vst [vmem:[#allocation222_spill] sm:$0xff] %v5484_v2  ;;  %9689 = vst [vmem:[#allocation223_spill] sm:$0xff] %v5486_v29 }
 0x30e   :  { %1532 = vrot.lane.b32.xlu0 %v5306_v6, %s4157_s8  ;;  %1534 = vrot.lane.b32.xlu1 %v5310_v8, %s4157_s8 }
 0x310   :  { %v5492_v4 = vpop.permute.xlu0 %1274  ;;  %v5494_v30 = vpop.permute.xlu1 %1276 }
 0x311   :  { %9690 = vst [vmem:[#allocation224_spill] sm:$0xff] %v5492_v4  ;;  %9691 = vst [vmem:[#allocation225_spill] sm:$0xff] %v5494_v30 }
 0x312   :  { %1540 = vrot.lane.b32.xlu0 %v5294_v25, %s4158_s9  ;;  %1542 = vrot.lane.b32.xlu1 %v5298_v21, %s4158_s9 }
 0x314   :  { %v5500_v26 = vpop.permute.xlu0 %1282  ;;  %v5502_v2 = vpop.permute.xlu1 %1284 }
 0x315   :  { %9692 = vst [vmem:[#allocation226_spill] sm:$0xff] %v5500_v26  ;;  %9693 = vst [vmem:[#allocation227_spill] sm:$0xff] %v5502_v2 }
 0x316   :  { %1544 = vrot.lane.b32.xlu0 %v5306_v6, %s4158_s9  ;;  %1546 = vrot.lane.b32.xlu1 %v5310_v8, %s4158_s9 }
 0x318   :  { %v5508_v29 = vpop.permute.xlu0 %1286  ;;  %v5510_v4 = vpop.permute.xlu1 %1288 }
 0x319   :  { %9694 = vst [vmem:[#allocation228_spill] sm:$0xff] %v5508_v29  ;;  %9695 = vst [vmem:[#allocation229_spill] sm:$0xff] %v5510_v4 }
 0x31a   :  { %1552 = vrot.lane.b32.xlu0 %v5294_v25, %s4159_s10  ;;  %1554 = vrot.lane.b32.xlu1 %v5298_v21, %s4159_s10 }
 0x31c   :  { %v5516_v30 = vpop.permute.xlu0 %1294  ;;  %v5518_v26 = vpop.permute.xlu1 %1296 }
 0x31d   :  { %9696 = vst [vmem:[#allocation230_spill] sm:$0xff] %v5516_v30  ;;  %9697 = vst [vmem:[#allocation231_spill] sm:$0xff] %v5518_v26 }
 0x31e   :  { %1556 = vrot.lane.b32.xlu0 %v5306_v6, %s4159_s10  ;;  %1558 = vrot.lane.b32.xlu1 %v5310_v8, %s4159_s10 }
 0x320   :  { %v5524_v2 = vpop.permute.xlu0 %1298  ;;  %v5526_v29 = vpop.permute.xlu1 %1300 }
 0x321   :  { %9698 = vst [vmem:[#allocation232_spill] sm:$0xff] %v5524_v2  ;;  %9699 = vst [vmem:[#allocation233_spill] sm:$0xff] %v5526_v29 }
 0x322   :  { %1564 = vrot.lane.b32.xlu0 %v5294_v25, %s4160_s11  ;;  %1566 = vrot.lane.b32.xlu1 %v5298_v21, %s4160_s11 }
 0x324   :  { %v5532_v4 = vpop.permute.xlu0 %1355  ;;  %v5534_v30 = vpop.permute.xlu1 %1357 }
 0x325   :  { %9700 = vst [vmem:[#allocation234_spill] sm:$0xff] %v5532_v4  ;;  %9701 = vst [vmem:[#allocation235_spill] sm:$0xff] %v5534_v30 }
 0x326   :  { %1568 = vrot.lane.b32.xlu0 %v5306_v6, %s4160_s11  ;;  %1570 = vrot.lane.b32.xlu1 %v5310_v8, %s4160_s11 }
 0x328   :  { %v5540_v26 = vpop.permute.xlu0 %1359  ;;  %v5542_v2 = vpop.permute.xlu1 %1361 }
 0x329   :  { %9702 = vst [vmem:[#allocation236_spill] sm:$0xff] %v5540_v26  ;;  %9703 = vst [vmem:[#allocation237_spill] sm:$0xff] %v5542_v2 }
 0x32a   :  { %1617 = vrot.lane.b32.xlu0 %v5294_v25, %s4161_s12  ;;  %1619 = vrot.lane.b32.xlu1 %v5298_v21, %s4161_s12 }
 0x32c   :  { %v5548_v29 = vpop.permute.xlu0 %1367  ;;  %v5550_v4 = vpop.permute.xlu1 %1369 }
 0x32d   :  { %9704 = vst [vmem:[#allocation238_spill] sm:$0xff] %v5548_v29  ;;  %9705 = vst [vmem:[#allocation239_spill] sm:$0xff] %v5550_v4 }
 0x32e   :  { %1621 = vrot.lane.b32.xlu0 %v5306_v6, %s4161_s12  ;;  %1623 = vrot.lane.b32.xlu1 %v5310_v8, %s4161_s12 }
 0x330   :  { %v5556_v30 = vpop.permute.xlu0 %1371  ;;  %v5558_v26 = vpop.permute.xlu1 %1373 }
 0x331   :  { %9706 = vst [vmem:[#allocation240_spill] sm:$0xff] %v5556_v30  ;;  %9707 = vst [vmem:[#allocation241_spill] sm:$0xff] %v5558_v26 }
 0x332   :  { %1629 = vrot.lane.b32.xlu0 %v5294_v25, %s4162_s13  ;;  %1631 = vrot.lane.b32.xlu1 %v5298_v21, %s4162_s13 }
 0x334   :  { %v5564_v2 = vpop.permute.xlu0 %1379  ;;  %v5566_v29 = vpop.permute.xlu1 %1381 }
 0x335   :  { %9708 = vst [vmem:[#allocation242_spill] sm:$0xff] %v5564_v2  ;;  %9709 = vst [vmem:[#allocation243_spill] sm:$0xff] %v5566_v29 }
 0x336   :  { %1633 = vrot.lane.b32.xlu0 %v5306_v6, %s4162_s13  ;;  %1635 = vrot.lane.b32.xlu1 %v5310_v8, %s4162_s13 }
 0x338   :  { %v5572_v4 = vpop.permute.xlu0 %1383  ;;  %v5574_v30 = vpop.permute.xlu1 %1385 }
 0x339   :  { %9710 = vst [vmem:[#allocation244_spill] sm:$0xff] %v5572_v4  ;;  %9711 = vst [vmem:[#allocation245_spill] sm:$0xff] %v5574_v30 }
 0x33a   :  { %1641 = vrot.lane.b32.xlu0 %v5294_v25, %s4163_s14  ;;  %1643 = vrot.lane.b32.xlu1 %v5298_v21, %s4163_s14 }
 0x33c   :  { %v5580_v26 = vpop.permute.xlu0 %1391  ;;  %v5582_v2 = vpop.permute.xlu1 %1393 }
 0x33d   :  { %9712 = vst [vmem:[#allocation246_spill] sm:$0xff] %v5580_v26  ;;  %9713 = vst [vmem:[#allocation247_spill] sm:$0xff] %v5582_v2 }
 0x33e   :  { %1645 = vrot.lane.b32.xlu0 %v5306_v6, %s4163_s14  ;;  %1647 = vrot.lane.b32.xlu1 %v5310_v8, %s4163_s14 }
 0x340   :  { %v5588_v29 = vpop.permute.xlu0 %1395  ;;  %v5590_v4 = vpop.permute.xlu1 %1397 }
 0x341   :  { %9714 = vst [vmem:[#allocation248_spill] sm:$0xff] %v5588_v29  ;;  %9715 = vst [vmem:[#allocation249_spill] sm:$0xff] %v5590_v4 }
 0x342   :  { %1653 = vrot.lane.b32.xlu0 %v5294_v25, %s4164_s15  ;;  %1655 = vrot.lane.b32.xlu1 %v5298_v21, %s4164_s15 }
 0x344   :  { %v5596_v30 = vpop.permute.xlu0 %1403  ;;  %v5598_v26 = vpop.permute.xlu1 %1405 }
 0x345   :  { %9716 = vst [vmem:[#allocation250_spill] sm:$0xff] %v5596_v30  ;;  %9717 = vst [vmem:[#allocation251_spill] sm:$0xff] %v5598_v26 }
 0x346   :  { %1657 = vrot.lane.b32.xlu0 %v5306_v6, %s4164_s15  ;;  %1659 = vrot.lane.b32.xlu1 %v5310_v8, %s4164_s15 }
 0x348   :  { %v5604_v2 = vpop.permute.xlu0 %1407  ;;  %v5606_v29 = vpop.permute.xlu1 %1409 }
 0x349   :  { %9718 = vst [vmem:[#allocation252_spill] sm:$0xff] %v5604_v2  ;;  %9719 = vst [vmem:[#allocation253_spill] sm:$0xff] %v5606_v29 }
 0x34a   :  { %1665 = vrot.lane.b32.xlu0 %v5294_v25, %s4165_s16  ;;  %1667 = vrot.lane.b32.xlu1 %v5298_v21, %s4165_s16 }
 0x34c   :  { %v5612_v4 = vpop.permute.xlu0 %1415  ;;  %v5614_v30 = vpop.permute.xlu1 %1417 }
 0x34d   :  { %9720 = vst [vmem:[#allocation254_spill] sm:$0xff] %v5612_v4  ;;  %9721 = vst [vmem:[#allocation255_spill] sm:$0xff] %v5614_v30 }
 0x34e   :  { %1669 = vrot.lane.b32.xlu0 %v5306_v6, %s4165_s16  ;;  %1671 = vrot.lane.b32.xlu1 %v5310_v8, %s4165_s16 }
 0x350   :  { %v5620_v26 = vpop.permute.xlu0 %1419  ;;  %v5622_v2 = vpop.permute.xlu1 %1421 }
 0x351   :  { %9722 = vst [vmem:[#allocation256_spill] sm:$0xff] %v5620_v26  ;;  %9723 = vst [vmem:[#allocation257_spill] sm:$0xff] %v5622_v2 }
 0x352   :  { %1677 = vrot.lane.b32.xlu0 %v5294_v25, %s4166_s17  ;;  %1679 = vrot.lane.b32.xlu1 %v5298_v21, %s4166_s17 }
 0x354   :  { %v5628_v29 = vpop.permute.xlu0 %1427  ;;  %v5630_v4 = vpop.permute.xlu1 %1429 }
 0x355   :  { %9724 = vst [vmem:[#allocation258_spill] sm:$0xff] %v5628_v29  ;;  %9725 = vst [vmem:[#allocation259_spill] sm:$0xff] %v5630_v4 }
 0x356   :  { %1681 = vrot.lane.b32.xlu0 %v5306_v6, %s4166_s17  ;;  %1683 = vrot.lane.b32.xlu1 %v5310_v8, %s4166_s17 }
 0x358   :  { %v5636_v30 = vpop.permute.xlu0 %1431  ;;  %v5638_v26 = vpop.permute.xlu1 %1433 }
 0x359   :  { %9726 = vst [vmem:[#allocation260_spill] sm:$0xff] %v5636_v30  ;;  %9727 = vst [vmem:[#allocation261_spill] sm:$0xff] %v5638_v26 }
 0x35a   :  { %1689 = vrot.lane.b32.xlu0 %v5294_v25, %s4167_s18  ;;  %1691 = vrot.lane.b32.xlu1 %v5298_v21, %s4167_s18 }
 0x35c   :  { %v5644_v2 = vpop.permute.xlu0 %1480  ;;  %v5646_v29 = vpop.permute.xlu1 %1482 }
 0x35d   :  { %9728 = vst [vmem:[#allocation262_spill] sm:$0xff] %v5644_v2  ;;  %9729 = vst [vmem:[#allocation263_spill] sm:$0xff] %v5646_v29 }
 0x35e   :  { %1693 = vrot.lane.b32.xlu0 %v5306_v6, %s4167_s18  ;;  %1695 = vrot.lane.b32.xlu1 %v5310_v8, %s4167_s18 }
 0x360   :  { %v5652_v4 = vpop.permute.xlu0 %1484  ;;  %v5654_v30 = vpop.permute.xlu1 %1486 }
 0x361   :  { %9730 = vst [vmem:[#allocation264_spill] sm:$0xff] %v5652_v4  ;;  %9731 = vst [vmem:[#allocation265_spill] sm:$0xff] %v5654_v30  ;;  %v5670_v4 = vld [vmem:[#allocation2 + $0x19] sm:$0xff] }
 0x362   :  { %1701 = vrot.lane.b32.xlu0 %v5294_v25, %s4168_s19  ;;  %1703 = vrot.lane.b32.xlu1 %v5298_v21, %s4168_s19  ;;  %v5674_v25 = vld [vmem:[#allocation2 + $0x21] sm:$0xff] }
 0x364   :  { %v5660_v26 = vpop.permute.xlu0 %1492  ;;  %v5662_v2 = vpop.permute.xlu1 %1494 }
 0x365   :  { %9732 = vst [vmem:[#allocation266_spill] sm:$0xff] %v5660_v26  ;;  %9733 = vst [vmem:[#allocation267_spill] sm:$0xff] %v5662_v2 }
 0x366   :  { %1705 = vrot.lane.b32.xlu0 %v5306_v6, %s4168_s19  ;;  %1707 = vrot.lane.b32.xlu1 %v5310_v8, %s4168_s19  ;;  %v5682_v6 = vld [vmem:[#allocation2 + $0x61] sm:$0xff]  ;;  %v5686_v8 = vld [vmem:[#allocation2 + $0x69] sm:$0xff] }
 0x368   :  { %v5668_v29 = vpop.permute.xlu0 %1496  ;;  %v5672_v30 = vpop.permute.xlu1 %1498 }
 0x369   :  { %9734 = vst [vmem:[#allocation268_spill] sm:$0xff] %v5668_v29  ;;  %9735 = vst [vmem:[#allocation269_spill] sm:$0xff] %v5672_v30 }
 0x36a   :  { %1762 = vrot.lane.b32.xlu0 %v5670_v4, %s4147_s0  ;;  %1764 = vrot.lane.b32.xlu1 %v5674_v25, %s4147_s0 }
 0x36c   :  { %v5680_v21 = vpop.permute.xlu0 %1504  ;;  %v5684_v26 = vpop.permute.xlu1 %1506 }
 0x36d   :  { %9736 = vst [vmem:[#allocation270_spill] sm:$0xff] %v5680_v21  ;;  %9737 = vst [vmem:[#allocation271_spill] sm:$0xff] %v5684_v26 }
 0x36e   :  { %1766 = vrot.lane.b32.xlu0 %v5682_v6, %s4147_s0  ;;  %1768 = vrot.lane.b32.xlu1 %v5686_v8, %s4147_s0 }
 0x370   :  { %v5692_v29 = vpop.permute.xlu0 %1508  ;;  %v5694_v30 = vpop.permute.xlu1 %1510 }
 0x371   :  { %9738 = vst [vmem:[#allocation272_spill] sm:$0xff] %v5692_v29  ;;  %9739 = vst [vmem:[#allocation273_spill] sm:$0xff] %v5694_v30 }
 0x372   :  { %1774 = vrot.lane.b32.xlu0 %v5670_v4, %s4148_s22  ;;  %1776 = vrot.lane.b32.xlu1 %v5674_v25, %s4148_s22 }
 0x374   :  { %v5700_v21 = vpop.permute.xlu0 %1516  ;;  %v5702_v26 = vpop.permute.xlu1 %1518 }
 0x375   :  { %9740 = vst [vmem:[#allocation274_spill] sm:$0xff] %v5700_v21  ;;  %9741 = vst [vmem:[#allocation275_spill] sm:$0xff] %v5702_v26 }
 0x376   :  { %1778 = vrot.lane.b32.xlu0 %v5682_v6, %s4148_s22  ;;  %1780 = vrot.lane.b32.xlu1 %v5686_v8, %s4148_s22 }
 0x378   :  { %v5708_v2 = vpop.permute.xlu0 %1520  ;;  %v5710_v29 = vpop.permute.xlu1 %1522 }
 0x379   :  { %9742 = vst [vmem:[#allocation276_spill] sm:$0xff] %v5708_v2  ;;  %9743 = vst [vmem:[#allocation277_spill] sm:$0xff] %v5710_v29 }
 0x37a   :  { %1786 = vrot.lane.b32.xlu0 %v5670_v4, %s4149_s23  ;;  %1788 = vrot.lane.b32.xlu1 %v5674_v25, %s4149_s23 }
 0x37c   :  { %v5716_v30 = vpop.permute.xlu0 %1528  ;;  %v5718_v21 = vpop.permute.xlu1 %1530 }
 0x37d   :  { %9744 = vst [vmem:[#allocation278_spill] sm:$0xff] %v5716_v30  ;;  %9745 = vst [vmem:[#allocation279_spill] sm:$0xff] %v5718_v21 }
 0x37e   :  { %1790 = vrot.lane.b32.xlu0 %v5682_v6, %s4149_s23  ;;  %1792 = vrot.lane.b32.xlu1 %v5686_v8, %s4149_s23 }
 0x380   :  { %v5724_v26 = vpop.permute.xlu0 %1532  ;;  %v5726_v2 = vpop.permute.xlu1 %1534 }
 0x381   :  { %9746 = vst [vmem:[#allocation280_spill] sm:$0xff] %v5724_v26  ;;  %9747 = vst [vmem:[#allocation281_spill] sm:$0xff] %v5726_v2 }
 0x382   :  { %1798 = vrot.lane.b32.xlu0 %v5670_v4, %s4150_s24  ;;  %1800 = vrot.lane.b32.xlu1 %v5674_v25, %s4150_s24 }
 0x384   :  { %v5732_v29 = vpop.permute.xlu0 %1540  ;;  %v5734_v30 = vpop.permute.xlu1 %1542 }
 0x385   :  { %9748 = vst [vmem:[#allocation282_spill] sm:$0xff] %v5732_v29  ;;  %9749 = vst [vmem:[#allocation283_spill] sm:$0xff] %v5734_v30 }
 0x386   :  { %1802 = vrot.lane.b32.xlu0 %v5682_v6, %s4150_s24  ;;  %1804 = vrot.lane.b32.xlu1 %v5686_v8, %s4150_s24 }
 0x388   :  { %v5740_v21 = vpop.permute.xlu0 %1544  ;;  %v5742_v26 = vpop.permute.xlu1 %1546 }
 0x389   :  { %9750 = vst [vmem:[#allocation284_spill] sm:$0xff] %v5740_v21  ;;  %9751 = vst [vmem:[#allocation285_spill] sm:$0xff] %v5742_v26 }
 0x38a   :  { %1810 = vrot.lane.b32.xlu0 %v5670_v4, %s4151_s26  ;;  %1812 = vrot.lane.b32.xlu1 %v5674_v25, %s4151_s26 }
 0x38c   :  { %v5748_v2 = vpop.permute.xlu0 %1552  ;;  %v5750_v29 = vpop.permute.xlu1 %1554 }
 0x38d   :  { %9752 = vst [vmem:[#allocation286_spill] sm:$0xff] %v5748_v2  ;;  %9753 = vst [vmem:[#allocation287_spill] sm:$0xff] %v5750_v29 }
 0x38e   :  { %1814 = vrot.lane.b32.xlu0 %v5682_v6, %s4151_s26  ;;  %1816 = vrot.lane.b32.xlu1 %v5686_v8, %s4151_s26 }
 0x390   :  { %v5756_v30 = vpop.permute.xlu0 %1556  ;;  %v5758_v21 = vpop.permute.xlu1 %1558 }
 0x391   :  { %9754 = vst [vmem:[#allocation288_spill] sm:$0xff] %v5756_v30  ;;  %9755 = vst [vmem:[#allocation289_spill] sm:$0xff] %v5758_v21 }
 0x392   :  { %1822 = vrot.lane.b32.xlu0 %v5670_v4, %s4152_s27  ;;  %1824 = vrot.lane.b32.xlu1 %v5674_v25, %s4152_s27 }
 0x394   :  { %v5764_v26 = vpop.permute.xlu0 %1564  ;;  %v5766_v2 = vpop.permute.xlu1 %1566 }
 0x395   :  { %9756 = vst [vmem:[#allocation290_spill] sm:$0xff] %v5764_v26  ;;  %9757 = vst [vmem:[#allocation291_spill] sm:$0xff] %v5766_v2 }
 0x396   :  { %1826 = vrot.lane.b32.xlu0 %v5682_v6, %s4152_s27  ;;  %1828 = vrot.lane.b32.xlu1 %v5686_v8, %s4152_s27 }
 0x398   :  { %v5772_v29 = vpop.permute.xlu0 %1568  ;;  %v5774_v30 = vpop.permute.xlu1 %1570 }
 0x399   :  { %9758 = vst [vmem:[#allocation292_spill] sm:$0xff] %v5772_v29  ;;  %9759 = vst [vmem:[#allocation293_spill] sm:$0xff] %v5774_v30 }
 0x39a   :  { %1834 = vrot.lane.b32.xlu0 %v5670_v4, %s4153_s28  ;;  %1836 = vrot.lane.b32.xlu1 %v5674_v25, %s4153_s28 }
 0x39c   :  { %v5780_v21 = vpop.permute.xlu0 %1617  ;;  %v5782_v26 = vpop.permute.xlu1 %1619 }
 0x39d   :  { %9760 = vst [vmem:[#allocation294_spill] sm:$0xff] %v5780_v21  ;;  %9761 = vst [vmem:[#allocation295_spill] sm:$0xff] %v5782_v26 }
 0x39e   :  { %1838 = vrot.lane.b32.xlu0 %v5682_v6, %s4153_s28  ;;  %1840 = vrot.lane.b32.xlu1 %v5686_v8, %s4153_s28 }
 0x3a0   :  { %v5788_v2 = vpop.permute.xlu0 %1621  ;;  %v5790_v29 = vpop.permute.xlu1 %1623 }
 0x3a1   :  { %9762 = vst [vmem:[#allocation296_spill] sm:$0xff] %v5788_v2  ;;  %9763 = vst [vmem:[#allocation297_spill] sm:$0xff] %v5790_v29 }
 0x3a2   :  { %1887 = vrot.lane.b32.xlu0 %v5670_v4, %s4143_s25  ;;  %1889 = vrot.lane.b32.xlu1 %v5674_v25, %s4143_s25 }
 0x3a4   :  { %v5796_v30 = vpop.permute.xlu0 %1629  ;;  %v5798_v21 = vpop.permute.xlu1 %1631 }
 0x3a5   :  { %9764 = vst [vmem:[#allocation298_spill] sm:$0xff] %v5796_v30  ;;  %9765 = vst [vmem:[#allocation299_spill] sm:$0xff] %v5798_v21 }
 0x3a6   :  { %1891 = vrot.lane.b32.xlu0 %v5682_v6, %s4143_s25  ;;  %1893 = vrot.lane.b32.xlu1 %v5686_v8, %s4143_s25 }
 0x3a8   :  { %v5804_v26 = vpop.permute.xlu0 %1633  ;;  %v5806_v2 = vpop.permute.xlu1 %1635 }
 0x3a9   :  { %9766 = vst [vmem:[#allocation300_spill] sm:$0xff] %v5804_v26  ;;  %9767 = vst [vmem:[#allocation301_spill] sm:$0xff] %v5806_v2 }
 0x3aa   :  { %1899 = vrot.lane.b32.xlu0 %v5670_v4, %s4154_s29  ;;  %1901 = vrot.lane.b32.xlu1 %v5674_v25, %s4154_s29 }
 0x3ac   :  { %v5812_v29 = vpop.permute.xlu0 %1641  ;;  %v5814_v30 = vpop.permute.xlu1 %1643 }
 0x3ad   :  { %9768 = vst [vmem:[#allocation302_spill] sm:$0xff] %v5812_v29  ;;  %9769 = vst [vmem:[#allocation303_spill] sm:$0xff] %v5814_v30 }
 0x3ae   :  { %1903 = vrot.lane.b32.xlu0 %v5682_v6, %s4154_s29  ;;  %1905 = vrot.lane.b32.xlu1 %v5686_v8, %s4154_s29 }
 0x3b0   :  { %v5820_v21 = vpop.permute.xlu0 %1645  ;;  %v5822_v26 = vpop.permute.xlu1 %1647 }
 0x3b1   :  { %9770 = vst [vmem:[#allocation304_spill] sm:$0xff] %v5820_v21  ;;  %9771 = vst [vmem:[#allocation305_spill] sm:$0xff] %v5822_v26 }
 0x3b2   :  { %1911 = vrot.lane.b32.xlu0 %v5670_v4, %s4155_s30  ;;  %1913 = vrot.lane.b32.xlu1 %v5674_v25, %s4155_s30 }
 0x3b4   :  { %v5828_v2 = vpop.permute.xlu0 %1653  ;;  %v5830_v29 = vpop.permute.xlu1 %1655 }
 0x3b5   :  { %9772 = vst [vmem:[#allocation306_spill] sm:$0xff] %v5828_v2  ;;  %9773 = vst [vmem:[#allocation307_spill] sm:$0xff] %v5830_v29 }
 0x3b6   :  { %1915 = vrot.lane.b32.xlu0 %v5682_v6, %s4155_s30  ;;  %1917 = vrot.lane.b32.xlu1 %v5686_v8, %s4155_s30 }
 0x3b8   :  { %v5836_v30 = vpop.permute.xlu0 %1657  ;;  %v5838_v21 = vpop.permute.xlu1 %1659 }
 0x3b9   :  { %9774 = vst [vmem:[#allocation308_spill] sm:$0xff] %v5836_v30  ;;  %9775 = vst [vmem:[#allocation309_spill] sm:$0xff] %v5838_v21 }
 0x3ba   :  { %1923 = vrot.lane.b32.xlu0 %v5670_v4, %s4156_s7  ;;  %1925 = vrot.lane.b32.xlu1 %v5674_v25, %s4156_s7 }
 0x3bc   :  { %v5844_v26 = vpop.permute.xlu0 %1665  ;;  %v5846_v2 = vpop.permute.xlu1 %1667 }
 0x3bd   :  { %9776 = vst [vmem:[#allocation310_spill] sm:$0xff] %v5844_v26  ;;  %9777 = vst [vmem:[#allocation311_spill] sm:$0xff] %v5846_v2 }
 0x3be   :  { %1927 = vrot.lane.b32.xlu0 %v5682_v6, %s4156_s7  ;;  %1929 = vrot.lane.b32.xlu1 %v5686_v8, %s4156_s7 }
 0x3c0   :  { %v5852_v29 = vpop.permute.xlu0 %1669  ;;  %v5854_v30 = vpop.permute.xlu1 %1671 }
 0x3c1   :  { %9778 = vst [vmem:[#allocation312_spill] sm:$0xff] %v5852_v29  ;;  %9779 = vst [vmem:[#allocation313_spill] sm:$0xff] %v5854_v30 }
 0x3c2   :  { %1935 = vrot.lane.b32.xlu0 %v5670_v4, %s4157_s8  ;;  %1937 = vrot.lane.b32.xlu1 %v5674_v25, %s4157_s8 }
 0x3c4   :  { %v5860_v21 = vpop.permute.xlu0 %1677  ;;  %v5862_v26 = vpop.permute.xlu1 %1679 }
 0x3c5   :  { %9780 = vst [vmem:[#allocation314_spill] sm:$0xff] %v5860_v21  ;;  %9781 = vst [vmem:[#allocation315_spill] sm:$0xff] %v5862_v26 }
 0x3c6   :  { %1939 = vrot.lane.b32.xlu0 %v5682_v6, %s4157_s8  ;;  %1941 = vrot.lane.b32.xlu1 %v5686_v8, %s4157_s8 }
 0x3c8   :  { %v5868_v2 = vpop.permute.xlu0 %1681  ;;  %v5870_v29 = vpop.permute.xlu1 %1683 }
 0x3c9   :  { %9782 = vst [vmem:[#allocation316_spill] sm:$0xff] %v5868_v2  ;;  %9783 = vst [vmem:[#allocation317_spill] sm:$0xff] %v5870_v29 }
 0x3ca   :  { %1947 = vrot.lane.b32.xlu0 %v5670_v4, %s4158_s9  ;;  %1949 = vrot.lane.b32.xlu1 %v5674_v25, %s4158_s9 }
 0x3cc   :  { %v5876_v30 = vpop.permute.xlu0 %1689  ;;  %v5878_v21 = vpop.permute.xlu1 %1691 }
 0x3cd   :  { %9784 = vst [vmem:[#allocation318_spill] sm:$0xff] %v5876_v30  ;;  %9785 = vst [vmem:[#allocation319_spill] sm:$0xff] %v5878_v21 }
 0x3ce   :  { %1951 = vrot.lane.b32.xlu0 %v5682_v6, %s4158_s9  ;;  %1953 = vrot.lane.b32.xlu1 %v5686_v8, %s4158_s9 }
 0x3d0   :  { %v5884_v26 = vpop.permute.xlu0 %1693  ;;  %v5886_v2 = vpop.permute.xlu1 %1695 }
 0x3d1   :  { %9786 = vst [vmem:[#allocation320_spill] sm:$0xff] %v5884_v26  ;;  %9787 = vst [vmem:[#allocation321_spill] sm:$0xff] %v5886_v2 }
 0x3d2   :  { %1959 = vrot.lane.b32.xlu0 %v5670_v4, %s4159_s10  ;;  %1961 = vrot.lane.b32.xlu1 %v5674_v25, %s4159_s10 }
 0x3d4   :  { %v5892_v29 = vpop.permute.xlu0 %1701  ;;  %v5894_v30 = vpop.permute.xlu1 %1703 }
 0x3d5   :  { %9788 = vst [vmem:[#allocation322_spill] sm:$0xff] %v5892_v29  ;;  %9789 = vst [vmem:[#allocation323_spill] sm:$0xff] %v5894_v30 }
 0x3d6   :  { %1963 = vrot.lane.b32.xlu0 %v5682_v6, %s4159_s10  ;;  %1965 = vrot.lane.b32.xlu1 %v5686_v8, %s4159_s10 }
 0x3d8   :  { %v5900_v21 = vpop.permute.xlu0 %1705  ;;  %v5902_v26 = vpop.permute.xlu1 %1707 }
 0x3d9   :  { %9790 = vst [vmem:[#allocation324_spill] sm:$0xff] %v5900_v21  ;;  %9791 = vst [vmem:[#allocation325_spill] sm:$0xff] %v5902_v26 }
 0x3da   :  { %1971 = vrot.lane.b32.xlu0 %v5670_v4, %s4160_s11  ;;  %1973 = vrot.lane.b32.xlu1 %v5674_v25, %s4160_s11 }
 0x3dc   :  { %v5908_v2 = vpop.permute.xlu0 %1762  ;;  %v5910_v29 = vpop.permute.xlu1 %1764 }
 0x3dd   :  { %9792 = vst [vmem:[#allocation326_spill] sm:$0xff] %v5908_v2  ;;  %9793 = vst [vmem:[#allocation327_spill] sm:$0xff] %v5910_v29 }
 0x3de   :  { %1975 = vrot.lane.b32.xlu0 %v5682_v6, %s4160_s11  ;;  %1977 = vrot.lane.b32.xlu1 %v5686_v8, %s4160_s11 }
 0x3e0   :  { %v5916_v30 = vpop.permute.xlu0 %1766  ;;  %v5918_v21 = vpop.permute.xlu1 %1768 }
 0x3e1   :  { %9794 = vst [vmem:[#allocation328_spill] sm:$0xff] %v5916_v30  ;;  %9795 = vst [vmem:[#allocation329_spill] sm:$0xff] %v5918_v21 }
 0x3e2   :  { %2024 = vrot.lane.b32.xlu0 %v5670_v4, %s4161_s12  ;;  %2026 = vrot.lane.b32.xlu1 %v5674_v25, %s4161_s12 }
 0x3e4   :  { %v5924_v26 = vpop.permute.xlu0 %1774  ;;  %v5926_v2 = vpop.permute.xlu1 %1776 }
 0x3e5   :  { %9796 = vst [vmem:[#allocation330_spill] sm:$0xff] %v5924_v26  ;;  %9797 = vst [vmem:[#allocation331_spill] sm:$0xff] %v5926_v2 }
 0x3e6   :  { %2028 = vrot.lane.b32.xlu0 %v5682_v6, %s4161_s12  ;;  %2030 = vrot.lane.b32.xlu1 %v5686_v8, %s4161_s12 }
 0x3e8   :  { %v5932_v29 = vpop.permute.xlu0 %1778  ;;  %v5934_v30 = vpop.permute.xlu1 %1780 }
 0x3e9   :  { %9798 = vst [vmem:[#allocation332_spill] sm:$0xff] %v5932_v29  ;;  %9799 = vst [vmem:[#allocation333_spill] sm:$0xff] %v5934_v30 }
 0x3ea   :  { %2036 = vrot.lane.b32.xlu0 %v5670_v4, %s4162_s13  ;;  %2038 = vrot.lane.b32.xlu1 %v5674_v25, %s4162_s13 }
 0x3ec   :  { %v5940_v21 = vpop.permute.xlu0 %1786  ;;  %v5942_v26 = vpop.permute.xlu1 %1788 }
 0x3ed   :  { %9800 = vst [vmem:[#allocation334_spill] sm:$0xff] %v5940_v21  ;;  %9801 = vst [vmem:[#allocation335_spill] sm:$0xff] %v5942_v26 }
 0x3ee   :  { %2040 = vrot.lane.b32.xlu0 %v5682_v6, %s4162_s13  ;;  %2042 = vrot.lane.b32.xlu1 %v5686_v8, %s4162_s13 }
 0x3f0   :  { %v5948_v2 = vpop.permute.xlu0 %1790  ;;  %v5950_v29 = vpop.permute.xlu1 %1792 }
 0x3f1   :  { %9802 = vst [vmem:[#allocation336_spill] sm:$0xff] %v5948_v2  ;;  %9803 = vst [vmem:[#allocation337_spill] sm:$0xff] %v5950_v29 }
 0x3f2   :  { %2048 = vrot.lane.b32.xlu0 %v5670_v4, %s4163_s14  ;;  %2050 = vrot.lane.b32.xlu1 %v5674_v25, %s4163_s14 }
 0x3f4   :  { %v5956_v30 = vpop.permute.xlu0 %1798  ;;  %v5958_v21 = vpop.permute.xlu1 %1800 }
 0x3f5   :  { %9804 = vst [vmem:[#allocation338_spill] sm:$0xff] %v5956_v30  ;;  %9805 = vst [vmem:[#allocation339_spill] sm:$0xff] %v5958_v21 }
 0x3f6   :  { %2052 = vrot.lane.b32.xlu0 %v5682_v6, %s4163_s14  ;;  %2054 = vrot.lane.b32.xlu1 %v5686_v8, %s4163_s14 }
 0x3f8   :  { %v5964_v26 = vpop.permute.xlu0 %1802  ;;  %v5966_v2 = vpop.permute.xlu1 %1804 }
 0x3f9   :  { %9806 = vst [vmem:[#allocation340_spill] sm:$0xff] %v5964_v26  ;;  %9807 = vst [vmem:[#allocation341_spill] sm:$0xff] %v5966_v2 }
 0x3fa   :  { %2060 = vrot.lane.b32.xlu0 %v5670_v4, %s4164_s15  ;;  %2062 = vrot.lane.b32.xlu1 %v5674_v25, %s4164_s15 }
 0x3fc   :  { %v5972_v29 = vpop.permute.xlu0 %1810  ;;  %v5974_v30 = vpop.permute.xlu1 %1812 }
 0x3fd   :  { %9808 = vst [vmem:[#allocation342_spill] sm:$0xff] %v5972_v29  ;;  %9809 = vst [vmem:[#allocation343_spill] sm:$0xff] %v5974_v30 }
 0x3fe   :  { %2064 = vrot.lane.b32.xlu0 %v5682_v6, %s4164_s15  ;;  %2066 = vrot.lane.b32.xlu1 %v5686_v8, %s4164_s15 }
 0x400   :  { %v5980_v21 = vpop.permute.xlu0 %1814  ;;  %v5982_v26 = vpop.permute.xlu1 %1816 }
 0x401   :  { %9810 = vst [vmem:[#allocation344_spill] sm:$0xff] %v5980_v21  ;;  %9811 = vst [vmem:[#allocation345_spill] sm:$0xff] %v5982_v26 }
 0x402   :  { %2072 = vrot.lane.b32.xlu0 %v5670_v4, %s4165_s16  ;;  %2074 = vrot.lane.b32.xlu1 %v5674_v25, %s4165_s16 }
 0x404   :  { %v5988_v2 = vpop.permute.xlu0 %1822  ;;  %v5990_v29 = vpop.permute.xlu1 %1824 }
 0x405   :  { %9812 = vst [vmem:[#allocation346_spill] sm:$0xff] %v5988_v2  ;;  %9813 = vst [vmem:[#allocation347_spill] sm:$0xff] %v5990_v29 }
 0x406   :  { %2076 = vrot.lane.b32.xlu0 %v5682_v6, %s4165_s16  ;;  %2078 = vrot.lane.b32.xlu1 %v5686_v8, %s4165_s16 }
 0x408   :  { %v5996_v30 = vpop.permute.xlu0 %1826  ;;  %v5998_v21 = vpop.permute.xlu1 %1828 }
 0x409   :  { %9814 = vst [vmem:[#allocation348_spill] sm:$0xff] %v5996_v30  ;;  %9815 = vst [vmem:[#allocation349_spill] sm:$0xff] %v5998_v21 }
 0x40a   :  { %2084 = vrot.lane.b32.xlu0 %v5670_v4, %s4166_s17  ;;  %2086 = vrot.lane.b32.xlu1 %v5674_v25, %s4166_s17 }
 0x40c   :  { %v6004_v26 = vpop.permute.xlu0 %1834  ;;  %v6006_v2 = vpop.permute.xlu1 %1836 }
 0x40d   :  { %9816 = vst [vmem:[#allocation350_spill] sm:$0xff] %v6004_v26  ;;  %9817 = vst [vmem:[#allocation351_spill] sm:$0xff] %v6006_v2 }
 0x40e   :  { %2088 = vrot.lane.b32.xlu0 %v5682_v6, %s4166_s17  ;;  %2090 = vrot.lane.b32.xlu1 %v5686_v8, %s4166_s17 }
 0x410   :  { %v6012_v29 = vpop.permute.xlu0 %1838  ;;  %v6014_v30 = vpop.permute.xlu1 %1840 }
 0x411   :  { %9818 = vst [vmem:[#allocation352_spill] sm:$0xff] %v6012_v29  ;;  %9819 = vst [vmem:[#allocation353_spill] sm:$0xff] %v6014_v30 }
 0x412   :  { %2096 = vrot.lane.b32.xlu0 %v5670_v4, %s4167_s18  ;;  %2098 = vrot.lane.b32.xlu1 %v5674_v25, %s4167_s18 }
 0x414   :  { %v6020_v21 = vpop.permute.xlu0 %1887  ;;  %v6022_v26 = vpop.permute.xlu1 %1889 }
 0x415   :  { %9820 = vst [vmem:[#allocation354_spill] sm:$0xff] %v6020_v21  ;;  %9821 = vst [vmem:[#allocation355_spill] sm:$0xff] %v6022_v26 }
 0x416   :  { %2100 = vrot.lane.b32.xlu0 %v5682_v6, %s4167_s18  ;;  %2102 = vrot.lane.b32.xlu1 %v5686_v8, %s4167_s18 }
 0x418   :  { %v6028_v2 = vpop.permute.xlu0 %1891  ;;  %v6030_v29 = vpop.permute.xlu1 %1893 }
 0x419   :  { %9822 = vst [vmem:[#allocation356_spill] sm:$0xff] %v6028_v2  ;;  %9823 = vst [vmem:[#allocation357_spill] sm:$0xff] %v6030_v29  ;;  %v6046_v2 = vld [vmem:[#allocation2 + $0x1a] sm:$0xff] }
 0x41a   :  { %2108 = vrot.lane.b32.xlu0 %v5670_v4, %s4168_s19  ;;  %2110 = vrot.lane.b32.xlu1 %v5674_v25, %s4168_s19  ;;  %v6050_v4 = vld [vmem:[#allocation2 + $0x22] sm:$0xff] }
 0x41c   :  { %v6036_v30 = vpop.permute.xlu0 %1899  ;;  %v6038_v21 = vpop.permute.xlu1 %1901 }
 0x41d   :  { %9824 = vst [vmem:[#allocation358_spill] sm:$0xff] %v6036_v30  ;;  %9825 = vst [vmem:[#allocation359_spill] sm:$0xff] %v6038_v21 }
 0x41e   :  { %2112 = vrot.lane.b32.xlu0 %v5682_v6, %s4168_s19  ;;  %2114 = vrot.lane.b32.xlu1 %v5686_v8, %s4168_s19  ;;  %v6058_v6 = vld [vmem:[#allocation2 + $0x62] sm:$0xff]  ;;  %v6062_v8 = vld [vmem:[#allocation2 + $0x6a] sm:$0xff] }
 0x420   :  { %v6044_v26 = vpop.permute.xlu0 %1903  ;;  %v6048_v29 = vpop.permute.xlu1 %1905 }
 0x421   :  { %9826 = vst [vmem:[#allocation360_spill] sm:$0xff] %v6044_v26  ;;  %9827 = vst [vmem:[#allocation361_spill] sm:$0xff] %v6048_v29 }
 0x422   :  { %2169 = vrot.lane.b32.xlu0 %v6046_v2, %s4147_s0  ;;  %2171 = vrot.lane.b32.xlu1 %v6050_v4, %s4147_s0 }
 0x424   :  { %v6056_v25 = vpop.permute.xlu0 %1911  ;;  %v6060_v30 = vpop.permute.xlu1 %1913 }
 0x425   :  { %9828 = vst [vmem:[#allocation362_spill] sm:$0xff] %v6056_v25  ;;  %9829 = vst [vmem:[#allocation363_spill] sm:$0xff] %v6060_v30 }
 0x426   :  { %2173 = vrot.lane.b32.xlu0 %v6058_v6, %s4147_s0  ;;  %2175 = vrot.lane.b32.xlu1 %v6062_v8, %s4147_s0 }
 0x428   :  { %v6068_v26 = vpop.permute.xlu0 %1915  ;;  %v6070_v29 = vpop.permute.xlu1 %1917 }
 0x429   :  { %9830 = vst [vmem:[#allocation364_spill] sm:$0xff] %v6068_v26  ;;  %9831 = vst [vmem:[#allocation365_spill] sm:$0xff] %v6070_v29 }
 0x42a   :  { %2181 = vrot.lane.b32.xlu0 %v6046_v2, %s4148_s22  ;;  %2183 = vrot.lane.b32.xlu1 %v6050_v4, %s4148_s22 }
 0x42c   :  { %v6076_v25 = vpop.permute.xlu0 %1923  ;;  %v6078_v30 = vpop.permute.xlu1 %1925 }
 0x42d   :  { %9832 = vst [vmem:[#allocation366_spill] sm:$0xff] %v6076_v25  ;;  %9833 = vst [vmem:[#allocation367_spill] sm:$0xff] %v6078_v30 }
 0x42e   :  { %2185 = vrot.lane.b32.xlu0 %v6058_v6, %s4148_s22  ;;  %2187 = vrot.lane.b32.xlu1 %v6062_v8, %s4148_s22 }
 0x430   :  { %v6084_v21 = vpop.permute.xlu0 %1927  ;;  %v6086_v26 = vpop.permute.xlu1 %1929 }
 0x431   :  { %9834 = vst [vmem:[#allocation368_spill] sm:$0xff] %v6084_v21  ;;  %9835 = vst [vmem:[#allocation369_spill] sm:$0xff] %v6086_v26 }
 0x432   :  { %2193 = vrot.lane.b32.xlu0 %v6046_v2, %s4149_s23  ;;  %2195 = vrot.lane.b32.xlu1 %v6050_v4, %s4149_s23 }
 0x434   :  { %v6092_v29 = vpop.permute.xlu0 %1935  ;;  %v6094_v25 = vpop.permute.xlu1 %1937 }
 0x435   :  { %9836 = vst [vmem:[#allocation370_spill] sm:$0xff] %v6092_v29  ;;  %9837 = vst [vmem:[#allocation371_spill] sm:$0xff] %v6094_v25 }
 0x436   :  { %2197 = vrot.lane.b32.xlu0 %v6058_v6, %s4149_s23  ;;  %2199 = vrot.lane.b32.xlu1 %v6062_v8, %s4149_s23 }
 0x438   :  { %v6100_v30 = vpop.permute.xlu0 %1939  ;;  %v6102_v21 = vpop.permute.xlu1 %1941 }
 0x439   :  { %9838 = vst [vmem:[#allocation372_spill] sm:$0xff] %v6100_v30  ;;  %9839 = vst [vmem:[#allocation373_spill] sm:$0xff] %v6102_v21 }
 0x43a   :  { %2205 = vrot.lane.b32.xlu0 %v6046_v2, %s4150_s24  ;;  %2207 = vrot.lane.b32.xlu1 %v6050_v4, %s4150_s24 }
 0x43c   :  { %v6108_v26 = vpop.permute.xlu0 %1947  ;;  %v6110_v29 = vpop.permute.xlu1 %1949 }
 0x43d   :  { %9840 = vst [vmem:[#allocation374_spill] sm:$0xff] %v6108_v26  ;;  %9841 = vst [vmem:[#allocation375_spill] sm:$0xff] %v6110_v29 }
 0x43e   :  { %2209 = vrot.lane.b32.xlu0 %v6058_v6, %s4150_s24  ;;  %2211 = vrot.lane.b32.xlu1 %v6062_v8, %s4150_s24 }
 0x440   :  { %v6116_v25 = vpop.permute.xlu0 %1951  ;;  %v6118_v30 = vpop.permute.xlu1 %1953 }
 0x441   :  { %9842 = vst [vmem:[#allocation376_spill] sm:$0xff] %v6116_v25  ;;  %9843 = vst [vmem:[#allocation377_spill] sm:$0xff] %v6118_v30 }
 0x442   :  { %2217 = vrot.lane.b32.xlu0 %v6046_v2, %s4151_s26  ;;  %2219 = vrot.lane.b32.xlu1 %v6050_v4, %s4151_s26 }
 0x444   :  { %v6124_v21 = vpop.permute.xlu0 %1959  ;;  %v6126_v26 = vpop.permute.xlu1 %1961 }
 0x445   :  { %9844 = vst [vmem:[#allocation378_spill] sm:$0xff] %v6124_v21  ;;  %9845 = vst [vmem:[#allocation379_spill] sm:$0xff] %v6126_v26 }
 0x446   :  { %2221 = vrot.lane.b32.xlu0 %v6058_v6, %s4151_s26  ;;  %2223 = vrot.lane.b32.xlu1 %v6062_v8, %s4151_s26 }
 0x448   :  { %v6132_v29 = vpop.permute.xlu0 %1963  ;;  %v6134_v25 = vpop.permute.xlu1 %1965 }
 0x449   :  { %9846 = vst [vmem:[#allocation380_spill] sm:$0xff] %v6132_v29  ;;  %9847 = vst [vmem:[#allocation381_spill] sm:$0xff] %v6134_v25 }
 0x44a   :  { %2229 = vrot.lane.b32.xlu0 %v6046_v2, %s4152_s27  ;;  %2231 = vrot.lane.b32.xlu1 %v6050_v4, %s4152_s27 }
 0x44c   :  { %v6140_v30 = vpop.permute.xlu0 %1971  ;;  %v6142_v21 = vpop.permute.xlu1 %1973 }
 0x44d   :  { %9848 = vst [vmem:[#allocation382_spill] sm:$0xff] %v6140_v30  ;;  %9849 = vst [vmem:[#allocation383_spill] sm:$0xff] %v6142_v21 }
 0x44e   :  { %2233 = vrot.lane.b32.xlu0 %v6058_v6, %s4152_s27  ;;  %2235 = vrot.lane.b32.xlu1 %v6062_v8, %s4152_s27 }
 0x450   :  { %v6148_v26 = vpop.permute.xlu0 %1975  ;;  %v6150_v29 = vpop.permute.xlu1 %1977 }
 0x451   :  { %9850 = vst [vmem:[#allocation384_spill] sm:$0xff] %v6148_v26  ;;  %9851 = vst [vmem:[#allocation385_spill] sm:$0xff] %v6150_v29 }
 0x452   :  { %2241 = vrot.lane.b32.xlu0 %v6046_v2, %s4153_s28  ;;  %2243 = vrot.lane.b32.xlu1 %v6050_v4, %s4153_s28 }
 0x454   :  { %v6156_v25 = vpop.permute.xlu0 %2024  ;;  %v6158_v30 = vpop.permute.xlu1 %2026 }
 0x455   :  { %9852 = vst [vmem:[#allocation386_spill] sm:$0xff] %v6156_v25  ;;  %9853 = vst [vmem:[#allocation387_spill] sm:$0xff] %v6158_v30 }
 0x456   :  { %2245 = vrot.lane.b32.xlu0 %v6058_v6, %s4153_s28  ;;  %2247 = vrot.lane.b32.xlu1 %v6062_v8, %s4153_s28 }
 0x458   :  { %v6164_v21 = vpop.permute.xlu0 %2028  ;;  %v6166_v26 = vpop.permute.xlu1 %2030 }
 0x459   :  { %9854 = vst [vmem:[#allocation388_spill] sm:$0xff] %v6164_v21  ;;  %9855 = vst [vmem:[#allocation389_spill] sm:$0xff] %v6166_v26 }
 0x45a   :  { %2294 = vrot.lane.b32.xlu0 %v6046_v2, %s4143_s25  ;;  %2296 = vrot.lane.b32.xlu1 %v6050_v4, %s4143_s25 }
 0x45c   :  { %v6172_v29 = vpop.permute.xlu0 %2036  ;;  %v6174_v25 = vpop.permute.xlu1 %2038 }
 0x45d   :  { %9856 = vst [vmem:[#allocation390_spill] sm:$0xff] %v6172_v29  ;;  %9857 = vst [vmem:[#allocation391_spill] sm:$0xff] %v6174_v25 }
 0x45e   :  { %2298 = vrot.lane.b32.xlu0 %v6058_v6, %s4143_s25  ;;  %2300 = vrot.lane.b32.xlu1 %v6062_v8, %s4143_s25 }
 0x460   :  { %v6180_v30 = vpop.permute.xlu0 %2040  ;;  %v6182_v21 = vpop.permute.xlu1 %2042 }
 0x461   :  { %9858 = vst [vmem:[#allocation392_spill] sm:$0xff] %v6180_v30  ;;  %9859 = vst [vmem:[#allocation393_spill] sm:$0xff] %v6182_v21 }
 0x462   :  { %2306 = vrot.lane.b32.xlu0 %v6046_v2, %s4154_s29  ;;  %2308 = vrot.lane.b32.xlu1 %v6050_v4, %s4154_s29 }
 0x464   :  { %v6188_v26 = vpop.permute.xlu0 %2048  ;;  %v6190_v29 = vpop.permute.xlu1 %2050 }
 0x465   :  { %9860 = vst [vmem:[#allocation394_spill] sm:$0xff] %v6188_v26  ;;  %9861 = vst [vmem:[#allocation395_spill] sm:$0xff] %v6190_v29 }
 0x466   :  { %2310 = vrot.lane.b32.xlu0 %v6058_v6, %s4154_s29  ;;  %2312 = vrot.lane.b32.xlu1 %v6062_v8, %s4154_s29 }
 0x468   :  { %v6196_v25 = vpop.permute.xlu0 %2052  ;;  %v6198_v30 = vpop.permute.xlu1 %2054 }
 0x469   :  { %9862 = vst [vmem:[#allocation396_spill] sm:$0xff] %v6196_v25  ;;  %9863 = vst [vmem:[#allocation397_spill] sm:$0xff] %v6198_v30 }
 0x46a   :  { %2318 = vrot.lane.b32.xlu0 %v6046_v2, %s4155_s30  ;;  %2320 = vrot.lane.b32.xlu1 %v6050_v4, %s4155_s30 }
 0x46c   :  { %v6204_v21 = vpop.permute.xlu0 %2060  ;;  %v6206_v26 = vpop.permute.xlu1 %2062 }
 0x46d   :  { %9864 = vst [vmem:[#allocation398_spill] sm:$0xff] %v6204_v21  ;;  %9865 = vst [vmem:[#allocation399_spill] sm:$0xff] %v6206_v26 }
 0x46e   :  { %2322 = vrot.lane.b32.xlu0 %v6058_v6, %s4155_s30  ;;  %2324 = vrot.lane.b32.xlu1 %v6062_v8, %s4155_s30 }
 0x470   :  { %v6212_v29 = vpop.permute.xlu0 %2064  ;;  %v6214_v25 = vpop.permute.xlu1 %2066 }
 0x471   :  { %9866 = vst [vmem:[#allocation400_spill] sm:$0xff] %v6212_v29  ;;  %9867 = vst [vmem:[#allocation401_spill] sm:$0xff] %v6214_v25 }
 0x472   :  { %2330 = vrot.lane.b32.xlu0 %v6046_v2, %s4156_s7  ;;  %2332 = vrot.lane.b32.xlu1 %v6050_v4, %s4156_s7 }
 0x474   :  { %v6220_v30 = vpop.permute.xlu0 %2072  ;;  %v6222_v21 = vpop.permute.xlu1 %2074 }
 0x475   :  { %9868 = vst [vmem:[#allocation402_spill] sm:$0xff] %v6220_v30  ;;  %9869 = vst [vmem:[#allocation403_spill] sm:$0xff] %v6222_v21 }
 0x476   :  { %2334 = vrot.lane.b32.xlu0 %v6058_v6, %s4156_s7  ;;  %2336 = vrot.lane.b32.xlu1 %v6062_v8, %s4156_s7 }
 0x478   :  { %v6228_v26 = vpop.permute.xlu0 %2076  ;;  %v6230_v29 = vpop.permute.xlu1 %2078 }
 0x479   :  { %9870 = vst [vmem:[#allocation404_spill] sm:$0xff] %v6228_v26  ;;  %9871 = vst [vmem:[#allocation405_spill] sm:$0xff] %v6230_v29 }
 0x47a   :  { %2342 = vrot.lane.b32.xlu0 %v6046_v2, %s4157_s8  ;;  %2344 = vrot.lane.b32.xlu1 %v6050_v4, %s4157_s8 }
 0x47c   :  { %v6236_v25 = vpop.permute.xlu0 %2084  ;;  %v6238_v30 = vpop.permute.xlu1 %2086 }
 0x47d   :  { %9872 = vst [vmem:[#allocation406_spill] sm:$0xff] %v6236_v25  ;;  %9873 = vst [vmem:[#allocation407_spill] sm:$0xff] %v6238_v30 }
 0x47e   :  { %2346 = vrot.lane.b32.xlu0 %v6058_v6, %s4157_s8  ;;  %2348 = vrot.lane.b32.xlu1 %v6062_v8, %s4157_s8 }
 0x480   :  { %v6244_v21 = vpop.permute.xlu0 %2088  ;;  %v6246_v26 = vpop.permute.xlu1 %2090 }
 0x481   :  { %9874 = vst [vmem:[#allocation408_spill] sm:$0xff] %v6244_v21  ;;  %9875 = vst [vmem:[#allocation409_spill] sm:$0xff] %v6246_v26 }
 0x482   :  { %2354 = vrot.lane.b32.xlu0 %v6046_v2, %s4158_s9  ;;  %2356 = vrot.lane.b32.xlu1 %v6050_v4, %s4158_s9 }
 0x484   :  { %v6252_v29 = vpop.permute.xlu0 %2096  ;;  %v6254_v25 = vpop.permute.xlu1 %2098 }
 0x485   :  { %9876 = vst [vmem:[#allocation410_spill] sm:$0xff] %v6252_v29  ;;  %9877 = vst [vmem:[#allocation411_spill] sm:$0xff] %v6254_v25 }
 0x486   :  { %2358 = vrot.lane.b32.xlu0 %v6058_v6, %s4158_s9  ;;  %2360 = vrot.lane.b32.xlu1 %v6062_v8, %s4158_s9 }
 0x488   :  { %v6260_v30 = vpop.permute.xlu0 %2100  ;;  %v6262_v21 = vpop.permute.xlu1 %2102 }
 0x489   :  { %9878 = vst [vmem:[#allocation412_spill] sm:$0xff] %v6260_v30  ;;  %9879 = vst [vmem:[#allocation413_spill] sm:$0xff] %v6262_v21 }
 0x48a   :  { %2366 = vrot.lane.b32.xlu0 %v6046_v2, %s4159_s10  ;;  %2368 = vrot.lane.b32.xlu1 %v6050_v4, %s4159_s10 }
 0x48c   :  { %v6268_v26 = vpop.permute.xlu0 %2108  ;;  %v6270_v29 = vpop.permute.xlu1 %2110 }
 0x48d   :  { %9880 = vst [vmem:[#allocation414_spill] sm:$0xff] %v6268_v26  ;;  %9881 = vst [vmem:[#allocation415_spill] sm:$0xff] %v6270_v29 }
 0x48e   :  { %2370 = vrot.lane.b32.xlu0 %v6058_v6, %s4159_s10  ;;  %2372 = vrot.lane.b32.xlu1 %v6062_v8, %s4159_s10 }
 0x490   :  { %v6276_v25 = vpop.permute.xlu0 %2112  ;;  %v6278_v30 = vpop.permute.xlu1 %2114 }
 0x491   :  { %9882 = vst [vmem:[#allocation416_spill] sm:$0xff] %v6276_v25  ;;  %9883 = vst [vmem:[#allocation417_spill] sm:$0xff] %v6278_v30 }
 0x492   :  { %2378 = vrot.lane.b32.xlu0 %v6046_v2, %s4160_s11  ;;  %2380 = vrot.lane.b32.xlu1 %v6050_v4, %s4160_s11 }
 0x494   :  { %v6284_v21 = vpop.permute.xlu0 %2169  ;;  %v6286_v26 = vpop.permute.xlu1 %2171 }
 0x495   :  { %9884 = vst [vmem:[#allocation418_spill] sm:$0xff] %v6284_v21  ;;  %9885 = vst [vmem:[#allocation419_spill] sm:$0xff] %v6286_v26 }
 0x496   :  { %2382 = vrot.lane.b32.xlu0 %v6058_v6, %s4160_s11  ;;  %2384 = vrot.lane.b32.xlu1 %v6062_v8, %s4160_s11 }
 0x498   :  { %v6292_v29 = vpop.permute.xlu0 %2173  ;;  %v6294_v25 = vpop.permute.xlu1 %2175 }
 0x499   :  { %9886 = vst [vmem:[#allocation420_spill] sm:$0xff] %v6292_v29  ;;  %9887 = vst [vmem:[#allocation421_spill] sm:$0xff] %v6294_v25 }
 0x49a   :  { %2431 = vrot.lane.b32.xlu0 %v6046_v2, %s4161_s12  ;;  %2433 = vrot.lane.b32.xlu1 %v6050_v4, %s4161_s12 }
 0x49c   :  { %v6300_v30 = vpop.permute.xlu0 %2181  ;;  %v6302_v21 = vpop.permute.xlu1 %2183 }
 0x49d   :  { %9888 = vst [vmem:[#allocation422_spill] sm:$0xff] %v6300_v30  ;;  %9889 = vst [vmem:[#allocation423_spill] sm:$0xff] %v6302_v21 }
 0x49e   :  { %2435 = vrot.lane.b32.xlu0 %v6058_v6, %s4161_s12  ;;  %2437 = vrot.lane.b32.xlu1 %v6062_v8, %s4161_s12 }
 0x4a0   :  { %v6308_v26 = vpop.permute.xlu0 %2185  ;;  %v6310_v29 = vpop.permute.xlu1 %2187 }
 0x4a1   :  { %9890 = vst [vmem:[#allocation424_spill] sm:$0xff] %v6308_v26  ;;  %9891 = vst [vmem:[#allocation425_spill] sm:$0xff] %v6310_v29 }
 0x4a2   :  { %2443 = vrot.lane.b32.xlu0 %v6046_v2, %s4162_s13  ;;  %2445 = vrot.lane.b32.xlu1 %v6050_v4, %s4162_s13 }
 0x4a4   :  { %v6316_v25 = vpop.permute.xlu0 %2193  ;;  %v6318_v30 = vpop.permute.xlu1 %2195 }
 0x4a5   :  { %9892 = vst [vmem:[#allocation426_spill] sm:$0xff] %v6316_v25  ;;  %9893 = vst [vmem:[#allocation427_spill] sm:$0xff] %v6318_v30 }
 0x4a6   :  { %2447 = vrot.lane.b32.xlu0 %v6058_v6, %s4162_s13  ;;  %2449 = vrot.lane.b32.xlu1 %v6062_v8, %s4162_s13 }
 0x4a8   :  { %v6324_v21 = vpop.permute.xlu0 %2197  ;;  %v6326_v26 = vpop.permute.xlu1 %2199 }
 0x4a9   :  { %9894 = vst [vmem:[#allocation428_spill] sm:$0xff] %v6324_v21  ;;  %9895 = vst [vmem:[#allocation429_spill] sm:$0xff] %v6326_v26 }
 0x4aa   :  { %2455 = vrot.lane.b32.xlu0 %v6046_v2, %s4163_s14  ;;  %2457 = vrot.lane.b32.xlu1 %v6050_v4, %s4163_s14 }
 0x4ac   :  { %v6332_v29 = vpop.permute.xlu0 %2205  ;;  %v6334_v25 = vpop.permute.xlu1 %2207 }
 0x4ad   :  { %9896 = vst [vmem:[#allocation430_spill] sm:$0xff] %v6332_v29  ;;  %9897 = vst [vmem:[#allocation431_spill] sm:$0xff] %v6334_v25 }
 0x4ae   :  { %2459 = vrot.lane.b32.xlu0 %v6058_v6, %s4163_s14  ;;  %2461 = vrot.lane.b32.xlu1 %v6062_v8, %s4163_s14 }
 0x4b0   :  { %v6340_v30 = vpop.permute.xlu0 %2209  ;;  %v6342_v21 = vpop.permute.xlu1 %2211 }
 0x4b1   :  { %9898 = vst [vmem:[#allocation432_spill] sm:$0xff] %v6340_v30  ;;  %9899 = vst [vmem:[#allocation433_spill] sm:$0xff] %v6342_v21 }
 0x4b2   :  { %2467 = vrot.lane.b32.xlu0 %v6046_v2, %s4164_s15  ;;  %2469 = vrot.lane.b32.xlu1 %v6050_v4, %s4164_s15 }
 0x4b4   :  { %v6348_v26 = vpop.permute.xlu0 %2217  ;;  %v6350_v29 = vpop.permute.xlu1 %2219 }
 0x4b5   :  { %9900 = vst [vmem:[#allocation434_spill] sm:$0xff] %v6348_v26  ;;  %9901 = vst [vmem:[#allocation435_spill] sm:$0xff] %v6350_v29 }
 0x4b6   :  { %2471 = vrot.lane.b32.xlu0 %v6058_v6, %s4164_s15  ;;  %2473 = vrot.lane.b32.xlu1 %v6062_v8, %s4164_s15 }
 0x4b8   :  { %v6356_v25 = vpop.permute.xlu0 %2221  ;;  %v6358_v30 = vpop.permute.xlu1 %2223 }
 0x4b9   :  { %9902 = vst [vmem:[#allocation436_spill] sm:$0xff] %v6356_v25  ;;  %9903 = vst [vmem:[#allocation437_spill] sm:$0xff] %v6358_v30 }
 0x4ba   :  { %2479 = vrot.lane.b32.xlu0 %v6046_v2, %s4165_s16  ;;  %2481 = vrot.lane.b32.xlu1 %v6050_v4, %s4165_s16 }
 0x4bc   :  { %v6364_v21 = vpop.permute.xlu0 %2229  ;;  %v6366_v26 = vpop.permute.xlu1 %2231 }
 0x4bd   :  { %9904 = vst [vmem:[#allocation438_spill] sm:$0xff] %v6364_v21  ;;  %9905 = vst [vmem:[#allocation439_spill] sm:$0xff] %v6366_v26 }
 0x4be   :  { %2483 = vrot.lane.b32.xlu0 %v6058_v6, %s4165_s16  ;;  %2485 = vrot.lane.b32.xlu1 %v6062_v8, %s4165_s16 }
 0x4c0   :  { %v6372_v29 = vpop.permute.xlu0 %2233  ;;  %v6374_v25 = vpop.permute.xlu1 %2235 }
 0x4c1   :  { %9906 = vst [vmem:[#allocation440_spill] sm:$0xff] %v6372_v29  ;;  %9907 = vst [vmem:[#allocation441_spill] sm:$0xff] %v6374_v25 }
 0x4c2   :  { %2491 = vrot.lane.b32.xlu0 %v6046_v2, %s4166_s17  ;;  %2493 = vrot.lane.b32.xlu1 %v6050_v4, %s4166_s17 }
 0x4c4   :  { %v6380_v30 = vpop.permute.xlu0 %2241  ;;  %v6382_v21 = vpop.permute.xlu1 %2243 }
 0x4c5   :  { %9908 = vst [vmem:[#allocation442_spill] sm:$0xff] %v6380_v30  ;;  %9909 = vst [vmem:[#allocation443_spill] sm:$0xff] %v6382_v21 }
 0x4c6   :  { %2495 = vrot.lane.b32.xlu0 %v6058_v6, %s4166_s17  ;;  %2497 = vrot.lane.b32.xlu1 %v6062_v8, %s4166_s17 }
 0x4c8   :  { %v6388_v26 = vpop.permute.xlu0 %2245  ;;  %v6390_v29 = vpop.permute.xlu1 %2247 }
 0x4c9   :  { %9910 = vst [vmem:[#allocation444_spill] sm:$0xff] %v6388_v26  ;;  %9911 = vst [vmem:[#allocation445_spill] sm:$0xff] %v6390_v29 }
 0x4ca   :  { %2503 = vrot.lane.b32.xlu0 %v6046_v2, %s4167_s18  ;;  %2505 = vrot.lane.b32.xlu1 %v6050_v4, %s4167_s18 }
 0x4cc   :  { %v6396_v25 = vpop.permute.xlu0 %2294  ;;  %v6398_v30 = vpop.permute.xlu1 %2296 }
 0x4cd   :  { %9912 = vst [vmem:[#allocation446_spill] sm:$0xff] %v6396_v25  ;;  %9913 = vst [vmem:[#allocation447_spill] sm:$0xff] %v6398_v30 }
 0x4ce   :  { %2507 = vrot.lane.b32.xlu0 %v6058_v6, %s4167_s18  ;;  %2509 = vrot.lane.b32.xlu1 %v6062_v8, %s4167_s18 }
 0x4d0   :  { %v6404_v21 = vpop.permute.xlu0 %2298  ;;  %v6406_v26 = vpop.permute.xlu1 %2300 }
 0x4d1   :  { %9914 = vst [vmem:[#allocation448_spill] sm:$0xff] %v6404_v21  ;;  %9915 = vst [vmem:[#allocation449_spill] sm:$0xff] %v6406_v26  ;;  %v6422_v21 = vld [vmem:[#allocation2 + $0x30] sm:$0xff] }
 0x4d2   :  { %2515 = vrot.lane.b32.xlu0 %v6046_v2, %s4168_s19  ;;  %2517 = vrot.lane.b32.xlu1 %v6050_v4, %s4168_s19  ;;  %v6426_v2 = vld [vmem:[#allocation2 + $0x38] sm:$0xff] }
 0x4d4   :  { %v6412_v29 = vpop.permute.xlu0 %2306  ;;  %v6414_v25 = vpop.permute.xlu1 %2308 }
 0x4d5   :  { %9916 = vst [vmem:[#allocation450_spill] sm:$0xff] %v6412_v29  ;;  %9917 = vst [vmem:[#allocation451_spill] sm:$0xff] %v6414_v25 }
 0x4d6   :  { %2519 = vrot.lane.b32.xlu0 %v6058_v6, %s4168_s19  ;;  %2521 = vrot.lane.b32.xlu1 %v6062_v8, %s4168_s19  ;;  %v6434_v6 = vld [vmem:[#allocation2 + $0x78] sm:$0xff]  ;;  %v6438_v8 = vld [vmem:[#allocation2 + $0x80] sm:$0xff] }
 0x4d8   :  { %v6420_v30 = vpop.permute.xlu0 %2310  ;;  %v6424_v26 = vpop.permute.xlu1 %2312 }
 0x4d9   :  { %9918 = vst [vmem:[#allocation452_spill] sm:$0xff] %v6420_v30  ;;  %9919 = vst [vmem:[#allocation453_spill] sm:$0xff] %v6424_v26 }
 0x4da   :  { %2576 = vrot.lane.b32.xlu0 %v6422_v21, %s4147_s0  ;;  %2578 = vrot.lane.b32.xlu1 %v6426_v2, %s4147_s0 }
 0x4dc   :  { %v6432_v4 = vpop.permute.xlu0 %2318  ;;  %v6436_v25 = vpop.permute.xlu1 %2320 }
 0x4dd   :  { %9920 = vst [vmem:[#allocation454_spill] sm:$0xff] %v6432_v4  ;;  %9921 = vst [vmem:[#allocation455_spill] sm:$0xff] %v6436_v25 }
 0x4de   :  { %2580 = vrot.lane.b32.xlu0 %v6434_v6, %s4147_s0  ;;  %2582 = vrot.lane.b32.xlu1 %v6438_v8, %s4147_s0 }
 0x4e0   :  { %v6444_v26 = vpop.permute.xlu0 %2322  ;;  %v6446_v30 = vpop.permute.xlu1 %2324 }
 0x4e1   :  { %9922 = vst [vmem:[#allocation456_spill] sm:$0xff] %v6444_v26  ;;  %9923 = vst [vmem:[#allocation457_spill] sm:$0xff] %v6446_v30 }
 0x4e2   :  { %2588 = vrot.lane.b32.xlu0 %v6422_v21, %s4148_s22  ;;  %2590 = vrot.lane.b32.xlu1 %v6426_v2, %s4148_s22 }
 0x4e4   :  { %v6452_v4 = vpop.permute.xlu0 %2330  ;;  %v6454_v25 = vpop.permute.xlu1 %2332 }
 0x4e5   :  { %9924 = vst [vmem:[#allocation458_spill] sm:$0xff] %v6452_v4  ;;  %9925 = vst [vmem:[#allocation459_spill] sm:$0xff] %v6454_v25 }
 0x4e6   :  { %2592 = vrot.lane.b32.xlu0 %v6434_v6, %s4148_s22  ;;  %2594 = vrot.lane.b32.xlu1 %v6438_v8, %s4148_s22 }
 0x4e8   :  { %v6460_v29 = vpop.permute.xlu0 %2334  ;;  %v6462_v26 = vpop.permute.xlu1 %2336 }
 0x4e9   :  { %9926 = vst [vmem:[#allocation460_spill] sm:$0xff] %v6460_v29  ;;  %9927 = vst [vmem:[#allocation461_spill] sm:$0xff] %v6462_v26 }
 0x4ea   :  { %2600 = vrot.lane.b32.xlu0 %v6422_v21, %s4149_s23  ;;  %2602 = vrot.lane.b32.xlu1 %v6426_v2, %s4149_s23 }
 0x4ec   :  { %v6468_v30 = vpop.permute.xlu0 %2342  ;;  %v6470_v4 = vpop.permute.xlu1 %2344 }
 0x4ed   :  { %9928 = vst [vmem:[#allocation462_spill] sm:$0xff] %v6468_v30  ;;  %9929 = vst [vmem:[#allocation463_spill] sm:$0xff] %v6470_v4 }
 0x4ee   :  { %2604 = vrot.lane.b32.xlu0 %v6434_v6, %s4149_s23  ;;  %2606 = vrot.lane.b32.xlu1 %v6438_v8, %s4149_s23 }
 0x4f0   :  { %v6476_v25 = vpop.permute.xlu0 %2346  ;;  %v6478_v29 = vpop.permute.xlu1 %2348 }
 0x4f1   :  { %9930 = vst [vmem:[#allocation464_spill] sm:$0xff] %v6476_v25  ;;  %9931 = vst [vmem:[#allocation465_spill] sm:$0xff] %v6478_v29 }
 0x4f2   :  { %2701 = vrot.lane.b32.xlu0 %v6422_v21, %s4143_s25  ;;  %2703 = vrot.lane.b32.xlu1 %v6426_v2, %s4143_s25 }
 0x4f4   :  { %v6484_v26 = vpop.permute.xlu0 %2354  ;;  %v6486_v30 = vpop.permute.xlu1 %2356 }
 0x4f5   :  { %9932 = vst [vmem:[#allocation466_spill] sm:$0xff] %v6484_v26  ;;  %9933 = vst [vmem:[#allocation467_spill] sm:$0xff] %v6486_v30 }
 0x4f6   :  { %2705 = vrot.lane.b32.xlu0 %v6434_v6, %s4143_s25  ;;  %2707 = vrot.lane.b32.xlu1 %v6438_v8, %s4143_s25 }
 0x4f8   :  { %v6492_v4 = vpop.permute.xlu0 %2358  ;;  %v6494_v25 = vpop.permute.xlu1 %2360 }
 0x4f9   :  { %9934 = vst [vmem:[#allocation468_spill] sm:$0xff] %v6492_v4  ;;  %9935 = vst [vmem:[#allocation469_spill] sm:$0xff] %v6494_v25 }
 0x4fa   :  { %2713 = vrot.lane.b32.xlu0 %v6422_v21, %s4154_s29  ;;  %2715 = vrot.lane.b32.xlu1 %v6426_v2, %s4154_s29 }
 0x4fc   :  { %v6500_v29 = vpop.permute.xlu0 %2366  ;;  %v6502_v26 = vpop.permute.xlu1 %2368 }
 0x4fd   :  { %9936 = vst [vmem:[#allocation470_spill] sm:$0xff] %v6500_v29  ;;  %9937 = vst [vmem:[#allocation471_spill] sm:$0xff] %v6502_v26 }
 0x4fe   :  { %2717 = vrot.lane.b32.xlu0 %v6434_v6, %s4154_s29  ;;  %2719 = vrot.lane.b32.xlu1 %v6438_v8, %s4154_s29 }
 0x500   :  { %v6508_v30 = vpop.permute.xlu0 %2370  ;;  %v6510_v4 = vpop.permute.xlu1 %2372 }
 0x501   :  { %9938 = vst [vmem:[#allocation472_spill] sm:$0xff] %v6508_v30  ;;  %9939 = vst [vmem:[#allocation473_spill] sm:$0xff] %v6510_v4 }
 0x502   :  { %2612 = vrot.lane.b32.xlu0 %v6422_v21, %s4150_s24  ;;  %2614 = vrot.lane.b32.xlu1 %v6426_v2, %s4150_s24 }
 0x504   :  { %v6516_v25 = vpop.permute.xlu0 %2378  ;;  %v6518_v29 = vpop.permute.xlu1 %2380 }
 0x505   :  { %9940 = vst [vmem:[#allocation474_spill] sm:$0xff] %v6516_v25  ;;  %9941 = vst [vmem:[#allocation475_spill] sm:$0xff] %v6518_v29 }
 0x506   :  { %2616 = vrot.lane.b32.xlu0 %v6434_v6, %s4150_s24  ;;  %2618 = vrot.lane.b32.xlu1 %v6438_v8, %s4150_s24 }
 0x508   :  { %v6524_v26 = vpop.permute.xlu0 %2382  ;;  %v6526_v30 = vpop.permute.xlu1 %2384 }
 0x509   :  { %9942 = vst [vmem:[#allocation476_spill] sm:$0xff] %v6524_v26  ;;  %9943 = vst [vmem:[#allocation477_spill] sm:$0xff] %v6526_v30 }
 0x50a   :  { %2725 = vrot.lane.b32.xlu0 %v6422_v21, %s4155_s30  ;;  %2727 = vrot.lane.b32.xlu1 %v6426_v2, %s4155_s30 }
 0x50c   :  { %v6532_v4 = vpop.permute.xlu0 %2431  ;;  %v6534_v25 = vpop.permute.xlu1 %2433 }
 0x50d   :  { %9944 = vst [vmem:[#allocation478_spill] sm:$0xff] %v6532_v4  ;;  %9945 = vst [vmem:[#allocation479_spill] sm:$0xff] %v6534_v25 }
 0x50e   :  { %2729 = vrot.lane.b32.xlu0 %v6434_v6, %s4155_s30  ;;  %2731 = vrot.lane.b32.xlu1 %v6438_v8, %s4155_s30 }
 0x510   :  { %v6540_v29 = vpop.permute.xlu0 %2435  ;;  %v6542_v26 = vpop.permute.xlu1 %2437 }
 0x511   :  { %9946 = vst [vmem:[#allocation480_spill] sm:$0xff] %v6540_v29  ;;  %9947 = vst [vmem:[#allocation481_spill] sm:$0xff] %v6542_v26 }
 0x512   :  { %2624 = vrot.lane.b32.xlu0 %v6422_v21, %s4151_s26  ;;  %2626 = vrot.lane.b32.xlu1 %v6426_v2, %s4151_s26 }
 0x514   :  { %v6548_v30 = vpop.permute.xlu0 %2443  ;;  %v6550_v4 = vpop.permute.xlu1 %2445 }
 0x515   :  { %9948 = vst [vmem:[#allocation482_spill] sm:$0xff] %v6548_v30  ;;  %9949 = vst [vmem:[#allocation483_spill] sm:$0xff] %v6550_v4 }
 0x516   :  { %2628 = vrot.lane.b32.xlu0 %v6434_v6, %s4151_s26  ;;  %2630 = vrot.lane.b32.xlu1 %v6438_v8, %s4151_s26 }
 0x518   :  { %v6556_v25 = vpop.permute.xlu0 %2447  ;;  %v6558_v29 = vpop.permute.xlu1 %2449 }
 0x519   :  { %9950 = vst [vmem:[#allocation484_spill] sm:$0xff] %v6556_v25  ;;  %9951 = vst [vmem:[#allocation485_spill] sm:$0xff] %v6558_v29 }
 0x51a   :  { %2737 = vrot.lane.b32.xlu0 %v6422_v21, %s4156_s7  ;;  %2739 = vrot.lane.b32.xlu1 %v6426_v2, %s4156_s7 }
 0x51c   :  { %v6564_v26 = vpop.permute.xlu0 %2455  ;;  %v6566_v30 = vpop.permute.xlu1 %2457 }
 0x51d   :  { %9952 = vst [vmem:[#allocation486_spill] sm:$0xff] %v6564_v26  ;;  %9953 = vst [vmem:[#allocation487_spill] sm:$0xff] %v6566_v30 }
 0x51e   :  { %2741 = vrot.lane.b32.xlu0 %v6434_v6, %s4156_s7  ;;  %2743 = vrot.lane.b32.xlu1 %v6438_v8, %s4156_s7 }
 0x520   :  { %v6572_v4 = vpop.permute.xlu0 %2459  ;;  %v6574_v25 = vpop.permute.xlu1 %2461 }
 0x521   :  { %9954 = vst [vmem:[#allocation488_spill] sm:$0xff] %v6572_v4  ;;  %9955 = vst [vmem:[#allocation489_spill] sm:$0xff] %v6574_v25 }
 0x522   :  { %2838 = vrot.lane.b32.xlu0 %v6422_v21, %s4161_s12  ;;  %2840 = vrot.lane.b32.xlu1 %v6426_v2, %s4161_s12 }
 0x524   :  { %v6580_v29 = vpop.permute.xlu0 %2467  ;;  %v6582_v26 = vpop.permute.xlu1 %2469 }
 0x525   :  { %9956 = vst [vmem:[#allocation490_spill] sm:$0xff] %v6580_v29  ;;  %9957 = vst [vmem:[#allocation491_spill] sm:$0xff] %v6582_v26 }
 0x526   :  { %2842 = vrot.lane.b32.xlu0 %v6434_v6, %s4161_s12  ;;  %2844 = vrot.lane.b32.xlu1 %v6438_v8, %s4161_s12 }
 0x528   :  { %v6588_v30 = vpop.permute.xlu0 %2471  ;;  %v6590_v4 = vpop.permute.xlu1 %2473 }
 0x529   :  { %9958 = vst [vmem:[#allocation492_spill] sm:$0xff] %v6588_v30  ;;  %9959 = vst [vmem:[#allocation493_spill] sm:$0xff] %v6590_v4 }
 0x52a   :  { %2850 = vrot.lane.b32.xlu0 %v6422_v21, %s4162_s13  ;;  %2852 = vrot.lane.b32.xlu1 %v6426_v2, %s4162_s13 }
 0x52c   :  { %v6596_v25 = vpop.permute.xlu0 %2479  ;;  %v6598_v29 = vpop.permute.xlu1 %2481 }
 0x52d   :  { %9960 = vst [vmem:[#allocation494_spill] sm:$0xff] %v6596_v25  ;;  %9961 = vst [vmem:[#allocation495_spill] sm:$0xff] %v6598_v29 }
 0x52e   :  { %2854 = vrot.lane.b32.xlu0 %v6434_v6, %s4162_s13  ;;  %2856 = vrot.lane.b32.xlu1 %v6438_v8, %s4162_s13 }
 0x530   :  { %v6604_v26 = vpop.permute.xlu0 %2483  ;;  %v6606_v30 = vpop.permute.xlu1 %2485 }
 0x531   :  { %9962 = vst [vmem:[#allocation496_spill] sm:$0xff] %v6604_v26  ;;  %9963 = vst [vmem:[#allocation497_spill] sm:$0xff] %v6606_v30 }
 0x532   :  { %2636 = vrot.lane.b32.xlu0 %v6422_v21, %s4152_s27  ;;  %2638 = vrot.lane.b32.xlu1 %v6426_v2, %s4152_s27 }
 0x534   :  { %v6612_v4 = vpop.permute.xlu0 %2491  ;;  %v6614_v25 = vpop.permute.xlu1 %2493 }
 0x535   :  { %9964 = vst [vmem:[#allocation498_spill] sm:$0xff] %v6612_v4  ;;  %9965 = vst [vmem:[#allocation499_spill] sm:$0xff] %v6614_v25 }
 0x536   :  { %2640 = vrot.lane.b32.xlu0 %v6434_v6, %s4152_s27  ;;  %2642 = vrot.lane.b32.xlu1 %v6438_v8, %s4152_s27 }
 0x538   :  { %v6620_v29 = vpop.permute.xlu0 %2495  ;;  %v6622_v26 = vpop.permute.xlu1 %2497 }
 0x539   :  { %9966 = vst [vmem:[#allocation500_spill] sm:$0xff] %v6620_v29  ;;  %9967 = vst [vmem:[#allocation501_spill] sm:$0xff] %v6622_v26 }
 0x53a   :  { %2749 = vrot.lane.b32.xlu0 %v6422_v21, %s4157_s8  ;;  %2751 = vrot.lane.b32.xlu1 %v6426_v2, %s4157_s8 }
 0x53c   :  { %v6628_v30 = vpop.permute.xlu0 %2503  ;;  %v6630_v4 = vpop.permute.xlu1 %2505 }
 0x53d   :  { %9968 = vst [vmem:[#allocation502_spill] sm:$0xff] %v6628_v30  ;;  %9969 = vst [vmem:[#allocation503_spill] sm:$0xff] %v6630_v4 }
 0x53e   :  { %2753 = vrot.lane.b32.xlu0 %v6434_v6, %s4157_s8  ;;  %2755 = vrot.lane.b32.xlu1 %v6438_v8, %s4157_s8 }
 0x540   :  { %v6636_v25 = vpop.permute.xlu0 %2507  ;;  %v6638_v29 = vpop.permute.xlu1 %2509 }
 0x541   :  { %9970 = vst [vmem:[#allocation504_spill] sm:$0xff] %v6636_v25  ;;  %9971 = vst [vmem:[#allocation505_spill] sm:$0xff] %v6638_v29 }
 0x542   :  { %2862 = vrot.lane.b32.xlu0 %v6422_v21, %s4163_s14  ;;  %2864 = vrot.lane.b32.xlu1 %v6426_v2, %s4163_s14 }
 0x544   :  { %v6644_v26 = vpop.permute.xlu0 %2515  ;;  %v6646_v30 = vpop.permute.xlu1 %2517 }
 0x545   :  { %9972 = vst [vmem:[#allocation506_spill] sm:$0xff] %v6644_v26  ;;  %9973 = vst [vmem:[#allocation507_spill] sm:$0xff] %v6646_v30 }
 0x546   :  { %2866 = vrot.lane.b32.xlu0 %v6434_v6, %s4163_s14  ;;  %2868 = vrot.lane.b32.xlu1 %v6438_v8, %s4163_s14 }
 0x548   :  { %v6652_v4 = vpop.permute.xlu0 %2519  ;;  %v6654_v25 = vpop.permute.xlu1 %2521 }
 0x549   :  { %9974 = vst [vmem:[#allocation508_spill] sm:$0xff] %v6652_v4  ;;  %9975 = vst [vmem:[#allocation509_spill] sm:$0xff] %v6654_v25 }
 0x54a   :  { %2648 = vrot.lane.b32.xlu0 %v6422_v21, %s4153_s28  ;;  %2650 = vrot.lane.b32.xlu1 %v6426_v2, %s4153_s28 }
 0x54c   :  { %v6660_v29 = vpop.permute.xlu0 %2576  ;;  %v6662_v26 = vpop.permute.xlu1 %2578 }
 0x54d   :  { %9976 = vst [vmem:[#allocation510_spill] sm:$0xff] %v6660_v29  ;;  %9977 = vst [vmem:[#allocation511_spill] sm:$0xff] %v6662_v26 }
 0x54e   :  { %2652 = vrot.lane.b32.xlu0 %v6434_v6, %s4153_s28  ;;  %2654 = vrot.lane.b32.xlu1 %v6438_v8, %s4153_s28 }
 0x550   :  { %v6668_v30 = vpop.permute.xlu0 %2580  ;;  %v6670_v4 = vpop.permute.xlu1 %2582 }
 0x551   :  { %9978 = vst [vmem:[#allocation512_spill] sm:$0xff] %v6668_v30  ;;  %9979 = vst [vmem:[#allocation513_spill] sm:$0xff] %v6670_v4 }
 0x552   :  { %2761 = vrot.lane.b32.xlu0 %v6422_v21, %s4158_s9  ;;  %2763 = vrot.lane.b32.xlu1 %v6426_v2, %s4158_s9 }
 0x554   :  { %v6676_v25 = vpop.permute.xlu0 %2588  ;;  %v6678_v29 = vpop.permute.xlu1 %2590 }
 0x555   :  { %9980 = vst [vmem:[#allocation514_spill] sm:$0xff] %v6676_v25  ;;  %9981 = vst [vmem:[#allocation515_spill] sm:$0xff] %v6678_v29 }
 0x556   :  { %2765 = vrot.lane.b32.xlu0 %v6434_v6, %s4158_s9  ;;  %2767 = vrot.lane.b32.xlu1 %v6438_v8, %s4158_s9 }
 0x558   :  { %v6684_v26 = vpop.permute.xlu0 %2592  ;;  %v6686_v30 = vpop.permute.xlu1 %2594 }
 0x559   :  { %9982 = vst [vmem:[#allocation516_spill] sm:$0xff] %v6684_v26  ;;  %9983 = vst [vmem:[#allocation517_spill] sm:$0xff] %v6686_v30  ;;  %v6702_v26 = vld [vmem:[#allocation2 + $0x31] sm:$0xff] }
 0x55a   :  { %2874 = vrot.lane.b32.xlu0 %v6422_v21, %s4164_s15  ;;  %2876 = vrot.lane.b32.xlu1 %v6426_v2, %s4164_s15  ;;  %9987 = vst [vmem:[#allocation521_spill] sm:$0xff] %v6702_v26 }
 0x55c   :  { %v6692_v4 = vpop.permute.xlu0 %2600  ;;  %v6694_v25 = vpop.permute.xlu1 %2602 }
 0x55d   :  { %9984 = vst [vmem:[#allocation518_spill] sm:$0xff] %v6692_v4  ;;  %9985 = vst [vmem:[#allocation519_spill] sm:$0xff] %v6694_v25  ;;  %v6714_v4 = vld [vmem:[#allocation2 + $0x79] sm:$0xff] }
 0x55e   :  { %2878 = vrot.lane.b32.xlu0 %v6434_v6, %s4164_s15  ;;  %2880 = vrot.lane.b32.xlu1 %v6438_v8, %s4164_s15 }
 0x560   :  { %v6700_v29 = vpop.permute.xlu0 %2604  ;;  %v6704_v30 = vpop.permute.xlu1 %2606 }
 0x561   :  { %9986 = vst [vmem:[#allocation520_spill] sm:$0xff] %v6700_v29  ;;  %9988 = vst [vmem:[#allocation522_spill] sm:$0xff] %v6704_v30 }
 0x562   :  { %2983 = vrot.lane.b32.xlu0 %v6702_v26, %s4147_s0  ;;  %2985 = vrot.lane.b32.xlu1 %v6706_v22, %s4147_s0 }
 0x564   :  { %v6712_v25 = vpop.permute.xlu0 %2701  ;;  %v6716_v57 = vpop.permute.xlu1 %2703 }
 0x565   :  { %9990 = vst [vmem:[#allocation524_spill] sm:$0xff] %v6712_v25  ;;  %9991 = vst [vmem:[#allocation525_spill] sm:$0xff] %v6716_v57 }
 0x566   :  { %2987 = vrot.lane.b32.xlu0 %v6714_v4, %s4147_s0  ;;  %2989 = vrot.lane.b32.xlu1 %v6718_v58, %s4147_s0 }
 0x568   :  { %v6724_v30 = vpop.permute.xlu0 %2705  ;;  %v6726_v29 = vpop.permute.xlu1 %2707 }
 0x569   :  { %9992 = vst [vmem:[#allocation526_spill] sm:$0xff] %v6724_v30  ;;  %9993 = vst [vmem:[#allocation527_spill] sm:$0xff] %v6726_v29 }
 0x56a   :  { %2773 = vrot.lane.b32.xlu0 %v6422_v21, %s4159_s10  ;;  %2775 = vrot.lane.b32.xlu1 %v6426_v2, %s4159_s10 }
 0x56c   :  { %v6732_v25 = vpop.permute.xlu0 %2713  ;;  %v6734_v57 = vpop.permute.xlu1 %2715 }
 0x56d   :  { %9994 = vst [vmem:[#allocation528_spill] sm:$0xff] %v6732_v25  ;;  %9995 = vst [vmem:[#allocation529_spill] sm:$0xff] %v6734_v57 }
 0x56e   :  { %2777 = vrot.lane.b32.xlu0 %v6434_v6, %s4159_s10  ;;  %2779 = vrot.lane.b32.xlu1 %v6438_v8, %s4159_s10 }
 0x570   :  { %v6740_v17 = vpop.permute.xlu0 %2717  ;;  %v6742_v30 = vpop.permute.xlu1 %2719 }
 0x571   :  { %9996 = vst [vmem:[#allocation530_spill] sm:$0xff] %v6740_v17  ;;  %9997 = vst [vmem:[#allocation531_spill] sm:$0xff] %v6742_v30 }
 0x572   :  { %2886 = vrot.lane.b32.xlu0 %v6422_v21, %s4165_s16  ;;  %2888 = vrot.lane.b32.xlu1 %v6426_v2, %s4165_s16 }
 0x574   :  { %v6748_v29 = vpop.permute.xlu0 %2612  ;;  %v6750_v25 = vpop.permute.xlu1 %2614 }
 0x575   :  { %9998 = vst [vmem:[#allocation532_spill] sm:$0xff] %v6748_v29  ;;  %9999 = vst [vmem:[#allocation533_spill] sm:$0xff] %v6750_v25 }
 0x576   :  { %2890 = vrot.lane.b32.xlu0 %v6434_v6, %s4165_s16  ;;  %2892 = vrot.lane.b32.xlu1 %v6438_v8, %s4165_s16 }
 0x578   :  { %v6756_v57 = vpop.permute.xlu0 %2616  ;;  %v6758_v17 = vpop.permute.xlu1 %2618 }
 0x579   :  { %10000 = vst [vmem:[#allocation534_spill] sm:$0xff] %v6756_v57  ;;  %10001 = vst [vmem:[#allocation535_spill] sm:$0xff] %v6758_v17 }
 0x57a   :  { %2995 = vrot.lane.b32.xlu0 %v6702_v26, %s4148_s22  ;;  %2997 = vrot.lane.b32.xlu1 %v6706_v22, %s4148_s22 }
 0x57c   :  { %v6764_v30 = vpop.permute.xlu0 %2725  ;;  %v6766_v29 = vpop.permute.xlu1 %2727 }
 0x57d   :  { %10002 = vst [vmem:[#allocation536_spill] sm:$0xff] %v6764_v30  ;;  %10003 = vst [vmem:[#allocation537_spill] sm:$0xff] %v6766_v29 }
 0x57e   :  { %2999 = vrot.lane.b32.xlu0 %v6714_v4, %s4148_s22  ;;  %3001 = vrot.lane.b32.xlu1 %v6718_v58, %s4148_s22 }
 0x580   :  { %v6772_v25 = vpop.permute.xlu0 %2729  ;;  %v6774_v57 = vpop.permute.xlu1 %2731 }
 0x581   :  { %10004 = vst [vmem:[#allocation538_spill] sm:$0xff] %v6772_v25  ;;  %10005 = vst [vmem:[#allocation539_spill] sm:$0xff] %v6774_v57 }
 0x582   :  { %2785 = vrot.lane.b32.xlu0 %v6422_v21, %s4160_s11  ;;  %2787 = vrot.lane.b32.xlu1 %v6426_v2, %s4160_s11 }
 0x584   :  { %v6780_v17 = vpop.permute.xlu0 %2624  ;;  %v6782_v30 = vpop.permute.xlu1 %2626 }
 0x585   :  { %10006 = vst [vmem:[#allocation540_spill] sm:$0xff] %v6780_v17  ;;  %10007 = vst [vmem:[#allocation541_spill] sm:$0xff] %v6782_v30 }
 0x586   :  { %2789 = vrot.lane.b32.xlu0 %v6434_v6, %s4160_s11  ;;  %2791 = vrot.lane.b32.xlu1 %v6438_v8, %s4160_s11 }
 0x588   :  { %v6788_v29 = vpop.permute.xlu0 %2628  ;;  %v6790_v25 = vpop.permute.xlu1 %2630 }
 0x589   :  { %10008 = vst [vmem:[#allocation542_spill] sm:$0xff] %v6788_v29  ;;  %10009 = vst [vmem:[#allocation543_spill] sm:$0xff] %v6790_v25 }
 0x58a   :  { %2898 = vrot.lane.b32.xlu0 %v6422_v21, %s4166_s17  ;;  %2900 = vrot.lane.b32.xlu1 %v6426_v2, %s4166_s17 }
 0x58c   :  { %v6796_v57 = vpop.permute.xlu0 %2737  ;;  %v6798_v17 = vpop.permute.xlu1 %2739 }
 0x58d   :  { %10010 = vst [vmem:[#allocation544_spill] sm:$0xff] %v6796_v57  ;;  %10011 = vst [vmem:[#allocation545_spill] sm:$0xff] %v6798_v17 }
 0x58e   :  { %2902 = vrot.lane.b32.xlu0 %v6434_v6, %s4166_s17  ;;  %2904 = vrot.lane.b32.xlu1 %v6438_v8, %s4166_s17 }
 0x590   :  { %v6804_v30 = vpop.permute.xlu0 %2741  ;;  %v6806_v29 = vpop.permute.xlu1 %2743 }
 0x591   :  { %10012 = vst [vmem:[#allocation546_spill] sm:$0xff] %v6804_v30  ;;  %10013 = vst [vmem:[#allocation547_spill] sm:$0xff] %v6806_v29 }
 0x592   :  { %3007 = vrot.lane.b32.xlu0 %v6702_v26, %s4149_s23  ;;  %3009 = vrot.lane.b32.xlu1 %v6706_v22, %s4149_s23 }
 0x594   :  { %v6812_v25 = vpop.permute.xlu0 %2838  ;;  %v6814_v57 = vpop.permute.xlu1 %2840 }
 0x595   :  { %10014 = vst [vmem:[#allocation548_spill] sm:$0xff] %v6812_v25  ;;  %10015 = vst [vmem:[#allocation549_spill] sm:$0xff] %v6814_v57 }
 0x596   :  { %3011 = vrot.lane.b32.xlu0 %v6714_v4, %s4149_s23  ;;  %3013 = vrot.lane.b32.xlu1 %v6718_v58, %s4149_s23 }
 0x598   :  { %v6820_v17 = vpop.permute.xlu0 %2842  ;;  %v6822_v30 = vpop.permute.xlu1 %2844 }
 0x599   :  { %10016 = vst [vmem:[#allocation550_spill] sm:$0xff] %v6820_v17  ;;  %10017 = vst [vmem:[#allocation551_spill] sm:$0xff] %v6822_v30 }
 0x59a   :  { %3108 = vrot.lane.b32.xlu0 %v6702_v26, %s4143_s25  ;;  %3110 = vrot.lane.b32.xlu1 %v6706_v22, %s4143_s25 }
 0x59c   :  { %v6828_v29 = vpop.permute.xlu0 %2850  ;;  %v6830_v25 = vpop.permute.xlu1 %2852 }
 0x59d   :  { %10018 = vst [vmem:[#allocation552_spill] sm:$0xff] %v6828_v29  ;;  %10019 = vst [vmem:[#allocation553_spill] sm:$0xff] %v6830_v25 }
 0x59e   :  { %3112 = vrot.lane.b32.xlu0 %v6714_v4, %s4143_s25  ;;  %3114 = vrot.lane.b32.xlu1 %v6718_v58, %s4143_s25 }
 0x5a0   :  { %v6836_v57 = vpop.permute.xlu0 %2854  ;;  %v6838_v17 = vpop.permute.xlu1 %2856 }
 0x5a1   :  { %10020 = vst [vmem:[#allocation554_spill] sm:$0xff] %v6836_v57  ;;  %10021 = vst [vmem:[#allocation555_spill] sm:$0xff] %v6838_v17 }
 0x5a2   :  { %3120 = vrot.lane.b32.xlu0 %v6702_v26, %s4154_s29  ;;  %3122 = vrot.lane.b32.xlu1 %v6706_v22, %s4154_s29 }
 0x5a4   :  { %v6844_v30 = vpop.permute.xlu0 %2636  ;;  %v6846_v29 = vpop.permute.xlu1 %2638 }
 0x5a5   :  { %10022 = vst [vmem:[#allocation556_spill] sm:$0xff] %v6844_v30  ;;  %10023 = vst [vmem:[#allocation557_spill] sm:$0xff] %v6846_v29 }
 0x5a6   :  { %3124 = vrot.lane.b32.xlu0 %v6714_v4, %s4154_s29  ;;  %3126 = vrot.lane.b32.xlu1 %v6718_v58, %s4154_s29 }
 0x5a8   :  { %v6852_v25 = vpop.permute.xlu0 %2640  ;;  %v6854_v57 = vpop.permute.xlu1 %2642 }
 0x5a9   :  { %10024 = vst [vmem:[#allocation558_spill] sm:$0xff] %v6852_v25  ;;  %10025 = vst [vmem:[#allocation559_spill] sm:$0xff] %v6854_v57 }
 0x5aa   :  { %2910 = vrot.lane.b32.xlu0 %v6422_v21, %s4167_s18  ;;  %2912 = vrot.lane.b32.xlu1 %v6426_v2, %s4167_s18 }
 0x5ac   :  { %v6860_v17 = vpop.permute.xlu0 %2749  ;;  %v6862_v30 = vpop.permute.xlu1 %2751 }
 0x5ad   :  { %10026 = vst [vmem:[#allocation560_spill] sm:$0xff] %v6860_v17  ;;  %10027 = vst [vmem:[#allocation561_spill] sm:$0xff] %v6862_v30 }
 0x5ae   :  { %2914 = vrot.lane.b32.xlu0 %v6434_v6, %s4167_s18  ;;  %2916 = vrot.lane.b32.xlu1 %v6438_v8, %s4167_s18 }
 0x5b0   :  { %v6868_v29 = vpop.permute.xlu0 %2753  ;;  %v6870_v25 = vpop.permute.xlu1 %2755 }
 0x5b1   :  { %10028 = vst [vmem:[#allocation562_spill] sm:$0xff] %v6868_v29  ;;  %10029 = vst [vmem:[#allocation563_spill] sm:$0xff] %v6870_v25 }
 0x5b2   :  { %3019 = vrot.lane.b32.xlu0 %v6702_v26, %s4150_s24  ;;  %3021 = vrot.lane.b32.xlu1 %v6706_v22, %s4150_s24 }
 0x5b4   :  { %v6876_v57 = vpop.permute.xlu0 %2862  ;;  %v6878_v17 = vpop.permute.xlu1 %2864 }
 0x5b5   :  { %10030 = vst [vmem:[#allocation564_spill] sm:$0xff] %v6876_v57  ;;  %10031 = vst [vmem:[#allocation565_spill] sm:$0xff] %v6878_v17 }
 0x5b6   :  { %3023 = vrot.lane.b32.xlu0 %v6714_v4, %s4150_s24  ;;  %3025 = vrot.lane.b32.xlu1 %v6718_v58, %s4150_s24 }
 0x5b8   :  { %v6884_v30 = vpop.permute.xlu0 %2866  ;;  %v6886_v29 = vpop.permute.xlu1 %2868 }
 0x5b9   :  { %10032 = vst [vmem:[#allocation566_spill] sm:$0xff] %v6884_v30  ;;  %10033 = vst [vmem:[#allocation567_spill] sm:$0xff] %v6886_v29 }
 0x5ba   :  { %3132 = vrot.lane.b32.xlu0 %v6702_v26, %s4155_s30  ;;  %3134 = vrot.lane.b32.xlu1 %v6706_v22, %s4155_s30 }
 0x5bc   :  { %v6892_v25 = vpop.permute.xlu0 %2648  ;;  %v6894_v57 = vpop.permute.xlu1 %2650 }
 0x5bd   :  { %10034 = vst [vmem:[#allocation568_spill] sm:$0xff] %v6892_v25  ;;  %10035 = vst [vmem:[#allocation569_spill] sm:$0xff] %v6894_v57 }
 0x5be   :  { %3136 = vrot.lane.b32.xlu0 %v6714_v4, %s4155_s30  ;;  %3138 = vrot.lane.b32.xlu1 %v6718_v58, %s4155_s30 }
 0x5c0   :  { %v6900_v17 = vpop.permute.xlu0 %2652  ;;  %v6902_v30 = vpop.permute.xlu1 %2654 }
 0x5c1   :  { %10036 = vst [vmem:[#allocation570_spill] sm:$0xff] %v6900_v17  ;;  %10037 = vst [vmem:[#allocation571_spill] sm:$0xff] %v6902_v30 }
 0x5c2   :  { %2922 = vrot.lane.b32.xlu0 %v6422_v21, %s4168_s19  ;;  %2924 = vrot.lane.b32.xlu1 %v6426_v2, %s4168_s19 }
 0x5c4   :  { %v6908_v29 = vpop.permute.xlu0 %2761  ;;  %v6910_v25 = vpop.permute.xlu1 %2763 }
 0x5c5   :  { %10038 = vst [vmem:[#allocation572_spill] sm:$0xff] %v6908_v29  ;;  %10039 = vst [vmem:[#allocation573_spill] sm:$0xff] %v6910_v25  ;;  %v7094_v29 = vld [vmem:[#allocation2 + $0x82] sm:$0xff] }
 0x5c6   :  { %2926 = vrot.lane.b32.xlu0 %v6434_v6, %s4168_s19  ;;  %2928 = vrot.lane.b32.xlu1 %v6438_v8, %s4168_s19 }
 0x5c8   :  { %v6916_v57 = vpop.permute.xlu0 %2765  ;;  %v6918_v17 = vpop.permute.xlu1 %2767 }
 0x5c9   :  { %10040 = vst [vmem:[#allocation574_spill] sm:$0xff] %v6916_v57  ;;  %10041 = vst [vmem:[#allocation575_spill] sm:$0xff] %v6918_v17  ;;  %v7082_v17 = vld [vmem:[#allocation2 + $0x3a] sm:$0xff] }
 0x5ca   :  { %3031 = vrot.lane.b32.xlu0 %v6702_v26, %s4151_s26  ;;  %3033 = vrot.lane.b32.xlu1 %v6706_v22, %s4151_s26 }
 0x5cc   :  { %v6924_v21 = vpop.permute.xlu0 %2874  ;;  %v6926_v2 = vpop.permute.xlu1 %2876 }
 0x5cd   :  { %10042 = vst [vmem:[#allocation576_spill] sm:$0xff] %v6924_v21  ;;  %10043 = vst [vmem:[#allocation577_spill] sm:$0xff] %v6926_v2 }
 0x5ce   :  { %3035 = vrot.lane.b32.xlu0 %v6714_v4, %s4151_s26  ;;  %3037 = vrot.lane.b32.xlu1 %v6718_v58, %s4151_s26 }
 0x5d0   :  { %v6932_v6 = vpop.permute.xlu0 %2878  ;;  %v6934_v8 = vpop.permute.xlu1 %2880 }
 0x5d1   :  { %10044 = vst [vmem:[#allocation578_spill] sm:$0xff] %v6932_v6  ;;  %10045 = vst [vmem:[#allocation579_spill] sm:$0xff] %v6934_v8 }
 0x5d2   :  { %3144 = vrot.lane.b32.xlu0 %v6702_v26, %s4156_s7  ;;  %3146 = vrot.lane.b32.xlu1 %v6706_v22, %s4156_s7 }
 0x5d4   :  { %v6940_v57 = vpop.permute.xlu0 %2983  ;;  %v6942_v21 = vpop.permute.xlu1 %2985 }
 0x5d5   :  { %10046 = vst [vmem:[#allocation580_spill] sm:$0xff] %v6940_v57  ;;  %10047 = vst [vmem:[#allocation581_spill] sm:$0xff] %v6942_v21 }
 0x5d6   :  { %3148 = vrot.lane.b32.xlu0 %v6714_v4, %s4156_s7  ;;  %3150 = vrot.lane.b32.xlu1 %v6718_v58, %s4156_s7 }
 0x5d8   :  { %v6948_v2 = vpop.permute.xlu0 %2987  ;;  %v6950_v6 = vpop.permute.xlu1 %2989 }
 0x5d9   :  { %10048 = vst [vmem:[#allocation582_spill] sm:$0xff] %v6948_v2  ;;  %10049 = vst [vmem:[#allocation583_spill] sm:$0xff] %v6950_v6 }
 0x5da   :  { %3245 = vrot.lane.b32.xlu0 %v6702_v26, %s4161_s12  ;;  %3247 = vrot.lane.b32.xlu1 %v6706_v22, %s4161_s12 }
 0x5dc   :  { %v6956_v8 = vpop.permute.xlu0 %2773  ;;  %v6958_v57 = vpop.permute.xlu1 %2775 }
 0x5dd   :  { %10050 = vst [vmem:[#allocation584_spill] sm:$0xff] %v6956_v8  ;;  %10051 = vst [vmem:[#allocation585_spill] sm:$0xff] %v6958_v57 }
 0x5de   :  { %3249 = vrot.lane.b32.xlu0 %v6714_v4, %s4161_s12  ;;  %3251 = vrot.lane.b32.xlu1 %v6718_v58, %s4161_s12 }
 0x5e0   :  { %v6964_v21 = vpop.permute.xlu0 %2777  ;;  %v6966_v2 = vpop.permute.xlu1 %2779 }
 0x5e1   :  { %10052 = vst [vmem:[#allocation586_spill] sm:$0xff] %v6964_v21  ;;  %10053 = vst [vmem:[#allocation587_spill] sm:$0xff] %v6966_v2 }
 0x5e2   :  { %3257 = vrot.lane.b32.xlu0 %v6702_v26, %s4162_s13  ;;  %3259 = vrot.lane.b32.xlu1 %v6706_v22, %s4162_s13 }
 0x5e4   :  { %v6972_v6 = vpop.permute.xlu0 %2886  ;;  %v6974_v8 = vpop.permute.xlu1 %2888 }
 0x5e5   :  { %10054 = vst [vmem:[#allocation588_spill] sm:$0xff] %v6972_v6  ;;  %10055 = vst [vmem:[#allocation589_spill] sm:$0xff] %v6974_v8 }
 0x5e6   :  { %3261 = vrot.lane.b32.xlu0 %v6714_v4, %s4162_s13  ;;  %3263 = vrot.lane.b32.xlu1 %v6718_v58, %s4162_s13 }
 0x5e8   :  { %v6980_v57 = vpop.permute.xlu0 %2890  ;;  %v6982_v21 = vpop.permute.xlu1 %2892 }
 0x5e9   :  { %10056 = vst [vmem:[#allocation590_spill] sm:$0xff] %v6980_v57  ;;  %10057 = vst [vmem:[#allocation591_spill] sm:$0xff] %v6982_v21 }
 0x5ea   :  { %3043 = vrot.lane.b32.xlu0 %v6702_v26, %s4152_s27  ;;  %3045 = vrot.lane.b32.xlu1 %v6706_v22, %s4152_s27 }
 0x5ec   :  { %v6988_v2 = vpop.permute.xlu0 %2995  ;;  %v6990_v6 = vpop.permute.xlu1 %2997 }
 0x5ed   :  { %10058 = vst [vmem:[#allocation592_spill] sm:$0xff] %v6988_v2  ;;  %10059 = vst [vmem:[#allocation593_spill] sm:$0xff] %v6990_v6 }
 0x5ee   :  { %3047 = vrot.lane.b32.xlu0 %v6714_v4, %s4152_s27  ;;  %3049 = vrot.lane.b32.xlu1 %v6718_v58, %s4152_s27 }
 0x5f0   :  { %v6996_v8 = vpop.permute.xlu0 %2999  ;;  %v6998_v57 = vpop.permute.xlu1 %3001 }
 0x5f1   :  { %10060 = vst [vmem:[#allocation594_spill] sm:$0xff] %v6996_v8  ;;  %10061 = vst [vmem:[#allocation595_spill] sm:$0xff] %v6998_v57 }
 0x5f2   :  { %3156 = vrot.lane.b32.xlu0 %v6702_v26, %s4157_s8  ;;  %3158 = vrot.lane.b32.xlu1 %v6706_v22, %s4157_s8 }
 0x5f4   :  { %v7004_v21 = vpop.permute.xlu0 %2785  ;;  %v7006_v2 = vpop.permute.xlu1 %2787 }
 0x5f5   :  { %10062 = vst [vmem:[#allocation596_spill] sm:$0xff] %v7004_v21  ;;  %10063 = vst [vmem:[#allocation597_spill] sm:$0xff] %v7006_v2 }
 0x5f6   :  { %3160 = vrot.lane.b32.xlu0 %v6714_v4, %s4157_s8  ;;  %3162 = vrot.lane.b32.xlu1 %v6718_v58, %s4157_s8 }
 0x5f8   :  { %v7012_v6 = vpop.permute.xlu0 %2789  ;;  %v7014_v8 = vpop.permute.xlu1 %2791 }
 0x5f9   :  { %10064 = vst [vmem:[#allocation598_spill] sm:$0xff] %v7012_v6  ;;  %10065 = vst [vmem:[#allocation599_spill] sm:$0xff] %v7014_v8 }
 0x5fa   :  { %3269 = vrot.lane.b32.xlu0 %v6702_v26, %s4163_s14  ;;  %3271 = vrot.lane.b32.xlu1 %v6706_v22, %s4163_s14 }
 0x5fc   :  { %v7020_v57 = vpop.permute.xlu0 %2898  ;;  %v7022_v21 = vpop.permute.xlu1 %2900 }
 0x5fd   :  { %10066 = vst [vmem:[#allocation600_spill] sm:$0xff] %v7020_v57  ;;  %10067 = vst [vmem:[#allocation601_spill] sm:$0xff] %v7022_v21 }
 0x5fe   :  { %3273 = vrot.lane.b32.xlu0 %v6714_v4, %s4163_s14  ;;  %3275 = vrot.lane.b32.xlu1 %v6718_v58, %s4163_s14 }
 0x600   :  { %v7028_v2 = vpop.permute.xlu0 %2902  ;;  %v7030_v6 = vpop.permute.xlu1 %2904 }
 0x601   :  { %10068 = vst [vmem:[#allocation602_spill] sm:$0xff] %v7028_v2  ;;  %10069 = vst [vmem:[#allocation603_spill] sm:$0xff] %v7030_v6 }
 0x602   :  { %3055 = vrot.lane.b32.xlu0 %v6702_v26, %s4153_s28  ;;  %3057 = vrot.lane.b32.xlu1 %v6706_v22, %s4153_s28 }
 0x604   :  { %v7036_v8 = vpop.permute.xlu0 %3007  ;;  %v7038_v57 = vpop.permute.xlu1 %3009 }
 0x605   :  { %10070 = vst [vmem:[#allocation604_spill] sm:$0xff] %v7036_v8  ;;  %10071 = vst [vmem:[#allocation605_spill] sm:$0xff] %v7038_v57 }
 0x606   :  { %3059 = vrot.lane.b32.xlu0 %v6714_v4, %s4153_s28  ;;  %3061 = vrot.lane.b32.xlu1 %v6718_v58, %s4153_s28 }
 0x608   :  { %v7044_v21 = vpop.permute.xlu0 %3011  ;;  %v7046_v2 = vpop.permute.xlu1 %3013 }
 0x609   :  { %10072 = vst [vmem:[#allocation606_spill] sm:$0xff] %v7044_v21  ;;  %10073 = vst [vmem:[#allocation607_spill] sm:$0xff] %v7046_v2 }
 0x60a   :  { %3168 = vrot.lane.b32.xlu0 %v6702_v26, %s4158_s9  ;;  %3170 = vrot.lane.b32.xlu1 %v6706_v22, %s4158_s9 }
 0x60c   :  { %v7052_v6 = vpop.permute.xlu0 %3108  ;;  %v7054_v8 = vpop.permute.xlu1 %3110 }
 0x60d   :  { %10074 = vst [vmem:[#allocation608_spill] sm:$0xff] %v7052_v6  ;;  %10075 = vst [vmem:[#allocation609_spill] sm:$0xff] %v7054_v8 }
 0x60e   :  { %3172 = vrot.lane.b32.xlu0 %v6714_v4, %s4158_s9  ;;  %3174 = vrot.lane.b32.xlu1 %v6718_v58, %s4158_s9 }
 0x610   :  { %v7060_v57 = vpop.permute.xlu0 %3112  ;;  %v7062_v21 = vpop.permute.xlu1 %3114 }
 0x611   :  { %10076 = vst [vmem:[#allocation610_spill] sm:$0xff] %v7060_v57  ;;  %10077 = vst [vmem:[#allocation611_spill] sm:$0xff] %v7062_v21  ;;  %v7078_v57 = vld [vmem:[#allocation2 + $0x32] sm:$0xff] }
 0x612   :  { %3281 = vrot.lane.b32.xlu0 %v6702_v26, %s4164_s15  ;;  %3283 = vrot.lane.b32.xlu1 %v6706_v22, %s4164_s15 }
 0x614   :  { %v7068_v2 = vpop.permute.xlu0 %3120  ;;  %v7070_v6 = vpop.permute.xlu1 %3122 }
 0x615   :  { %10078 = vst [vmem:[#allocation612_spill] sm:$0xff] %v7068_v2  ;;  %10079 = vst [vmem:[#allocation613_spill] sm:$0xff] %v7070_v6  ;;  %v7090_v6 = vld [vmem:[#allocation2 + $0x7a] sm:$0xff] }
 0x616   :  { %3285 = vrot.lane.b32.xlu0 %v6714_v4, %s4164_s15  ;;  %3287 = vrot.lane.b32.xlu1 %v6718_v58, %s4164_s15 }
 0x618   :  { %v7076_v8 = vpop.permute.xlu0 %3124  ;;  %v7080_v21 = vpop.permute.xlu1 %3126 }
 0x619   :  { %10080 = vst [vmem:[#allocation614_spill] sm:$0xff] %v7076_v8  ;;  %10081 = vst [vmem:[#allocation615_spill] sm:$0xff] %v7080_v21 }
 0x61a   :  { %3390 = vrot.lane.b32.xlu0 %v7078_v57, %s4147_s0  ;;  %3392 = vrot.lane.b32.xlu1 %v7082_v17, %s4147_s0 }
 0x61c   :  { %v7088_v2 = vpop.permute.xlu0 %2910  ;;  %v7092_v25 = vpop.permute.xlu1 %2912 }
 0x61d   :  { %10082 = vst [vmem:[#allocation616_spill] sm:$0xff] %v7088_v2  ;;  %10083 = vst [vmem:[#allocation617_spill] sm:$0xff] %v7092_v25 }
 0x61e   :  { %3394 = vrot.lane.b32.xlu0 %v7090_v6, %s4147_s0  ;;  %3396 = vrot.lane.b32.xlu1 %v7094_v29, %s4147_s0 }
 0x620   :  { %v7100_v8 = vpop.permute.xlu0 %2914  ;;  %v7102_v21 = vpop.permute.xlu1 %2916 }
 0x621   :  { %10084 = vst [vmem:[#allocation618_spill] sm:$0xff] %v7100_v8  ;;  %10085 = vst [vmem:[#allocation619_spill] sm:$0xff] %v7102_v21 }
 0x622   :  { %3180 = vrot.lane.b32.xlu0 %v6702_v26, %s4159_s10  ;;  %3182 = vrot.lane.b32.xlu1 %v6706_v22, %s4159_s10 }
 0x624   :  { %v7108_v2 = vpop.permute.xlu0 %3019  ;;  %v7110_v25 = vpop.permute.xlu1 %3021 }
 0x625   :  { %10086 = vst [vmem:[#allocation620_spill] sm:$0xff] %v7108_v2  ;;  %10087 = vst [vmem:[#allocation621_spill] sm:$0xff] %v7110_v25 }
 0x626   :  { %3184 = vrot.lane.b32.xlu0 %v6714_v4, %s4159_s10  ;;  %3186 = vrot.lane.b32.xlu1 %v6718_v58, %s4159_s10 }
 0x628   :  { %v7116_v30 = vpop.permute.xlu0 %3023  ;;  %v7118_v8 = vpop.permute.xlu1 %3025 }
 0x629   :  { %10088 = vst [vmem:[#allocation622_spill] sm:$0xff] %v7116_v30  ;;  %10089 = vst [vmem:[#allocation623_spill] sm:$0xff] %v7118_v8 }
 0x62a   :  { %3293 = vrot.lane.b32.xlu0 %v6702_v26, %s4165_s16  ;;  %3295 = vrot.lane.b32.xlu1 %v6706_v22, %s4165_s16 }
 0x62c   :  { %v7124_v21 = vpop.permute.xlu0 %3132  ;;  %v7126_v2 = vpop.permute.xlu1 %3134 }
 0x62d   :  { %10090 = vst [vmem:[#allocation624_spill] sm:$0xff] %v7124_v21  ;;  %10091 = vst [vmem:[#allocation625_spill] sm:$0xff] %v7126_v2 }
 0x62e   :  { %3297 = vrot.lane.b32.xlu0 %v6714_v4, %s4165_s16  ;;  %3299 = vrot.lane.b32.xlu1 %v6718_v58, %s4165_s16 }
 0x630   :  { %v7132_v25 = vpop.permute.xlu0 %3136  ;;  %v7134_v30 = vpop.permute.xlu1 %3138 }
 0x631   :  { %10092 = vst [vmem:[#allocation626_spill] sm:$0xff] %v7132_v25  ;;  %10093 = vst [vmem:[#allocation627_spill] sm:$0xff] %v7134_v30 }
 0x632   :  { %3402 = vrot.lane.b32.xlu0 %v7078_v57, %s4148_s22  ;;  %3404 = vrot.lane.b32.xlu1 %v7082_v17, %s4148_s22 }
 0x634   :  { %v7140_v8 = vpop.permute.xlu0 %2922  ;;  %v7142_v21 = vpop.permute.xlu1 %2924 }
 0x635   :  { %10094 = vst [vmem:[#allocation628_spill] sm:$0xff] %v7140_v8  ;;  %10095 = vst [vmem:[#allocation629_spill] sm:$0xff] %v7142_v21 }
 0x636   :  { %3406 = vrot.lane.b32.xlu0 %v7090_v6, %s4148_s22  ;;  %3408 = vrot.lane.b32.xlu1 %v7094_v29, %s4148_s22 }
 0x638   :  { %v7148_v2 = vpop.permute.xlu0 %2926  ;;  %v7150_v25 = vpop.permute.xlu1 %2928 }
 0x639   :  { %10096 = vst [vmem:[#allocation630_spill] sm:$0xff] %v7148_v2  ;;  %10097 = vst [vmem:[#allocation631_spill] sm:$0xff] %v7150_v25 }
 0x63a   :  { %3192 = vrot.lane.b32.xlu0 %v6702_v26, %s4160_s11  ;;  %3194 = vrot.lane.b32.xlu1 %v6706_v22, %s4160_s11 }
 0x63c   :  { %v7156_v30 = vpop.permute.xlu0 %3031  ;;  %v7158_v8 = vpop.permute.xlu1 %3033 }
 0x63d   :  { %10098 = vst [vmem:[#allocation632_spill] sm:$0xff] %v7156_v30  ;;  %10099 = vst [vmem:[#allocation633_spill] sm:$0xff] %v7158_v8  ;;  %v4081_v30 = vld [vmem:[#allocation2] sm:$0xff] }
 0x63e   :  { %3196 = vrot.lane.b32.xlu0 %v6714_v4, %s4160_s11  ;;  %3198 = vrot.lane.b32.xlu1 %v6718_v58, %s4160_s11  ;;  %v212_v25 = vsel %vm211_vm3, %v4081_v30, %v4404_v31 }
 0x63f   :  { %v217_v31 = vsel %vm216_vm4, %v212_v25, %v4420_v35  ;;  %v10109_v25 = vld [vmem:[#allocation9_spill] sm:$0xff] }
 0x640   :  { %v7164_v21 = vpop.permute.xlu0 %3035  ;;  %v7166_v2 = vpop.permute.xlu1 %3037 }
 0x641   :  { %10100 = vst [vmem:[#allocation634_spill] sm:$0xff] %v7164_v21  ;;  %10101 = vst [vmem:[#allocation635_spill] sm:$0xff] %v7166_v2  ;;  %v4082_v21 = vld [vmem:[#allocation2 + $0x8] sm:$0xff] }
 0x642   :  { %3305 = vrot.lane.b32.xlu0 %v6702_v26, %s4166_s17  ;;  %3307 = vrot.lane.b32.xlu1 %v6706_v22, %s4166_s17  ;;  %v213_v2 = vsel %vm211_vm3, %v4082_v21, %v4406_v32  ;;  %v215_v22 = vsel %vm211_vm3, %v4083_v18, %v4414_v34  ;;  %v10110_v21 = vld [vmem:[#allocation8_spill] sm:$0xff] }
 0x643   :  { %v218_v28 = vsel %vm216_vm4, %v213_v2, %v4422_v36  ;;  %v220_v32 = vsel %vm216_vm4, %v215_v22, %v4430_v38 }
 0x644   :  { %v7172_v8 = vpop.permute.xlu0 %3144  ;;  %v7178_v26 = vpop.permute.xlu1 %3146  ;;  %v223_v34 = vsel %vm221_vm5, %v218_v28, %v4438_v40  ;;  %v225_v35 = vsel %vm221_vm5, %v220_v32, %v4446_v42 }
 0x645   :  { %10102 = vst [vmem:[#allocation636_spill] sm:$0xff] %v7172_v8  ;;  %10103 = vst [vmem:[#allocation637_spill] sm:$0xff] %v7178_v26  ;;  %v214_v8 = vsel %vm211_vm3, %v4084_v27, %v4412_v33  ;;  %v222_v33 = vsel %vm221_vm5, %v217_v31, %v4436_v39  ;;  %v228_v38 = vsel %vm226_vm6, %v223_v34, %v4454_v44  ;;  %v10111_v31 = vld [vmem:[#allocation7_spill] sm:$0xff] }
 0x646   :  { %3309 = vrot.lane.b32.xlu0 %v6714_v4, %s4166_s17  ;;  %v219_v30 = vsel %vm216_vm4, %v214_v8, %v4428_v37  ;;  %3311 = vrot.lane.b32.xlu1 %v6718_v58, %s4166_s17  ;;  %v227_v37 = vsel %vm226_vm6, %v222_v33, %v4452_v43  ;;  %v230_v39 = vsel %vm226_vm6, %v225_v35, %v4462_v46  ;;  %v10113_v33 = vld [vmem:[#allocation11_spill] sm:$0xff] }
 0x647   :  { %v224_v36 = vsel %vm221_vm5, %v219_v30, %v4444_v41  ;;  %v233_v42 = vsel %vm231_vm7, %v228_v38, %v4470_v48  ;;  %v232_v41 = vsel %vm231_vm7, %v227_v37, %v4468_v47  ;;  %v235_v44 = vsel %vm231_vm7, %v230_v39, %v4478_v50  ;;  %v10112_v30 = vld [vmem:[#allocation6_spill] sm:$0xff]  ;;  %v10115_v37 = vld [vmem:[#allocation13_spill] sm:$0xff]  ;;  %v10518_v26 = vld [vmem:[#allocation387_spill] sm:$0xff] }
 0x648   :  { %v7208_v18 = vpop.permute.xlu0 %3148  ;;  %v229_v40 = vsel %vm226_vm6, %v224_v36, %v4460_v45  ;;  %v7218_v22 = vpop.permute.xlu1 %3150  ;;  %v356_v46 = vsel %vm211_vm3, %v4518_v60, %v4534_v0  ;;  %v355_v45 = vsel %vm211_vm3, %v4516_v59, %v4532_v63  ;;  %v238_v47 = vsel %vm236_vm8, %v233_v42, %v4486_v52  ;;  %v10114_v36 = vld [vmem:[#allocation10_spill] sm:$0xff] }
 0x649   :  { %10104 = vst [vmem:[#allocation638_spill] sm:$0xff] %v7208_v18  ;;  %10105 = vst [vmem:[#allocation639_spill] sm:$0xff] %v7218_v22  ;;  %v234_v43 = vsel %vm231_vm7, %v229_v40, %v4476_v49  ;;  %v237_v48 = vsel %vm236_vm8, %v232_v41, %v4484_v51  ;;  %v360_v49 = vsel %vm216_vm4, %v356_v46, %v4556_v7  ;;  %v10116_v40 = vld [vmem:[#allocation12_spill] sm:$0xff]  ;;  %v10479_v18 = vld [vmem:[#allocation343_spill] sm:$0xff] }
 0x64a   :  { %3414 = vrot.lane.b32.xlu0 %v7078_v57, %s4149_s23  ;;  %v359_v50 = vsel %vm216_vm4, %v355_v45, %v4552_v5  ;;  %3416 = vrot.lane.b32.xlu1 %v7082_v17, %s4149_s23  ;;  %v240_v59 = vsel %vm236_vm8, %v235_v44, %v4494_v54  ;;  %v239_v60 = vsel %vm236_vm8, %v234_v43, %v4492_v53  ;;  %v10117_v43 = vld [vmem:[#allocation17_spill] sm:$0xff]  ;;  %v10118_v45 = vld [vmem:[#allocation16_spill] sm:$0xff] }
 0x64b   :  { %v364_v52 = vsel %vm221_vm5, %v360_v49, %v4574_v12  ;;  %v363_v51 = vsel %vm221_vm5, %v359_v50, %v4572_v11  ;;  %v243_v0 = vsel %vm241_vm9, %v238_v47, %v4502_v56  ;;  %v242_v5 = vsel %vm241_vm9, %v237_v48, %v4500_v55  ;;  %v7265_v11 = vld [vmem:[%s9464_s1] ss:$0 sm:$0xff] }
 0x64c   :  { %v7250_v63 = vpop.permute.xlu0 %3245  ;;  %v368_v54 = vsel %vm226_vm6, %v364_v52, %v4590_v16  ;;  %v367_v53 = vsel %vm226_vm6, %v363_v51, %v4588_v15  ;;  %v7260_v7 = vpop.permute.xlu1 %3247  ;;  %v358_v56 = vsel %vm211_vm3, %v4526_v62, %v4544_v3  ;;  %v357_v55 = vsel %vm211_vm3, %v4524_v61, %v4540_v1  ;;  %v10119_v48 = vld [vmem:[#allocation23_spill] sm:$0xff] }
 0x64d   :  { %v372_v12 = vsel %vm231_vm7, %v368_v54, %v4606_v20  ;;  %v371_v15 = vsel %vm231_vm7, %v367_v53, %v4604_v19  ;;  %v362_v16 = vsel %vm216_vm4, %v358_v56, %v4566_v10  ;;  %v361_v27 = vsel %vm216_vm4, %v357_v55, %v4564_v9  ;;  %v7296_v10 = vld [vmem:[%s9464_s1 + $0x1] ss:$0 sm:$0xff]  ;;  %v10107_v20 = vld [vmem:[#allocation14_spill] sm:$0xff]  ;;  %v10125_v53 = vld [vmem:[#allocation24_spill] sm:$0xff] }
 0x64e   :  { %3418 = vrot.lane.b32.xlu0 %v7090_v6, %s4149_s23  ;;  %v376_v62 = vsel %vm236_vm8, %v372_v12, %v4622_v24  ;;  %v375_v61 = vsel %vm236_vm8, %v371_v15, %v4620_v23  ;;  %3420 = vrot.lane.b32.xlu1 %v7094_v29, %s4149_s23  ;;  %v366_v1 = vsel %vm221_vm5, %v362_v16, %v4582_v14  ;;  %v10106_v9 = vld [vmem:[#allocation15_spill] sm:$0xff]  ;;  %v10126_v56 = vld [vmem:[#allocation20_spill] sm:$0xff]  ;;  %v10128_v16 = vld [vmem:[#allocation26_spill] sm:$0xff] }
 0x64f   :  { %v365_v3 = vsel %vm221_vm5, %v361_v27, %v4580_v13  ;;  %v380_v19 = vsel %vm241_vm9, %v376_v62, %v10106_v9  ;;  %v379_v23 = vsel %vm241_vm9, %v375_v61, %v10107_v20  ;;  %v252_v28 = vmul.f32 %v7265_v11, %v243_v0  ;;  %v10120_v49 = vld [vmem:[#allocation19_spill] sm:$0xff]  ;;  %v10123_v0 = vld [vmem:[#allocation25_spill] sm:$0xff] }
 0x650   :  { %v7302_v24 = vpop.permute.xlu0 %3249  ;;  %v251_v14 = vmul.f32 %v7265_v11, %v242_v5  ;;  %v370_v13 = vsel %vm226_vm6, %v366_v1, %v10109_v25  ;;  %v369_v2 = vsel %vm226_vm6, %v365_v3, %v10110_v21  ;;  %v7310_v8 = vpop.permute.xlu1 %3251  ;;  %v245_v32 = vsel %vm241_vm9, %v240_v59, %v10111_v31  ;;  %v10121_v59 = vld [vmem:[#allocation22_spill] sm:$0xff]  ;;  %v10124_v5 = vld [vmem:[#allocation21_spill] sm:$0xff]  ;;  %v10127_v12 = vld [vmem:[#allocation27_spill] sm:$0xff] }
 0x651   :  { %10108 = vst [vmem:[#allocation15_spill] sm:$0xff] %v7302_v24  ;;  %v244_v34 = vsel %vm241_vm9, %v239_v60, %v10112_v30  ;;  %v374_v35 = vsel %vm231_vm7, %v370_v13, %v10113_v33  ;;  %v373_v38 = vsel %vm231_vm7, %v369_v2, %v10114_v36  ;;  %v389_v41 = vmul.f32 %v7296_v10, %v380_v19  ;;  %v10122_v60 = vld [vmem:[#allocation18_spill] sm:$0xff]  ;;  %v10129_v61 = vld [vmem:[#allocation29_spill] sm:$0xff]  ;;  %v10130_v3 = vld [vmem:[#allocation28_spill] sm:$0xff] }
 0x652   :  { %3515 = vrot.lane.b32.xlu0 %v7078_v57, %s4143_s25  ;;  %v378_v39 = vsel %vm236_vm8, %v374_v35, %v10115_v37  ;;  %v377_v42 = vsel %vm236_vm8, %v373_v38, %v10116_v40  ;;  %v388_v44 = vmul.f32 %v7296_v10, %v379_v23  ;;  %3517 = vrot.lane.b32.xlu1 %v7082_v17, %s4143_s25  ;;  %v10131_v19 = vld [vmem:[#allocation31_spill] sm:$0xff]  ;;  %v10132_v23 = vld [vmem:[#allocation30_spill] sm:$0xff]  ;;  %v10133_v13 = vld [vmem:[#allocation33_spill] sm:$0xff] }
 0x653   :  { %v382_v46 = vsel %vm241_vm9, %v378_v39, %v10117_v43  ;;  %v381_v47 = vsel %vm241_vm9, %v377_v42, %v10118_v45  ;;  %v493_v50 = vsel %vm211_vm3, %v10120_v49, %v10119_v48  ;;  %v492_v52 = vsel %vm211_vm3, %v10122_v60, %v10121_v59  ;;  %v10134_v2 = vld [vmem:[#allocation32_spill] sm:$0xff]  ;;  %v10135_v30 = vld [vmem:[#allocation35_spill] sm:$0xff]  ;;  %v10136_v35 = vld [vmem:[#allocation34_spill] sm:$0xff] }
 0x654   :  { %v7340_v51 = vpop.permute.xlu0 %3257  ;;  %v495_v54 = vsel %vm211_vm3, %v10124_v5, %v10123_v0  ;;  %v494_v55 = vsel %vm211_vm3, %v10126_v56, %v10125_v53  ;;  %v497_v15 = vsel %vm216_vm4, %v493_v50, %v10127_v12  ;;  %v496_v27 = vsel %vm216_vm4, %v492_v52, %v10128_v16  ;;  %v7352_v62 = vpop.permute.xlu1 %3259  ;;  %v10137_v38 = vld [vmem:[#allocation37_spill] sm:$0xff]  ;;  %v10138_v39 = vld [vmem:[#allocation36_spill] sm:$0xff]  ;;  %v10139_v42 = vld [vmem:[#allocation39_spill] sm:$0xff] }
 0x655   :  { %v499_v1 = vsel %vm216_vm4, %v495_v54, %v10129_v61  ;;  %v498_v9 = vsel %vm216_vm4, %v494_v55, %v10130_v3  ;;  %v501_v20 = vsel %vm221_vm5, %v497_v15, %v10131_v19  ;;  %v500_v25 = vsel %vm221_vm5, %v496_v27, %v10132_v23  ;;  %v10140_v45 = vld [vmem:[#allocation38_spill] sm:$0xff]  ;;  %v10142_v50 = vld [vmem:[#allocation41_spill] sm:$0xff]  ;;  %v10143_v60 = vld [vmem:[#allocation40_spill] sm:$0xff] }
 0x656   :  { %3519 = vrot.lane.b32.xlu0 %v7090_v6, %s4143_s25  ;;  %v503_v21 = vsel %vm221_vm5, %v499_v1, %v10133_v13  ;;  %v502_v31 = vsel %vm221_vm5, %v498_v9, %v10134_v2  ;;  %v505_v33 = vsel %vm226_vm6, %v501_v20, %v10135_v30  ;;  %v504_v36 = vsel %vm226_vm6, %v500_v25, %v10136_v35  ;;  %v10144_v0 = vld [vmem:[#allocation43_spill] sm:$0xff]  ;;  %v10145_v54 = vld [vmem:[#allocation42_spill] sm:$0xff]  ;;  %v10146_v55 = vld [vmem:[#allocation45_spill] sm:$0xff] }
 0x657   :  { %3521 = vrot.lane.b32.xlu1 %v7094_v29, %s4143_s25  ;;  %v507_v37 = vsel %vm226_vm6, %v503_v21, %v10137_v38  ;;  %v506_v40 = vsel %vm226_vm6, %v502_v31, %v10138_v39  ;;  %v509_v43 = vsel %vm231_vm7, %v505_v33, %v10139_v42  ;;  %v508_v48 = vsel %vm231_vm7, %v504_v36, %v10140_v45  ;;  %v10147_v15 = vld [vmem:[#allocation44_spill] sm:$0xff]  ;;  %v10148_v61 = vld [vmem:[#allocation47_spill] sm:$0xff]  ;;  %v10149_v3 = vld [vmem:[#allocation46_spill] sm:$0xff] }
 0x658   :  { %v7382_v49 = vpop.permute.xlu0 %3261  ;;  %v511_v59 = vsel %vm231_vm7, %v507_v37, %v10142_v50  ;;  %v510_v52 = vsel %vm231_vm7, %v506_v40, %v10143_v60  ;;  %v513_v5 = vsel %vm236_vm8, %v509_v43, %v10144_v0  ;;  %v512_v53 = vsel %vm236_vm8, %v508_v48, %v10145_v54  ;;  %v7392_v56 = vpop.permute.xlu1 %3263  ;;  %v3970_v27 = vld [vmem:[%s9464_s1 + $0x2] ss:$0 sm:$0xff]  ;;  %v10150_v19 = vld [vmem:[#allocation49_spill] sm:$0xff]  ;;  %v10158_v45 = vld [vmem:[#allocation55_spill] sm:$0xff] }
 0x659   :  { %10141 = vst [vmem:[#allocation14_spill] sm:$0xff] %v7382_v49  ;;  %v515_v12 = vsel %vm236_vm8, %v511_v59, %v10146_v55  ;;  %v514_v16 = vsel %vm236_vm8, %v510_v52, %v10147_v15  ;;  %v517_v1 = vsel %vm241_vm9, %v513_v5, %v10148_v61  ;;  %v516_v9 = vsel %vm241_vm9, %v512_v53, %v10149_v3  ;;  %v10151_v23 = vld [vmem:[#allocation48_spill] sm:$0xff]  ;;  %v10159_v50 = vld [vmem:[#allocation54_spill] sm:$0xff]  ;;  %v10160_v60 = vld [vmem:[#allocation57_spill] sm:$0xff] }
 0x65a   :  { %3527 = vrot.lane.b32.xlu0 %v7078_v57, %s4154_s29  ;;  %v519_v20 = vsel %vm241_vm9, %v515_v12, %v10150_v19  ;;  %v518_v25 = vsel %vm241_vm9, %v514_v16, %v10151_v23  ;;  %v7414_v13 = vmul.f32 %v7265_v11, %v245_v32  ;;  %v7417_v21 = vmul.f32 %v7265_v11, %v244_v34  ;;  %v10154_v34 = vld [vmem:[#allocation51_spill] sm:$0xff]  ;;  %v4088_v40 = vld [vmem:[#allocation2 + $0x49] sm:$0xff]  ;;  %v10163_v55 = vld [vmem:[#allocation58_spill] sm:$0xff] }
 0x65b   :  { %3529 = vrot.lane.b32.xlu1 %v7082_v17, %s4154_s29  ;;  %v7419_v2 = vadd.f32 %v389_v41, %v252_v28  ;;  %v7421_v31 = vadd.f32 %v388_v44, %v251_v14  ;;  %v7426_v33 = vmul.f32 %v7296_v10, %v382_v46  ;;  %v7429_v35 = vmul.f32 %v7296_v10, %v381_v47  ;;  %v4085_v14 = vld [vmem:[#allocation2 + $0x9] sm:$0xff]  ;;  %v4086_v44 = vld [vmem:[#allocation2 + $0x1] sm:$0xff]  ;;  %v10155_v46 = vld [vmem:[#allocation50_spill] sm:$0xff] }
 0x65c   :  { %v7423_v30 = vpop.permute.xlu0 %3043  ;;  %v7431_v36 = vmul.f32 %v3970_v27, %v517_v1  ;;  %v7433_v38 = vmul.f32 %v3970_v27, %v516_v9  ;;  %v7435_v32 = vpop.permute.xlu1 %3045  ;;  %v7437_v11 = vmul.f32 %v3970_v27, %v519_v20  ;;  %v7439_v28 = vmul.f32 %v3970_v27, %v518_v25  ;;  %v4087_v10 = vld [vmem:[#allocation2 + $0x51] sm:$0xff]  ;;  %v10157_v42 = vld [vmem:[#allocation52_spill] sm:$0xff]  ;;  %v10162_v54 = vld [vmem:[#allocation59_spill] sm:$0xff] }
 0x65d   :  { %10152 = vst [vmem:[#allocation9_spill] sm:$0xff] %v7423_v30  ;;  %10153 = vst [vmem:[#allocation8_spill] sm:$0xff] %v7435_v32  ;;  %v626_v41 = vsel %vm211_vm3, %v4085_v14, %v10154_v34  ;;  %v625_v37 = vsel %vm211_vm3, %v4086_v44, %v10155_v46  ;;  %v10156_v47 = vld [vmem:[#allocation53_spill] sm:$0xff]  ;;  %v627_v43 = vsel %vm211_vm3, %v4088_v40, %v10157_v42  ;;  %v10161_v0 = vld [vmem:[#allocation56_spill] sm:$0xff] }
 0x65e   :  { %3531 = vrot.lane.b32.xlu0 %v7090_v6, %s4154_s29  ;;  %v628_v39 = vsel %vm211_vm3, %v4087_v10, %v10156_v47  ;;  %v630_v48 = vsel %vm216_vm4, %v626_v41, %v10158_v45  ;;  %v629_v59 = vsel %vm216_vm4, %v625_v37, %v10159_v50  ;;  %v631_v5 = vsel %vm216_vm4, %v627_v43, %v10161_v0  ;;  %v10165_v16 = vld [vmem:[#allocation61_spill] sm:$0xff]  ;;  %v10166_v61 = vld [vmem:[#allocation60_spill] sm:$0xff]  ;;  %v10167_v3 = vld [vmem:[#allocation63_spill] sm:$0xff] }
 0x65f   :  { %3533 = vrot.lane.b32.xlu1 %v7094_v29, %s4154_s29  ;;  %v632_v52 = vsel %vm216_vm4, %v628_v39, %v10160_v60  ;;  %v634_v53 = vsel %vm221_vm5, %v630_v48, %v10162_v54  ;;  %v633_v12 = vsel %vm221_vm5, %v629_v59, %v10163_v55  ;;  %v635_v1 = vsel %vm221_vm5, %v631_v5, %v10166_v61  ;;  %v10168_v19 = vld [vmem:[#allocation62_spill] sm:$0xff]  ;;  %v10170_v25 = vld [vmem:[#allocation65_spill] sm:$0xff]  ;;  %v10171_v34 = vld [vmem:[#allocation64_spill] sm:$0xff] }
 0x660   :  { %v7465_v15 = vpop.permute.xlu0 %3047  ;;  %v636_v27 = vsel %vm221_vm5, %v632_v52, %v10165_v16  ;;  %v638_v9 = vsel %vm226_vm6, %v634_v53, %v10167_v3  ;;  %v637_v20 = vsel %vm226_vm6, %v633_v12, %v10168_v19  ;;  %v7475_v23 = vpop.permute.xlu1 %3049  ;;  %v639_v41 = vsel %vm226_vm6, %v635_v1, %v10171_v34  ;;  %v10172_v44 = vld [vmem:[#allocation67_spill] sm:$0xff]  ;;  %v10173_v37 = vld [vmem:[#allocation66_spill] sm:$0xff]  ;;  %v10174_v47 = vld [vmem:[#allocation521_spill] sm:$0xff] }
 0x661   :  { %10164 = vst [vmem:[#allocation7_spill] sm:$0xff] %v7465_v15  ;;  %10169 = vst [vmem:[#allocation6_spill] sm:$0xff] %v7475_v23  ;;  %v640_v14 = vsel %vm226_vm6, %v636_v27, %v10170_v25  ;;  %v642_v46 = vsel %vm231_vm7, %v638_v9, %v10172_v44  ;;  %v641_v10 = vsel %vm231_vm7, %v637_v20, %v10173_v37  ;;  %v10175_v39 = vld [vmem:[#allocation69_spill] sm:$0xff]  ;;  %v10176_v42 = vld [vmem:[#allocation68_spill] sm:$0xff] }
 0x662   :  { %3317 = vrot.lane.b32.xlu0 %v10174_v47, %s4167_s18  ;;  %v644_v40 = vsel %vm231_vm7, %v640_v14, %v10175_v39  ;;  %v643_v43 = vsel %vm231_vm7, %v639_v41, %v10176_v42  ;;  %v10177_v45 = vld [vmem:[#allocation71_spill] sm:$0xff]  ;;  %v10178_v50 = vld [vmem:[#allocation70_spill] sm:$0xff]  ;;  %v10180_v52 = vld [vmem:[#allocation73_spill] sm:$0xff] }
 0x663   :  { %v646_v48 = vsel %vm236_vm8, %v642_v46, %v10177_v45  ;;  %v645_v59 = vsel %vm236_vm8, %v641_v10, %v10178_v50  ;;  %v10179_v60 = vld [vmem:[#allocation523_spill] sm:$0xff]  ;;  %v648_v0 = vsel %vm236_vm8, %v644_v40, %v10180_v52  ;;  %v10181_v5 = vld [vmem:[#allocation72_spill] sm:$0xff]  ;;  %v10183_v12 = vld [vmem:[#allocation74_spill] sm:$0xff] }
 0x664   :  { %3319 = vrot.lane.b32.xlu1 %v10179_v60, %s4167_s18  ;;  %v647_v54 = vsel %vm236_vm8, %v643_v43, %v10181_v5  ;;  %v10182_v53 = vld [vmem:[#allocation75_spill] sm:$0xff]  ;;  %v649_v16 = vsel %vm241_vm9, %v645_v59, %v10183_v12  ;;  %v7505_v27 = vpop.permute.xlu0 %3156  ;;  %v10185_v61 = vld [vmem:[#allocation77_spill] sm:$0xff]  ;;  %v10186_v3 = vld [vmem:[#allocation76_spill] sm:$0xff]  ;;  %v7517_v44 = vpop.permute.xlu1 %3158 }
 0x665   :  { %v650_v55 = vsel %vm241_vm9, %v646_v48, %v10182_v53  ;;  %10184 = vst [vmem:[#allocation11_spill] sm:$0xff] %v7505_v27  ;;  %v652_v1 = vsel %vm241_vm9, %v648_v0, %v10185_v61  ;;  %v651_v9 = vsel %vm241_vm9, %v647_v54, %v10186_v3  ;;  %v10187_v19 = vld [vmem:[#allocation83_spill] sm:$0xff]  ;;  %v10189_v14 = vld [vmem:[#allocation82_spill] sm:$0xff]  ;;  %10191 = vst [vmem:[#allocation10_spill] sm:$0xff] %v7517_v44 }
 0x666   :  { %v10188_v20 = vld [vmem:[#allocation79_spill] sm:$0xff]  ;;  %v10190_v34 = vld [vmem:[#allocation78_spill] sm:$0xff]  ;;  %v10192_v46 = vld [vmem:[#allocation85_spill] sm:$0xff]  ;;  %3321 = vrot.lane.b32.xlu0 %v6714_v4, %s4167_s18 }
 0x667   :  { %v763_v25 = vsel %vm211_vm3, %v10188_v20, %v10187_v19  ;;  %v762_v41 = vsel %vm211_vm3, %v10190_v34, %v10189_v14  ;;  %v10193_v37 = vld [vmem:[#allocation81_spill] sm:$0xff]  ;;  %v10194_v47 = vld [vmem:[#allocation84_spill] sm:$0xff]  ;;  %v10196_v42 = vld [vmem:[#allocation87_spill] sm:$0xff] }
 0x668   :  { %v765_v10 = vsel %vm211_vm3, %v10193_v37, %v10192_v46  ;;  %v10195_v39 = vld [vmem:[#allocation80_spill] sm:$0xff]  ;;  %v767_v43 = vsel %vm216_vm4, %v763_v25, %v10196_v42  ;;  %v10197_v45 = vld [vmem:[#allocation86_spill] sm:$0xff]  ;;  %v10198_v50 = vld [vmem:[#allocation89_spill] sm:$0xff]  ;;  %3323 = vrot.lane.b32.xlu1 %v6718_v58, %s4167_s18  ;;  %v7549_v34 = vpop.permute.xlu0 %3160 }
 0x669   :  { %v764_v40 = vsel %vm211_vm3, %v10195_v39, %v10194_v47  ;;  %v766_v48 = vsel %vm216_vm4, %v762_v41, %v10197_v45  ;;  %v769_v59 = vsel %vm216_vm4, %v765_v10, %v10198_v50  ;;  %v10199_v60 = vld [vmem:[#allocation88_spill] sm:$0xff]  ;;  %v10200_v0 = vld [vmem:[#allocation91_spill] sm:$0xff]  ;;  %v10201_v54 = vld [vmem:[#allocation90_spill] sm:$0xff]  ;;  %10206 = vst [vmem:[#allocation13_spill] sm:$0xff] %v7549_v34 }
 0x66a   :  { %v768_v52 = vsel %vm216_vm4, %v764_v40, %v10199_v60  ;;  %v771_v5 = vsel %vm221_vm5, %v767_v43, %v10200_v0  ;;  %v770_v53 = vsel %vm221_vm5, %v766_v48, %v10201_v54  ;;  %v10202_v12 = vld [vmem:[#allocation93_spill] sm:$0xff]  ;;  %v10203_v3 = vld [vmem:[#allocation92_spill] sm:$0xff]  ;;  %v10204_v19 = vld [vmem:[#allocation95_spill] sm:$0xff]  ;;  %v7562_v43 = vpop.permute.xlu1 %3162  ;;  %3426 = vrot.lane.b32.xlu0 %v7078_v57, %s4150_s24 }
 0x66b   :  { %v773_v61 = vsel %vm221_vm5, %v769_v59, %v10202_v12  ;;  %v772_v4 = vsel %vm221_vm5, %v768_v52, %v10203_v3  ;;  %v775_v20 = vsel %vm226_vm6, %v771_v5, %v10204_v19  ;;  %v10205_v25 = vld [vmem:[#allocation94_spill] sm:$0xff]  ;;  %v3971_v41 = vld [vmem:[%s9464_s1 + $0x3] ss:$0 sm:$0xff]  ;;  %v10207_v46 = vld [vmem:[#allocation97_spill] sm:$0xff]  ;;  %10211 = vst [vmem:[#allocation12_spill] sm:$0xff] %v7562_v43 }
 0x66c   :  { %v774_v14 = vsel %vm226_vm6, %v770_v53, %v10205_v25  ;;  %v777_v58 = vsel %vm226_vm6, %v773_v61, %v10207_v46  ;;  %v10208_v37 = vld [vmem:[#allocation96_spill] sm:$0xff]  ;;  %v10209_v47 = vld [vmem:[#allocation99_spill] sm:$0xff]  ;;  %v10210_v40 = vld [vmem:[#allocation98_spill] sm:$0xff]  ;;  %3428 = vrot.lane.b32.xlu1 %v7082_v17, %s4150_s24  ;;  %v658_v46 = vmul.f32 %v3971_v41, %v649_v16  ;;  %v529_v16 = vadd.f32 %v7433_v38, %v7421_v31 }
 0x66d   :  { %v776_v10 = vsel %vm226_vm6, %v772_v4, %v10208_v37  ;;  %v779_v39 = vsel %vm231_vm7, %v775_v20, %v10209_v47  ;;  %v778_v42 = vsel %vm231_vm7, %v774_v14, %v10210_v40  ;;  %v10212_v45 = vld [vmem:[#allocation101_spill] sm:$0xff]  ;;  %v10213_v50 = vld [vmem:[#allocation100_spill] sm:$0xff]  ;;  %v10214_v60 = vld [vmem:[#allocation103_spill] sm:$0xff]  ;;  %v659_v14 = vmul.f32 %v3971_v41, %v650_v55 }
 0x66e   :  { %v781_v48 = vsel %vm231_vm7, %v777_v58, %v10212_v45  ;;  %v780_v59 = vsel %vm231_vm7, %v776_v10, %v10213_v50  ;;  %v783_v52 = vsel %vm236_vm8, %v779_v39, %v10214_v60  ;;  %v10215_v0 = vld [vmem:[#allocation102_spill] sm:$0xff]  ;;  %v10216_v54 = vld [vmem:[#allocation105_spill] sm:$0xff]  ;;  %v10217_v12 = vld [vmem:[#allocation104_spill] sm:$0xff]  ;;  %v7591_v39 = vpop.permute.xlu0 %3269  ;;  %v395_v40 = vadd.f32 %v7426_v33, %v7414_v13  ;;  %v7597_v50 = vpop.permute.xlu1 %3271  ;;  %3430 = vrot.lane.b32.xlu0 %v7090_v6, %s4150_s24 }
 0x66f   :  { %v782_v5 = vsel %vm236_vm8, %v778_v42, %v10215_v0  ;;  %v785_v53 = vsel %vm236_vm8, %v781_v48, %v10216_v54  ;;  %v784_v61 = vsel %vm236_vm8, %v780_v59, %v10217_v12  ;;  %v3972_v3 = vld [vmem:[%s9464_s1 + $0x4] ss:$0 sm:$0xff]  ;;  %v10218_v4 = vld [vmem:[#allocation107_spill] sm:$0xff]  ;;  %v10219_v20 = vld [vmem:[#allocation106_spill] sm:$0xff]  ;;  %v394_v42 = vadd.f32 %v7429_v35, %v7417_v21 }
 0x670   :  { %v787_v19 = vsel %vm241_vm9, %v783_v52, %v10218_v4  ;;  %v786_v25 = vsel %vm241_vm9, %v782_v5, %v10219_v20  ;;  %v10220_v58 = vld [vmem:[#allocation109_spill] sm:$0xff]  ;;  %v10221_v10 = vld [vmem:[#allocation108_spill] sm:$0xff]  ;;  %v661_v45 = vmul.f32 %v3971_v41, %v652_v1  ;;  %v660_v48 = vmul.f32 %v3971_v41, %v651_v9  ;;  %3432 = vrot.lane.b32.xlu1 %v7094_v29, %s4150_s24  ;;  %v10223_v38 = vld [vmem:[#allocation115_spill] sm:$0xff] }
 0x671   :  { %v789_v37 = vsel %vm241_vm9, %v785_v53, %v10220_v58  ;;  %v788_v47 = vsel %vm241_vm9, %v784_v61, %v10221_v10  ;;  %v530_v55 = vadd.f32 %v7431_v36, %v7419_v2  ;;  %v796_v59 = vmul.f32 %v3972_v3, %v787_v19  ;;  %v10224_v41 = vld [vmem:[#allocation111_spill] sm:$0xff]  ;;  %v10225_v0 = vld [vmem:[#allocation114_spill] sm:$0xff]  ;;  %v10232_v10 = vld [vmem:[#allocation113_spill] sm:$0xff] }
 0x672   :  { %v795_v60 = vmul.f32 %v3972_v3, %v786_v25  ;;  %v532_v13 = vadd.f32 %v7437_v11, %v395_v40  ;;  %v531_v33 = vadd.f32 %v7439_v28, %v394_v42  ;;  %v798_v21 = vmul.f32 %v3972_v3, %v789_v37  ;;  %v7609_v2 = vpop.permute.xlu0 %3273  ;;  %v10226_v5 = vld [vmem:[#allocation110_spill] sm:$0xff]  ;;  %v7617_v28 = vpop.permute.xlu1 %3275  ;;  %v10227_v12 = vld [vmem:[#allocation119_spill] sm:$0xff]  ;;  %3539 = vrot.lane.b32.xlu0 %v7078_v57, %s4155_s30  ;;  %v10231_v37 = vld [vmem:[#allocation117_spill] sm:$0xff] }
 0x673   :  { %v797_v35 = vmul.f32 %v3972_v3, %v788_v47  ;;  %v663_v1 = vadd.f32 %v659_v14, %v530_v55  ;;  %v662_v9 = vadd.f32 %v658_v46, %v529_v16  ;;  %10222 = vst [vmem:[#allocation17_spill] sm:$0xff] %v7609_v2  ;;  %v900_v52 = vsel %vm211_vm3, %v10224_v41, %v10223_v38  ;;  %v10228_v3 = vld [vmem:[#allocation118_spill] sm:$0xff]  ;;  %v10229_v25 = vld [vmem:[#allocation123_spill] sm:$0xff]  ;;  %v10233_v40 = vld [vmem:[#allocation116_spill] sm:$0xff] }
 0x674   :  { %v665_v36 = vadd.f32 %v661_v45, %v532_v13  ;;  %v664_v31 = vadd.f32 %v660_v48, %v531_v33  ;;  %v899_v11 = vsel %vm211_vm3, %v10226_v5, %v10225_v0  ;;  %v904_v61 = vsel %vm216_vm4, %v900_v52, %v10227_v12  ;;  %v10230_v46 = vld [vmem:[#allocation122_spill] sm:$0xff]  ;;  %3541 = vrot.lane.b32.xlu1 %v7082_v17, %s4155_s30  ;;  %v10234_v42 = vld [vmem:[#allocation112_spill] sm:$0xff]  ;;  %v10235_v48 = vld [vmem:[#allocation127_spill] sm:$0xff] }
 0x675   :  { %v7619_v54 = vadd.f32 %v796_v59, %v663_v1  ;;  %v7621_v53 = vadd.f32 %v795_v60, %v662_v9  ;;  %v903_v4 = vsel %vm216_vm4, %v899_v11, %v10228_v3  ;;  %v908_v14 = vsel %vm221_vm5, %v904_v61, %v10229_v25  ;;  %v10236_v16 = vld [vmem:[#allocation126_spill] sm:$0xff]  ;;  %v10238_v13 = vld [vmem:[#allocation121_spill] sm:$0xff]  ;;  %v10240_v1 = vld [vmem:[#allocation131_spill] sm:$0xff] }
 0x676   :  { %v7629_v19 = vadd.f32 %v798_v21, %v665_v36  ;;  %v7631_v20 = vadd.f32 %v797_v35, %v664_v31  ;;  %v907_v58 = vsel %vm221_vm5, %v903_v4, %v10230_v46  ;;  %v902_v47 = vsel %vm211_vm3, %v10232_v10, %v10231_v37  ;;  %v7649_v60 = vpop.permute.xlu0 %3055  ;;  %v10239_v21 = vld [vmem:[#allocation120_spill] sm:$0xff]  ;;  %v10241_v36 = vld [vmem:[#allocation130_spill] sm:$0xff]  ;;  %v7659_v38 = vpop.permute.xlu1 %3057  ;;  %v10243_v41 = vld [vmem:[#allocation125_spill] sm:$0xff]  ;;  %3543 = vrot.lane.b32.xlu0 %v7090_v6, %s4155_s30 }
 0x677   :  { %v901_v45 = vsel %vm211_vm3, %v10234_v42, %v10233_v40  ;;  %v912_v55 = vsel %vm226_vm6, %v908_v14, %v10235_v48  ;;  %v911_v59 = vsel %vm226_vm6, %v907_v58, %v10236_v16  ;;  %10237 = vst [vmem:[#allocation16_spill] sm:$0xff] %v7649_v60  ;;  %v906_v33 = vsel %vm216_vm4, %v902_v47, %v10238_v13  ;;  %v10244_v0 = vld [vmem:[#allocation124_spill] sm:$0xff]  ;;  %v10245_v11 = vld [vmem:[#allocation135_spill] sm:$0xff]  ;;  %v10246_v61 = vld [vmem:[#allocation134_spill] sm:$0xff] }
 0x678   :  { %v905_v35 = vsel %vm216_vm4, %v901_v45, %v10239_v21  ;;  %v916_v9 = vsel %vm231_vm7, %v912_v55, %v10240_v1  ;;  %v915_v31 = vsel %vm231_vm7, %v911_v59, %v10241_v36  ;;  %10242 = vst [vmem:[#allocation23_spill] sm:$0xff] %v7659_v38  ;;  %v910_v52 = vsel %vm221_vm5, %v906_v33, %v10243_v41  ;;  %v10247_v4 = vld [vmem:[#allocation129_spill] sm:$0xff]  ;;  %v10248_v14 = vld [vmem:[#allocation128_spill] sm:$0xff]  ;;  %v10249_v37 = vld [vmem:[#allocation139_spill] sm:$0xff] }
 0x679   :  { %v909_v5 = vsel %vm221_vm5, %v905_v35, %v10244_v0  ;;  %v920_v12 = vsel %vm236_vm8, %v916_v9, %v10245_v11  ;;  %v919_v3 = vsel %vm236_vm8, %v915_v31, %v10246_v61  ;;  %v914_v25 = vsel %vm226_vm6, %v910_v52, %v10247_v4  ;;  %v3973_v58 = vld [vmem:[%s9464_s1 + $0x5] ss:$0 sm:$0xff]  ;;  %v10250_v47 = vld [vmem:[#allocation138_spill] sm:$0xff]  ;;  %3545 = vrot.lane.b32.xlu1 %v7094_v29, %s4155_s30  ;;  %v10251_v42 = vld [vmem:[#allocation133_spill] sm:$0xff] }
 0x67a   :  { %v913_v46 = vsel %vm226_vm6, %v909_v5, %v10248_v14  ;;  %v924_v10 = vsel %vm241_vm9, %v920_v12, %v10249_v37  ;;  %v923_v40 = vsel %vm241_vm9, %v919_v3, %v10250_v47  ;;  %v918_v45 = vsel %vm231_vm7, %v914_v25, %v10251_v42  ;;  %v10252_v48 = vld [vmem:[#allocation132_spill] sm:$0xff]  ;;  %v4089_v16 = vld [vmem:[#allocation2 + $0xa] sm:$0xff]  ;;  %v10253_v59 = vld [vmem:[#allocation143_spill] sm:$0xff]  ;;  %v7692_v1 = vpop.permute.xlu0 %3059  ;;  %v7702_v12 = vpop.permute.xlu1 %3061 }
 0x67b   :  { %v917_v55 = vsel %vm231_vm7, %v913_v46, %v10252_v48  ;;  %v1033_v13 = vsel %vm211_vm3, %v4089_v16, %v10253_v59  ;;  %v4090_v33 = vld [vmem:[#allocation2 + $0x2] sm:$0xff]  ;;  %v10254_v21 = vld [vmem:[#allocation142_spill] sm:$0xff]  ;;  %10255 = vst [vmem:[#allocation19_spill] sm:$0xff] %v7692_v1  ;;  %v10256_v9 = vld [vmem:[#allocation137_spill] sm:$0xff]  ;;  %v933_v61 = vmul.f32 %v3973_v58, %v924_v10  ;;  %v932_v3 = vmul.f32 %v3973_v58, %v923_v40 }
 0x67c   :  { %v1032_v35 = vsel %vm211_vm3, %v4090_v33, %v10254_v21  ;;  %v922_v36 = vsel %vm236_vm8, %v918_v45, %v10256_v9  ;;  %v10257_v31 = vld [vmem:[#allocation136_spill] sm:$0xff]  ;;  %v10258_v52 = vld [vmem:[#allocation147_spill] sm:$0xff]  ;;  %v10259_v5 = vld [vmem:[#allocation146_spill] sm:$0xff]  ;;  %10260 = vst [vmem:[#allocation22_spill] sm:$0xff] %v7702_v12 }
 0x67d   :  { %v921_v41 = vsel %vm236_vm8, %v917_v55, %v10257_v31  ;;  %v1037_v0 = vsel %vm216_vm4, %v1033_v13, %v10258_v52  ;;  %v1036_v11 = vsel %vm216_vm4, %v1032_v35, %v10259_v5  ;;  %v10261_v4 = vld [vmem:[#allocation151_spill] sm:$0xff]  ;;  %v10262_v14 = vld [vmem:[#allocation150_spill] sm:$0xff]  ;;  %v10263_v47 = vld [vmem:[#allocation141_spill] sm:$0xff] }
 0x67e   :  { %v1041_v25 = vsel %vm221_vm5, %v1037_v0, %v10261_v4  ;;  %v1040_v46 = vsel %vm221_vm5, %v1036_v11, %v10262_v14  ;;  %v4091_v37 = vld [vmem:[#allocation2 + $0x31] sm:$0xff]  ;;  %v926_v42 = vsel %vm241_vm9, %v922_v36, %v10263_v47  ;;  %v10264_v45 = vld [vmem:[#allocation140_spill] sm:$0xff]  ;;  %v10265_v55 = vld [vmem:[#allocation155_spill] sm:$0xff]  ;;  %v7726_v5 = vpop.permute.xlu0 %3168 }
 0x67f   :  { %3329 = vrot.lane.b32.xlu0 %v4091_v37, %s4168_s19  ;;  %v925_v48 = vsel %vm241_vm9, %v921_v41, %v10264_v45  ;;  %v1045_v16 = vsel %vm226_vm6, %v1041_v25, %v10265_v55  ;;  %v10266_v10 = vld [vmem:[#allocation154_spill] sm:$0xff]  ;;  %v10267_v33 = vld [vmem:[#allocation145_spill] sm:$0xff]  ;;  %v10268_v9 = vld [vmem:[#allocation144_spill] sm:$0xff]  ;;  %10271 = vst [vmem:[#allocation18_spill] sm:$0xff] %v7726_v5  ;;  %v7736_v55 = vpop.permute.xlu1 %3170 }
 0x680   :  { %v1044_v40 = vsel %vm226_vm6, %v1040_v46, %v10266_v10  ;;  %v4092_v59 = vld [vmem:[#allocation2 + $0x39] sm:$0xff]  ;;  %v4094_v35 = vld [vmem:[#allocation2 + $0x4a] sm:$0xff]  ;;  %v10273_v25 = vld [vmem:[#allocation148_spill] sm:$0xff]  ;;  %10276 = vst [vmem:[#allocation25_spill] sm:$0xff] %v7736_v55 }
 0x681   :  { %3331 = vrot.lane.b32.xlu1 %v4092_v59, %s4168_s19  ;;  %v4093_v13 = vld [vmem:[#allocation2 + $0x52] sm:$0xff]  ;;  %v1034_v36 = vsel %vm211_vm3, %v4094_v35, %v10268_v9  ;;  %v10269_v31 = vld [vmem:[#allocation159_spill] sm:$0xff]  ;;  %v10272_v11 = vld [vmem:[#allocation149_spill] sm:$0xff] }
 0x682   :  { %v1035_v21 = vsel %vm211_vm3, %v4093_v13, %v10267_v33  ;;  %v1049_v41 = vsel %vm231_vm7, %v1045_v16, %v10269_v31  ;;  %v10270_v52 = vld [vmem:[#allocation158_spill] sm:$0xff]  ;;  %v1038_v14 = vsel %vm216_vm4, %v1034_v36, %v10273_v25  ;;  %v10274_v46 = vld [vmem:[#allocation163_spill] sm:$0xff]  ;;  %v10277_v16 = vld [vmem:[#allocation153_spill] sm:$0xff]  ;;  %v937_v31 = vadd.f32 %v933_v61, %v7619_v54  ;;  %v7763_v54 = vpop.permute.xlu0 %3172 }
 0x683   :  { %v1048_v0 = vsel %vm231_vm7, %v1044_v40, %v10270_v52  ;;  %v1039_v4 = vsel %vm216_vm4, %v1035_v21, %v10272_v11  ;;  %v1053_v37 = vsel %vm236_vm8, %v1049_v41, %v10274_v46  ;;  %v10275_v47 = vld [vmem:[#allocation162_spill] sm:$0xff]  ;;  %v10278_v40 = vld [vmem:[#allocation152_spill] sm:$0xff]  ;;  %v10279_v33 = vld [vmem:[#allocation167_spill] sm:$0xff]  ;;  %v936_v41 = vadd.f32 %v932_v3, %v7621_v53  ;;  %10285 = vst [vmem:[#allocation21_spill] sm:$0xff] %v7763_v54 }
 0x684   :  { %v1052_v45 = vsel %vm236_vm8, %v1048_v0, %v10275_v47  ;;  %v1043_v10 = vsel %vm221_vm5, %v1039_v4, %v10277_v16  ;;  %v1042_v59 = vsel %vm221_vm5, %v1038_v14, %v10278_v40  ;;  %v7745_v13 = vld [vmem:[%s9464_s1 + $0x6] ss:$0 sm:$0xff]  ;;  %v1057_v21 = vsel %vm241_vm9, %v1053_v37, %v10279_v33  ;;  %v10280_v35 = vld [vmem:[#allocation166_spill] sm:$0xff]  ;;  %v10281_v52 = vld [vmem:[#allocation157_spill] sm:$0xff] }
 0x685   :  { %v1056_v9 = vsel %vm241_vm9, %v1052_v45, %v10280_v35  ;;  %v4095_v36 = vld [vmem:[#allocation2 + $0x79] sm:$0xff]  ;;  %v1047_v0 = vsel %vm226_vm6, %v1043_v10, %v10281_v52  ;;  %v10282_v11 = vld [vmem:[#allocation156_spill] sm:$0xff]  ;;  %v935_v14 = vmul.f32 %v3973_v58, %v926_v42  ;;  %v934_v46 = vmul.f32 %v3973_v58, %v925_v48  ;;  %v10283_v37 = vld [vmem:[#allocation161_spill] sm:$0xff]  ;;  %v7771_v42 = vpop.permute.xlu1 %3174 }
 0x686   :  { %3333 = vrot.lane.b32.xlu0 %v4095_v36, %s4168_s19  ;;  %v1046_v4 = vsel %vm226_vm6, %v1042_v59, %v10282_v11  ;;  %v4096_v25 = vld [vmem:[#allocation2 + $0x81] sm:$0xff]  ;;  %v1051_v47 = vsel %vm231_vm7, %v1047_v0, %v10283_v37  ;;  %v10286_v53 = vld [vmem:[#allocation165_spill] sm:$0xff]  ;;  %v1066_v40 = vmul.f32 %v7745_v13, %v1057_v21  ;;  %v1065_v59 = vmul.f32 %v7745_v13, %v1056_v9  ;;  %v10293_v11 = vld [vmem:[#allocation174_spill] sm:$0xff] }
 0x687   :  { %3335 = vrot.lane.b32.xlu1 %v4096_v25, %s4168_s19  ;;  %v10284_v45 = vld [vmem:[#allocation160_spill] sm:$0xff]  ;;  %v1055_v61 = vsel %vm236_vm8, %v1051_v47, %v10286_v53  ;;  %10288 = vst [vmem:[#allocation24_spill] sm:$0xff] %v7771_v42  ;;  %v10289_v58 = vld [vmem:[#allocation169_spill] sm:$0xff]  ;;  %v10291_v36 = vld [vmem:[#allocation175_spill] sm:$0xff] }
 0x688   :  { %v1050_v16 = vsel %vm231_vm7, %v1046_v4, %v10284_v45  ;;  %v10287_v3 = vld [vmem:[#allocation164_spill] sm:$0xff]  ;;  %v1059_v48 = vsel %vm241_vm9, %v1055_v61, %v10289_v58  ;;  %v10292_v52 = vld [vmem:[#allocation171_spill] sm:$0xff]  ;;  %v10294_v4 = vld [vmem:[#allocation170_spill] sm:$0xff]  ;;  %v1070_v54 = vadd.f32 %v1066_v40, %v937_v31  ;;  %v1069_v12 = vadd.f32 %v1065_v59, %v936_v41 }
 0x689   :  { %v1054_v10 = vsel %vm236_vm8, %v1050_v16, %v10287_v3  ;;  %v10290_v33 = vld [vmem:[#allocation168_spill] sm:$0xff]  ;;  %v1170_v0 = vsel %vm211_vm3, %v10292_v52, %v10291_v36  ;;  %v1169_v25 = vsel %vm211_vm3, %v10294_v4, %v10293_v11  ;;  %v10295_v21 = vld [vmem:[#allocation177_spill] sm:$0xff]  ;;  %v10299_v53 = vld [vmem:[#allocation179_spill] sm:$0xff] }
 0x68a   :  { %v1058_v35 = vsel %vm241_vm9, %v1054_v10, %v10290_v33  ;;  %3438 = vrot.lane.b32.xlu0 %v7078_v57, %s4151_s26  ;;  %v10296_v9 = vld [vmem:[#allocation173_spill] sm:$0xff]  ;;  %v10297_v47 = vld [vmem:[#allocation176_spill] sm:$0xff]  ;;  %v1174_v61 = vsel %vm216_vm4, %v1170_v0, %v10299_v53  ;;  %v10300_v3 = vld [vmem:[#allocation178_spill] sm:$0xff] }
 0x68b   :  { %v1172_v37 = vsel %vm211_vm3, %v10296_v9, %v10295_v21  ;;  %v10298_v45 = vld [vmem:[#allocation172_spill] sm:$0xff]  ;;  %v1173_v10 = vsel %vm216_vm4, %v1169_v25, %v10300_v3  ;;  %3440 = vrot.lane.b32.xlu1 %v7082_v17, %s4151_s26  ;;  %v10301_v58 = vld [vmem:[#allocation181_spill] sm:$0xff]  ;;  %v10303_v11 = vld [vmem:[#allocation183_spill] sm:$0xff] }
 0x68c   :  { %v1171_v16 = vsel %vm211_vm3, %v10298_v45, %v10297_v47  ;;  %v1176_v33 = vsel %vm216_vm4, %v1172_v37, %v10301_v58  ;;  %v10302_v36 = vld [vmem:[#allocation180_spill] sm:$0xff]  ;;  %v1178_v4 = vsel %vm221_vm5, %v1174_v61, %v10303_v11  ;;  %v10304_v21 = vld [vmem:[#allocation182_spill] sm:$0xff]  ;;  %v7805_v47 = vpop.permute.xlu0 %3281  ;;  %v10306_v0 = vld [vmem:[#allocation185_spill] sm:$0xff] }
 0x68d   :  { %v1175_v52 = vsel %vm216_vm4, %v1171_v16, %v10302_v36  ;;  %v1177_v9 = vsel %vm221_vm5, %v1173_v10, %v10304_v21  ;;  %10305 = vst [vmem:[#allocation20_spill] sm:$0xff] %v7805_v47  ;;  %v1180_v25 = vsel %vm221_vm5, %v1176_v33, %v10306_v0  ;;  %v10307_v45 = vld [vmem:[#allocation184_spill] sm:$0xff]  ;;  %v10308_v3 = vld [vmem:[#allocation187_spill] sm:$0xff]  ;;  %v10309_v58 = vld [vmem:[#allocation186_spill] sm:$0xff]  ;;  %v7815_v36 = vpop.permute.xlu1 %3283 }
 0x68e   :  { %v1179_v53 = vsel %vm221_vm5, %v1175_v52, %v10307_v45  ;;  %v1182_v37 = vsel %vm226_vm6, %v1178_v4, %v10308_v3  ;;  %v1181_v16 = vsel %vm226_vm6, %v1177_v9, %v10309_v58  ;;  %v10310_v61 = vld [vmem:[#allocation189_spill] sm:$0xff]  ;;  %v10311_v10 = vld [vmem:[#allocation188_spill] sm:$0xff]  ;;  %v10312_v42 = vld [vmem:[#allocation191_spill] sm:$0xff]  ;;  %3442 = vrot.lane.b32.xlu0 %v7090_v6, %s4151_s26 }
 0x68f   :  { %v1184_v11 = vsel %vm226_vm6, %v1180_v25, %v10310_v61  ;;  %v1183_v21 = vsel %vm226_vm6, %v1179_v53, %v10311_v10  ;;  %v1186_v33 = vsel %vm231_vm7, %v1182_v37, %v10312_v42  ;;  %v10313_v0 = vld [vmem:[#allocation190_spill] sm:$0xff]  ;;  %v10314_v4 = vld [vmem:[#allocation193_spill] sm:$0xff]  ;;  %v10315_v45 = vld [vmem:[#allocation192_spill] sm:$0xff]  ;;  %3444 = vrot.lane.b32.xlu1 %v7094_v29, %s4151_s26  ;;  %s4172_s26 = smov [#allocation3]  }
 0x690   :  { %v1185_v52 = vsel %vm231_vm7, %v1181_v16, %v10313_v0  ;;  %v1188_v9 = vsel %vm231_vm7, %v1184_v11, %v10314_v4  ;;  %v1187_v3 = vsel %vm231_vm7, %v1183_v21, %v10315_v45  ;;  %v10316_v58 = vld [vmem:[#allocation195_spill] sm:$0xff]  ;;  %v10317_v61 = vld [vmem:[#allocation194_spill] sm:$0xff]  ;;  %v10318_v42 = vld [vmem:[#allocation197_spill] sm:$0xff] }
 0x691   :  { %v1190_v25 = vsel %vm236_vm8, %v1186_v33, %v10316_v58  ;;  %v1189_v53 = vsel %vm236_vm8, %v1185_v52, %v10317_v61  ;;  %v1192_v37 = vsel %vm236_vm8, %v1188_v9, %v10318_v42  ;;  %v10319_v16 = vld [vmem:[#allocation196_spill] sm:$0xff]  ;;  %v10320_v21 = vld [vmem:[#allocation199_spill] sm:$0xff]  ;;  %v10321_v33 = vld [vmem:[#allocation198_spill] sm:$0xff]  ;;  %v7848_v52 = vpop.permute.xlu0 %3285  ;;  %v7854_v42 = vpop.permute.xlu1 %3287 }
 0x692   :  { %v1191_v10 = vsel %vm236_vm8, %v1187_v3, %v10319_v16  ;;  %v3975_v11 = vld [vmem:[%s9464_s1 + $0x7] ss:$0 sm:$0xff]  ;;  %v1194_v0 = vsel %vm241_vm9, %v1190_v25, %v10320_v21  ;;  %v1193_v4 = vsel %vm241_vm9, %v1189_v53, %v10321_v33  ;;  %10322 = vst [vmem:[#allocation27_spill] sm:$0xff] %v7848_v52  ;;  %v10323_v45 = vld [vmem:[#allocation201_spill] sm:$0xff]  ;;  %v939_v3 = vadd.f32 %v935_v14, %v7629_v19  ;;  %v10326_v19 = vld [vmem:[#allocation203_spill] sm:$0xff] }
 0x693   :  { %v1196_v58 = vsel %vm241_vm9, %v1192_v37, %v10323_v45  ;;  %v10324_v61 = vld [vmem:[#allocation200_spill] sm:$0xff]  ;;  %v938_v16 = vadd.f32 %v934_v46, %v7631_v20  ;;  %3551 = vrot.lane.b32.xlu0 %v7078_v57, %s4156_s7  ;;  %v1068_v25 = vmul.f32 %v7745_v13, %v1059_v48  ;;  %v1067_v53 = vmul.f32 %v7745_v13, %v1058_v35  ;;  %v10325_v45 = vld [vmem:[#allocation207_spill] sm:$0xff]  ;;  %v10327_v31 = vld [vmem:[#allocation206_spill] sm:$0xff] }
 0x694   :  { %v1195_v9 = vsel %vm241_vm9, %v1191_v10, %v10324_v61  ;;  %v1203_v21 = vmul.f32 %v3975_v11, %v1194_v0  ;;  %v1202_v37 = vmul.f32 %v3975_v11, %v1193_v4  ;;  %3553 = vrot.lane.b32.xlu1 %v7082_v17, %s4156_s7  ;;  %v1205_v10 = vmul.f32 %v3975_v11, %v1196_v58  ;;  %v10328_v41 = vld [vmem:[#allocation202_spill] sm:$0xff]  ;;  %v10329_v40 = vld [vmem:[#allocation209_spill] sm:$0xff]  ;;  %v10331_v48 = vld [vmem:[#allocation208_spill] sm:$0xff] }
 0x695   :  { %v1204_v33 = vmul.f32 %v3975_v11, %v1195_v9  ;;  %v1307_v20 = vsel %vm211_vm3, %v10326_v19, %v10325_v45  ;;  %v1306_v14 = vsel %vm211_vm3, %v10328_v41, %v10327_v31  ;;  %v7870_v46 = vpop.permute.xlu0 %3390  ;;  %v10330_v59 = vld [vmem:[#allocation205_spill] sm:$0xff]  ;;  %v10332_v35 = vld [vmem:[#allocation204_spill] sm:$0xff]  ;;  %v10333_v4 = vld [vmem:[#allocation211_spill] sm:$0xff]  ;;  %v7882_v9 = vpop.permute.xlu1 %3392 }
 0x696   :  { %v1309_v13 = vsel %vm211_vm3, %v10330_v59, %v10329_v40  ;;  %v1308_v0 = vsel %vm211_vm3, %v10332_v35, %v10331_v48  ;;  %v1311_v11 = vsel %vm216_vm4, %v1307_v20, %v10333_v4  ;;  %v10334_v58 = vld [vmem:[#allocation210_spill] sm:$0xff]  ;;  %v10335_v45 = vld [vmem:[#allocation213_spill] sm:$0xff]  ;;  %v10336_v31 = vld [vmem:[#allocation212_spill] sm:$0xff] }
 0x697   :  { %v1310_v61 = vsel %vm216_vm4, %v1306_v14, %v10334_v58  ;;  %v1313_v19 = vsel %vm216_vm4, %v1309_v13, %v10335_v45  ;;  %v1312_v41 = vsel %vm216_vm4, %v1308_v0, %v10336_v31  ;;  %v10337_v43 = vld [vmem:[#allocation215_spill] sm:$0xff]  ;;  %v10338_v59 = vld [vmem:[#allocation214_spill] sm:$0xff]  ;;  %3555 = vrot.lane.b32.xlu0 %v7090_v6, %s4156_s7  ;;  %v10339_v20 = vld [vmem:[#allocation217_spill] sm:$0xff] }
 0x698   :  { %v1315_v40 = vsel %vm221_vm5, %v1311_v11, %v10337_v43  ;;  %v1314_v48 = vsel %vm221_vm5, %v1310_v61, %v10338_v59  ;;  %v1317_v14 = vsel %vm221_vm5, %v1313_v19, %v10339_v20  ;;  %v10340_v35 = vld [vmem:[#allocation216_spill] sm:$0xff]  ;;  %v10341_v58 = vld [vmem:[#allocation219_spill] sm:$0xff]  ;;  %v10342_v45 = vld [vmem:[#allocation218_spill] sm:$0xff]  ;;  %3557 = vrot.lane.b32.xlu1 %v7094_v29, %s4156_s7  ;;  %s3960_s7 = sshll.u32 %s4172_s26, 4  ;;  %s3961_s7 = int_to_ptr.vmem [resolvable:$true] %s3960_s7 }
 0x699   :  { %v1316_v4 = vsel %vm221_vm5, %v1312_v41, %v10340_v35  ;;  %v1319_v13 = vsel %vm226_vm6, %v1315_v40, %v10341_v58  ;;  %v1318_v0 = vsel %vm226_vm6, %v1314_v48, %v10342_v45  ;;  %v10343_v43 = vld [vmem:[#allocation221_spill] sm:$0xff]  ;;  %v10344_v61 = vld [vmem:[#allocation220_spill] sm:$0xff]  ;;  %v10345_v59 = vld [vmem:[#allocation223_spill] sm:$0xff]  ;;  %v7912_v35 = vpop.permute.xlu0 %3394  ;;  %p4126_p1 = scmp.lt.s32.totalorder %s3961_s7, %s3961_s7 }
 0x69a   :  { %v1321_v11 = vsel %vm226_vm6, %v1317_v14, %v10343_v43  ;;  %v1320_v31 = vsel %vm226_vm6, %v1316_v4, %v10344_v61  ;;  %v1323_v19 = vsel %vm231_vm7, %v1319_v13, %v10345_v59  ;;  %v10346_v20 = vld [vmem:[#allocation222_spill] sm:$0xff]  ;;  %v10347_v40 = vld [vmem:[#allocation225_spill] sm:$0xff]  ;;  %v10348_v58 = vld [vmem:[#allocation224_spill] sm:$0xff]  ;;  %v7922_v61 = vpop.permute.xlu1 %3396 }
 0x69b   :  { %v1322_v41 = vsel %vm231_vm7, %v1318_v0, %v10346_v20  ;;  %v1325_v48 = vsel %vm231_vm7, %v1321_v11, %v10347_v40  ;;  %v1324_v45 = vsel %vm231_vm7, %v1320_v31, %v10348_v58  ;;  %v10349_v34 = vld [vmem:[#allocation227_spill] sm:$0xff]  ;;  %v10350_v43 = vld [vmem:[#allocation226_spill] sm:$0xff]  ;;  %v10351_v13 = vld [vmem:[#allocation229_spill] sm:$0xff]  ;;  %3652 = vrot.lane.b32.xlu0 %v7078_v57, %s4161_s12 }
 0x69c   :  { %v1327_v14 = vsel %vm236_vm8, %v1323_v19, %v10349_v34  ;;  %v1326_v4 = vsel %vm236_vm8, %v1322_v41, %v10350_v43  ;;  %v1329_v59 = vsel %vm236_vm8, %v1325_v48, %v10351_v13  ;;  %v10352_v0 = vld [vmem:[#allocation228_spill] sm:$0xff]  ;;  %v10353_v40 = vld [vmem:[#allocation231_spill] sm:$0xff]  ;;  %v10354_v58 = vld [vmem:[#allocation230_spill] sm:$0xff]  ;;  %v1072_v19 = vadd.f32 %v1068_v25, %v939_v3  ;;  %3654 = vrot.lane.b32.xlu1 %v7082_v17, %s4161_s12 }
 0x69d   :  { %v1328_v20 = vsel %vm236_vm8, %v1324_v45, %v10352_v0  ;;  %v3976_v11 = vld [vmem:[%s9464_s1 + $0x8] ss:$0 sm:$0xff]  ;;  %v1331_v31 = vsel %vm241_vm9, %v1327_v14, %v10353_v40  ;;  %v1330_v34 = vsel %vm241_vm9, %v1326_v4, %v10354_v58  ;;  %v1071_v41 = vadd.f32 %v1067_v53, %v938_v16  ;;  %v10355_v43 = vld [vmem:[#allocation233_spill] sm:$0xff]  ;;  %v7947_v40 = vpop.permute.xlu0 %3180  ;;  %v10372_v1 = vld [vmem:[#allocation247_spill] sm:$0xff] }
 0x69e   :  { %v1333_v48 = vsel %vm241_vm9, %v1329_v59, %v10355_v43  ;;  %v10356_v13 = vld [vmem:[#allocation232_spill] sm:$0xff]  ;;  %v7943_v0 = vadd.f32 %v1203_v21, %v1070_v54  ;;  %v7945_v14 = vadd.f32 %v1202_v37, %v1069_v12  ;;  %10357 = vst [vmem:[#allocation26_spill] sm:$0xff] %v7947_v40  ;;  %v7949_v4 = vadd.f32 %v1205_v10, %v1072_v19  ;;  %v7953_v25 = vpop.permute.xlu1 %3182  ;;  %v10359_v43 = vld [vmem:[#allocation235_spill] sm:$0xff]  ;;  %v10360_v21 = vld [vmem:[#allocation234_spill] sm:$0xff] }
 0x69f   :  { %v1332_v45 = vsel %vm241_vm9, %v1328_v20, %v10356_v13  ;;  %v7951_v58 = vadd.f32 %v1204_v33, %v1071_v41  ;;  %v1340_v3 = vmul.f32 %v3976_v11, %v1331_v31  ;;  %v1339_v16 = vmul.f32 %v3976_v11, %v1330_v34  ;;  %10358 = vst [vmem:[#allocation29_spill] sm:$0xff] %v7953_v25  ;;  %v4097_v20 = vld [vmem:[#allocation2 + $0x20] sm:$0xff]  ;;  %v4098_v12 = vld [vmem:[#allocation2 + $0x18] sm:$0xff]  ;;  %v4099_v10 = vld [vmem:[#allocation2 + $0x68] sm:$0xff] }
 0x6a0   :  { %v7955_v53 = vmul.f32 %v3976_v11, %v1333_v48  ;;  %v7957_v59 = vmul.f32 %v3976_v11, %v1332_v45  ;;  %v1440_v54 = vsel %vm211_vm3, %v4097_v20, %v10359_v43  ;;  %v1439_v37 = vsel %vm211_vm3, %v4098_v12, %v10360_v21  ;;  %3656 = vrot.lane.b32.xlu0 %v7090_v6, %s4161_s12  ;;  %v10361_v33 = vld [vmem:[#allocation237_spill] sm:$0xff]  ;;  %v4100_v34 = vld [vmem:[#allocation2 + $0x60] sm:$0xff]  ;;  %v10364_v13 = vld [vmem:[#allocation238_spill] sm:$0xff] }
 0x6a1   :  { %v1442_v31 = vsel %vm211_vm3, %v4099_v10, %v10361_v33  ;;  %v10362_v19 = vld [vmem:[#allocation236_spill] sm:$0xff]  ;;  %v10363_v41 = vld [vmem:[#allocation239_spill] sm:$0xff]  ;;  %v1443_v45 = vsel %vm216_vm4, %v1439_v37, %v10364_v13  ;;  %3658 = vrot.lane.b32.xlu1 %v7094_v29, %s4161_s12  ;;  %v10365_v20 = vld [vmem:[#allocation241_spill] sm:$0xff] }
 0x6a2   :  { %v1441_v11 = vsel %vm211_vm3, %v4100_v34, %v10362_v19  ;;  %v1444_v48 = vsel %vm216_vm4, %v1440_v54, %v10363_v41  ;;  %v1446_v43 = vsel %vm216_vm4, %v1442_v31, %v10365_v20  ;;  %v10366_v12 = vld [vmem:[#allocation240_spill] sm:$0xff]  ;;  %v10367_v10 = vld [vmem:[#allocation243_spill] sm:$0xff]  ;;  %v10368_v25 = vld [vmem:[#allocation242_spill] sm:$0xff]  ;;  %v7983_v19 = vpop.permute.xlu0 %3184 }
 0x6a3   :  { %v1445_v21 = vsel %vm216_vm4, %v1441_v11, %v10366_v12  ;;  %v1448_v33 = vsel %vm221_vm5, %v1444_v48, %v10367_v10  ;;  %v1447_v34 = vsel %vm221_vm5, %v1443_v45, %v10368_v25  ;;  %10369 = vst [vmem:[#allocation28_spill] sm:$0xff] %v7983_v19  ;;  %v10370_v54 = vld [vmem:[#allocation245_spill] sm:$0xff]  ;;  %v10371_v41 = vld [vmem:[#allocation244_spill] sm:$0xff]  ;;  %v10373_v20 = vld [vmem:[#allocation246_spill] sm:$0xff]  ;;  %v7993_v12 = vpop.permute.xlu1 %3186 }
 0x6a4   :  { %v1450_v37 = vsel %vm221_vm5, %v1446_v43, %v10370_v54  ;;  %v1449_v13 = vsel %vm221_vm5, %v1445_v21, %v10371_v41  ;;  %v1452_v31 = vsel %vm226_vm6, %v1448_v33, %v10372_v1  ;;  %v1451_v11 = vsel %vm226_vm6, %v1447_v34, %v10373_v20  ;;  %10374 = vst [vmem:[#allocation31_spill] sm:$0xff] %v7993_v12  ;;  %v10375_v48 = vld [vmem:[#allocation249_spill] sm:$0xff]  ;;  %v10376_v25 = vld [vmem:[#allocation248_spill] sm:$0xff]  ;;  %v10377_v19 = vld [vmem:[#allocation251_spill] sm:$0xff] }
 0x6a5   :  { %v1454_v10 = vsel %vm226_vm6, %v1450_v37, %v10375_v48  ;;  %v1453_v45 = vsel %vm226_vm6, %v1449_v13, %v10376_v25  ;;  %v1456_v43 = vsel %vm231_vm7, %v1452_v31, %v10377_v19  ;;  %v10378_v54 = vld [vmem:[#allocation250_spill] sm:$0xff]  ;;  %3664 = vrot.lane.b32.xlu0 %v7078_v57, %s4162_s13  ;;  %v10379_v1 = vld [vmem:[#allocation253_spill] sm:$0xff]  ;;  %v10380_v34 = vld [vmem:[#allocation252_spill] sm:$0xff]  ;;  %3666 = vrot.lane.b32.xlu1 %v7082_v17, %s4162_s13 }
 0x6a6   :  { %v1455_v21 = vsel %vm231_vm7, %v1451_v11, %v10378_v54  ;;  %v1458_v33 = vsel %vm231_vm7, %v1454_v10, %v10379_v1  ;;  %v1457_v41 = vsel %vm231_vm7, %v1453_v45, %v10380_v34  ;;  %v10381_v20 = vld [vmem:[#allocation267_spill] sm:$0xff]  ;;  %v10383_v13 = vld [vmem:[#allocation266_spill] sm:$0xff]  ;;  %v10434_v23 = vld [vmem:[#allocation296_spill] sm:$0xff] }
 0x6a7   :  { %v10382_v37 = vld [vmem:[#allocation263_spill] sm:$0xff]  ;;  %v10384_v25 = vld [vmem:[#allocation262_spill] sm:$0xff]  ;;  %v10538_v2 = vld [vmem:[#allocation393_spill] sm:$0xff] }
 0x6a8   :  { %v1577_v48 = vsel %vm211_vm3, %v10382_v37, %v10381_v20  ;;  %v1576_v19 = vsel %vm211_vm3, %v10384_v25, %v10383_v13  ;;  %v10385_v31 = vld [vmem:[#allocation255_spill] sm:$0xff]  ;;  %v10386_v11 = vld [vmem:[#allocation254_spill] sm:$0xff]  ;;  %v8025_v20 = vpop.permute.xlu0 %3293  ;;  %v10390_v37 = vld [vmem:[#allocation257_spill] sm:$0xff] }
 0x6a9   :  { %v1460_v57 = vsel %vm236_vm8, %v1456_v43, %v10385_v31  ;;  %v1459_v10 = vsel %vm236_vm8, %v1455_v21, %v10386_v11  ;;  %v10387_v54 = vld [vmem:[#allocation271_spill] sm:$0xff]  ;;  %v10388_v1 = vld [vmem:[#allocation270_spill] sm:$0xff]  ;;  %10389 = vst [vmem:[#allocation30_spill] sm:$0xff] %v8025_v20  ;;  %v1462_v13 = vsel %vm236_vm8, %v1458_v33, %v10390_v37  ;;  %v10391_v25 = vld [vmem:[#allocation256_spill] sm:$0xff]  ;;  %v8035_v11 = vpop.permute.xlu1 %3295  ;;  %3668 = vrot.lane.b32.xlu0 %v7090_v6, %s4162_s13 }
 0x6aa   :  { %v1581_v45 = vsel %vm216_vm4, %v1577_v48, %v10387_v54  ;;  %v1580_v34 = vsel %vm216_vm4, %v1576_v19, %v10388_v1  ;;  %v1461_v17 = vsel %vm236_vm8, %v1457_v41, %v10391_v25  ;;  %v10392_v12 = vld [vmem:[#allocation275_spill] sm:$0xff]  ;;  %v10393_v31 = vld [vmem:[#allocation274_spill] sm:$0xff]  ;;  %v3977_v48 = vld [vmem:[%s9464_s1 + $0x9] ss:$0 sm:$0xff]  ;;  %3670 = vrot.lane.b32.xlu1 %v7094_v29, %s4162_s13 }
 0x6ab   :  { %v1585_v43 = vsel %vm221_vm5, %v1581_v45, %v10392_v12  ;;  %v1584_v21 = vsel %vm221_vm5, %v1580_v34, %v10393_v31  ;;  %v10394_v19 = vld [vmem:[#allocation259_spill] sm:$0xff]  ;;  %v10395_v1 = vld [vmem:[#allocation258_spill] sm:$0xff]  ;;  %v10398_v45 = vld [vmem:[#allocation261_spill] sm:$0xff] }
 0x6ac   :  { %v1464_v54 = vsel %vm241_vm9, %v1460_v57, %v10394_v19  ;;  %v1463_v33 = vsel %vm241_vm9, %v1459_v10, %v10395_v1  ;;  %v10396_v37 = vld [vmem:[#allocation279_spill] sm:$0xff]  ;;  %v10397_v25 = vld [vmem:[#allocation278_spill] sm:$0xff]  ;;  %v1466_v34 = vsel %vm241_vm9, %v1462_v13, %v10398_v45  ;;  %v10399_v31 = vld [vmem:[#allocation260_spill] sm:$0xff] }
 0x6ad   :  { %v1589_v41 = vsel %vm226_vm6, %v1585_v43, %v10396_v37  ;;  %v1588_v12 = vsel %vm226_vm6, %v1584_v21, %v10397_v25  ;;  %v1465_v40 = vsel %vm241_vm9, %v1461_v17, %v10399_v31  ;;  %v10400_v55 = vld [vmem:[#allocation283_spill] sm:$0xff]  ;;  %v10401_v19 = vld [vmem:[#allocation282_spill] sm:$0xff]  ;;  %v1344_v43 = vadd.f32 %v1340_v3, %v7943_v0  ;;  %v8066_v17 = vpop.permute.xlu0 %3297  ;;  %v10407_v31 = vld [vmem:[#allocation269_spill] sm:$0xff] }
 0x6ae   :  { %v1593_v57 = vsel %vm231_vm7, %v1589_v41, %v10400_v55  ;;  %v1592_v10 = vsel %vm231_vm7, %v1588_v12, %v10401_v19  ;;  %v1343_v21 = vadd.f32 %v1339_v16, %v7945_v14  ;;  %v10402_v6 = vld [vmem:[#allocation287_spill] sm:$0xff]  ;;  %v10403_v13 = vld [vmem:[#allocation286_spill] sm:$0xff]  ;;  %10404 = vst [vmem:[#allocation33_spill] sm:$0xff] %v8066_v17  ;;  %v1473_v25 = vmul.f32 %v3977_v48, %v1464_v54  ;;  %v8071_v41 = vld [vmem:[%s9464_s1 + $0xa] ss:$0 sm:$0xff]  ;;  %v8077_v16 = vpop.permute.xlu1 %3299 }
 0x6af   :  { %v1597_v1 = vsel %vm236_vm8, %v1593_v57, %v10402_v6  ;;  %v1596_v37 = vsel %vm236_vm8, %v1592_v10, %v10403_v13  ;;  %v1472_v55 = vmul.f32 %v3977_v48, %v1463_v33  ;;  %v10405_v29 = vld [vmem:[#allocation291_spill] sm:$0xff]  ;;  %v10406_v3 = vld [vmem:[#allocation290_spill] sm:$0xff]  ;;  %v1475_v12 = vmul.f32 %v3977_v48, %v1466_v34  ;;  %v10408_v57 = vld [vmem:[#allocation265_spill] sm:$0xff] }
 0x6b0   :  { %v1601_v0 = vsel %vm241_vm9, %v1597_v1, %v10405_v29  ;;  %v1600_v14 = vsel %vm241_vm9, %v1596_v37, %v10406_v3  ;;  %v1474_v45 = vmul.f32 %v3977_v48, %v1465_v40  ;;  %v1579_v54 = vsel %vm211_vm3, %v10408_v57, %v10407_v31  ;;  %v10409_v33 = vld [vmem:[#allocation268_spill] sm:$0xff]  ;;  %v8085_v6 = vld [vmem:[#allocation2 + $0x32] sm:$0xff]  ;;  %v10411_v40 = vld [vmem:[#allocation273_spill] sm:$0xff] }
 0x6b1   :  { %v10410_v19 = vld [vmem:[#allocation264_spill] sm:$0xff]  ;;  %3450 = vrot.lane.b32.xlu0 %v8085_v6, %s4152_s27  ;;  %v1346_v1 = vadd.f32 %v7955_v53, %v7949_v4  ;;  %v1345_v34 = vadd.f32 %v7957_v59, %v7951_v58  ;;  %v1583_v48 = vsel %vm216_vm4, %v1579_v54, %v10411_v40  ;;  %v8097_v29 = vld [vmem:[#allocation2 + $0x3a] sm:$0xff]  ;;  %v10413_v3 = vld [vmem:[#allocation277_spill] sm:$0xff]  ;;  %v1610_v53 = vmul.f32 %v8071_v41, %v1601_v0  ;;  %v8107_v59 = vpop.permute.xlu0 %3402 }
 0x6b2   :  { %v1578_v10 = vsel %vm211_vm3, %v10410_v19, %v10409_v33  ;;  %v10412_v13 = vld [vmem:[#allocation272_spill] sm:$0xff]  ;;  %3452 = vrot.lane.b32.xlu1 %v8097_v29, %s4152_s27  ;;  %v1587_v31 = vsel %vm221_vm5, %v1583_v48, %v10413_v3  ;;  %v1609_v58 = vmul.f32 %v8071_v41, %v1600_v14  ;;  %v1477_v54 = vadd.f32 %v1473_v25, %v1344_v43  ;;  %v10415_v19 = vld [vmem:[#allocation281_spill] sm:$0xff]  ;;  %v8113_v38 = vpop.permute.xlu1 %3404  ;;  %v8123_v43 = vld [vmem:[#allocation2 + $0x7a] sm:$0xff] }
 0x6b3   :  { %v1582_v37 = vsel %vm216_vm4, %v1578_v10, %v10412_v13  ;;  %v10414_v57 = vld [vmem:[#allocation276_spill] sm:$0xff]  ;;  %v1476_v33 = vadd.f32 %v1472_v55, %v1343_v21  ;;  %v1591_v10 = vsel %vm226_vm6, %v1587_v31, %v10415_v19  ;;  %v8115_v48 = vadd.f32 %v1475_v12, %v1346_v1  ;;  %v10419_v21 = vld [vmem:[#allocation289_spill] sm:$0xff]  ;;  %v10421_v1 = vld [vmem:[#allocation299_spill] sm:$0xff] }
 0x6b4   :  { %v1586_v4 = vsel %vm221_vm5, %v1582_v37, %v10414_v57  ;;  %v10416_v40 = vld [vmem:[#allocation280_spill] sm:$0xff]  ;;  %v8117_v3 = vadd.f32 %v1474_v45, %v1345_v34  ;;  %v10417_v37 = vld [vmem:[#allocation285_spill] sm:$0xff]  ;;  %v10422_v45 = vld [vmem:[#allocation295_spill] sm:$0xff] }
 0x6b5   :  { %v1590_v13 = vsel %vm226_vm6, %v1586_v4, %v10416_v40  ;;  %v1595_v0 = vsel %vm231_vm7, %v1591_v10, %v10417_v37  ;;  %v10418_v14 = vld [vmem:[#allocation284_spill] sm:$0xff]  ;;  %3454 = vrot.lane.b32.xlu0 %v8123_v43, %s4152_s27  ;;  %v1714_v34 = vsel %vm211_vm3, %v10422_v45, %v10421_v1  ;;  %v10423_v31 = vld [vmem:[#allocation298_spill] sm:$0xff]  ;;  %v8141_v40 = vadd.f32 %v1610_v53, %v1477_v54  ;;  %v10425_v37 = vld [vmem:[#allocation303_spill] sm:$0xff] }
 0x6b6   :  { %v1594_v57 = vsel %vm231_vm7, %v1590_v13, %v10418_v14  ;;  %v1599_v25 = vsel %vm236_vm8, %v1595_v0, %v10419_v21  ;;  %v10420_v55 = vld [vmem:[#allocation288_spill] sm:$0xff]  ;;  %v10424_v4 = vld [vmem:[#allocation294_spill] sm:$0xff]  ;;  %v8143_v13 = vadd.f32 %v1609_v58, %v1476_v33  ;;  %v1718_v0 = vsel %vm216_vm4, %v1714_v34, %v10425_v37  ;;  %v8149_v21 = vpop.permute.xlu0 %3406  ;;  %v8159_v33 = vpop.permute.xlu1 %3408  ;;  %v10431_v34 = vld [vmem:[#allocation301_spill] sm:$0xff] }
 0x6b7   :  { %v1598_v12 = vsel %vm236_vm8, %v1594_v57, %v10420_v55  ;;  %v1713_v19 = vsel %vm211_vm3, %v10424_v4, %v10423_v31  ;;  %v8137_v10 = vld [vmem:[#allocation2 + $0x82] sm:$0xff]  ;;  %v10426_v14 = vld [vmem:[#allocation302_spill] sm:$0xff]  ;;  %v10427_v55 = vld [vmem:[#allocation293_spill] sm:$0xff] }
 0x6b8   :  { %3456 = vrot.lane.b32.xlu1 %v8137_v10, %s4152_s27  ;;  %v1717_v57 = vsel %vm216_vm4, %v1713_v19, %v10426_v14  ;;  %v1603_v1 = vsel %vm241_vm9, %v1599_v25, %v10427_v55  ;;  %v10428_v45 = vld [vmem:[#allocation292_spill] sm:$0xff]  ;;  %v10429_v4 = vld [vmem:[#allocation307_spill] sm:$0xff]  ;;  %v10430_v54 = vld [vmem:[#allocation306_spill] sm:$0xff] }
 0x6b9   :  { %v1602_v31 = vsel %vm241_vm9, %v1598_v12, %v10428_v45  ;;  %v1722_v53 = vsel %vm221_vm5, %v1718_v0, %v10429_v4  ;;  %v1721_v58 = vsel %vm221_vm5, %v1717_v57, %v10430_v54  ;;  %v10432_v37 = vld [vmem:[#allocation297_spill] sm:$0xff]  ;;  %v10433_v14 = vld [vmem:[#allocation300_spill] sm:$0xff]  ;;  %v10435_v25 = vld [vmem:[#allocation311_spill] sm:$0xff]  ;;  %3563 = vrot.lane.b32.xlu0 %v8085_v6, %s4157_s8 }
 0x6ba   :  { %v1716_v19 = vsel %vm211_vm3, %v10432_v37, %v10431_v34  ;;  %v1715_v5 = vsel %vm211_vm3, %v10434_v23, %v10433_v14  ;;  %v1726_v55 = vsel %vm226_vm6, %v1722_v53, %v10435_v25  ;;  %v10436_v12 = vld [vmem:[#allocation310_spill] sm:$0xff]  ;;  %v10437_v0 = vld [vmem:[#allocation305_spill] sm:$0xff]  ;;  %v10438_v4 = vld [vmem:[#allocation304_spill] sm:$0xff] }
 0x6bb   :  { %v1725_v45 = vsel %vm226_vm6, %v1721_v58, %v10436_v12  ;;  %v1720_v57 = vsel %vm216_vm4, %v1716_v19, %v10437_v0  ;;  %v1719_v54 = vsel %vm216_vm4, %v1715_v5, %v10438_v4  ;;  %v10439_v34 = vld [vmem:[#allocation315_spill] sm:$0xff]  ;;  %v10440_v60 = vld [vmem:[#allocation314_spill] sm:$0xff]  ;;  %v10441_v53 = vld [vmem:[#allocation309_spill] sm:$0xff]  ;;  %v8191_v4 = vpop.permute.xlu0 %3192 }
 0x6bc   :  { %v1730_v37 = vsel %vm231_vm7, %v1726_v55, %v10439_v34  ;;  %v1729_v23 = vsel %vm231_vm7, %v1725_v45, %v10440_v60  ;;  %3565 = vrot.lane.b32.xlu1 %v8097_v29, %s4157_s8  ;;  %v1724_v58 = vsel %vm221_vm5, %v1720_v57, %v10441_v53  ;;  %v10442_v14 = vld [vmem:[#allocation308_spill] sm:$0xff]  ;;  %v10443_v12 = vld [vmem:[#allocation319_spill] sm:$0xff]  ;;  %v10444_v0 = vld [vmem:[#allocation318_spill] sm:$0xff]  ;;  %10445 = vst [vmem:[#allocation32_spill] sm:$0xff] %v8191_v4 }
 0x6bd   :  { %v1723_v25 = vsel %vm221_vm5, %v1719_v54, %v10442_v14  ;;  %v1734_v19 = vsel %vm236_vm8, %v1730_v37, %v10443_v12  ;;  %v1733_v5 = vsel %vm236_vm8, %v1729_v23, %v10444_v0  ;;  %v10446_v55 = vld [vmem:[#allocation312_spill] sm:$0xff]  ;;  %v3979_v45 = vld [vmem:[%s9464_s1 + $0xb] ss:$0 sm:$0xff]  ;;  %v10447_v34 = vld [vmem:[#allocation323_spill] sm:$0xff]  ;;  %v8204_v23 = vpop.permute.xlu1 %3194  ;;  %v1611_v0 = vmul.f32 %v8071_v41, %v1602_v31  ;;  %3567 = vrot.lane.b32.xlu0 %v8123_v43, %s4157_s8 }
 0x6be   :  { %v1727_v60 = vsel %vm226_vm6, %v1723_v25, %v10446_v55  ;;  %v1738_v57 = vsel %vm241_vm9, %v1734_v19, %v10447_v34  ;;  %v10448_v53 = vld [vmem:[#allocation322_spill] sm:$0xff]  ;;  %10450 = vst [vmem:[#allocation35_spill] sm:$0xff] %v8204_v23  ;;  %v10451_v4 = vld [vmem:[#allocation313_spill] sm:$0xff]  ;;  %v10452_v55 = vld [vmem:[#allocation316_spill] sm:$0xff] }
 0x6bf   :  { %v1737_v54 = vsel %vm241_vm9, %v1733_v5, %v10448_v53  ;;  %v4105_v14 = vld [vmem:[#allocation2 + $0x19] sm:$0xff]  ;;  %v1728_v25 = vsel %vm226_vm6, %v1724_v58, %v10451_v4  ;;  %v1731_v44 = vsel %vm231_vm7, %v1727_v60, %v10452_v55  ;;  %v1612_v5 = vmul.f32 %v8071_v41, %v1603_v1  ;;  %v10454_v34 = vld [vmem:[#allocation317_spill] sm:$0xff]  ;;  %v8228_v1 = vpop.permute.xlu0 %3196 }
 0x6c0   :  { %v10449_v37 = vld [vmem:[#allocation326_spill] sm:$0xff]  ;;  %v1732_v53 = vsel %vm231_vm7, %v1728_v25, %v10454_v34  ;;  %3569 = vrot.lane.b32.xlu1 %v8137_v10, %s4157_s8  ;;  %v10457_v4 = vld [vmem:[#allocation321_spill] sm:$0xff]  ;;  %v1747_v60 = vmul.f32 %v3979_v45, %v1738_v57  ;;  %10459 = vst [vmem:[#allocation34_spill] sm:$0xff] %v8228_v1  ;;  %v10466_v1 = vld [vmem:[#allocation328_spill] sm:$0xff] }
 0x6c1   :  { %v1846_v12 = vsel %vm211_vm3, %v4105_v14, %v10449_v37  ;;  %v10453_v15 = vld [vmem:[#allocation330_spill] sm:$0xff]  ;;  %v10455_v14 = vld [vmem:[#allocation320_spill] sm:$0xff]  ;;  %v10460_v25 = vld [vmem:[#allocation325_spill] sm:$0xff]  ;;  %v8238_v57 = vpop.permute.xlu1 %3198  ;;  %3676 = vrot.lane.b32.xlu0 %v8085_v6, %s4163_s14 }
 0x6c2   :  { %v1850_v19 = vsel %vm216_vm4, %v1846_v12, %v10453_v15  ;;  %v1735_v31 = vsel %vm236_vm8, %v1731_v44, %v10455_v14  ;;  %v10456_v37 = vld [vmem:[#allocation334_spill] sm:$0xff]  ;;  %v1736_v15 = vsel %vm236_vm8, %v1732_v53, %v10457_v4  ;;  %v1746_v12 = vmul.f32 %v3979_v45, %v1737_v54  ;;  %v10461_v44 = vld [vmem:[#allocation324_spill] sm:$0xff]  ;;  %10464 = vst [vmem:[#allocation37_spill] sm:$0xff] %v8238_v57  ;;  %v10465_v4 = vld [vmem:[#allocation329_spill] sm:$0xff] }
 0x6c3   :  { %v1854_v58 = vsel %vm221_vm5, %v1850_v19, %v10456_v37  ;;  %v10458_v55 = vld [vmem:[#allocation338_spill] sm:$0xff]  ;;  %v1740_v34 = vsel %vm241_vm9, %v1736_v15, %v10460_v25  ;;  %v1739_v14 = vsel %vm241_vm9, %v1735_v31, %v10461_v44  ;;  %v4106_v19 = vld [vmem:[#allocation2 + $0x21] sm:$0xff]  ;;  %v4107_v54 = vld [vmem:[#allocation2 + $0x69] sm:$0xff] }
 0x6c4   :  { %v1858_v41 = vsel %vm226_vm6, %v1854_v58, %v10458_v55  ;;  %v10462_v37 = vld [vmem:[#allocation327_spill] sm:$0xff]  ;;  %v10463_v27 = vld [vmem:[#allocation342_spill] sm:$0xff]  ;;  %v1849_v58 = vsel %vm211_vm3, %v4107_v54, %v10465_v4  ;;  %3678 = vrot.lane.b32.xlu1 %v8097_v29, %s4163_s14  ;;  %v10477_v57 = vld [vmem:[#allocation341_spill] sm:$0xff] }
 0x6c5   :  { %v1847_v23 = vsel %vm211_vm3, %v4106_v19, %v10462_v37  ;;  %v1862_v53 = vsel %vm231_vm7, %v1858_v41, %v10463_v27  ;;  %v4108_v55 = vld [vmem:[#allocation2 + $0x61] sm:$0xff]  ;;  %v10468_v44 = vld [vmem:[#allocation346_spill] sm:$0xff]  ;;  %v10469_v27 = vld [vmem:[#allocation333_spill] sm:$0xff]  ;;  %v8277_v22 = vpop.permute.xlu1 %3307  ;;  %3680 = vrot.lane.b32.xlu0 %v8123_v43, %s4163_s14 }
 0x6c6   :  { %v1848_v15 = vsel %vm211_vm3, %v4108_v55, %v10466_v1  ;;  %v10467_v25 = vld [vmem:[#allocation331_spill] sm:$0xff]  ;;  %v1866_v30 = vsel %vm236_vm8, %v1862_v53, %v10468_v44  ;;  %v1853_v41 = vsel %vm216_vm4, %v1849_v58, %v10469_v27  ;;  %v10470_v19 = vld [vmem:[#allocation332_spill] sm:$0xff]  ;;  %v3980_v1 = vld [vmem:[%s9464_s1 + $0xc] ss:$0 sm:$0xff]  ;;  %v1748_v53 = vmul.f32 %v3979_v45, %v1739_v14 }
 0x6c7   :  { %v1851_v31 = vsel %vm216_vm4, %v1847_v23, %v10467_v25  ;;  %v1852_v37 = vsel %vm216_vm4, %v1848_v15, %v10470_v19  ;;  %v10471_v54 = vld [vmem:[#allocation335_spill] sm:$0xff]  ;;  %v10472_v23 = vld [vmem:[#allocation350_spill] sm:$0xff]  ;;  %v10473_v25 = vld [vmem:[#allocation337_spill] sm:$0xff]  ;;  %v8269_v19 = vpop.permute.xlu0 %3305 }
 0x6c8   :  { %v1855_v4 = vsel %vm221_vm5, %v1851_v31, %v10471_v54  ;;  %v1870_v55 = vsel %vm241_vm9, %v1866_v30, %v10472_v23  ;;  %v1857_v58 = vsel %vm221_vm5, %v1853_v41, %v10473_v25  ;;  %v10474_v44 = vld [vmem:[#allocation336_spill] sm:$0xff]  ;;  %v10475_v27 = vld [vmem:[#allocation339_spill] sm:$0xff]  ;;  %10476 = vst [vmem:[#allocation36_spill] sm:$0xff] %v8269_v19  ;;  %v1749_v54 = vmul.f32 %v3979_v45, %v1740_v34  ;;  %v10480_v41 = vld [vmem:[#allocation345_spill] sm:$0xff] }
 0x6c9   :  { %v1856_v15 = vsel %vm221_vm5, %v1852_v37, %v10474_v44  ;;  %v1859_v31 = vsel %vm226_vm6, %v1855_v4, %v10475_v27  ;;  %v1861_v32 = vsel %vm226_vm6, %v1857_v58, %v10477_v57  ;;  %v10478_v30 = vld [vmem:[#allocation340_spill] sm:$0xff]  ;;  %v10482_v44 = vld [vmem:[#allocation347_spill] sm:$0xff]  ;;  %v1879_v34 = vmul.f32 %v3980_v1, %v1870_v55  ;;  %v10483_v58 = vld [vmem:[#allocation349_spill] sm:$0xff]  ;;  %3682 = vrot.lane.b32.xlu1 %v8137_v10, %s4163_s14 }
 0x6ca   :  { %v1860_v23 = vsel %vm226_vm6, %v1856_v15, %v10478_v30  ;;  %v1863_v14 = vsel %vm231_vm7, %v1859_v31, %v10479_v18  ;;  %v1865_v37 = vsel %vm231_vm7, %v1861_v32, %v10480_v41  ;;  %v10481_v25 = vld [vmem:[#allocation344_spill] sm:$0xff]  ;;  %v1615_v57 = vadd.f32 %v1611_v0, %v8117_v3  ;;  %v10485_v31 = vld [vmem:[#allocation351_spill] sm:$0xff]  ;;  %3462 = vrot.lane.b32.xlu0 %v8085_v6, %s4153_s28  ;;  %v10529_v52 = vld [vmem:[#allocation398_spill] sm:$0xff] }
 0x6cb   :  { %v1864_v4 = vsel %vm231_vm7, %v1860_v23, %v10481_v25  ;;  %v1867_v45 = vsel %vm236_vm8, %v1863_v14, %v10482_v44  ;;  %v1869_v18 = vsel %vm236_vm8, %v1865_v37, %v10483_v58  ;;  %v10484_v15 = vld [vmem:[#allocation348_spill] sm:$0xff]  ;;  %v1616_v30 = vadd.f32 %v1612_v5, %v8115_v48  ;;  %v10486_v23 = vld [vmem:[#allocation353_spill] sm:$0xff]  ;;  %v8302_v41 = vpop.permute.xlu0 %3309  ;;  %v8307_v25 = vpop.permute.xlu1 %3311  ;;  %v10491_v58 = vld [vmem:[#allocation358_spill] sm:$0xff] }
 0x6cc   :  { %v1868_v27 = vsel %vm236_vm8, %v1864_v4, %v10484_v15  ;;  %v1871_v32 = vsel %vm241_vm9, %v1867_v45, %v10485_v31  ;;  %v1750_v55 = vadd.f32 %v1746_v12, %v8143_v13  ;;  %v1873_v14 = vsel %vm241_vm9, %v1869_v18, %v10486_v23  ;;  %v10487_v3 = vld [vmem:[#allocation352_spill] sm:$0xff]  ;;  %10488 = vst [vmem:[#allocation39_spill] sm:$0xff] %v8302_v41  ;;  %v10489_v45 = vld [vmem:[#allocation359_spill] sm:$0xff] }
 0x6cd   :  { %v1872_v0 = vsel %vm241_vm9, %v1868_v27, %v10487_v3  ;;  %v8305_v37 = vadd.f32 %v1747_v60, %v8141_v40  ;;  %v8309_v4 = vadd.f32 %v1749_v54, %v1616_v30  ;;  %v8311_v44 = vadd.f32 %v1748_v53, %v1615_v57  ;;  %v10490_v40 = vld [vmem:[#allocation355_spill] sm:$0xff]  ;;  %v10492_v54 = vld [vmem:[#allocation354_spill] sm:$0xff]  ;;  %3464 = vrot.lane.b32.xlu1 %v8097_v29, %s4153_s28  ;;  %v10494_v57 = vld [vmem:[#allocation357_spill] sm:$0xff] }
 0x6ce   :  { %v8313_v48 = vmul.f32 %v3980_v1, %v1871_v32  ;;  %v8315_v13 = vadd.f32 %v1879_v34, %v1750_v55  ;;  %v8319_v5 = vmul.f32 %v3980_v1, %v1873_v14  ;;  %v8321_v12 = vmul.f32 %v3980_v1, %v1872_v0  ;;  %v10493_v34 = vld [vmem:[#allocation361_spill] sm:$0xff]  ;;  %v10495_v15 = vld [vmem:[#allocation360_spill] sm:$0xff]  ;;  %v10497_v31 = vld [vmem:[#allocation363_spill] sm:$0xff]  ;;  %3466 = vrot.lane.b32.xlu0 %v8123_v43, %s4153_s28 }
 0x6cf   :  { %v1984_v60 = vsel %vm211_vm3, %v10490_v40, %v10489_v45  ;;  %v1983_v53 = vsel %vm211_vm3, %v10492_v54, %v10491_v58  ;;  %v1986_v18 = vsel %vm211_vm3, %v10494_v57, %v10493_v34  ;;  %v10496_v27 = vld [vmem:[#allocation356_spill] sm:$0xff]  ;;  %v10498_v30 = vld [vmem:[#allocation362_spill] sm:$0xff]  ;;  %v8341_v23 = vpop.permute.xlu0 %3414  ;;  %v10499_v14 = vld [vmem:[#allocation365_spill] sm:$0xff]  ;;  %v8351_v57 = vpop.permute.xlu1 %3416 }
 0x6d0   :  { %v1985_v1 = vsel %vm211_vm3, %v10496_v27, %v10495_v15  ;;  %v1988_v32 = vsel %vm216_vm4, %v1984_v60, %v10497_v31  ;;  %v1987_v55 = vsel %vm216_vm4, %v1983_v53, %v10498_v30  ;;  %v1990_v3 = vsel %vm216_vm4, %v1986_v18, %v10499_v14  ;;  %v10500_v0 = vld [vmem:[#allocation364_spill] sm:$0xff]  ;;  %v10501_v40 = vld [vmem:[#allocation367_spill] sm:$0xff]  ;;  %v10502_v54 = vld [vmem:[#allocation366_spill] sm:$0xff] }
 0x6d1   :  { %v1989_v45 = vsel %vm216_vm4, %v1985_v1, %v10500_v0  ;;  %v1992_v58 = vsel %vm221_vm5, %v1988_v32, %v10501_v40  ;;  %v1991_v34 = vsel %vm221_vm5, %v1987_v55, %v10502_v54  ;;  %v10503_v60 = vld [vmem:[#allocation369_spill] sm:$0xff]  ;;  %v10504_v53 = vld [vmem:[#allocation368_spill] sm:$0xff]  ;;  %v10505_v31 = vld [vmem:[#allocation371_spill] sm:$0xff]  ;;  %3468 = vrot.lane.b32.xlu1 %v8137_v10, %s4153_s28 }
 0x6d2   :  { %v1994_v15 = vsel %vm221_vm5, %v1990_v3, %v10503_v60  ;;  %v1993_v27 = vsel %vm221_vm5, %v1989_v45, %v10504_v53  ;;  %v1996_v18 = vsel %vm226_vm6, %v1992_v58, %v10505_v31  ;;  %v10506_v30 = vld [vmem:[#allocation370_spill] sm:$0xff]  ;;  %v10507_v32 = vld [vmem:[#allocation373_spill] sm:$0xff]  ;;  %v10508_v14 = vld [vmem:[#allocation372_spill] sm:$0xff]  ;;  %3575 = vrot.lane.b32.xlu0 %v8085_v6, %s4158_s9 }
 0x6d3   :  { %v1995_v1 = vsel %vm226_vm6, %v1991_v34, %v10506_v30  ;;  %v1998_v55 = vsel %vm226_vm6, %v1994_v15, %v10507_v32  ;;  %v1997_v0 = vsel %vm226_vm6, %v1993_v27, %v10508_v14  ;;  %v10509_v40 = vld [vmem:[#allocation375_spill] sm:$0xff]  ;;  %v10510_v54 = vld [vmem:[#allocation374_spill] sm:$0xff]  ;;  %v10511_v58 = vld [vmem:[#allocation377_spill] sm:$0xff]  ;;  %v8381_v32 = vpop.permute.xlu0 %3418 }
 0x6d4   :  { %v2000_v3 = vsel %vm231_vm7, %v1996_v18, %v10509_v40  ;;  %v1999_v45 = vsel %vm231_vm7, %v1995_v1, %v10510_v54  ;;  %v2002_v34 = vsel %vm231_vm7, %v1998_v55, %v10511_v58  ;;  %v10512_v60 = vld [vmem:[#allocation376_spill] sm:$0xff]  ;;  %v10513_v31 = vld [vmem:[#allocation379_spill] sm:$0xff]  ;;  %v10514_v30 = vld [vmem:[#allocation378_spill] sm:$0xff] }
 0x6d5   :  { %v2001_v53 = vsel %vm231_vm7, %v1997_v0, %v10512_v60  ;;  %v2004_v15 = vsel %vm236_vm8, %v2000_v3, %v10513_v31  ;;  %v2003_v27 = vsel %vm236_vm8, %v1999_v45, %v10514_v30  ;;  %v10515_v18 = vld [vmem:[#allocation381_spill] sm:$0xff]  ;;  %v10516_v14 = vld [vmem:[#allocation380_spill] sm:$0xff]  ;;  %v10517_v54 = vld [vmem:[#allocation391_spill] sm:$0xff]  ;;  %v8393_v3 = vpop.permute.xlu1 %3420  ;;  %3577 = vrot.lane.b32.xlu1 %v8097_v29, %s4158_s9 }
 0x6d6   :  { %v2006_v1 = vsel %vm236_vm8, %v2002_v34, %v10515_v18  ;;  %v2005_v40 = vsel %vm236_vm8, %v2001_v53, %v10516_v14  ;;  %v2121_v55 = vsel %vm211_vm3, %v10518_v26, %v10517_v54  ;;  %v10519_v58 = vld [vmem:[#allocation390_spill] sm:$0xff]  ;;  %v10522_v30 = vld [vmem:[#allocation392_spill] sm:$0xff]  ;;  %v10524_v18 = vld [vmem:[#allocation395_spill] sm:$0xff]  ;;  %3579 = vrot.lane.b32.xlu0 %v8123_v43, %s4158_s9 }
 0x6d7   :  { %v10520_v0 = vld [vmem:[#allocation386_spill] sm:$0xff]  ;;  %v10523_v41 = vld [vmem:[#allocation388_spill] sm:$0xff]  ;;  %v2125_v53 = vsel %vm216_vm4, %v2121_v55, %v10524_v18  ;;  %v10526_v26 = vld [vmem:[#allocation383_spill] sm:$0xff] }
 0x6d8   :  { %v2120_v60 = vsel %vm211_vm3, %v10520_v0, %v10519_v58  ;;  %v10521_v31 = vld [vmem:[#allocation382_spill] sm:$0xff]  ;;  %v2122_v34 = vsel %vm211_vm3, %v10523_v41, %v10522_v30  ;;  %v2008_v54 = vsel %vm241_vm9, %v2004_v15, %v10526_v26  ;;  %v10527_v58 = vld [vmem:[#allocation396_spill] sm:$0xff]  ;;  %v10541_v49 = vld [vmem:[#allocation411_spill] sm:$0xff] }
 0x6d9   :  { %v2007_v45 = vsel %vm241_vm9, %v2003_v27, %v10521_v31  ;;  %v10525_v14 = vld [vmem:[#allocation394_spill] sm:$0xff]  ;;  %v2126_v0 = vsel %vm216_vm4, %v2122_v34, %v10527_v58  ;;  %v10528_v27 = vld [vmem:[#allocation399_spill] sm:$0xff]  ;;  %v10530_v55 = vld [vmem:[#allocation384_spill] sm:$0xff]  ;;  %v3516_v58 = vpop.permute.xlu0 %3515  ;;  %3581 = vrot.lane.b32.xlu1 %v8137_v10, %s4158_s9 }
 0x6da   :  { %v2124_v17 = vsel %vm216_vm4, %v2120_v60, %v10525_v14  ;;  %v2129_v31 = vsel %vm221_vm5, %v2125_v53, %v10528_v27  ;;  %v2009_v60 = vsel %vm241_vm9, %v2005_v40, %v10530_v55  ;;  %v10531_v30 = vld [vmem:[#allocation400_spill] sm:$0xff]  ;;  %v10532_v14 = vld [vmem:[#allocation403_spill] sm:$0xff]  ;;  %v10533_v26 = vld [vmem:[#allocation402_spill] sm:$0xff]  ;;  %3688 = vrot.lane.b32.xlu0 %v8085_v6, %s4164_s15 }
 0x6db   :  { %v2128_v41 = vsel %vm221_vm5, %v2124_v17, %v10529_v52  ;;  %v2130_v18 = vsel %vm221_vm5, %v2126_v0, %v10531_v30  ;;  %v2133_v15 = vsel %vm226_vm6, %v2129_v31, %v10532_v14  ;;  %v3981_v52 = vld [vmem:[%s9464_s1 + $0xd] ss:$0 sm:$0xff]  ;;  %v10535_v27 = vld [vmem:[#allocation404_spill] sm:$0xff]  ;;  %v10536_v55 = vld [vmem:[#allocation407_spill] sm:$0xff]  ;;  %v3518_v14 = vpop.permute.xlu1 %3517 }
 0x6dc   :  { %v2132_v34 = vsel %vm226_vm6, %v2128_v41, %v10533_v26  ;;  %v10534_v17 = vld [vmem:[#allocation385_spill] sm:$0xff]  ;;  %v2134_v40 = vsel %vm226_vm6, %v2130_v18, %v10535_v27  ;;  %v2137_v0 = vsel %vm231_vm7, %v2133_v15, %v10536_v55  ;;  %v10537_v30 = vld [vmem:[#allocation406_spill] sm:$0xff]  ;;  %v10540_v19 = vld [vmem:[#allocation408_spill] sm:$0xff] }
 0x6dd   :  { %v2010_v53 = vsel %vm241_vm9, %v2006_v1, %v10534_v17  ;;  %v2136_v31 = vsel %vm231_vm7, %v2132_v34, %v10537_v30  ;;  %v10539_v41 = vld [vmem:[#allocation389_spill] sm:$0xff]  ;;  %v2138_v24 = vsel %vm231_vm7, %v2134_v40, %v10540_v19  ;;  %v2141_v1 = vsel %vm236_vm8, %v2137_v0, %v10541_v49  ;;  %v10542_v17 = vld [vmem:[#allocation410_spill] sm:$0xff]  ;;  %v10544_v27 = vld [vmem:[#allocation412_spill] sm:$0xff]  ;;  %3690 = vrot.lane.b32.xlu1 %v8097_v29, %s4164_s15 }
 0x6de   :  { %v2123_v26 = vsel %vm211_vm3, %v10539_v41, %v10538_v2  ;;  %v2140_v18 = vsel %vm236_vm8, %v2136_v31, %v10542_v17  ;;  %v10543_v15 = vld [vmem:[#allocation397_spill] sm:$0xff]  ;;  %v2142_v55 = vsel %vm236_vm8, %v2138_v24, %v10544_v27  ;;  %v10545_v19 = vld [vmem:[#allocation415_spill] sm:$0xff]  ;;  %v10546_v49 = vld [vmem:[#allocation414_spill] sm:$0xff]  ;;  %v2017_v30 = vmul.f32 %v3981_v52, %v2008_v54  ;;  %3692 = vrot.lane.b32.xlu0 %v8123_v43, %s4164_s15 }
 0x6df   :  { %v2127_v34 = vsel %vm216_vm4, %v2123_v26, %v10543_v15  ;;  %v3982_v2 = vld [vmem:[%s9464_s1 + $0xe] ss:$0 sm:$0xff]  ;;  %v2145_v40 = vsel %vm241_vm9, %v2141_v1, %v10545_v19  ;;  %v2144_v0 = vsel %vm241_vm9, %v2140_v18, %v10546_v49  ;;  %v2016_v31 = vmul.f32 %v3981_v52, %v2007_v45  ;;  %v10548_v17 = vld [vmem:[#allocation416_spill] sm:$0xff]  ;;  %v3520_v15 = vpop.permute.xlu0 %3519  ;;  %v3522_v49 = vpop.permute.xlu1 %3521 }
 0x6e0   :  { %v10547_v41 = vld [vmem:[#allocation401_spill] sm:$0xff]  ;;  %v2146_v24 = vsel %vm241_vm9, %v2142_v55, %v10548_v17  ;;  %v1884_v27 = vadd.f32 %v8313_v48, %v8305_v37  ;;  %v2019_v20 = vmul.f32 %v3981_v52, %v2010_v53  ;;  %v2018_v1 = vmul.f32 %v3981_v52, %v2009_v60  ;;  %v4109_v53 = vld [vmem:[#allocation2 + $0x1a] sm:$0xff]  ;;  %v10552_v55 = vld [vmem:[#allocation418_spill] sm:$0xff] }
 0x6e1   :  { %v2131_v26 = vsel %vm221_vm5, %v2127_v34, %v10547_v41  ;;  %v10549_v19 = vld [vmem:[#allocation405_spill] sm:$0xff]  ;;  %v1885_v54 = vadd.f32 %v8321_v12, %v8311_v44  ;;  %v2154_v34 = vmul.f32 %v3982_v2, %v2145_v40  ;;  %v2153_v41 = vmul.f32 %v3982_v2, %v2144_v0  ;;  %v10554_v17 = vld [vmem:[#allocation422_spill] sm:$0xff]  ;;  %3694 = vrot.lane.b32.xlu1 %v8137_v10, %s4164_s15 }
 0x6e2   :  { %v2135_v18 = vsel %vm226_vm6, %v2131_v26, %v10549_v19  ;;  %v10550_v45 = vld [vmem:[#allocation409_spill] sm:$0xff]  ;;  %v1886_v37 = vadd.f32 %v8319_v5, %v8309_v4  ;;  %v2155_v52 = vmul.f32 %v3982_v2, %v2146_v24  ;;  %v2253_v26 = vsel %vm211_vm3, %v4109_v53, %v10552_v55  ;;  %v10555_v24 = vld [vmem:[#allocation426_spill] sm:$0xff]  ;;  %3587 = vrot.lane.b32.xlu0 %v8085_v6, %s4159_s10 }
 0x6e3   :  { %v2139_v47 = vsel %vm231_vm7, %v2135_v18, %v10550_v45  ;;  %v10551_v48 = vld [vmem:[#allocation413_spill] sm:$0xff]  ;;  %v2021_v44 = vadd.f32 %v2017_v30, %v1884_v27  ;;  %v2020_v12 = vadd.f32 %v2016_v31, %v8315_v13  ;;  %v2257_v4 = vsel %vm216_vm4, %v2253_v26, %v10554_v17  ;;  %v3528_v5 = vpop.permute.xlu0 %3527  ;;  %v3530_v45 = vpop.permute.xlu1 %3529  ;;  %v10556_v13 = vld [vmem:[#allocation430_spill] sm:$0xff]  ;;  %v4112_v26 = vld [vmem:[#allocation2 + $0x62] sm:$0xff] }
 0x6e4   :  { %v2143_v60 = vsel %vm236_vm8, %v2139_v47, %v10551_v48  ;;  %v10553_v40 = vld [vmem:[#allocation417_spill] sm:$0xff]  ;;  %v2023_v19 = vadd.f32 %v2019_v20, %v1886_v37  ;;  %v2022_v47 = vadd.f32 %v2018_v1, %v1885_v54  ;;  %v2261_v18 = vsel %vm221_vm5, %v2257_v4, %v10555_v24  ;;  %v4110_v54 = vld [vmem:[#allocation2 + $0x22] sm:$0xff]  ;;  %v10557_v37 = vld [vmem:[#allocation419_spill] sm:$0xff] }
 0x6e5   :  { %v2147_v0 = vsel %vm241_vm9, %v2143_v60, %v10553_v40  ;;  %v8489_v48 = vsel %vm211_vm3, %v3516_v58, %v3528_v5  ;;  %v8491_v53 = vadd.f32 %v2154_v34, %v2021_v44  ;;  %v2157_v30 = vadd.f32 %v2153_v41, %v2020_v12  ;;  %v10558_v60 = vld [vmem:[#allocation434_spill] sm:$0xff]  ;;  %v4111_v41 = vld [vmem:[#allocation2 + $0x6a] sm:$0xff]  ;;  %v10560_v44 = vld [vmem:[#allocation420_spill] sm:$0xff]  ;;  %3589 = vrot.lane.b32.xlu1 %v8097_v29, %s4159_s10 }
 0x6e6   :  { %v2265_v31 = vsel %vm226_vm6, %v2261_v18, %v10556_v13  ;;  %v8496_v27 = vsel %vm211_vm3, %v3518_v14, %v3530_v45  ;;  %v2156_v20 = vmul.f32 %v3982_v2, %v2147_v0  ;;  %v8500_v1 = vadd.f32 %v2155_v52, %v2022_v47  ;;  %v10559_v55 = vld [vmem:[#allocation421_spill] sm:$0xff]  ;;  %v10561_v52 = vld [vmem:[#allocation423_spill] sm:$0xff]  ;;  %v10562_v40 = vld [vmem:[#allocation438_spill] sm:$0xff]  ;;  %3591 = vrot.lane.b32.xlu0 %v8123_v43, %s4159_s10 }
 0x6e7   :  { %v2254_v58 = vsel %vm211_vm3, %v4110_v54, %v10557_v37  ;;  %v2269_v34 = vsel %vm231_vm7, %v2265_v31, %v10558_v60  ;;  %v2256_v14 = vsel %vm211_vm3, %v4111_v41, %v10559_v55  ;;  %v2255_v2 = vsel %vm211_vm3, %v4112_v26, %v10560_v44  ;;  %v3532_v17 = vpop.permute.xlu0 %3531  ;;  %v10563_v4 = vld [vmem:[#allocation427_spill] sm:$0xff]  ;;  %v8521_v47 = vld [vmem:[%s9464_s1 + $0xf] ss:$0 sm:$0xff]  ;;  %v10564_v24 = vld [vmem:[#allocation442_spill] sm:$0xff]  ;;  %v3534_v13 = vpop.permute.xlu1 %3533 }
 0x6e8   :  { %v2258_v12 = vsel %vm216_vm4, %v2254_v58, %v10561_v52  ;;  %v2273_v0 = vsel %vm236_vm8, %v2269_v34, %v10562_v40  ;;  %v3342_v45 = vsel %vm211_vm3, %v7260_v7, %v7352_v62  ;;  %v8529_v31 = vsel %vm211_vm3, %v3520_v15, %v3532_v17  ;;  %v10565_v54 = vld [vmem:[#allocation424_spill] sm:$0xff]  ;;  %v10566_v58 = vld [vmem:[#allocation431_spill] sm:$0xff]  ;;  %v10567_v7 = vld [vmem:[#allocation425_spill] sm:$0xff] }
 0x6e9   :  { %v2262_v5 = vsel %vm221_vm5, %v2258_v12, %v10563_v4  ;;  %v2277_v18 = vsel %vm241_vm9, %v2273_v0, %v10564_v24  ;;  %v2259_v37 = vsel %vm216_vm4, %v2255_v2, %v10565_v54  ;;  %v3346_v34 = vsel %vm216_vm4, %v3342_v45, %v7597_v50  ;;  %v10568_v15 = vld [vmem:[#allocation428_spill] sm:$0xff]  ;;  %v10569_v26 = vld [vmem:[#allocation435_spill] sm:$0xff]  ;;  %v10570_v50 = vld [vmem:[#allocation429_spill] sm:$0xff]  ;;  %3593 = vrot.lane.b32.xlu1 %v8137_v10, %s4159_s10 }
 0x6ea   :  { %v2266_v60 = vsel %vm226_vm6, %v2262_v5, %v10566_v58  ;;  %v8538_v41 = vsel %vm211_vm3, %v3522_v49, %v3534_v13  ;;  %v2260_v62 = vsel %vm216_vm4, %v2256_v14, %v10567_v7  ;;  %v2263_v55 = vsel %vm221_vm5, %v2259_v37, %v10568_v15  ;;  %v10571_v52 = vld [vmem:[#allocation439_spill] sm:$0xff]  ;;  %v10572_v17 = vld [vmem:[#allocation432_spill] sm:$0xff]  ;;  %3700 = vrot.lane.b32.xlu0 %v8085_v6, %s4165_s16 }
 0x6eb   :  { %v2270_v44 = vsel %vm231_vm7, %v2266_v60, %v10569_v26  ;;  %v3350_v2 = vsel %vm221_vm5, %v3346_v34, %v7815_v36  ;;  %v2264_v49 = vsel %vm221_vm5, %v2260_v62, %v10570_v50  ;;  %v2286_v14 = vmul.f32 %v8521_v47, %v2277_v18  ;;  %v8559_v0 = vpop.permute.xlu0 %3317  ;;  %v10573_v36 = vld [vmem:[#allocation443_spill] sm:$0xff]  ;;  %v3320_v13 = vpop.permute.xlu1 %3319  ;;  %v10574_v18 = vld [vmem:[#allocation433_spill] sm:$0xff]  ;;  %v10577_v34 = vld [vmem:[#allocation440_spill] sm:$0xff] }
 0x6ec   :  { %v2274_v12 = vsel %vm236_vm8, %v2270_v44, %v10571_v52  ;;  %v3354_v40 = vsel %vm226_vm6, %v3350_v2, %v8035_v11  ;;  %v2267_v4 = vsel %vm226_vm6, %v2263_v55, %v10572_v17  ;;  %v3344_v24 = vsel %vm211_vm3, %v7310_v8, %v7392_v56  ;;  %v10575_v11 = vld [vmem:[#allocation436_spill] sm:$0xff]  ;;  %v10576_v56 = vld [vmem:[#allocation437_spill] sm:$0xff]  ;;  %v10582_v52 = vld [vmem:[#allocation446_spill] sm:$0xff] }
 0x6ed   :  { %v2278_v5 = vsel %vm241_vm9, %v2274_v12, %v10573_v36  ;;  %v3358_v45 = vsel %vm231_vm7, %v3354_v40, %v8277_v22  ;;  %v2268_v54 = vsel %vm226_vm6, %v2264_v49, %v10574_v18  ;;  %v2271_v37 = vsel %vm231_vm7, %v2267_v4, %v10575_v11  ;;  %v10579_v44 = vld [vmem:[#allocation445_spill] sm:$0xff]  ;;  %v10581_v49 = vld [vmem:[#allocation450_spill] sm:$0xff]  ;;  %v10584_v17 = vld [vmem:[#allocation447_spill] sm:$0xff]  ;;  %3702 = vrot.lane.b32.xlu1 %v8097_v29, %s4165_s16 }
 0x6ee   :  { %v3348_v58 = vsel %vm216_vm4, %v3344_v24, %v7617_v28  ;;  %v8577_v60 = vsel %vm236_vm8, %v3358_v45, %v3320_v13  ;;  %v8581_v8 = vadd.f32 %v2156_v20, %v2023_v19  ;;  %v2272_v22 = vsel %vm231_vm7, %v2268_v54, %v10576_v56  ;;  %v10578_v28 = vld [vmem:[#allocation441_spill] sm:$0xff]  ;;  %v10585_v4 = vld [vmem:[#allocation452_spill] sm:$0xff]  ;;  %v10589_v54 = vld [vmem:[#allocation454_spill] sm:$0xff]  ;;  %3704 = vrot.lane.b32.xlu0 %v8123_v43, %s4165_s16 }
 0x6ef   :  { %v2275_v7 = vsel %vm236_vm8, %v2271_v37, %v10577_v34  ;;  %v3352_v62 = vsel %vm221_vm5, %v3348_v58, %v7854_v42  ;;  %v2276_v15 = vsel %vm236_vm8, %v2272_v22, %v10578_v28  ;;  %v8594_v55 = vmul.f32 %v8521_v47, %v2278_v5  ;;  %v8600_v26 = vpop.permute.xlu0 %3321  ;;  %v10580_v42 = vld [vmem:[#allocation444_spill] sm:$0xff]  ;;  %v10588_v13 = vld [vmem:[#allocation449_spill] sm:$0xff]  ;;  %v10590_v58 = vld [vmem:[#allocation455_spill] sm:$0xff] }
 0x6f0   :  { %v8596_v19 = vadd.f32 %v2286_v14, %v2157_v30  ;;  %v3356_v20 = vsel %vm226_vm6, %v3352_v62, %v8077_v16  ;;  %v2280_v2 = vsel %vm241_vm9, %v2276_v15, %v10579_v44  ;;  %v2279_v50 = vsel %vm241_vm9, %v2275_v7, %v10580_v42  ;;  %v3324_v30 = vpop.permute.xlu1 %3323  ;;  %v10583_v14 = vld [vmem:[#allocation451_spill] sm:$0xff]  ;;  %v10586_v36 = vld [vmem:[#allocation448_spill] sm:$0xff] }
 0x6f1   :  { %v2390_v12 = vsel %vm211_vm3, %v10582_v52, %v10581_v49  ;;  %v3360_v40 = vsel %vm231_vm7, %v3356_v20, %v8307_v25  ;;  %v2391_v16 = vsel %vm211_vm3, %v10584_v17, %v10583_v14  ;;  %v2392_v5 = vsel %vm211_vm3, %v10586_v36, %v10585_v4  ;;  %v10587_v25 = vld [vmem:[#allocation453_spill] sm:$0xff]  ;;  %v10591_v22 = vld [vmem:[#allocation456_spill] sm:$0xff]  ;;  %v10594_v52 = vld [vmem:[#allocation459_spill] sm:$0xff]  ;;  %3706 = vrot.lane.b32.xlu1 %v8137_v10, %s4165_s16 }
 0x6f2   :  { %v3474_v24 = vsel %vm211_vm3, %v8085_v6, %v7870_v46  ;;  %v8621_v45 = vsel %vm236_vm8, %v3360_v40, %v3324_v30  ;;  %v2393_v18 = vsel %vm211_vm3, %v10588_v13, %v10587_v25  ;;  %v2394_v11 = vsel %vm216_vm4, %v2390_v12, %v10589_v54  ;;  %v10595_v12 = vld [vmem:[#allocation460_spill] sm:$0xff]  ;;  %v10597_v17 = vld [vmem:[#allocation462_spill] sm:$0xff]  ;;  %3599 = vrot.lane.b32.xlu0 %v8085_v6, %s4160_s11 }
 0x6f3   :  { %v3475_v37 = vsel %vm211_vm3, %v8097_v29, %v7882_v9  ;;  %v3478_v46 = vsel %vm216_vm4, %v3474_v24, %v8107_v59  ;;  %v2395_v56 = vsel %vm216_vm4, %v2391_v16, %v10590_v58  ;;  %v2396_v34 = vsel %vm216_vm4, %v2392_v5, %v10591_v22  ;;  %v3427_v28 = vpop.permute.xlu0 %3426  ;;  %v10592_v9 = vld [vmem:[#allocation457_spill] sm:$0xff]  ;;  %v10593_v59 = vld [vmem:[#allocation458_spill] sm:$0xff] }
 0x6f4   :  { %v3479_v7 = vsel %vm216_vm4, %v3475_v37, %v8113_v38  ;;  %v3482_v62 = vsel %vm221_vm5, %v3478_v46, %v8341_v23  ;;  %v2397_v15 = vsel %vm216_vm4, %v2393_v18, %v10592_v9  ;;  %v2398_v20 = vsel %vm221_vm5, %v2394_v11, %v10593_v59  ;;  %v3429_v42 = vpop.permute.xlu1 %3428  ;;  %v10599_v24 = vld [vmem:[#allocation466_spill] sm:$0xff]  ;;  %v10602_v22 = vld [vmem:[#allocation465_spill] sm:$0xff] }
 0x6f5   :  { %v3483_v44 = vsel %vm221_vm5, %v3479_v7, %v8351_v57  ;;  %v8652_v49 = vsel %vm226_vm6, %v3482_v62, %v3427_v28  ;;  %v2399_v38 = vsel %vm221_vm5, %v2395_v56, %v10594_v52  ;;  %v2400_v23 = vsel %vm221_vm5, %v2396_v34, %v10595_v12  ;;  %v10596_v57 = vld [vmem:[#allocation461_spill] sm:$0xff]  ;;  %v10603_v34 = vld [vmem:[#allocation467_spill] sm:$0xff]  ;;  %v10604_v62 = vld [vmem:[#allocation474_spill] sm:$0xff]  ;;  %3601 = vrot.lane.b32.xlu1 %v8097_v29, %s4160_s11 }
 0x6f6   :  { %v3476_v40 = vsel %vm211_vm3, %v8123_v43, %v7912_v35  ;;  %v8662_v30 = vsel %vm226_vm6, %v3483_v44, %v3429_v42  ;;  %v2401_v14 = vsel %vm221_vm5, %v2397_v15, %v10596_v57  ;;  %v2402_v16 = vsel %vm226_vm6, %v2398_v20, %v10597_v17  ;;  %v10598_v35 = vld [vmem:[#allocation463_spill] sm:$0xff]  ;;  %v8701_v7 = vld [vmem:[%s9464_s1 + $0x10] ss:$0 sm:$0xff]  ;;  %v10606_v20 = vld [vmem:[#allocation468_spill] sm:$0xff]  ;;  %3603 = vrot.lane.b32.xlu0 %v8123_v43, %s4160_s11 }
 0x6f7   :  { %v3477_v4 = vsel %vm211_vm3, %v8137_v10, %v7922_v61  ;;  %v3480_v36 = vsel %vm216_vm4, %v3476_v40, %v8149_v21  ;;  %v2403_v5 = vsel %vm226_vm6, %v2399_v38, %v10598_v35  ;;  %v2406_v25 = vsel %vm231_vm7, %v2402_v16, %v10599_v24  ;;  %v3431_v54 = vpop.permute.xlu0 %3430  ;;  %v10600_v61 = vld [vmem:[#allocation464_spill] sm:$0xff]  ;;  %v10601_v21 = vld [vmem:[#allocation470_spill] sm:$0xff]  ;;  %v10605_v15 = vld [vmem:[#allocation469_spill] sm:$0xff] }
 0x6f8   :  { %v3481_v13 = vsel %vm216_vm4, %v3477_v4, %v8159_v33  ;;  %v3484_v18 = vsel %vm221_vm5, %v3480_v36, %v8381_v32  ;;  %v2404_v11 = vsel %vm226_vm6, %v2400_v23, %v10600_v61  ;;  %v2410_v37 = vsel %vm236_vm8, %v2406_v25, %v10601_v21  ;;  %v3433_v58 = vpop.permute.xlu1 %3432  ;;  %v10607_v42 = vld [vmem:[#allocation471_spill] sm:$0xff]  ;;  %v10608_v12 = vld [vmem:[#allocation473_spill] sm:$0xff]  ;;  %v10618_v21 = vld [vmem:[#allocation480_spill] sm:$0xff] }
 0x6f9   :  { %v3485_v46 = vsel %vm221_vm5, %v3481_v13, %v8393_v3  ;;  %v8692_v56 = vsel %vm226_vm6, %v3484_v18, %v3431_v54  ;;  %v2405_v33 = vsel %vm226_vm6, %v2401_v14, %v10602_v22  ;;  %v2407_v32 = vsel %vm231_vm7, %v2403_v5, %v10603_v34  ;;  %v10610_v57 = vld [vmem:[#allocation475_spill] sm:$0xff]  ;;  %v10611_v4 = vld [vmem:[#allocation477_spill] sm:$0xff]  ;;  %v10615_v18 = vld [vmem:[#allocation482_spill] sm:$0xff]  ;;  %3605 = vrot.lane.b32.xlu1 %v8137_v10, %s4160_s11 }
 0x6fa   :  { %v2414_v28 = vsel %vm241_vm9, %v2410_v37, %v10604_v62  ;;  %v8706_v3 = vsel %vm226_vm6, %v3485_v46, %v3433_v58  ;;  %v8711_v9 = vmul.f32 %v8521_v47, %v2279_v50  ;;  %v2409_v59 = vsel %vm231_vm7, %v2405_v33, %v10605_v15  ;;  %v10609_v50 = vld [vmem:[#allocation472_spill] sm:$0xff]  ;;  %v10613_v24 = vld [vmem:[#allocation483_spill] sm:$0xff]  ;;  %v10616_v54 = vld [vmem:[#allocation478_spill] sm:$0xff]  ;;  %3712 = vrot.lane.b32.xlu0 %v8085_v6, %s4166_s17 }
 0x6fb   :  { %v2408_v44 = vsel %vm231_vm7, %v2404_v11, %v10606_v20  ;;  %v2411_v52 = vsel %vm236_vm8, %v2407_v32, %v10607_v42  ;;  %v8722_v38 = vmul.f32 %v8521_v47, %v2280_v2  ;;  %v2413_v23 = vsel %vm236_vm8, %v2409_v59, %v10608_v12  ;;  %v3540_v17 = vpop.permute.xlu0 %3539  ;;  %v10612_v47 = vld [vmem:[#allocation476_spill] sm:$0xff]  ;;  %v10614_v25 = vld [vmem:[#allocation479_spill] sm:$0xff]  ;;  %v10620_v58 = vld [vmem:[#allocation481_spill] sm:$0xff] }
 0x6fc   :  { %v2412_v40 = vsel %vm236_vm8, %v2408_v44, %v10609_v50  ;;  %v8730_v14 = vsel %vm241_vm9, %v2411_v52, %v10610_v57  ;;  %v8733_v16 = vmul.f32 %v8701_v7, %v2414_v28  ;;  %v8737_v36 = vsel %vm241_vm9, %v2413_v23, %v10611_v4  ;;  %v3542_v35 = vpop.permute.xlu1 %3541  ;;  %v10617_v11 = vld [vmem:[#allocation484_spill] sm:$0xff]  ;;  %v10621_v33 = vld [vmem:[#allocation487_spill] sm:$0xff]  ;;  %v10622_v32 = vld [vmem:[#allocation486_spill] sm:$0xff] }
 0x6fd   :  { %v8741_v2 = vsel %vm241_vm9, %v2412_v40, %v10612_v47  ;;  %v8745_v5 = vsel %vm216_vm4, %v8489_v48, %v3540_v17  ;;  %v2528_v13 = vsel %vm211_vm3, %v10614_v25, %v10613_v24  ;;  %v2527_v61 = vsel %vm211_vm3, %v10616_v54, %v10615_v18  ;;  %v10619_v48 = vld [vmem:[#allocation485_spill] sm:$0xff]  ;;  %v10624_v59 = vld [vmem:[#allocation488_spill] sm:$0xff]  ;;  %v10625_v44 = vld [vmem:[#allocation490_spill] sm:$0xff]  ;;  %3714 = vrot.lane.b32.xlu1 %v8097_v29, %s4166_s17 }
 0x6fe   :  { %v2529_v37 = vsel %vm211_vm3, %v10618_v21, %v10617_v11  ;;  %v8758_v46 = vsel %vm216_vm4, %v8496_v27, %v3542_v35  ;;  %v2530_v22 = vsel %vm211_vm3, %v10620_v58, %v10619_v48  ;;  %v2532_v34 = vsel %vm216_vm4, %v2528_v13, %v10621_v33  ;;  %v10623_v27 = vld [vmem:[#allocation489_spill] sm:$0xff]  ;;  %v10626_v23 = vld [vmem:[#allocation491_spill] sm:$0xff]  ;;  %v10628_v40 = vld [vmem:[#allocation20_spill] sm:$0xff]  ;;  %3716 = vrot.lane.b32.xlu0 %v8123_v43, %s4166_s17 }
 0x6ff   :  { %v2531_v62 = vsel %vm216_vm4, %v2527_v61, %v10622_v32  ;;  %v3341_v28 = vsel %vm211_vm3, %v7250_v63, %v7340_v51  ;;  %v2534_v15 = vsel %vm216_vm4, %v2530_v22, %v10623_v27  ;;  %v2533_v20 = vsel %vm216_vm4, %v2529_v37, %v10624_v59  ;;  %v3544_v12 = vpop.permute.xlu0 %3543  ;;  %v10627_v63 = vld [vmem:[#allocation492_spill] sm:$0xff]  ;;  %v10629_v47 = vld [vmem:[#allocation493_spill] sm:$0xff]  ;;  %v10630_v24 = vld [vmem:[#allocation30_spill] sm:$0xff] }
 0x700   :  { %v2535_v42 = vsel %vm221_vm5, %v2531_v62, %v10625_v44  ;;  %v3345_v52 = vsel %vm216_vm4, %v3341_v28, %v7591_v39  ;;  %v2536_v50 = vsel %vm221_vm5, %v2532_v34, %v10626_v23  ;;  %v2537_v51 = vsel %vm221_vm5, %v2533_v20, %v10627_v63  ;;  %v3546_v17 = vpop.permute.xlu1 %3545  ;;  %v3833_v13 = vld [vmem:[%s9466_s3 + $0x78] sm:$0xff]  ;;  %v10634_v21 = vld [vmem:[#allocation36_spill] sm:$0xff]  ;;  %v3832_v48 = vld [vmem:[%s9466_s3 + $0x70] sm:$0xff] }
 0x701   :  { %v3349_v57 = vsel %vm221_vm5, %v3345_v52, %v10628_v40  ;;  %v8790_v4 = vsel %vm216_vm4, %v8529_v31, %v3544_v12  ;;  %v2538_v35 = vsel %vm221_vm5, %v2534_v15, %v10629_v47  ;;  %v8798_v25 = vsel %vm216_vm4, %v8538_v41, %v3546_v17  ;;  %v10631_v18 = vld [vmem:[#allocation494_spill] sm:$0xff]  ;;  %v10633_v61 = vld [vmem:[#allocation15_spill] sm:$0xff]  ;;  %v10636_v33 = vld [vmem:[#allocation496_spill] sm:$0xff]  ;;  %3718 = vrot.lane.b32.xlu1 %v8137_v10, %s4166_s17  ;;  %s4121_s17 = scalar_lea.vmem %s3961_s7, 32 }
 0x702   :  { %v3353_v39 = vsel %vm226_vm6, %v3349_v57, %v10630_v24  ;;  %v2539_v31 = vsel %vm226_vm6, %v2535_v42, %v10631_v18  ;;  %v10632_v54 = vld [vmem:[#allocation14_spill] sm:$0xff]  ;;  %v4169_v41 = vmov 0.0   ;;  %v10635_v58 = vld [vmem:[#allocation495_spill] sm:$0xff]  ;;  %v2541_v34 = vsel %vm226_vm6, %v2537_v51, %v10636_v33  ;;  %v10637_v32 = vld [vmem:[#allocation17_spill] sm:$0xff]  ;;  %3724 = vrot.lane.b32.xlu0 %v8085_v6, %s4167_s18  ;;  %p4122_p0 = scmp.ne.s32.totalorder %s3961_s7, %s4121_s17  ;;  %p4127_p2 = scmp.lt.s32.totalorder %s4121_s17, %s4121_s17 }
 0x703   :  { %v3343_v11 = vsel %vm211_vm3, %v10633_v61, %v10632_v54  ;;  %v3357_v37 = vsel %vm231_vm7, %v3353_v39, %v10634_v21  ;;  %4015 = vmatprep.subr.mxu0 %v4169_v41  ;;  %v2540_v22 = vsel %vm226_vm6, %v2536_v50, %v10635_v58  ;;  %v3330_v27 = vpop.permute.xlu0 %3329  ;;  %v10638_v15 = vld [vmem:[#allocation497_spill] sm:$0xff]  ;;  %v10639_v20 = vld [vmem:[#allocation498_spill] sm:$0xff]  ;;  %v10640_v42 = vld [vmem:[#allocation27_spill] sm:$0xff]  ;;  %4047 = vmatprep.mubr.msk.f32.mxu0 %vm4170_vm10, %v4169_v41 }
 0x704   :  { %v3347_v62 = vsel %vm216_vm4, %v3343_v11, %v10637_v32  ;;  %v3361_v28 = vsel %vm236_vm8, %v3357_v37, %v8559_v0  ;;  %4016 = vmatpush3.msra.mxu0 %v3833_v13  ;;  %v2542_v59 = vsel %vm226_vm6, %v2538_v35, %v10638_v15  ;;  %v2543_v44 = vsel %vm231_vm7, %v2539_v31, %v10639_v20  ;;  %v3332_v12 = vpop.permute.xlu1 %3331  ;;  %v10641_v50 = vld [vmem:[#allocation499_spill] sm:$0xff]  ;;  %v10642_v63 = vld [vmem:[#allocation33_spill] sm:$0xff]  ;;  %v10644_v47 = vld [vmem:[#allocation500_spill] sm:$0xff]  ;;  %p4128_p3 = por %p4127_p2, %p4126_p1 }
 0x705   :  { %v3351_v52 = vsel %vm221_vm5, %v3347_v62, %v10640_v42  ;;  %v8833_v23 = vsel %vm241_vm9, %v3361_v28, %v3330_v27  ;;  %4017 = vmatprep.subr.mxu0 %v4169_v41  ;;  %v2544_v0 = vsel %vm231_vm7, %v2540_v22, %v10641_v50  ;;  %v8842_v40 = vsel %vm241_vm9, %v8577_v60, %v3332_v12  ;;  %v10643_v57 = vld [vmem:[#allocation501_spill] sm:$0xff]  ;;  %v10645_v24 = vld [vmem:[#allocation39_spill] sm:$0xff]  ;;  %v10647_v31 = vld [vmem:[#allocation502_spill] sm:$0xff] }
 0x706   :  { %v3355_v51 = vsel %vm226_vm6, %v3351_v52, %v10642_v63  ;;  %4018 = vmatpush3.msra.mxu0 %v3832_v48  ;;  %v2546_v17 = vsel %vm231_vm7, %v2542_v59, %v10643_v57  ;;  %v2545_v35 = vsel %vm231_vm7, %v2541_v34, %v10644_v47  ;;  %v3831_v60 = vld [vmem:[%s9466_s3 + $0x68] sm:$0xff]  ;;  %v10646_v13 = vld [vmem:[#allocation503_spill] sm:$0xff]  ;;  %v2547_v54 = vsel %vm236_vm8, %v2543_v44, %v10647_v31  ;;  %v3985_v22 = vld [vmem:[%s9464_s1 + $0x11] ss:$0 sm:$0xff]  ;;  %p4129_p4 = pnand %p4128_p3, %p4122_p0 }
 0x707   :  { %v3359_v39 = vsel %vm231_vm7, %v3355_v51, %v10645_v24  ;;  %4019 = vmatprep.subr.mxu0 %v4169_v41  ;;  %v2548_v18 = vsel %vm236_vm8, %v2544_v0, %v10646_v13  ;;  %v10648_v61 = vld [vmem:[#allocation504_spill] sm:$0xff]  ;;  %v3334_v37 = vpop.permute.xlu0 %3333  ;;  %v10649_v48 = vld [vmem:[#allocation505_spill] sm:$0xff]  ;;  %v10650_v33 = vld [vmem:[#allocation507_spill] sm:$0xff]  ;;  %v2424_v52 = vmul.f32 %v8701_v7, %v8730_v14  ;;  %v2426_v12 = vmul.f32 %v8701_v7, %v8737_v36 }
 0x708   :  { %v2549_v11 = vsel %vm236_vm8, %v2545_v35, %v10648_v61  ;;  %v3363_v21 = vsel %vm236_vm8, %v3359_v39, %v8600_v26  ;;  %4020 = vmatpush3.msra.mxu0 %v3831_v60  ;;  %v2550_v58 = vsel %vm236_vm8, %v2546_v17, %v10649_v48  ;;  %v2552_v34 = vsel %vm241_vm9, %v2548_v18, %v10650_v33  ;;  %v10651_v32 = vld [vmem:[#allocation506_spill] sm:$0xff]  ;;  %v3336_v28 = vpop.permute.xlu1 %3335  ;;  %v3830_v26 = vld [vmem:[%s9466_s3 + $0x60] sm:$0xff]  ;;  %v10652_v15 = vld [vmem:[#allocation509_spill] sm:$0xff] }
 0x709   :  { %v2551_v62 = vsel %vm241_vm9, %v2547_v54, %v10651_v32  ;;  %v8876_v27 = vsel %vm241_vm9, %v3363_v21, %v3334_v37  ;;  %4021 = vmatprep.subr.mxu0 %v4169_v41  ;;  %v2554_v59 = vsel %vm241_vm9, %v2550_v58, %v10652_v15  ;;  %v10653_v20 = vld [vmem:[#allocation508_spill] sm:$0xff]  ;;  %v8888_v42 = vsel %vm241_vm9, %v8621_v45, %v3336_v28  ;;  %v3829_v45 = vld [vmem:[%s9466_s3 + $0x58] sm:$0xff]  ;;  %v4114_v61 = vld [vmem:[#allocation2 + $0x30] sm:$0xff] }
 0x70a   :  { %v2553_v44 = vsel %vm241_vm9, %v2549_v11, %v10653_v20  ;;  %4022 = vmatpush3.msra.mxu0 %v3830_v26  ;;  %v2425_v50 = vmul.f32 %v8701_v7, %v8741_v2  ;;  %3726 = vrot.lane.b32.xlu1 %v8097_v29, %s4167_s18  ;;  %v2291_v0 = vadd.f32 %v8594_v55, %v8491_v53  ;;  %v3828_v53 = vld [vmem:[%s9466_s3 + $0x50] sm:$0xff]  ;;  %v3826_v13 = vld [vmem:[%s9466_s3 + $0x40] sm:$0xff]  ;;  %v4113_v18 = vld [vmem:[#allocation2 + $0x38] sm:$0xff] }
 0x70b   :  { %4023 = vmatprep.subr.mxu0 %v4169_v41  ;;  %v2293_v14 = vadd.f32 %v8722_v38, %v8581_v8  ;;  %v2292_v36 = vadd.f32 %v8711_v9, %v8500_v1  ;;  %v2560_v63 = vmul.f32 %v3985_v22, %v2551_v62  ;;  %v3439_v7 = vpop.permute.xlu0 %3438  ;;  %v2561_v2 = vmul.f32 %v3985_v22, %v2552_v34  ;;  %v10654_v31 = vld [vmem:[#allocation511_spill] sm:$0xff]  ;;  %v10655_v11 = vld [vmem:[#allocation510_spill] sm:$0xff]  ;;  %v10656_v48 = vld [vmem:[#allocation513_spill] sm:$0xff] }
 0x70c   :  { %4024 = vmatpush3.msra.mxu0 %v3829_v45  ;;  %v2563_v51 = vmul.f32 %v3985_v22, %v2554_v59  ;;  %v2562_v57 = vmul.f32 %v3985_v22, %v2553_v44  ;;  %v3441_v17 = vpop.permute.xlu1 %3440  ;;  %v8912_v47 = vsel %vm231_vm7, %v8652_v49, %v3439_v7  ;;  %v2427_v1 = vadd.f32 %v8733_v16, %v8596_v19  ;;  %v3827_v19 = vld [vmem:[%s9466_s3 + $0x48] sm:$0xff]  ;;  %v4116_v22 = vld [vmem:[#allocation2 + $0x78] sm:$0xff] }
 0x70d   :  { %4025 = vmatprep.subr.mxu0 %v4169_v41  ;;  %v8922_v8 = vsel %vm231_vm7, %v8662_v30, %v3441_v17  ;;  %3728 = vrot.lane.b32.xlu0 %v8123_v43, %s4167_s18  ;;  %v2428_v55 = vadd.f32 %v2424_v52, %v2291_v0  ;;  %v2430_v49 = vadd.f32 %v2426_v12, %v2293_v14  ;;  %v10657_v33 = vld [vmem:[#allocation512_spill] sm:$0xff]  ;;  %v10658_v32 = vld [vmem:[#allocation514_spill] sm:$0xff]  ;;  %v10660_v26 = vld [vmem:[#allocation517_spill] sm:$0xff] }
 0x70e   :  { %4026 = vmatpush3.msra.mxu0 %v3828_v53  ;;  %v2429_v9 = vadd.f32 %v2425_v50, %v2292_v36  ;;  %3730 = vrot.lane.b32.xlu1 %v8137_v10, %s4167_s18  ;;  %v8932_v38 = vadd.f32 %v2560_v63, %v2427_v1  ;;  %v2661_v54 = vsel %vm211_vm3, %v4113_v18, %v10654_v31  ;;  %v10661_v59 = vld [vmem:[#allocation516_spill] sm:$0xff]  ;;  %v10662_v44 = vld [vmem:[#allocation518_spill] sm:$0xff]  ;;  %v10668_v1 = vld [vmem:[#allocation529_spill] sm:$0xff] }
 0x70f   :  { %4027 = vmatprep.subr.mxu0 %v4169_v41  ;;  %v3443_v30 = vpop.permute.xlu0 %3442  ;;  %v8934_v16 = vadd.f32 %v2561_v2, %v2428_v55  ;;  %v8936_v35 = vadd.f32 %v2563_v51, %v2430_v49  ;;  %v2660_v21 = vsel %vm211_vm3, %v4114_v61, %v10655_v11  ;;  %v2662_v34 = vsel %vm211_vm3, %v4116_v22, %v10657_v33  ;;  %v10664_v45 = vld [vmem:[#allocation520_spill] sm:$0xff]  ;;  %v3824_v63 = vld [vmem:[%s9466_s3 + $0x30] sm:$0xff] }
 0x710   :  { %4028 = vmatpush3.msra.mxu0 %v3827_v19  ;;  %v8938_v24 = vadd.f32 %v2562_v57, %v2429_v9  ;;  %v3445_v39 = vpop.permute.xlu1 %3444  ;;  %v8942_v60 = vsel %vm231_vm7, %v8692_v56, %v3443_v30  ;;  %v4115_v56 = vld [vmem:[#allocation2 + $0x80] sm:$0xff]  ;;  %v2664_v62 = vsel %vm216_vm4, %v2660_v21, %v10658_v32  ;;  %v2666_v20 = vsel %vm216_vm4, %v2662_v34, %v10661_v59  ;;  %v3823_v7 = vld [vmem:[%s9466_s3 + $0x28] sm:$0xff]  ;;  %v10665_v2 = vld [vmem:[#allocation522_spill] sm:$0xff] }
 0x711   :  { %4029 = vmatprep.subr.mxu0 %v4169_v41  ;;  %v8954_v37 = vsel %vm231_vm7, %v8706_v3, %v3445_v39  ;;  %3736 = vrot.lane.b32.xlu0 %v8085_v6, %s4168_s19  ;;  %v2663_v58 = vsel %vm211_vm3, %v4115_v56, %v10656_v48  ;;  %v3825_v6 = vld [vmem:[%s9466_s3 + $0x38] sm:$0xff]  ;;  %v2668_v52 = vsel %vm221_vm5, %v2664_v62, %v10662_v44  ;;  %v10666_v57 = vld [vmem:[#allocation528_spill] sm:$0xff]  ;;  %v10669_v55 = vld [vmem:[#allocation525_spill] sm:$0xff] }
 0x712   :  { %4030 = vmatpush3.msra.mxu0 %v3826_v13  ;;  %3738 = vrot.lane.b32.xlu1 %v8097_v29, %s4168_s19  ;;  %v10659_v3 = vld [vmem:[#allocation515_spill] sm:$0xff]  ;;  %v2667_v15 = vsel %vm216_vm4, %v2663_v58, %v10660_v26  ;;  %v2670_v0 = vsel %vm221_vm5, %v2666_v20, %v10664_v45  ;;  %v10667_v17 = vld [vmem:[#allocation524_spill] sm:$0xff]  ;;  %v2798_v49 = vsel %vm211_vm3, %v10669_v55, %v10668_v1  ;;  %v10672_v39 = vld [vmem:[#allocation530_spill] sm:$0xff] }
 0x713   :  { %4031 = vmatprep.subr.mxu0 %v4169_v41  ;;  %v2665_v28 = vsel %vm216_vm4, %v2661_v54, %v10659_v3  ;;  %v3552_v12 = vpop.permute.xlu0 %3551  ;;  %v10663_v29 = vld [vmem:[#allocation519_spill] sm:$0xff]  ;;  %v2671_v51 = vsel %vm221_vm5, %v2667_v15, %v10665_v2  ;;  %v2797_v53 = vsel %vm211_vm3, %v10667_v17, %v10666_v57  ;;  %v10673_v13 = vld [vmem:[#allocation526_spill] sm:$0xff]  ;;  %v10675_v54 = vld [vmem:[#allocation532_spill] sm:$0xff] }
 0x714   :  { %4032 = vmatpush3.msra.mxu0 %v3825_v6  ;;  %v2669_v50 = vsel %vm221_vm5, %v2665_v28, %v10663_v29  ;;  %v3554_v14 = vpop.permute.xlu1 %3553  ;;  %v8984_v36 = vsel %vm221_vm5, %v8745_v5, %v3552_v12  ;;  %v10670_v9 = vld [vmem:[#allocation531_spill] sm:$0xff]  ;;  %v2799_v18 = vsel %vm211_vm3, %v10673_v13, %v10672_v39  ;;  %v2672_v61 = vsel %vm226_vm6, %v2668_v52, %v10675_v54  ;;  %v10676_v11 = vld [vmem:[#allocation534_spill] sm:$0xff]  ;;  %v10678_v58 = vld [vmem:[#allocation541_spill] sm:$0xff] }
 0x715   :  { %4033 = vmatprep.subr.mxu0 %v4169_v41  ;;  %v9000_v5 = vsel %vm221_vm5, %v8758_v46, %v3554_v14  ;;  %3740 = vrot.lane.b32.xlu0 %v8123_v43, %s4168_s19  ;;  %v10671_v19 = vld [vmem:[#allocation527_spill] sm:$0xff]  ;;  %v10674_v46 = vld [vmem:[#allocation533_spill] sm:$0xff]  ;;  %v2674_v21 = vsel %vm226_vm6, %v2670_v0, %v10676_v11  ;;  %v10679_v33 = vld [vmem:[#allocation540_spill] sm:$0xff] }
 0x716   :  { %4034 = vmatpush3.msra.mxu0 %v3824_v63  ;;  %v2800_v30 = vsel %vm211_vm3, %v10671_v19, %v10670_v9  ;;  %3742 = vrot.lane.b32.xlu1 %v8137_v10, %s4168_s19  ;;  %v3822_v43 = vld [vmem:[%s9466_s3 + $0x20] sm:$0xff]  ;;  %v2673_v31 = vsel %vm226_vm6, %v2669_v50, %v10674_v46  ;;  %v2676_v34 = vsel %vm231_vm7, %v2672_v61, %v10679_v33  ;;  %v3821_v6 = vld [vmem:[%s9466_s3 + $0x18] sm:$0xff]  ;;  %v3986_v0 = vld [vmem:[%s9464_s1 + $0x12] ss:$0 sm:$0xff] }
 0x717   :  { %4035 = vmatprep.subr.mxu0 %v4169_v41  ;;  %v3556_v56 = vpop.permute.xlu0 %3555  ;;  %v10677_v10 = vld [vmem:[#allocation535_spill] sm:$0xff]  ;;  %v2677_v22 = vsel %vm231_vm7, %v2673_v31, %v10678_v58  ;;  %v10681_v26 = vld [vmem:[#allocation542_spill] sm:$0xff]  ;;  %v10682_v59 = vld [vmem:[#allocation556_spill] sm:$0xff] }
 0x718   :  { %4036 = vmatpush3.msra.mxu0 %v3823_v7  ;;  %v2675_v48 = vsel %vm226_vm6, %v2671_v51, %v10677_v10  ;;  %v3558_v32 = vpop.permute.xlu1 %3557  ;;  %v9034_v62 = vsel %vm221_vm5, %v8790_v4, %v3556_v56  ;;  %v10680_v3 = vld [vmem:[#allocation543_spill] sm:$0xff]  ;;  %v2678_v15 = vsel %vm231_vm7, %v2674_v21, %v10681_v26  ;;  %v2680_v20 = vsel %vm236_vm8, %v2676_v34, %v10682_v59  ;;  %v10683_v4 = vld [vmem:[#allocation557_spill] sm:$0xff]  ;;  %v10685_v50 = vld [vmem:[#allocation558_spill] sm:$0xff] }
 0x719   :  { %4037 = vmatprep.subr.mxu0 %v4169_v41  ;;  %v2679_v28 = vsel %vm231_vm7, %v2675_v48, %v10680_v3  ;;  %v9048_v44 = vsel %vm221_vm5, %v8798_v25, %v3558_v32  ;;  %v2681_v52 = vsel %vm236_vm8, %v2677_v22, %v10683_v4  ;;  %v10684_v12 = vld [vmem:[#allocation559_spill] sm:$0xff]  ;;  %v2682_v45 = vsel %vm236_vm8, %v2678_v15, %v10685_v50  ;;  %v10686_v14 = vld [vmem:[#allocation568_spill] sm:$0xff]  ;;  %v3820_v25 = vld [vmem:[%s9466_s3 + $0x10] sm:$0xff] }
 0x71a   :  { %4038 = vmatpush3.msra.mxu0 %v3822_v43  ;;  %v2683_v29 = vsel %vm236_vm8, %v2679_v28, %v10684_v12  ;;  %v2684_v63 = vsel %vm241_vm9, %v2680_v20, %v10686_v14  ;;  %v10687_v7 = vld [vmem:[#allocation536_spill] sm:$0xff]  ;;  %v10688_v51 = vld [vmem:[#allocation569_spill] sm:$0xff]  ;;  %v10689_v17 = vld [vmem:[#allocation571_spill] sm:$0xff] }
 0x71b   :  { %4039 = vmatprep.subr.mxu0 %v4169_v41  ;;  %v2801_v2 = vsel %vm216_vm4, %v2797_v53, %v10687_v7  ;;  %v2685_v57 = vsel %vm241_vm9, %v2681_v52, %v10688_v51  ;;  %v2687_v1 = vsel %vm241_vm9, %v2683_v29, %v10689_v17  ;;  %v10690_v55 = vld [vmem:[#allocation570_spill] sm:$0xff]  ;;  %v3653_v19 = vpop.permute.xlu0 %3652  ;;  %v10691_v39 = vld [vmem:[#allocation537_spill] sm:$0xff]  ;;  %v10692_v43 = vld [vmem:[#allocation539_spill] sm:$0xff] }
 0x71c   :  { %v2686_v9 = vsel %vm241_vm9, %v2682_v45, %v10690_v55  ;;  %4040 = vmatpush3.msra.mxu0 %v3821_v6  ;;  %v2802_v13 = vsel %vm216_vm4, %v2798_v49, %v10691_v39  ;;  %v2804_v46 = vsel %vm216_vm4, %v2800_v30, %v10692_v43  ;;  %v10693_v31 = vld [vmem:[#allocation538_spill] sm:$0xff]  ;;  %v10694_v54 = vld [vmem:[#allocation544_spill] sm:$0xff]  ;;  %v3655_v11 = vpop.permute.xlu1 %3654  ;;  %v10695_v56 = vld [vmem:[#allocation545_spill] sm:$0xff]  ;;  %v2694_v32 = vmul.f32 %v3986_v0, %v2685_v57 }
 0x71d   :  { %v2803_v53 = vsel %vm216_vm4, %v2799_v18, %v10693_v31  ;;  %v2805_v61 = vsel %vm221_vm5, %v2801_v2, %v10694_v54  ;;  %4041 = vmatprep.subr.mxu0 %v4169_v41  ;;  %v3819_v21 = vld [vmem:[%s9466_s3 + $0x8] sm:$0xff]  ;;  %v2806_v10 = vsel %vm221_vm5, %v2802_v13, %v10695_v56  ;;  %v10696_v49 = vld [vmem:[#allocation547_spill] sm:$0xff]  ;;  %v10697_v30 = vld [vmem:[#allocation546_spill] sm:$0xff]  ;;  %v2693_v18 = vmul.f32 %v3986_v0, %v2684_v63 }
 0x71e   :  { %v2808_v48 = vsel %vm221_vm5, %v2804_v46, %v10696_v49  ;;  %v2807_v58 = vsel %vm221_vm5, %v2803_v53, %v10697_v30  ;;  %4042 = vmatpush3.msra.mxu0 %v3820_v25  ;;  %v10698_v22 = vld [vmem:[#allocation552_spill] sm:$0xff]  ;;  %v2696_v6 = vmul.f32 %v3986_v0, %v2687_v1  ;;  %v2695_v3 = vmul.f32 %v3986_v0, %v2686_v9  ;;  %v10700_v26 = vld [vmem:[#allocation553_spill] sm:$0xff]  ;;  %v10702_v20 = vld [vmem:[#allocation555_spill] sm:$0xff] }
 0x71f   :  { %v10699_v33 = vld [vmem:[#allocation548_spill] sm:$0xff]  ;;  %4043 = vmatprep.subr.mxu0 %v4169_v41  ;;  %v10701_v15 = vld [vmem:[#allocation549_spill] sm:$0xff]  ;;  %v10703_v4 = vld [vmem:[#allocation551_spill] sm:$0xff]  ;;  %v3657_v14 = vpop.permute.xlu0 %3656  ;;  %v2697_v53 = vadd.f32 %v2693_v18, %v8932_v38  ;;  %v2698_v54 = vadd.f32 %v2694_v32, %v8934_v16 }
 0x720   :  { %v2934_v34 = vsel %vm211_vm3, %v10699_v33, %v10698_v22  ;;  %v3818_v28 = vld [vmem:[%s9466_s3] sm:$0xff]  ;;  %v2935_v59 = vsel %vm211_vm3, %v10701_v15, %v10700_v26  ;;  %v2937_v52 = vsel %vm211_vm3, %v10703_v4, %v10702_v20  ;;  %v10704_v12 = vld [vmem:[#allocation554_spill] sm:$0xff]  ;;  %4044 = vmatpush3.msra.mxu0 %v3819_v21  ;;  %v10707_v63 = vld [vmem:[#allocation561_spill] sm:$0xff]  ;;  %v3659_v55 = vpop.permute.xlu1 %3658  ;;  %v2699_v21 = vadd.f32 %v2695_v3, %v8938_v24 }
 0x721   :  { %v10705_v29 = vld [vmem:[#allocation550_spill] sm:$0xff]  ;;  %v10706_v45 = vld [vmem:[#allocation560_spill] sm:$0xff]  ;;  %v2810_v25 = vsel %vm226_vm6, %v2806_v10, %v10707_v63  ;;  %v10708_v7 = vld [vmem:[#allocation563_spill] sm:$0xff]  ;;  %4045 = vmatprep.subr.mxu0 %v4169_v41 }
 0x722   :  { %v2936_v50 = vsel %vm211_vm3, %v10705_v29, %v10704_v12  ;;  %v2809_v0 = vsel %vm226_vm6, %v2805_v61, %v10706_v45  ;;  %v2812_v2 = vsel %vm226_vm6, %v2808_v48, %v10708_v7  ;;  %v10709_v51 = vld [vmem:[#allocation562_spill] sm:$0xff]  ;;  %v10710_v17 = vld [vmem:[#allocation564_spill] sm:$0xff]  ;;  %v10711_v9 = vld [vmem:[#allocation565_spill] sm:$0xff]  ;;  %4046 = vmatpush3.msra.mxu0 %v3818_v28  ;;  %v2700_v61 = vadd.f32 %v2696_v6, %v8936_v35 }
 0x723   :  { %v2811_v57 = vsel %vm226_vm6, %v2807_v58, %v10709_v51  ;;  %v2938_v1 = vsel %vm216_vm4, %v2934_v34, %v10710_v17  ;;  %v2939_v39 = vsel %vm216_vm4, %v2935_v59, %v10711_v9  ;;  %v10712_v13 = vld [vmem:[#allocation567_spill] sm:$0xff]  ;;  %v10713_v46 = vld [vmem:[#allocation566_spill] sm:$0xff]  ;;  %v10714_v56 = vld [vmem:[#allocation572_spill] sm:$0xff]  ;;  %v3665_v16 = vpop.permute.xlu0 %3664 }
 0x724   :  { %v2941_v43 = vsel %vm216_vm4, %v2937_v52, %v10712_v13  ;;  %v2940_v31 = vsel %vm216_vm4, %v2936_v50, %v10713_v46  ;;  %v2813_v10 = vsel %vm231_vm7, %v2809_v0, %v10714_v56  ;;  %v10715_v49 = vld [vmem:[#allocation573_spill] sm:$0xff]  ;;  %v10716_v30 = vld [vmem:[#allocation575_spill] sm:$0xff]  ;;  %v10717_v22 = vld [vmem:[#allocation574_spill] sm:$0xff]  ;;  %v3667_v26 = vpop.permute.xlu1 %3666  ;;  %v9148_v15 = vsel %vm211_vm3, %v3653_v19, %v3665_v16 }
 0x725   :  { %v2814_v48 = vsel %vm231_vm7, %v2810_v25, %v10715_v49  ;;  %v2816_v58 = vsel %vm231_vm7, %v2812_v2, %v10716_v30  ;;  %v2815_v33 = vsel %vm231_vm7, %v2811_v57, %v10717_v22  ;;  %v10718_v38 = vld [vmem:[#allocation584_spill] sm:$0xff]  ;;  %v10719_v34 = vld [vmem:[#allocation585_spill] sm:$0xff]  ;;  %v10720_v24 = vld [vmem:[#allocation586_spill] sm:$0xff]  ;;  %v9157_v50 = vsel %vm211_vm3, %v3655_v11, %v3667_v26 }
 0x726   :  { %v2817_v18 = vsel %vm236_vm8, %v2813_v10, %v10718_v38  ;;  %v2818_v35 = vsel %vm236_vm8, %v2814_v48, %v10719_v34  ;;  %v2819_v32 = vsel %vm236_vm8, %v2815_v33, %v10720_v24  ;;  %v3987_v6 = vld [vmem:[%s9464_s1 + $0x13] ss:$0 sm:$0xff]  ;;  %v10721_v3 = vld [vmem:[#allocation596_spill] sm:$0xff]  ;;  %v10722_v59 = vld [vmem:[#allocation587_spill] sm:$0xff] }
 0x727   :  { %v2821_v28 = vsel %vm241_vm9, %v2817_v18, %v10721_v3  ;;  %v2820_v20 = vsel %vm236_vm8, %v2816_v58, %v10722_v59  ;;  %v10723_v4 = vld [vmem:[#allocation597_spill] sm:$0xff]  ;;  %v10724_v12 = vld [vmem:[#allocation598_spill] sm:$0xff]  ;;  %v10726_v63 = vld [vmem:[#allocation576_spill] sm:$0xff]  ;;  %v3669_v49 = vpop.permute.xlu0 %3668 }
 0x728   :  { %v2822_v52 = vsel %vm241_vm9, %v2818_v35, %v10723_v4  ;;  %v2823_v29 = vsel %vm241_vm9, %v2819_v32, %v10724_v12  ;;  %v10725_v45 = vld [vmem:[#allocation577_spill] sm:$0xff]  ;;  %v2942_v25 = vsel %vm221_vm5, %v2938_v1, %v10726_v63  ;;  %v10727_v19 = vld [vmem:[#allocation578_spill] sm:$0xff]  ;;  %v10728_v2 = vld [vmem:[#allocation599_spill] sm:$0xff]  ;;  %v2830_v10 = vmul.f32 %v3987_v6, %v2821_v28  ;;  %v3671_v22 = vpop.permute.xlu1 %3670 }
 0x729   :  { %v2943_v0 = vsel %vm221_vm5, %v2939_v39, %v10725_v45  ;;  %v2944_v7 = vsel %vm221_vm5, %v2940_v31, %v10727_v19  ;;  %v2824_v51 = vsel %vm241_vm9, %v2820_v20, %v10728_v2  ;;  %v10729_v57 = vld [vmem:[#allocation579_spill] sm:$0xff]  ;;  %v10730_v13 = vld [vmem:[#allocation581_spill] sm:$0xff]  ;;  %v10731_v56 = vld [vmem:[#allocation580_spill] sm:$0xff]  ;;  %v2831_v30 = vmul.f32 %v3987_v6, %v2822_v52 }
 0x72a   :  { %v2945_v17 = vsel %vm221_vm5, %v2941_v43, %v10729_v57  ;;  %v4117_v9 = vld [vmem:[#allocation2 + $0x39] sm:$0xff]  ;;  %v4118_v46 = vld [vmem:[#allocation2 + $0x31] sm:$0xff]  ;;  %v2832_v58 = vmul.f32 %v3987_v6, %v2823_v29  ;;  %v9176_v33 = vsel %vm211_vm3, %v3657_v14, %v3669_v49  ;;  %v4120_v43 = vld [vmem:[#allocation2 + $0x81] sm:$0xff]  ;;  %v2833_v35 = vmul.f32 %v3987_v6, %v2824_v51 }
 0x72b   :  { %v3068_v11 = vsel %vm211_vm3, %v4117_v9, %v10730_v13  ;;  %v3067_v39 = vsel %vm211_vm3, %v4118_v46, %v10731_v56  ;;  %v4119_v1 = vld [vmem:[#allocation2 + $0x79] sm:$0xff]  ;;  %v10734_v16 = vld [vmem:[#allocation588_spill] sm:$0xff]  ;;  %v9183_v24 = vsel %vm211_vm3, %v3659_v55, %v3671_v22  ;;  %v10735_v32 = vld [vmem:[#allocation589_spill] sm:$0xff]  ;;  %v2834_v63 = vadd.f32 %v2830_v10, %v2697_v53 }
 0x72c   :  { %v10732_v48 = vld [vmem:[#allocation582_spill] sm:$0xff]  ;;  %v10733_v38 = vld [vmem:[#allocation583_spill] sm:$0xff]  ;;  %v2946_v34 = vsel %vm226_vm6, %v2942_v25, %v10734_v16  ;;  %v2947_v3 = vsel %vm226_vm6, %v2943_v0, %v10735_v32  ;;  %v10738_v20 = vld [vmem:[#allocation592_spill] sm:$0xff]  ;;  %v3451_v0 = vpop.permute.xlu0 %3450  ;;  %v2835_v25 = vadd.f32 %v2831_v30, %v2698_v54  ;;  %v9199_v19 = vadd.f32 %v2832_v58, %v2699_v21  ;;  %v3453_v51 = vpop.permute.xlu1 %3452 }
 0x72d   :  { %v3069_v31 = vsel %vm211_vm3, %v4119_v1, %v10732_v48  ;;  %v3070_v18 = vsel %vm211_vm3, %v4120_v43, %v10733_v38  ;;  %v10736_v28 = vld [vmem:[#allocation591_spill] sm:$0xff]  ;;  %v10737_v59 = vld [vmem:[#allocation590_spill] sm:$0xff]  ;;  %v3071_v4 = vsel %vm216_vm4, %v3067_v39, %v10738_v20  ;;  %v10739_v52 = vld [vmem:[#allocation593_spill] sm:$0xff]  ;;  %v9205_v57 = vsel %vm236_vm8, %v8912_v47, %v3451_v0 }
 0x72e   :  { %v2949_v26 = vsel %vm226_vm6, %v2945_v17, %v10736_v28  ;;  %v2948_v14 = vsel %vm226_vm6, %v2944_v7, %v10737_v59  ;;  %v3072_v12 = vsel %vm216_vm4, %v3068_v11, %v10739_v52  ;;  %v10740_v29 = vld [vmem:[#allocation595_spill] sm:$0xff]  ;;  %v10741_v55 = vld [vmem:[#allocation594_spill] sm:$0xff]  ;;  %v10742_v2 = vld [vmem:[#allocation600_spill] sm:$0xff]  ;;  %v9207_v17 = vadd.f32 %v2833_v35, %v2700_v61 }
 0x72f   :  { %v3074_v6 = vsel %vm216_vm4, %v3070_v18, %v10740_v29  ;;  %v3073_v45 = vsel %vm216_vm4, %v3069_v31, %v10741_v55  ;;  %v2950_v7 = vsel %vm231_vm7, %v2946_v34, %v10742_v2  ;;  %v10743_v9 = vld [vmem:[#allocation601_spill] sm:$0xff]  ;;  %v10744_v11 = vld [vmem:[#allocation616_spill] sm:$0xff]  ;;  %v9215_v54 = vsel %vm236_vm8, %v8922_v8, %v3453_v51  ;;  %v10745_v21 = vld [vmem:[#allocation603_spill] sm:$0xff] }
 0x730   :  { %v2951_v13 = vsel %vm231_vm7, %v2947_v3, %v10743_v9  ;;  %v2954_v53 = vsel %vm236_vm8, %v2950_v7, %v10744_v11  ;;  %v2953_v46 = vsel %vm231_vm7, %v2949_v26, %v10745_v21  ;;  %v10746_v56 = vld [vmem:[#allocation602_spill] sm:$0xff]  ;;  %v10747_v47 = vld [vmem:[#allocation617_spill] sm:$0xff]  ;;  %v10748_v49 = vld [vmem:[#allocation628_spill] sm:$0xff]  ;;  %v3455_v18 = vpop.permute.xlu0 %3454 }
 0x731   :  { %v2952_v39 = vsel %vm231_vm7, %v2948_v14, %v10746_v56  ;;  %v2955_v61 = vsel %vm236_vm8, %v2951_v13, %v10747_v47  ;;  %v3988_v10 = vld [vmem:[%s9464_s1 + $0x14] ss:$0 sm:$0xff]  ;;  %v2958_v1 = vsel %vm241_vm9, %v2954_v53, %v10748_v49  ;;  %v10749_v48 = vld [vmem:[#allocation605_spill] sm:$0xff]  ;;  %v10750_v31 = vld [vmem:[#allocation604_spill] sm:$0xff]  ;;  %v3457_v14 = vpop.permute.xlu1 %3456  ;;  %v9246_v20 = vsel %vm236_vm8, %v8942_v60, %v3455_v18 }
 0x732   :  { %v3076_v8 = vsel %vm221_vm5, %v3072_v12, %v10749_v48  ;;  %v3075_v30 = vsel %vm221_vm5, %v3071_v4, %v10750_v31  ;;  %v10751_v58 = vld [vmem:[#allocation606_spill] sm:$0xff]  ;;  %v10752_v43 = vld [vmem:[#allocation629_spill] sm:$0xff]  ;;  %v10753_v16 = vld [vmem:[#allocation607_spill] sm:$0xff]  ;;  %v9256_v0 = vsel %vm236_vm8, %v8954_v37, %v3457_v14 }
 0x733   :  { %v3077_v22 = vsel %vm221_vm5, %v3073_v45, %v10751_v58  ;;  %v2959_v38 = vsel %vm241_vm9, %v2955_v61, %v10752_v43  ;;  %v3078_v34 = vsel %vm221_vm5, %v3074_v6, %v10753_v16  ;;  %v10754_v35 = vld [vmem:[#allocation613_spill] sm:$0xff]  ;;  %v10756_v28 = vld [vmem:[#allocation612_spill] sm:$0xff]  ;;  %v10758_v4 = vld [vmem:[#allocation615_spill] sm:$0xff]  ;;  %v2967_v45 = vmul.f32 %v3988_v10, %v2958_v1 }
 0x734   :  { %v10755_v32 = vld [vmem:[#allocation609_spill] sm:$0xff]  ;;  %v10757_v26 = vld [vmem:[#allocation608_spill] sm:$0xff]  ;;  %v10759_v52 = vld [vmem:[#allocation611_spill] sm:$0xff]  ;;  %v2968_v11 = vmul.f32 %v3988_v10, %v2959_v38 }
 0x735   :  { %v3205_v3 = vsel %vm211_vm3, %v10755_v32, %v10754_v35  ;;  %v3204_v59 = vsel %vm211_vm3, %v10757_v26, %v10756_v28  ;;  %v3207_v12 = vsel %vm211_vm3, %v10759_v52, %v10758_v4  ;;  %v10760_v29 = vld [vmem:[#allocation614_spill] sm:$0xff]  ;;  %v10762_v2 = vld [vmem:[#allocation619_spill] sm:$0xff]  ;;  %v10764_v9 = vld [vmem:[#allocation620_spill] sm:$0xff]  ;;  %v2971_v32 = vadd.f32 %v2967_v45, %v2834_v63 }
 0x736   :  { %v10761_v55 = vld [vmem:[#allocation610_spill] sm:$0xff]  ;;  %v2957_v7 = vsel %vm236_vm8, %v2953_v46, %v10762_v2  ;;  %v3079_v13 = vsel %vm226_vm6, %v3075_v30, %v10764_v9  ;;  %v10765_v53 = vld [vmem:[#allocation621_spill] sm:$0xff]  ;;  %v10767_v61 = vld [vmem:[#allocation631_spill] sm:$0xff]  ;;  %v3564_v46 = vpop.permute.xlu0 %3563 }
 0x737   :  { %v3206_v6 = vsel %vm211_vm3, %v10761_v55, %v10760_v29  ;;  %v10763_v51 = vld [vmem:[#allocation618_spill] sm:$0xff]  ;;  %v3080_v21 = vsel %vm226_vm6, %v3076_v8, %v10765_v53  ;;  %v2961_v37 = vsel %vm241_vm9, %v2957_v7, %v10767_v61  ;;  %v10769_v48 = vld [vmem:[#allocation623_spill] sm:$0xff]  ;;  %v10770_v31 = vld [vmem:[#allocation625_spill] sm:$0xff]  ;;  %v3566_v8 = vpop.permute.xlu1 %3565 }
 0x738   :  { %v2956_v60 = vsel %vm236_vm8, %v2952_v39, %v10763_v51  ;;  %v10766_v56 = vld [vmem:[#allocation622_spill] sm:$0xff]  ;;  %v3082_v39 = vsel %vm226_vm6, %v3078_v34, %v10769_v48  ;;  %v3209_v30 = vsel %vm216_vm4, %v3205_v3, %v10770_v31  ;;  %v10771_v58 = vld [vmem:[#allocation624_spill] sm:$0xff]  ;;  %v10772_v38 = vld [vmem:[#allocation627_spill] sm:$0xff]  ;;  %v9288_v34 = vsel %vm226_vm6, %v9000_v5, %v3566_v8 }
 0x739   :  { %v3081_v47 = vsel %vm226_vm6, %v3077_v22, %v10766_v56  ;;  %v10768_v49 = vld [vmem:[#allocation630_spill] sm:$0xff]  ;;  %v3208_v43 = vsel %vm216_vm4, %v3204_v59, %v10771_v58  ;;  %v9280_v22 = vsel %vm226_vm6, %v8984_v36, %v3564_v46  ;;  %v3211_v18 = vsel %vm216_vm4, %v3207_v12, %v10772_v38  ;;  %v10774_v59 = vld [vmem:[#allocation632_spill] sm:$0xff]  ;;  %v10775_v4 = vld [vmem:[#allocation633_spill] sm:$0xff] }
 0x73a   :  { %v2960_v1 = vsel %vm241_vm9, %v2956_v60, %v10768_v49  ;;  %v10773_v16 = vld [vmem:[#allocation626_spill] sm:$0xff]  ;;  %v2972_v3 = vadd.f32 %v2968_v11, %v2835_v25  ;;  %v2970_v28 = vmul.f32 %v3988_v10, %v2961_v37  ;;  %v3083_v14 = vsel %vm231_vm7, %v3079_v13, %v10774_v59  ;;  %v10776_v52 = vld [vmem:[#allocation635_spill] sm:$0xff]  ;;  %v10778_v63 = vld [vmem:[#allocation636_spill] sm:$0xff]  ;;  %v3568_v5 = vpop.permute.xlu0 %3567 }
 0x73b   :  { %v3210_v35 = vsel %vm216_vm4, %v3206_v6, %v10773_v16  ;;  %v2969_v26 = vmul.f32 %v3988_v10, %v2960_v1  ;;  %v3084_v36 = vsel %vm231_vm7, %v3080_v21, %v10775_v4  ;;  %v3086_v12 = vsel %vm231_vm7, %v3082_v39, %v10776_v52  ;;  %v10777_v29 = vld [vmem:[#allocation634_spill] sm:$0xff]  ;;  %v10779_v45 = vld [vmem:[#allocation637_spill] sm:$0xff]  ;;  %v10780_v10 = vld [vmem:[#allocation639_spill] sm:$0xff]  ;;  %v3570_v60 = vpop.permute.xlu1 %3569 }
 0x73c   :  { %v3085_v55 = vsel %vm231_vm7, %v3081_v47, %v10777_v29  ;;  %v3212_v6 = vsel %vm221_vm5, %v3208_v43, %v10778_v63  ;;  %v3213_v25 = vsel %vm221_vm5, %v3209_v30, %v10779_v45  ;;  %v3215_v2 = vsel %vm221_vm5, %v3211_v18, %v10780_v10  ;;  %v10781_v7 = vld [vmem:[#allocation638_spill] sm:$0xff]  ;;  %v10782_v13 = vld [vmem:[#allocation8_spill] sm:$0xff]  ;;  %v10783_v53 = vld [vmem:[#allocation9_spill] sm:$0xff] }
 0x73d   :  { %v3214_v51 = vsel %vm221_vm5, %v3210_v35, %v10781_v7  ;;  %v9308_v9 = vsel %vm226_vm6, %v9034_v62, %v3568_v5  ;;  %v3088_v11 = vsel %vm236_vm8, %v3084_v36, %v10782_v13  ;;  %v3087_v21 = vsel %vm236_vm8, %v3083_v14, %v10783_v53  ;;  %v10784_v56 = vld [vmem:[#allocation11_spill] sm:$0xff]  ;;  %v10786_v1 = vld [vmem:[#allocation10_spill] sm:$0xff]  ;;  %v10787_v48 = vld [vmem:[#allocation16_spill] sm:$0xff] }
 0x73e   :  { %v3216_v47 = vsel %vm226_vm6, %v3212_v6, %v10784_v56  ;;  %v9318_v61 = vsel %vm226_vm6, %v9048_v44, %v3570_v60  ;;  %v10785_v37 = vld [vmem:[#allocation7_spill] sm:$0xff]  ;;  %v3217_v62 = vsel %vm226_vm6, %v3213_v25, %v10786_v1  ;;  %v3989_v46 = vld [vmem:[%s9464_s1 + $0x15] ss:$0 sm:$0xff]  ;;  %v3091_v39 = vsel %vm241_vm9, %v3087_v21, %v10787_v48  ;;  %v10791_v38 = vld [vmem:[#allocation25_spill] sm:$0xff]  ;;  %v3677_v59 = vpop.permute.xlu0 %3676 }
 0x73f   :  { %v3089_v49 = vsel %vm236_vm8, %v3085_v55, %v10785_v37  ;;  %v10788_v31 = vld [vmem:[#allocation18_spill] sm:$0xff]  ;;  %v10790_v43 = vld [vmem:[#allocation23_spill] sm:$0xff]  ;;  %v3221_v18 = vsel %vm231_vm7, %v3217_v62, %v10791_v38  ;;  %v10794_v36 = vld [vmem:[#allocation29_spill] sm:$0xff]  ;;  %v3679_v63 = vpop.permute.xlu1 %3678  ;;  %v9350_v6 = vsel %vm216_vm4, %v9148_v15, %v3677_v59  ;;  %v3100_v25 = vmul.f32 %v3989_v46, %v3091_v39 }
 0x740   :  { %v3220_v30 = vsel %vm231_vm7, %v3216_v47, %v10788_v31  ;;  %v10789_v58 = vld [vmem:[#allocation6_spill] sm:$0xff]  ;;  %v3092_v8 = vsel %vm241_vm9, %v3088_v11, %v10790_v43  ;;  %v10793_v14 = vld [vmem:[#allocation19_spill] sm:$0xff]  ;;  %v3225_v52 = vsel %vm236_vm8, %v3221_v18, %v10794_v36  ;;  %v10795_v29 = vld [vmem:[#allocation32_spill] sm:$0xff]  ;;  %v9358_v60 = vsel %vm216_vm4, %v9157_v50, %v3679_v63 }
 0x741   :  { %v3090_v44 = vsel %vm236_vm8, %v3086_v12, %v10789_v58  ;;  %v10792_v16 = vld [vmem:[#allocation26_spill] sm:$0xff]  ;;  %v3093_v4 = vsel %vm241_vm9, %v3089_v49, %v10793_v14  ;;  %v10796_v5 = vld [vmem:[#allocation13_spill] sm:$0xff]  ;;  %v10797_v10 = vld [vmem:[#allocation35_spill] sm:$0xff]  ;;  %v3101_v53 = vmul.f32 %v3989_v46, %v3092_v8  ;;  %v3104_v38 = vadd.f32 %v3100_v25, %v2971_v32 }
 0x742   :  { %v3224_v35 = vsel %vm236_vm8, %v3220_v30, %v10792_v16  ;;  %v3990_v12 = vld [vmem:[%s9464_s1 + $0x16] ss:$0 sm:$0xff]  ;;  %v3218_v45 = vsel %vm226_vm6, %v3214_v51, %v10796_v5  ;;  %v3229_v7 = vsel %vm241_vm9, %v3225_v52, %v10797_v10  ;;  %v10798_v13 = vld [vmem:[#allocation12_spill] sm:$0xff]  ;;  %v10800_v15 = vld [vmem:[#allocation21_spill] sm:$0xff]  ;;  %v3102_v37 = vmul.f32 %v3989_v46, %v3093_v4 }
 0x743   :  { %v3228_v55 = vsel %vm241_vm9, %v3224_v35, %v10795_v29  ;;  %v3219_v11 = vsel %vm226_vm6, %v3215_v2, %v10798_v13  ;;  %v10799_v21 = vld [vmem:[#allocation22_spill] sm:$0xff]  ;;  %v3222_v47 = vsel %vm231_vm7, %v3218_v45, %v10800_v15  ;;  %v10801_v49 = vld [vmem:[#allocation24_spill] sm:$0xff]  ;;  %v3681_v2 = vpop.permute.xlu0 %3680  ;;  %v10803_v39 = vld [vmem:[#allocation31_spill] sm:$0xff]  ;;  %v3238_v30 = vmul.f32 %v3990_v12, %v3229_v7  ;;  %v3683_v43 = vpop.permute.xlu1 %3682 }
 0x744   :  { %v3094_v56 = vsel %vm241_vm9, %v3090_v44, %v10799_v21  ;;  %v3991_v51 = vld [vmem:[%s9464_s1 + $0x17] ss:$0 sm:$0xff]  ;;  %v3223_v1 = vsel %vm231_vm7, %v3219_v11, %v10801_v49  ;;  %v10802_v50 = vld [vmem:[#allocation28_spill] sm:$0xff]  ;;  %v3237_v48 = vmul.f32 %v3990_v12, %v3228_v55  ;;  %v9379_v8 = vsel %vm216_vm4, %v9176_v33, %v3681_v2  ;;  %v10805_v18 = vld [vmem:[#allocation37_spill] sm:$0xff] }
 0x745   :  { %v3226_v62 = vsel %vm236_vm8, %v3222_v47, %v10802_v50  ;;  %v3227_v31 = vsel %vm236_vm8, %v3223_v1, %v10803_v39  ;;  %v10804_v58 = vld [vmem:[#allocation34_spill] sm:$0xff]  ;;  %v3374_v35 = vmul.f32 %v3991_v51, %v8833_v23  ;;  %v9386_v59 = vsel %vm216_vm4, %v9183_v24, %v3683_v43 }
 0x746   :  { %v3230_v44 = vsel %vm241_vm9, %v3226_v62, %v10804_v58  ;;  %v3231_v16 = vsel %vm241_vm9, %v3227_v31, %v10805_v18  ;;  %v2973_v14 = vadd.f32 %v2969_v26, %v9199_v19  ;;  %v3105_v4 = vadd.f32 %v3101_v53, %v2972_v3  ;;  %v3992_v33 = vld [vmem:[%s9464_s1 + $0x18] ss:$0 sm:$0xff] }
 0x747   :  { %v3103_v36 = vmul.f32 %v3989_v46, %v3094_v56  ;;  %v3375_v52 = vmul.f32 %v3991_v51, %v8842_v40  ;;  %v2974_v32 = vadd.f32 %v2970_v28, %v9207_v17  ;;  %v3241_v29 = vadd.f32 %v3237_v48, %v3104_v38  ;;  %v3463_v63 = vpop.permute.xlu0 %3462  ;;  %v3465_v24 = vpop.permute.xlu1 %3464 }
 0x748   :  { %v3239_v55 = vmul.f32 %v3990_v12, %v3230_v44  ;;  %v3106_v23 = vadd.f32 %v3102_v37, %v2973_v14  ;;  %v3242_v5 = vadd.f32 %v3238_v30, %v3105_v4  ;;  %v3240_v45 = vmul.f32 %v3990_v12, %v3231_v16  ;;  %v3993_v16 = vld [vmem:[%s9464_s1 + $0x19] ss:$0 sm:$0xff] }
 0x749   :  { %v3498_v19 = vsel %vm241_vm9, %v9205_v57, %v3463_v63  ;;  %v3378_v3 = vadd.f32 %v3374_v35, %v3241_v29  ;;  %v3376_v26 = vmul.f32 %v3991_v51, %v8876_v27  ;;  %v3499_v40 = vsel %vm241_vm9, %v9215_v54, %v3465_v24 }
 0x74a   :  { %v3507_v46 = vmul.f32 %v3992_v33, %v3498_v19  ;;  %v3107_v25 = vadd.f32 %v3103_v36, %v2974_v32  ;;  %v3379_v10 = vadd.f32 %v3375_v52, %v3242_v5  ;;  %v3377_v17 = vmul.f32 %v3991_v51, %v8888_v42 }
 0x74b   :  { %v3508_v28 = vmul.f32 %v3992_v33, %v3499_v40  ;;  %v3243_v7 = vadd.f32 %v3239_v55, %v3106_v23  ;;  %v3467_v11 = vpop.permute.xlu0 %3466  ;;  %v3469_v21 = vpop.permute.xlu1 %3468 }
 0x74c   :  { %v3511_v13 = vadd.f32 %v3507_v46, %v3378_v3  ;;  %v3244_v12 = vadd.f32 %v3240_v45, %v3107_v25  ;;  %v3500_v57 = vsel %vm241_vm9, %v9246_v20, %v3467_v11  ;;  %v3501_v27 = vsel %vm241_vm9, %v9256_v0, %v3469_v21 }
 0x74d   :  { %v3512_v53 = vadd.f32 %v3508_v28, %v3379_v10  ;;  %v3380_v56 = vadd.f32 %v3376_v26, %v3243_v7  ;;  %v3509_v54 = vmul.f32 %v3992_v33, %v3500_v57  ;;  %v3510_v47 = vmul.f32 %v3992_v33, %v3501_v27 }
 0x74e   :  { %v3381_v15 = vadd.f32 %v3377_v17, %v3244_v12 }
 0x74f   :  { %v3513_v37 = vadd.f32 %v3509_v54, %v3380_v56  ;;  %v3576_v49 = vpop.permute.xlu0 %3575  ;;  %v3578_v51 = vpop.permute.xlu1 %3577  ;;  %v3994_v54 = vld [vmem:[%s9464_s1 + $0x1a] ss:$0 sm:$0xff] }
 0x750   :  { %v3514_v42 = vadd.f32 %v3510_v47, %v3381_v15  ;;  %v3627_v18 = vsel %vm231_vm7, %v9280_v22, %v3576_v49  ;;  %v3628_v35 = vsel %vm231_vm7, %v9288_v34, %v3578_v51 }
 0x753   :  { %v3580_v1 = vpop.permute.xlu0 %3579  ;;  %v3582_v50 = vpop.permute.xlu1 %3581 }
 0x754   :  { %v3629_v22 = vsel %vm231_vm7, %v9308_v9, %v3580_v1  ;;  %v3630_v63 = vsel %vm231_vm7, %v9318_v61, %v3582_v50 }
 0x757   :  { %v3689_v62 = vpop.permute.xlu0 %3688  ;;  %v3691_v48 = vpop.permute.xlu1 %3690 }
 0x758   :  { %v3756_v12 = vsel %vm221_vm5, %v9350_v6, %v3689_v62  ;;  %v3757_v21 = vsel %vm221_vm5, %v9358_v60, %v3691_v48 }
 0x75b   :  { %v3693_v2 = vpop.permute.xlu0 %3692  ;;  %v3695_v39 = vpop.permute.xlu1 %3694 }
 0x75c   :  { %v3758_v6 = vsel %vm221_vm5, %v9379_v8, %v3693_v2  ;;  %v3759_v51 = vsel %vm221_vm5, %v9386_v59, %v3695_v39  ;;  %v3995_v8 = vld [vmem:[%s9465_s2] ss:$0 sm:$0xff] }
 0x75f   :  { %v3588_v31 = vpop.permute.xlu0 %3587  ;;  %v3590_v30 = vpop.permute.xlu1 %3589 }
 0x760   :  { %v3631_v14 = vsel %vm236_vm8, %v3627_v18, %v3588_v31  ;;  %v3632_v36 = vsel %vm236_vm8, %v3628_v35, %v3590_v30 }
 0x763   :  { %v3592_v20 = vpop.permute.xlu0 %3591  ;;  %v3594_v58 = vpop.permute.xlu1 %3593 }
 0x764   :  { %v3633_v34 = vsel %vm236_vm8, %v3629_v22, %v3592_v20  ;;  %v3634_v45 = vsel %vm236_vm8, %v3630_v63, %v3594_v58 }
 0x767   :  { %v3701_v44 = vpop.permute.xlu0 %3700  ;;  %v3703_v43 = vpop.permute.xlu1 %3702 }
 0x768   :  { %v3760_v57 = vsel %vm226_vm6, %v3756_v12, %v3701_v44  ;;  %v3761_v56 = vsel %vm226_vm6, %v3757_v21, %v3703_v43 }
 0x76b   :  { %v3705_v0 = vpop.permute.xlu0 %3704  ;;  %v3707_v38 = vpop.permute.xlu1 %3706 }
 0x76c   :  { %v3762_v1 = vsel %vm226_vm6, %v3758_v6, %v3705_v0  ;;  %v3763_v48 = vsel %vm226_vm6, %v3759_v51, %v3707_v38 }
 0x76f   :  { %v3600_v4 = vpop.permute.xlu0 %3599  ;;  %v3602_v52 = vpop.permute.xlu1 %3601 }
 0x770   :  { %v3635_v33 = vsel %vm241_vm9, %v3631_v14, %v3600_v4  ;;  %v3636_v32 = vsel %vm241_vm9, %v3632_v36, %v3602_v52 }
 0x771   :  { %v3644_v29 = vmul.f32 %v3993_v16, %v3635_v33  ;;  %v3645_v55 = vmul.f32 %v3993_v16, %v3636_v32 }
 0x773   :  { %v3648_v23 = vadd.f32 %v3644_v29, %v3511_v13  ;;  %v3604_v5 = vpop.permute.xlu0 %3603  ;;  %v3649_v24 = vadd.f32 %v3645_v55, %v3512_v53  ;;  %v3606_v19 = vpop.permute.xlu1 %3605 }
 0x774   :  { %v3637_v3 = vsel %vm241_vm9, %v3633_v34, %v3604_v5  ;;  %v3638_v26 = vsel %vm241_vm9, %v3634_v45, %v3606_v19 }
 0x775   :  { %v3646_v40 = vmul.f32 %v3993_v16, %v3637_v3  ;;  %v3647_v46 = vmul.f32 %v3993_v16, %v3638_v26 }
 0x777   :  { %v3650_v25 = vadd.f32 %v3646_v40, %v3513_v37  ;;  %v3713_v9 = vpop.permute.xlu0 %3712  ;;  %v3651_v10 = vadd.f32 %v3647_v46, %v3514_v42  ;;  %v3715_v17 = vpop.permute.xlu1 %3714 }
 0x778   :  { %v3764_v27 = vsel %vm231_vm7, %v3760_v57, %v3713_v9  ;;  %v3765_v15 = vsel %vm231_vm7, %v3761_v56, %v3715_v17 }
 0x77b   :  { %v3717_v28 = vpop.permute.xlu0 %3716  ;;  %v3719_v61 = vpop.permute.xlu1 %3718 }
 0x77c   :  { %v3766_v31 = vsel %vm231_vm7, %v3762_v1, %v3717_v28  ;;  %v3767_v30 = vsel %vm231_vm7, %v3763_v48, %v3719_v61  ;;  %v3916_v28 = vlaneseq  ;;  %v3941_v48 = vld [vmem:[%s9468_s5] sm:$0x3] }
 0x77e   :  { %v3917_v61 = vand.u32 127, %v3916_v28 }
 0x77f   :  { %v3725_v7 = vpop.permute.xlu0 %3724  ;;  %v3727_v11 = vpop.permute.xlu1 %3726 }
 0x780   :  { %v3768_v47 = vsel %vm236_vm8, %v3764_v27, %v3725_v7  ;;  %v3769_v60 = vsel %vm236_vm8, %v3765_v15, %v3727_v11  ;;  %v3996_v7 = vld [vmem:[%s9467_s4] ss:$0 sm:$0xff]  ;;  %vm3918_vm12 = vcmp.lt.s32.totalorder %v3917_v61, 10  ;;  %vm3946_vm1 = vcmp.eq.s32.totalorder %v3917_v61, 10 }
 0x783   :  { %v3729_v13 = vpop.permute.xlu0 %3728  ;;  %v3731_v53 = vpop.permute.xlu1 %3730 }
 0x784   :  { %v3770_v20 = vsel %vm236_vm8, %v3766_v31, %v3729_v13  ;;  %v3771_v39 = vsel %vm236_vm8, %v3767_v30, %v3731_v53 }
 0x787   :  { %v3737_v37 = vpop.permute.xlu0 %3736  ;;  %v3739_v49 = vpop.permute.xlu1 %3738 }
 0x788   :  { %v3772_v42 = vsel %vm241_vm9, %v3768_v47, %v3737_v37  ;;  %v3773_v50 = vsel %vm241_vm9, %v3769_v60, %v3739_v49 }
 0x789   :  { %v3781_v62 = vmul.f32 %v3994_v54, %v3772_v42  ;;  %v3782_v2 = vmul.f32 %v3994_v54, %v3773_v50  ;;  %v4171_v42 = vmov 0  }
 0x78a   :  { %4080 = vset.pattern.permute.xlu0 %v4171_v42 }
 0x78b   :  { %v3785_v58 = vadd.f32 %v3781_v62, %v3648_v23  ;;  %v3741_v59 = vpop.permute.xlu0 %3740  ;;  %v3786_v44 = vadd.f32 %v3782_v2, %v3649_v24  ;;  %v3743_v43 = vpop.permute.xlu1 %3742 }
 0x78c   :  { %v3774_v0 = vsel %vm241_vm9, %v3770_v20, %v3741_v59  ;;  %v3775_v18 = vsel %vm241_vm9, %v3771_v39, %v3743_v43 }
 0x78d   :  { %v3796_v38 = vadd.f32 %v3995_v8, %v3785_v58  ;;  %v3783_v16 = vmul.f32 %v3994_v54, %v3774_v0  ;;  %v3797_v35 = vadd.f32 %v3995_v8, %v3786_v44  ;;  %v3784_v14 = vmul.f32 %v3994_v54, %v3775_v18 }
 0x78f   :  { %v3800_v4 = vmax.f32 %v3796_v38, 0.0  ;;  %v3787_v36 = vadd.f32 %v3783_v16, %v3650_v25  ;;  %v3801_v52 = vmax.f32 %v3797_v35, 0.0  ;;  %v3788_v33 = vadd.f32 %v3784_v14, %v3651_v10 }
 0x791   :  { %v3798_v32 = vadd.f32 %v3995_v8, %v3787_v36  ;;  %v3804_v29 = vadd.f32 %v3801_v52, %v3800_v4  ;;  %v3799_v22 = vadd.f32 %v3995_v8, %v3788_v33 }
 0x793   :  { %v3802_v55 = vmax.f32 %v3798_v32, 0.0  ;;  %v3805_v63 = vrot.slane %v3804_v29, 4  ;;  %v3803_v34 = vmax.f32 %v3799_v22, 0.0 }
 0x795   :  { %v3811_v23 = vadd.f32 %v3803_v34, %v3802_v55  ;;  %v3806_v5 = vadd.f32 %v3805_v63, %v3804_v29 }
 0x797   :  { %v3812_v45 = vrot.slane %v3811_v23, 4  ;;  %v3807_v24 = vrot.slane %v3806_v5, 2 }
 0x799   :  { %v3808_v19 = vadd.f32 %v3807_v24, %v3806_v5  ;;  %v3813_v3 = vadd.f32 %v3812_v45, %v3811_v23 }
 0x79b   :  { %v3814_v26 = vrot.slane %v3813_v3, 2  ;;  %v3809_v40 = vrot.slane %v3808_v19, 1 }
 0x79d   :  { %v3815_v46 = vadd.f32 %v3814_v26, %v3813_v3  ;;  %v3810_v25 = vadd.f32 %v3809_v40, %v3808_v19 }
 0x79f   :  { %v3816_v9 = vrot.slane %v3815_v46, 1 }
 0x7a1   :  { %v3817_v17 = vadd.f32 %v3816_v9, %v3815_v46 }
 0x7a3   :  { %v3844_v10 = vsel %vm3843_vm11, %v3817_v17, %v3810_v25 }
 0x7a4   :  { %4048 = vmatmul.mubr.f32.vlgmr.msra.gmra.mxu0 %v3844_v10 }
 0x864   :  { %v3912_v11 = vpop.f32.mrf.mxu0 }
 0x865   :  { %v3913_v13 = vadd.f32 %v3996_v7, %v3912_v11 }
 0x866   :  { %v4049_v12 = vpop.f32.mrf.mxu0 }
 0x867   :  { %v3919_v53 = vsel %vm3918_vm12, %v3913_v13, -3e+38  ;;  %v3945_v21 = vsel %vm3918_vm12, %v3913_v13, 0.0 }
 0x868   :  { %v3921_v57 = vsel %vm3920_vm13, %v3919_v53, -inf }
 0x869   :  { %3922 = vmax.xlane.f32.xlu0 %v3921_v57 }
 0x8f2   :  { %v3923_v56 = vpop.xlane.xlu0 %3922 }
 0x8f3   :  { %vm3924_vm14 = vcmp.eq.f32.partialorder %v3919_v53, %v3923_v56 }
 0x8f4   :  { %v3925_v27 = vsel %vm3924_vm14, %v3917_v61, 2147483647 }
 0x8f5   :  { %v3926_v54 = vsel %vm3920_vm13, %v3925_v27, 2147483647 }
 0x8f6   :  { %v3928_v15 = vshra.s32 %v3926_v54, 16  ;;  %v3927_v37 = vand.u32 65535, %v3926_v54 }
 0x8f8   :  { %v3930_v47 = vcvt.s32.f32 %v3928_v15  ;;  %v3929_v60 = vcvt.s32.f32 %v3927_v37 }
 0x8fa   :  { %3931 = vmin.xlane.f32.xlu1 %v3930_v47 }
 0x983   :  { %v3932_v6 = vpop.xlane.xlu1 %3931 }
 0x984   :  { %vm3933_vm15 = vcmp.eq.f32.partialorder %v3930_v47, %v3932_v6  ;;  %v3938_v51 = vcvt.f32.s32 %v3932_v6 }
 0x985   :  { %v3934_v49 = vsel %vm3933_vm15, %v3929_v60, inf }
 0x986   :  { %3935 = vmin.xlane.f32.xlu0 %v3934_v49  ;;  %v3939_v50 = vshll.u32 %v3938_v51, 16 }
 0xa0f   :  { %v3936_v1 = vpop.xlane.xlu0 %3935 }
 0xa10   :  { %v3937_v62 = vcvt.f32.s32 %v3936_v1 }
 0xa12   :  { %v3940_v31 = vadd.s32 %v3939_v50, %v3937_v62 }
 0xa14   :  { %vm3942_vm0 = vcmp.eq.s32.totalorder %v3940_v31, %v3941_v48 }
 0xa15   :  { %v3997_v8 = vsel %vm3942_vm0, 1.0, %v4169_v41 }
 0xa16   :  { %3949 = vperm.xlu0 %4080, %v3997_v8  }
 0xa91   :  { %v3950_v2 = vpop.permute.xlu0 %3949 }
 0xa92   :  { %v3952_v30 = vsel %vm3946_vm1, %v3950_v2, %v3945_v21 }
 0xa93   :  { %3953 = vst [vmem:[#allocation3] sm:$0x3] %v3952_v30 }
 0xa94   :  { %4132 = shalt.err (!%p4129_p4)
}
 0xa95   :  { %3963 = dma.vmem_to_hbm [thread:$0]  %s3961_s7, 32, %s9469_s6, [#allocation4]  }
 0xa96   :  { %4141 = dma.done.wait [#allocation4], 32  }
 0xa97   :  { %4142 = vsyncadd [#allocation4], 4294967264 }
 0xa98   :  { %3967 = vsyncpa [#allocation4], 1 }

</bundles_post_ra>
